<compile_context>
chip_gen: v5e
topology: v5e:2x2
jax: 0.10.0
libtpu: 0.0.40
codegen_flags: <defaults>
</compile_context>

<pallas_src>
import functools

import jax
import jax.numpy as jnp
from jax.experimental import pallas as pl
from jax.experimental.pallas import tpu as pltpu

EPS = 1e-5          # nn.BatchNorm2d default eps
NEG_SLOPE = 0.2     # nn.LeakyReLU(0.2) in ConvUnit
VMEM_LIMIT = 32 * 1024 * 1024


def _round_up(v, m):
    return ((v + m - 1) // m) * m


def _apply_act(y, act):
    if act == "relu":
        return jnp.maximum(y, 0.0)
    if act == "leaky_relu":
        return jnp.where(y > 0, y, NEG_SLOPE * y)
    return y


# ----------------------------- Pallas kernels -------------------------------

def _mm_bn_kernel(a_ref, b_ref, o_ref, stats_ref, acc_ref):
    """Tiled matmul; at the last K step also emits per-tile column sum /
    sum-of-squares (rows 0 and 1 of an (8, tn) stats block) for BatchNorm."""
    @pl.when(pl.program_id(2) == 0)
    def _():
        acc_ref[...] = jnp.zeros_like(acc_ref)

    # bf16 x bf16 -> f32 accumulate on the MXU.
    acc_ref[...] += jnp.dot(a_ref[...], b_ref[...],
                            preferred_element_type=jnp.float32)

    @pl.when(pl.program_id(2) == pl.num_programs(2) - 1)
    def _():
        acc = acc_ref[...]
        o_ref[...] = acc.astype(o_ref.dtype)
        s = jnp.sum(acc, axis=0, keepdims=True)
        sq = jnp.sum(acc * acc, axis=0, keepdims=True)
        pad = jnp.zeros((6, acc.shape[1]), jnp.float32)
        stats_ref[0] = jnp.concatenate([s, sq, pad], axis=0)


def _mm_bias_act_kernel(a_ref, b_ref, bias_ref, o_ref, acc_ref, *, act):
    """Tiled matmul with bias + activation fused into the epilogue
    (used for the layers without BatchNorm)."""
    @pl.when(pl.program_id(2) == 0)
    def _():
        acc_ref[...] = jnp.zeros_like(acc_ref)

    acc_ref[...] += jnp.dot(a_ref[...], b_ref[...],
                            preferred_element_type=jnp.float32)

    @pl.when(pl.program_id(2) == pl.num_programs(2) - 1)
    def _():
        y = acc_ref[...] + bias_ref[...]
        o_ref[...] = _apply_act(y, act).astype(o_ref.dtype)


def _scale_shift_act_kernel(x_ref, scale_ref, shift_ref, o_ref, *, act):
    """Row-tiled BN normalize + affine + activation."""
    y = x_ref[...].astype(jnp.float32) * scale_ref[...] + shift_ref[...]
    o_ref[...] = _apply_act(y, act).astype(o_ref.dtype)


# --------------------------- Pallas call wrappers ----------------------------

def _tiles(M, K, N):
    """Tile sizes honoring (8/16,128) tiling and keeping VMEM use ~1-2 MiB."""
    if M <= 256:
        tm = _round_up(M, 16)       # bf16 sublane packing -> multiple of 16
        Mp = tm
    else:
        tm = 256
        Mp = _round_up(M, tm)
    Kp = _round_up(K, 128)
    tk = 256 if Kp % 256 == 0 else 128
    Np = _round_up(N, 128)
    tn = Np if Np <= 512 else 256   # Cout <= 512 here: whole N stays resident
    if Np % tn != 0:
        tn = 128
    return tm, tk, tn, Mp, Kp, Np


def conv_matmul(a, b, *, bn, bias=None, act=None, out_dtype=jnp.bfloat16):
    """C = A @ B with bf16 operands / f32 accumulation.

    bn=True  -> returns (conv_out (Mp, Np), col_sum (Np,), col_sumsq (Np,))
    bn=False -> returns activation(conv + bias) as (Mp, Np)
    Zero padding keeps all statistics exact (padded rows/cols contribute 0)."""
    M, K = a.shape
    K2, N = b.shape
    assert K == K2
    tm, tk, tn, Mp, Kp, Np = _tiles(M, K, N)

    a_p = jnp.pad(a, ((0, Mp - M), (0, Kp - K))).astype(jnp.bfloat16)
    b_p = jnp.pad(b, ((0, Kp - K), (0, Np - N))).astype(jnp.bfloat16)

    grid = (Mp // tm, Np // tn, Kp // tk)
    a_spec = pl.BlockSpec((tm, tk), lambda i, j, k: (i, k))
    b_spec = pl.BlockSpec((tk, tn), lambda i, j, k: (k, j))
    o_spec = pl.BlockSpec((tm, tn), lambda i, j, k: (i, j))
    cparams = pltpu.CompilerParams(
        dimension_semantics=("parallel", "parallel", "arbitrary"),
        vmem_limit_bytes=VMEM_LIMIT)
    # f32 accumulator scratch (needed for exact BN stats / f32 epilogue math
    # even though the stored output is bf16).
    scratch = [pltpu.VMEM((tm, tn), jnp.float32)]

    if bn:
        n_mt = Mp // tm
        out, stats = pl.pallas_call(
            _mm_bn_kernel,
            out_shape=(jax.ShapeDtypeStruct((Mp, Np), out_dtype),
                       jax.ShapeDtypeStruct((n_mt, 8, Np), jnp.float32)),
            grid_spec=pltpu.PrefetchScalarGridSpec(
                num_scalar_prefetch=0,
                grid=grid,
                in_specs=[a_spec, b_spec],
                out_specs=(o_spec,
                           pl.BlockSpec((1, 8, tn), lambda i, j, k: (i, 0, j))),
                scratch_shapes=scratch),
            compiler_params=cparams,
        )(a_p, b_p)
        col_sum = jnp.sum(stats[:, 0, :], axis=0)
        col_sq = jnp.sum(stats[:, 1, :], axis=0)
        return out, col_sum, col_sq

    if bias is None:
        bias_p = jnp.zeros((1, Np), jnp.float32)
    else:
        bias_p = jnp.pad(bias.astype(jnp.float32), (0, Np - N)).reshape(1, Np)
    kern = functools.partial(_mm_bias_act_kernel, act=act)
    out = pl.pallas_call(
        kern,
        out_shape=jax.ShapeDtypeStruct((Mp, Np), out_dtype),
        grid_spec=pltpu.PrefetchScalarGridSpec(
            num_scalar_prefetch=0,
            grid=grid,
            in_specs=[a_spec, b_spec,
                      pl.BlockSpec((1, tn), lambda i, j, k: (0, j))],
            out_specs=o_spec,
            scratch_shapes=scratch),
        compiler_params=cparams,
    )(a_p, b_p, bias_p)
    return out


def scale_shift_act(x, scale, shift, act, out_dtype=jnp.bfloat16):
    """Row-tiled y = act(x * scale + shift) for the BatchNorm layers."""
    Mp, Np = x.shape
    tm = 256 if Mp % 256 == 0 else Mp   # Mp is either <=256 or a multiple of 256
    kern = functools.partial(_scale_shift_act_kernel, act=act)
    return pl.pallas_call(
        kern,
        out_shape=jax.ShapeDtypeStruct((Mp, Np), out_dtype),
        grid_spec=pltpu.PrefetchScalarGridSpec(
            num_scalar_prefetch=0,
            grid=(Mp // tm,),
            in_specs=[pl.BlockSpec((tm, Np), lambda i: (i, 0)),
                      pl.BlockSpec((1, Np), lambda i: (0, 0)),
                      pl.BlockSpec((1, Np), lambda i: (0, 0))],
            out_specs=pl.BlockSpec((tm, Np), lambda i: (i, 0))),
        compiler_params=pltpu.CompilerParams(
            dimension_semantics=("parallel",),
            vmem_limit_bytes=VMEM_LIMIT),
    )(x, scale.reshape(1, Np), shift.reshape(1, Np))


# ------------------------------- JAX glue ------------------------------------

def im2col(x, k, stride, pad):
    """x: NHWC (bf16). Returns (patches [N*Ho*Wo, k*k*C], (N, Ho, Wo))."""
    N, H, W, C = x.shape
    Ho = (H + 2 * pad - k) // stride + 1
    Wo = (W + 2 * pad - k) // stride + 1
    xp = jnp.pad(x, ((0, 0), (pad, pad), (pad, pad), (0, 0)))
    cols = []
    for di in range(k):
        for dj in range(k):
            cols.append(xp[:, di:di + stride * Ho:stride,
                           dj:dj + stride * Wo:stride, :])
    patches = jnp.concatenate(cols, axis=-1)      # (N, Ho, Wo, k*k*C)
    return patches.reshape(N * Ho * Wo, k * k * C), (N, Ho, Wo)


def conv_unit(x, p, k, stride, pad, act, use_bn, use_bias):
    """ConvUnit.forward on an NHWC tensor (training-mode BatchNorm)."""
    A, (N, Ho, Wo) = im2col(x, k, stride, pad)
    M, K = A.shape
    w = p["w"]                                    # (Cout, Cin, kh, kw)
    Cout = w.shape[0]
    Wmat = jnp.transpose(w, (2, 3, 1, 0)).reshape(K, Cout)

    if use_bn:
        conv, col_sum, col_sq = conv_matmul(A, Wmat, bn=True,
                                            out_dtype=jnp.bfloat16)
        Np = conv.shape[1]
        mean = col_sum / M                        # padded rows are zero -> exact
        var = jnp.maximum(col_sq / M - mean * mean, 0.0)   # biased (training)
        inv_std = jax.lax.rsqrt(var + EPS)
        gamma = jnp.pad(p["gamma"], (0, Np - Cout))
        beta = jnp.pad(p["beta"], (0, Np - Cout))
        scale = gamma * inv_std
        shift = beta - mean * scale
        y = scale_shift_act(conv, scale, shift, act, out_dtype=jnp.bfloat16)
    else:
        # decoder8 (bias, no activation) is the network output -> keep f32.
        out_dtype = jnp.float32 if act is None else jnp.bfloat16
        y = conv_matmul(A, Wmat, bn=False, bias=p.get("b"), act=act,
                        out_dtype=out_dtype)

    return y[:M, :Cout].reshape(N, Ho, Wo, Cout)


def upscale_concat(x, skip):
    """F.interpolate(mode='nearest', size=skip HW) then channel concat (NHWC)."""
    N, H, W, C = x.shape
    _, Hs, Ws, _ = skip.shape
    hi = (jnp.arange(Hs) * H) // Hs               # PyTorch nearest: floor(dst*in/out)
    wi = (jnp.arange(Ws) * W) // Ws
    up = x[:, hi][:, :, wi]
    return jnp.concatenate([up, skip], axis=-1)


# ----------------------------- model definition ------------------------------

# (name, cin, cout, k, stride, pad, bias, batch_norm, act)
LAYER_CFG = [
    ("encoder1",    3,  64, 7, 2, 3, False, False, "relu"),
    ("encoder2",   64, 128, 5, 2, 2, False, True,  "relu"),
    ("encoder3",  128, 256, 3, 2, 1, False, True,  "relu"),
    ("encoder4",  256, 512, 3, 2, 1, False, True,  "relu"),
    ("encoder5",  512, 512, 3, 2, 1, False, True,  "relu"),
    ("encoder6",  512, 512, 3, 2, 1, False, True,  "relu"),
    ("encoder7",  512, 512, 3, 2, 1, False, True,  "relu"),
    ("encoder8",  512, 512, 3, 1, 2, False, True,  "relu"),   # dilation arg ignored by ConvUnit
    ("decoder1", 1024, 512, 3, 1, 1, False, True,  "leaky_relu"),
    ("decoder2", 1024, 512, 3, 1, 1, False, True,  "leaky_relu"),
    ("decoder3", 1024, 512, 3, 1, 1, False, True,  "leaky_relu"),
    ("decoder4", 1024, 512, 3, 1, 1, False, True,  "leaky_relu"),
    ("decoder5",  768, 256, 3, 1, 1, False, True,  "leaky_relu"),
    ("decoder6",  384, 128, 3, 1, 1, False, True,  "leaky_relu"),
    ("decoder7",  192,  64, 3, 1, 1, False, True,  "leaky_relu"),
    ("decoder8",   67,   3, 3, 1, 1, True,  False, None),
]
CFG_BY_NAME = {c[0]: c for c in LAYER_CFG}


def init_params(key):
    params = {}
    for idx, (name, cin, cout, k, s, pd, bias, bn, act) in enumerate(LAYER_CFG):
        lk = jax.random.fold_in(key, idx)
        kw, kb, kg, kbt = jax.random.split(lk, 4)
        p = {"w": 0.05 * jax.random.normal(kw, (cout, cin, k, k), jnp.float32)}
        if bias:
            p["b"] = 0.05 * jax.random.normal(kb, (cout,), jnp.float32)
        if bn:
            p["gamma"] = 1.0 + 0.1 * jax.random.normal(kg, (cout,), jnp.float32)
            p["beta"] = 0.1 * jax.random.normal(kbt, (cout,), jnp.float32)
        params[name] = p
    return params


def conv_unet_forward(params, x_nchw):
    # NCHW -> NHWC, bf16 activations between layers (f32 accumulation inside kernels)
    x = jnp.transpose(x_nchw, (0, 2, 3, 1)).astype(jnp.bfloat16)

    def run(name, inp):
        _, cin, cout, k, s, pd, bias, bn, act = CFG_BY_NAME[name]
        return conv_unit(inp, params[name], k, s, pd, act, bn, bias)

    img1 = run("encoder1", x)
    img2 = run("encoder2", img1)
    img3 = run("encoder3", img2)
    img4 = run("encoder4", img3)
    img5 = run("encoder5", img4)
    img6 = run("encoder6", img5)
    img7 = run("encoder7", img6)
    img8 = run("encoder8", img7)
    # TODO(synk): fold the decoder upscale+concat into the matmul K loop
    # (split Cin into upsampled/skip halves) to avoid materializing the
    # 1024-channel concatenated activations.
    img9 = run("decoder1", upscale_concat(img8, img7))
    img10 = run("decoder2", upscale_concat(img9, img6))
    img11 = run("decoder3", upscale_concat(img10, img5))
    img12 = run("decoder4", upscale_concat(img11, img4))
    img13 = run("decoder5", upscale_concat(img12, img3))
    img14 = run("decoder6", upscale_concat(img13, img2))
    img15 = run("decoder7", upscale_concat(img14, img1))
    img16 = run("decoder8", upscale_concat(img15, x))
    return jnp.transpose(img16, (0, 3, 1, 2)).astype(jnp.float32)  # NHWC -> NCHW


if __name__ == "__main__":
    key = jax.random.PRNGKey(0)
    pkey, xkey = jax.random.split(key)
    params = init_params(pkey)
    x = jax.random.normal(xkey, (2, 3, 16, 16), jnp.float32)       # NCHW, like PyTorch
    fwd = jax.jit(conv_unet_forward)
    out = fwd(params, x)
    jax.block_until_ready(out)
    assert out.shape == (2, 3, 16, 16), out.shape
    assert bool(jnp.all(jnp.isfinite(out)))
    print("KERNEL_OK")
</pallas_src>

<mosaic_0001>
module attributes {stable_mosaic.version = 11 : i64} {
  func.func @_mm_bias_act_kernel(%arg0: i32, %arg1: i32, %arg2: i32, %arg3: memref<128x256xbf16, #tpu.memory_space<vmem>>, %arg4: memref<256x128xbf16, #tpu.memory_space<vmem>>, %arg5: memref<1x128xf32, #tpu.memory_space<vmem>>, %arg6: memref<128x128xbf16, #tpu.memory_space<vmem>>, %arg7: memref<128x128xf32, #tpu.memory_space<vmem>>) attributes {dimension_semantics = [#tpu.dimension_semantics<parallel>, #tpu.dimension_semantics<parallel>, #tpu.dimension_semantics<arbitrary>], iteration_bounds = array<i64: 1, 1, 1>, scalar_prefetch = 0 : i64, scratch_operands = 1 : i64, tpu.core_type = #tpu.core_type<tc>, window_params = [{transform_indices = @transform_0, window_bounds = array<i64: 128, 256>}, {transform_indices = @transform_1, window_bounds = array<i64: 256, 128>}, {transform_indices = @transform_2, window_bounds = array<i64: 1, 128>}, {transform_indices = @transform_3, window_bounds = array<i64: 128, 128>}]} {
    %c0_i32 = arith.constant 0 : i32
    %0 = arith.cmpi eq, %arg2, %c0_i32 : i32
    %1 = arith.extui %0 : i1 to i32
    %c0_i32_0 = arith.constant 0 : i32
    %2 = arith.cmpi ne, %1, %c0_i32_0 : i32
    scf.if %2 {
      %cst_10 = arith.constant 0.000000e+00 : f32
      %12 = vector.broadcast %cst_10 : f32 to vector<128x128xf32>
      %c0_11 = arith.constant 0 : index
      %c0_12 = arith.constant 0 : index
      %13 = vector.load %arg7[%c0_11, %c0_12] : memref<128x128xf32, #tpu.memory_space<vmem>>, vector<128x128xf32>
      tpu.vector_store %arg7[%c0_11, %c0_12], %12 {strides = array<i32>} : memref<128x128xf32, #tpu.memory_space<vmem>>, vector<128x128xf32>,
    } else {
    }
    %c0 = arith.constant 0 : index
    %c0_1 = arith.constant 0 : index
    %3 = vector.load %arg7[%c0, %c0_1] : memref<128x128xf32, #tpu.memory_space<vmem>>, vector<128x128xf32>
    %c0_2 = arith.constant 0 : index
    %c0_3 = arith.constant 0 : index
    %4 = vector.load %arg3[%c0_2, %c0_3] : memref<128x256xbf16, #tpu.memory_space<vmem>>, vector<128x256xbf16>
    %c0_4 = arith.constant 0 : index
    %c0_5 = arith.constant 0 : index
    %5 = vector.load %arg4[%c0_4, %c0_5] : memref<256x128xbf16, #tpu.memory_space<vmem>>, vector<256x128xbf16>
    %cst = arith.constant dense<0.000000e+00> : vector<128x128xf32>
    %6 = tpu.matmul %4, %5, %cst {dimension_numbers = #tpu.dot_dimension_numbers<[1], [0], [0], [1], [0, 0, 1, 1], [], []>} : vector<128x256xbf16>, vector<256x128xbf16>, vector<128x128xf32> -> vector<128x128xf32>
    %7 = arith.addf %3, %6 : vector<128x128xf32>
    %c0_6 = arith.constant 0 : index
    %c0_7 = arith.constant 0 : index
    %8 = vector.load %arg7[%c0_6, %c0_7] : memref<128x128xf32, #tpu.memory_space<vmem>>, vector<128x128xf32>
    tpu.vector_store %arg7[%c0_6, %c0_7], %7 {strides = array<i32>} : memref<128x128xf32, #tpu.memory_space<vmem>>, vector<128x128xf32>,
    %c0_i32_8 = arith.constant 0 : i32
    %9 = arith.cmpi eq, %arg2, %c0_i32_8 : i32
    %10 = arith.extui %9 : i1 to i32
    %c0_i32_9 = arith.constant 0 : i32
    %11 = arith.cmpi ne, %10, %c0_i32_9 : i32
    scf.if %11 {
      %c0_10 = arith.constant 0 : index
      %c0_11 = arith.constant 0 : index
      %12 = vector.load %arg7[%c0_10, %c0_11] : memref<128x128xf32, #tpu.memory_space<vmem>>, vector<128x128xf32>
      %c0_12 = arith.constant 0 : index
      %c0_13 = arith.constant 0 : index
      %13 = vector.load %arg5[%c0_12, %c0_13] : memref<1x128xf32, #tpu.memory_space<vmem>>, vector<1x128xf32>
      %14 = vector.broadcast %13 : vector<1x128xf32> to vector<128x128xf32>
      %15 = arith.addf %12, %14 : vector<128x128xf32>
      %cst_14 = arith.constant 0.000000e+00 : f32
      %16 = vector.broadcast %cst_14 : f32 to vector<128x128xf32>
      %17 = arith.maximumf %15, %16 : vector<128x128xf32>
      %18 = arith.truncf %17 : vector<128x128xf32> to vector<128x128xbf16>
      %c0_15 = arith.constant 0 : index
      %c0_16 = arith.constant 0 : index
      %19 = vector.load %arg6[%c0_15, %c0_16] : memref<128x128xbf16, #tpu.memory_space<vmem>>, vector<128x128xbf16>
      tpu.vector_store %arg6[%c0_15, %c0_16], %18 {strides = array<i32>} : memref<128x128xbf16, #tpu.memory_space<vmem>>, vector<128x128xbf16>,
    } else {
    }
    return
  }
  func.func @transform_0(%arg0: i32, %arg1: i32, %arg2: i32) -> (i32, i32) {
    %c0_i32 = arith.constant 0 : i32
    return %arg0, %arg2 : i32, i32
  }
  func.func @transform_1(%arg0: i32, %arg1: i32, %arg2: i32) -> (i32, i32) {
    %c0_i32 = arith.constant 0 : i32
    return %arg2, %arg1 : i32, i32
  }
  func.func @transform_2(%arg0: i32, %arg1: i32, %arg2: i32) -> (i32, i32) {
    %c0_i32 = arith.constant 0 : i32
    %c0_i32_0 = arith.constant 0 : i32
    return %c0_i32, %arg1 : i32, i32
  }
  func.func @transform_3(%arg0: i32, %arg1: i32, %arg2: i32) -> (i32, i32) {
    %c0_i32 = arith.constant 0 : i32
    return %arg0, %arg1 : i32, i32
  }
}

module attributes {stable_mosaic.version = 11 : i64} {
  func.func @_mm_bn_kernel(%arg0: i32, %arg1: i32, %arg2: i32, %arg3: memref<32x128xbf16, #tpu.memory_space<vmem>>, %arg4: memref<128x128xbf16, #tpu.memory_space<vmem>>, %arg5: memref<32x128xbf16, #tpu.memory_space<vmem>>, %arg6: memref<1x8x128xf32, #tpu.memory_space<vmem>>, %arg7: memref<32x128xf32, #tpu.memory_space<vmem>>) attributes {dimension_semantics = [#tpu.dimension_semantics<parallel>, #tpu.dimension_semantics<parallel>, #tpu.dimension_semantics<arbitrary>], iteration_bounds = array<i64: 1, 1, 13>, scalar_prefetch = 0 : i64, scratch_operands = 1 : i64, tpu.core_type = #tpu.core_type<tc>, window_params = [{transform_indices = @transform_0, window_bounds = array<i64: 32, 128>}, {transform_indices = @transform_1, window_bounds = array<i64: 128, 128>}, {transform_indices = @transform_2, window_bounds = array<i64: 32, 128>}, {transform_indices = @transform_3, window_bounds = array<i64: 1, 8, 128>}]} {
    %c0_i32 = arith.constant 0 : i32
    %0 = arith.cmpi eq, %arg2, %c0_i32 : i32
    %1 = arith.extui %0 : i1 to i32
    %c0_i32_0 = arith.constant 0 : i32
    %2 = arith.cmpi ne, %1, %c0_i32_0 : i32
    scf.if %2 {
      %cst_9 = arith.constant 0.000000e+00 : f32
      %12 = vector.broadcast %cst_9 : f32 to vector<32x128xf32>
      %c0_10 = arith.constant 0 : index
      %c0_11 = arith.constant 0 : index
      %13 = vector.load %arg7[%c0_10, %c0_11] : memref<32x128xf32, #tpu.memory_space<vmem>>, vector<32x128xf32>
      tpu.vector_store %arg7[%c0_10, %c0_11], %12 {strides = array<i32>} : memref<32x128xf32, #tpu.memory_space<vmem>>, vector<32x128xf32>,
    } else {
    }
    %c0 = arith.constant 0 : index
    %c0_1 = arith.constant 0 : index
    %3 = vector.load %arg7[%c0, %c0_1] : memref<32x128xf32, #tpu.memory_space<vmem>>, vector<32x128xf32>
    %c0_2 = arith.constant 0 : index
    %c0_3 = arith.constant 0 : index
    %4 = vector.load %arg3[%c0_2, %c0_3] : memref<32x128xbf16, #tpu.memory_space<vmem>>, vector<32x128xbf16>
    %c0_4 = arith.constant 0 : index
    %c0_5 = arith.constant 0 : index
    %5 = vector.load %arg4[%c0_4, %c0_5] : memref<128x128xbf16, #tpu.memory_space<vmem>>, vector<128x128xbf16>
    %cst = arith.constant dense<0.000000e+00> : vector<32x128xf32>
    %6 = tpu.matmul %4, %5, %cst {dimension_numbers = #tpu.dot_dimension_numbers<[1], [0], [0], [1], [0, 0, 1, 1], [], []>} : vector<32x128xbf16>, vector<128x128xbf16>, vector<32x128xf32> -> vector<32x128xf32>
    %7 = arith.addf %3, %6 : vector<32x128xf32>
    %c0_6 = arith.constant 0 : index
    %c0_7 = arith.constant 0 : index
    %8 = vector.load %arg7[%c0_6, %c0_7] : memref<32x128xf32, #tpu.memory_space<vmem>>, vector<32x128xf32>
    tpu.vector_store %arg7[%c0_6, %c0_7], %7 {strides = array<i32>} : memref<32x128xf32, #tpu.memory_space<vmem>>, vector<32x128xf32>,
    %c12_i32 = arith.constant 12 : i32
    %9 = arith.cmpi eq, %arg2, %c12_i32 : i32
    %10 = arith.extui %9 : i1 to i32
    %c0_i32_8 = arith.constant 0 : i32
    %11 = arith.cmpi ne, %10, %c0_i32_8 : i32
    scf.if %11 {
      %c0_9 = arith.constant 0 : index
      %c0_10 = arith.constant 0 : index
      %12 = vector.load %arg7[%c0_9, %c0_10] : memref<32x128xf32, #tpu.memory_space<vmem>>, vector<32x128xf32>
      %13 = arith.truncf %12 : vector<32x128xf32> to vector<32x128xbf16>
      %c0_11 = arith.constant 0 : index
      %c0_12 = arith.constant 0 : index
      %14 = vector.load %arg5[%c0_11, %c0_12] : memref<32x128xbf16, #tpu.memory_space<vmem>>, vector<32x128xbf16>
      tpu.vector_store %arg5[%c0_11, %c0_12], %13 {strides = array<i32>} : memref<32x128xbf16, #tpu.memory_space<vmem>>, vector<32x128xbf16>,
      %cst_13 = arith.constant dense<0.000000e+00> : vector<128xf32>
      %15 = vector.multi_reduction <add>, %12, %cst_13 [0] : vector<32x128xf32> to vector<128xf32>
      %16 = vector.shape_cast %15 : vector<128xf32> to vector<1x128xf32>
      %17 = arith.mulf %12, %12 : vector<32x128xf32>
      %cst_14 = arith.constant dense<0.000000e+00> : vector<128xf32>
      %18 = vector.multi_reduction <add>, %17, %cst_14 [0] : vector<32x128xf32> to vector<128xf32>
      %19 = vector.shape_cast %18 : vector<128xf32> to vector<1x128xf32>
      %cst_15 = arith.constant 0.000000e+00 : f32
      %20 = vector.broadcast %cst_15 : f32 to vector<6x128xf32>
      %21 = tpu.concatenate %16, %19, %20 in 0 : vector<1x128xf32>, vector<1x128xf32>, vector<6x128xf32> -> vector<8x128xf32>
      %c0_16 = arith.constant 0 : index
      %c0_17 = arith.constant 0 : index
      %c0_18 = arith.constant 0 : index
      %22 = vector.load %arg6[%c0_16, %c0_17, %c0_18] : memref<1x8x128xf32, #tpu.memory_space<vmem>>, vector<1x8x128xf32>
      %23 = vector.shape_cast %22 : vector<1x8x128xf32> to vector<8x128xf32>
      %24 = vector.shape_cast %21 : vector<8x128xf32> to vector<1x8x128xf32>
      tpu.vector_store %arg6[%c0_16, %c0_17, %c0_18], %24 {strides = array<i32>} : memref<1x8x128xf32, #tpu.memory_space<vmem>>, vector<1x8x128xf32>,
    } else {
    }
    return
  }
  func.func @transform_0(%arg0: i32, %arg1: i32, %arg2: i32) -> (i32, i32) {
    %c0_i32 = arith.constant 0 : i32
    return %arg0, %arg2 : i32, i32
  }
  func.func @transform_1(%arg0: i32, %arg1: i32, %arg2: i32) -> (i32, i32) {
    %c0_i32 = arith.constant 0 : i32
    return %arg2, %arg1 : i32, i32
  }
  func.func @transform_2(%arg0: i32, %arg1: i32, %arg2: i32) -> (i32, i32) {
    %c0_i32 = arith.constant 0 : i32
    return %arg0, %arg1 : i32, i32
  }
  func.func @transform_3(%arg0: i32, %arg1: i32, %arg2: i32) -> (i32, i32, i32) {
    %c0_i32 = arith.constant 0 : i32
    %c0_i32_0 = arith.constant 0 : i32
    return %arg0, %c0_i32, %arg1 : i32, i32, i32
  }
}

module attributes {stable_mosaic.version = 11 : i64} {
  func.func @_scale_shift_act_kernel(%arg0: i32, %arg1: memref<32x128xbf16, #tpu.memory_space<vmem>>, %arg2: memref<1x128xf32, #tpu.memory_space<vmem>>, %arg3: memref<1x128xf32, #tpu.memory_space<vmem>>, %arg4: memref<32x128xbf16, #tpu.memory_space<vmem>>) attributes {dimension_semantics = [#tpu.dimension_semantics<parallel>], iteration_bounds = array<i64: 1>, scalar_prefetch = 0 : i64, scratch_operands = 0 : i64, tpu.core_type = #tpu.core_type<tc>, window_params = [{transform_indices = @transform_0, window_bounds = array<i64: 32, 128>}, {pipeline_mode = #tpu.pipeline_mode<synchronous>, transform_indices = @transform_1, window_bounds = array<i64: 1, 128>}, {pipeline_mode = #tpu.pipeline_mode<synchronous>, transform_indices = @transform_2, window_bounds = array<i64: 1, 128>}, {transform_indices = @transform_3, window_bounds = array<i64: 32, 128>}]} {
    %c0 = arith.constant 0 : index
    %c0_0 = arith.constant 0 : index
    %0 = vector.load %arg1[%c0, %c0_0] : memref<32x128xbf16, #tpu.memory_space<vmem>>, vector<32x128xbf16>
    %1 = arith.extf %0 : vector<32x128xbf16> to vector<32x128xf32>
    %c0_1 = arith.constant 0 : index
    %c0_2 = arith.constant 0 : index
    %2 = vector.load %arg2[%c0_1, %c0_2] : memref<1x128xf32, #tpu.memory_space<vmem>>, vector<1x128xf32>
    %3 = vector.broadcast %2 : vector<1x128xf32> to vector<32x128xf32>
    %4 = arith.mulf %1, %3 : vector<32x128xf32>
    %c0_3 = arith.constant 0 : index
    %c0_4 = arith.constant 0 : index
    %5 = vector.load %arg3[%c0_3, %c0_4] : memref<1x128xf32, #tpu.memory_space<vmem>>, vector<1x128xf32>
    %6 = vector.broadcast %5 : vector<1x128xf32> to vector<32x128xf32>
    %7 = arith.addf %4, %6 : vector<32x128xf32>
    %cst = arith.constant 0.000000e+00 : f32
    %8 = vector.broadcast %cst : f32 to vector<32x128xf32>
    %9 = arith.maximumf %7, %8 : vector<32x128xf32>
    %10 = arith.truncf %9 : vector<32x128xf32> to vector<32x128xbf16>
    %c0_5 = arith.constant 0 : index
    %c0_6 = arith.constant 0 : index
    %11 = vector.load %arg4[%c0_5, %c0_6] : memref<32x128xbf16, #tpu.memory_space<vmem>>, vector<32x128xbf16>
    tpu.vector_store %arg4[%c0_5, %c0_6], %10 {strides = array<i32>} : memref<32x128xbf16, #tpu.memory_space<vmem>>, vector<32x128xbf16>,
    return
  }
  func.func @transform_0(%arg0: i32) -> (i32, i32) {
    %c0_i32 = arith.constant 0 : i32
    %c0_i32_0 = arith.constant 0 : i32
    return %arg0, %c0_i32 : i32, i32
  }
  func.func @transform_1(%arg0: i32) -> (i32, i32) {
    %c0_i32 = arith.constant 0 : i32
    %c0_i32_0 = arith.constant 0 : i32
    %c0_i32_1 = arith.constant 0 : i32
    return %c0_i32, %c0_i32_0 : i32, i32
  }
  func.func @transform_2(%arg0: i32) -> (i32, i32) {
    %c0_i32 = arith.constant 0 : i32
    %c0_i32_0 = arith.constant 0 : i32
    %c0_i32_1 = arith.constant 0 : i32
    return %c0_i32, %c0_i32_0 : i32, i32
  }
  func.func @transform_3(%arg0: i32) -> (i32, i32) {
    %c0_i32 = arith.constant 0 : i32
    %c0_i32_0 = arith.constant 0 : i32
    return %arg0, %c0_i32 : i32, i32
  }
}

module attributes {stable_mosaic.version = 11 : i64} {
  func.func @_mm_bn_kernel(%arg0: i32, %arg1: i32, %arg2: i32, %arg3: memref<16x128xbf16, #tpu.memory_space<vmem>>, %arg4: memref<128x256xbf16, #tpu.memory_space<vmem>>, %arg5: memref<16x256xbf16, #tpu.memory_space<vmem>>, %arg6: memref<1x8x256xf32, #tpu.memory_space<vmem>>, %arg7: memref<16x256xf32, #tpu.memory_space<vmem>>) attributes {dimension_semantics = [#tpu.dimension_semantics<parallel>, #tpu.dimension_semantics<parallel>, #tpu.dimension_semantics<arbitrary>], iteration_bounds = array<i64: 1, 1, 9>, scalar_prefetch = 0 : i64, scratch_operands = 1 : i64, tpu.core_type = #tpu.core_type<tc>, window_params = [{transform_indices = @transform_0, window_bounds = array<i64: 16, 128>}, {transform_indices = @transform_1, window_bounds = array<i64: 128, 256>}, {transform_indices = @transform_2, window_bounds = array<i64: 16, 256>}, {transform_indices = @transform_3, window_bounds = array<i64: 1, 8, 256>}]} {
    %c0_i32 = arith.constant 0 : i32
    %0 = arith.cmpi eq, %arg2, %c0_i32 : i32
    %1 = arith.extui %0 : i1 to i32
    %c0_i32_0 = arith.constant 0 : i32
    %2 = arith.cmpi ne, %1, %c0_i32_0 : i32
    scf.if %2 {
      %cst_9 = arith.constant 0.000000e+00 : f32
      %12 = vector.broadcast %cst_9 : f32 to vector<16x256xf32>
      %c0_10 = arith.constant 0 : index
      %c0_11 = arith.constant 0 : index
      %13 = vector.load %arg7[%c0_10, %c0_11] : memref<16x256xf32, #tpu.memory_space<vmem>>, vector<16x256xf32>
      tpu.vector_store %arg7[%c0_10, %c0_11], %12 {strides = array<i32>} : memref<16x256xf32, #tpu.memory_space<vmem>>, vector<16x256xf32>,
    } else {
    }
    %c0 = arith.constant 0 : index
    %c0_1 = arith.constant 0 : index
    %3 = vector.load %arg7[%c0, %c0_1] : memref<16x256xf32, #tpu.memory_space<vmem>>, vector<16x256xf32>
    %c0_2 = arith.constant 0 : index
    %c0_3 = arith.constant 0 : index
    %4 = vector.load %arg3[%c0_2, %c0_3] : memref<16x128xbf16, #tpu.memory_space<vmem>>, vector<16x128xbf16>
    %c0_4 = arith.constant 0 : index
    %c0_5 = arith.constant 0 : index
    %5 = vector.load %arg4[%c0_4, %c0_5] : memref<128x256xbf16, #tpu.memory_space<vmem>>, vector<128x256xbf16>
    %cst = arith.constant dense<0.000000e+00> : vector<16x256xf32>
    %6 = tpu.matmul %4, %5, %cst {dimension_numbers = #tpu.dot_dimension_numbers<[1], [0], [0], [1], [0, 0, 1, 1], [], []>} : vector<16x128xbf16>, vector<128x256xbf16>, vector<16x256xf32> -> vector<16x256xf32>
    %7 = arith.addf %3, %6 : vector<16x256xf32>
    %c0_6 = arith.constant 0 : index
    %c0_7 = arith.constant 0 : index
    %8 = vector.load %arg7[%c0_6, %c0_7] : memref<16x256xf32, #tpu.memory_space<vmem>>, vector<16x256xf32>
    tpu.vector_store %arg7[%c0_6, %c0_7], %7 {strides = array<i32>} : memref<16x256xf32, #tpu.memory_space<vmem>>, vector<16x256xf32>,
    %c8_i32 = arith.constant 8 : i32
    %9 = arith.cmpi eq, %arg2, %c8_i32 : i32
    %10 = arith.extui %9 : i1 to i32
    %c0_i32_8 = arith.constant 0 : i32
    %11 = arith.cmpi ne, %10, %c0_i32_8 : i32
    scf.if %11 {
      %c0_9 = arith.constant 0 : index
      %c0_10 = arith.constant 0 : index
      %12 = vector.load %arg7[%c0_9, %c0_10] : memref<16x256xf32, #tpu.memory_space<vmem>>, vector<16x256xf32>
      %13 = arith.truncf %12 : vector<16x256xf32> to vector<16x256xbf16>
      %c0_11 = arith.constant 0 : index
      %c0_12 = arith.constant 0 : index
      %14 = vector.load %arg5[%c0_11, %c0_12] : memref<16x256xbf16, #tpu.memory_space<vmem>>, vector<16x256xbf16>
      tpu.vector_store %arg5[%c0_11, %c0_12], %13 {strides = array<i32>} : memref<16x256xbf16, #tpu.memory_space<vmem>>, vector<16x256xbf16>,
      %cst_13 = arith.constant dense<0.000000e+00> : vector<256xf32>
      %15 = vector.multi_reduction <add>, %12, %cst_13 [0] : vector<16x256xf32> to vector<256xf32>
      %16 = vector.shape_cast %15 : vector<256xf32> to vector<1x256xf32>
      %17 = arith.mulf %12, %12 : vector<16x256xf32>
      %cst_14 = arith.constant dense<0.000000e+00> : vector<256xf32>
      %18 = vector.multi_reduction <add>, %17, %cst_14 [0] : vector<16x256xf32> to vector<256xf32>
      %19 = vector.shape_cast %18 : vector<256xf32> to vector<1x256xf32>
      %cst_15 = arith.constant 0.000000e+00 : f32
      %20 = vector.broadcast %cst_15 : f32 to vector<6x256xf32>
      %21 = tpu.concatenate %16, %19, %20 in 0 : vector<1x256xf32>, vector<1x256xf32>, vector<6x256xf32> -> vector<8x256xf32>
      %c0_16 = arith.constant 0 : index
      %c0_17 = arith.constant 0 : index
      %c0_18 = arith.constant 0 : index
      %22 = vector.load %arg6[%c0_16, %c0_17, %c0_18] : memref<1x8x256xf32, #tpu.memory_space<vmem>>, vector<1x8x256xf32>
      %23 = vector.shape_cast %22 : vector<1x8x256xf32> to vector<8x256xf32>
      %24 = vector.shape_cast %21 : vector<8x256xf32> to vector<1x8x256xf32>
      tpu.vector_store %arg6[%c0_16, %c0_17, %c0_18], %24 {strides = array<i32>} : memref<1x8x256xf32, #tpu.memory_space<vmem>>, vector<1x8x256xf32>,
    } else {
    }
    return
  }
  func.func @transform_0(%arg0: i32, %arg1: i32, %arg2: i32) -> (i32, i32) {
    %c0_i32 = arith.constant 0 : i32
    return %arg0, %arg2 : i32, i32
  }
  func.func @transform_1(%arg0: i32, %arg1: i32, %arg2: i32) -> (i32, i32) {
    %c0_i32 = arith.constant 0 : i32
    return %arg2, %arg1 : i32, i32
  }
  func.func @transform_2(%arg0: i32, %arg1: i32, %arg2: i32) -> (i32, i32) {
    %c0_i32 = arith.constant 0 : i32
    return %arg0, %arg1 : i32, i32
  }
  func.func @transform_3(%arg0: i32, %arg1: i32, %arg2: i32) -> (i32, i32, i32) {
    %c0_i32 = arith.constant 0 : i32
    %c0_i32_0 = arith.constant 0 : i32
    return %arg0, %c0_i32, %arg1 : i32, i32, i32
  }
}

module attributes {stable_mosaic.version = 11 : i64} {
  func.func @_scale_shift_act_kernel(%arg0: i32, %arg1: memref<16x256xbf16, #tpu.memory_space<vmem>>, %arg2: memref<1x256xf32, #tpu.memory_space<vmem>>, %arg3: memref<1x256xf32, #tpu.memory_space<vmem>>, %arg4: memref<16x256xbf16, #tpu.memory_space<vmem>>) attributes {dimension_semantics = [#tpu.dimension_semantics<parallel>], iteration_bounds = array<i64: 1>, scalar_prefetch = 0 : i64, scratch_operands = 0 : i64, tpu.core_type = #tpu.core_type<tc>, window_params = [{transform_indices = @transform_0, window_bounds = array<i64: 16, 256>}, {pipeline_mode = #tpu.pipeline_mode<synchronous>, transform_indices = @transform_1, window_bounds = array<i64: 1, 256>}, {pipeline_mode = #tpu.pipeline_mode<synchronous>, transform_indices = @transform_2, window_bounds = array<i64: 1, 256>}, {transform_indices = @transform_3, window_bounds = array<i64: 16, 256>}]} {
    %c0 = arith.constant 0 : index
    %c0_0 = arith.constant 0 : index
    %0 = vector.load %arg1[%c0, %c0_0] : memref<16x256xbf16, #tpu.memory_space<vmem>>, vector<16x256xbf16>
    %1 = arith.extf %0 : vector<16x256xbf16> to vector<16x256xf32>
    %c0_1 = arith.constant 0 : index
    %c0_2 = arith.constant 0 : index
    %2 = vector.load %arg2[%c0_1, %c0_2] : memref<1x256xf32, #tpu.memory_space<vmem>>, vector<1x256xf32>
    %3 = vector.broadcast %2 : vector<1x256xf32> to vector<16x256xf32>
    %4 = arith.mulf %1, %3 : vector<16x256xf32>
    %c0_3 = arith.constant 0 : index
    %c0_4 = arith.constant 0 : index
    %5 = vector.load %arg3[%c0_3, %c0_4] : memref<1x256xf32, #tpu.memory_space<vmem>>, vector<1x256xf32>
    %6 = vector.broadcast %5 : vector<1x256xf32> to vector<16x256xf32>
    %7 = arith.addf %4, %6 : vector<16x256xf32>
    %cst = arith.constant 0.000000e+00 : f32
    %8 = vector.broadcast %cst : f32 to vector<16x256xf32>
    %9 = arith.maximumf %7, %8 : vector<16x256xf32>
    %10 = arith.truncf %9 : vector<16x256xf32> to vector<16x256xbf16>
    %c0_5 = arith.constant 0 : index
    %c0_6 = arith.constant 0 : index
    %11 = vector.load %arg4[%c0_5, %c0_6] : memref<16x256xbf16, #tpu.memory_space<vmem>>, vector<16x256xbf16>
    tpu.vector_store %arg4[%c0_5, %c0_6], %10 {strides = array<i32>} : memref<16x256xbf16, #tpu.memory_space<vmem>>, vector<16x256xbf16>,
    return
  }
  func.func @transform_0(%arg0: i32) -> (i32, i32) {
    %c0_i32 = arith.constant 0 : i32
    %c0_i32_0 = arith.constant 0 : i32
    return %arg0, %c0_i32 : i32, i32
  }
  func.func @transform_1(%arg0: i32) -> (i32, i32) {
    %c0_i32 = arith.constant 0 : i32
    %c0_i32_0 = arith.constant 0 : i32
    %c0_i32_1 = arith.constant 0 : i32
    return %c0_i32, %c0_i32_0 : i32, i32
  }
  func.func @transform_2(%arg0: i32) -> (i32, i32) {
    %c0_i32 = arith.constant 0 : i32
    %c0_i32_0 = arith.constant 0 : i32
    %c0_i32_1 = arith.constant 0 : i32
    return %c0_i32, %c0_i32_0 : i32, i32
  }
  func.func @transform_3(%arg0: i32) -> (i32, i32) {
    %c0_i32 = arith.constant 0 : i32
    %c0_i32_0 = arith.constant 0 : i32
    return %arg0, %c0_i32 : i32, i32
  }
}

module attributes {stable_mosaic.version = 11 : i64} {
  func.func @_mm_bn_kernel(%arg0: i32, %arg1: i32, %arg2: i32, %arg3: memref<16x256xbf16, #tpu.memory_space<vmem>>, %arg4: memref<256x512xbf16, #tpu.memory_space<vmem>>, %arg5: memref<16x512xbf16, #tpu.memory_space<vmem>>, %arg6: memref<1x8x512xf32, #tpu.memory_space<vmem>>, %arg7: memref<16x512xf32, #tpu.memory_space<vmem>>) attributes {dimension_semantics = [#tpu.dimension_semantics<parallel>, #tpu.dimension_semantics<parallel>, #tpu.dimension_semantics<arbitrary>], iteration_bounds = array<i64: 1, 1, 9>, scalar_prefetch = 0 : i64, scratch_operands = 1 : i64, tpu.core_type = #tpu.core_type<tc>, window_params = [{transform_indices = @transform_0, window_bounds = array<i64: 16, 256>}, {transform_indices = @transform_1, window_bounds = array<i64: 256, 512>}, {transform_indices = @transform_2, window_bounds = array<i64: 16, 512>}, {transform_indices = @transform_3, window_bounds = array<i64: 1, 8, 512>}]} {
    %c0_i32 = arith.constant 0 : i32
    %0 = arith.cmpi eq, %arg2, %c0_i32 : i32
    %1 = arith.extui %0 : i1 to i32
    %c0_i32_0 = arith.constant 0 : i32
    %2 = arith.cmpi ne, %1, %c0_i32_0 : i32
    scf.if %2 {
      %cst_9 = arith.constant 0.000000e+00 : f32
      %12 = vector.broadcast %cst_9 : f32 to vector<16x512xf32>
      %c0_10 = arith.constant 0 : index
      %c0_11 = arith.constant 0 : index
      %13 = vector.load %arg7[%c0_10, %c0_11] : memref<16x512xf32, #tpu.memory_space<vmem>>, vector<16x512xf32>
      tpu.vector_store %arg7[%c0_10, %c0_11], %12 {strides = array<i32>} : memref<16x512xf32, #tpu.memory_space<vmem>>, vector<16x512xf32>,
    } else {
    }
    %c0 = arith.constant 0 : index
    %c0_1 = arith.constant 0 : index
    %3 = vector.load %arg7[%c0, %c0_1] : memref<16x512xf32, #tpu.memory_space<vmem>>, vector<16x512xf32>
    %c0_2 = arith.constant 0 : index
    %c0_3 = arith.constant 0 : index
    %4 = vector.load %arg3[%c0_2, %c0_3] : memref<16x256xbf16, #tpu.memory_space<vmem>>, vector<16x256xbf16>
    %c0_4 = arith.constant 0 : index
    %c0_5 = arith.constant 0 : index
    %5 = vector.load %arg4[%c0_4, %c0_5] : memref<256x512xbf16, #tpu.memory_space<vmem>>, vector<256x512xbf16>
    %cst = arith.constant dense<0.000000e+00> : vector<16x512xf32>
    %6 = tpu.matmul %4, %5, %cst {dimension_numbers = #tpu.dot_dimension_numbers<[1], [0], [0], [1], [0, 0, 1, 1], [], []>} : vector<16x256xbf16>, vector<256x512xbf16>, vector<16x512xf32> -> vector<16x512xf32>
    %7 = arith.addf %3, %6 : vector<16x512xf32>
    %c0_6 = arith.constant 0 : index
    %c0_7 = arith.constant 0 : index
    %8 = vector.load %arg7[%c0_6, %c0_7] : memref<16x512xf32, #tpu.memory_space<vmem>>, vector<16x512xf32>
    tpu.vector_store %arg7[%c0_6, %c0_7], %7 {strides = array<i32>} : memref<16x512xf32, #tpu.memory_space<vmem>>, vector<16x512xf32>,
    %c8_i32 = arith.constant 8 : i32
    %9 = arith.cmpi eq, %arg2, %c8_i32 : i32
    %10 = arith.extui %9 : i1 to i32
    %c0_i32_8 = arith.constant 0 : i32
    %11 = arith.cmpi ne, %10, %c0_i32_8 : i32
    scf.if %11 {
      %c0_9 = arith.constant 0 : index
      %c0_10 = arith.constant 0 : index
      %12 = vector.load %arg7[%c0_9, %c0_10] : memref<16x512xf32, #tpu.memory_space<vmem>>, vector<16x512xf32>
      %13 = arith.truncf %12 : vector<16x512xf32> to vector<16x512xbf16>
      %c0_11 = arith.constant 0 : index
      %c0_12 = arith.constant 0 : index
      %14 = vector.load %arg5[%c0_11, %c0_12] : memref<16x512xbf16, #tpu.memory_space<vmem>>, vector<16x512xbf16>
      tpu.vector_store %arg5[%c0_11, %c0_12], %13 {strides = array<i32>} : memref<16x512xbf16, #tpu.memory_space<vmem>>, vector<16x512xbf16>,
      %cst_13 = arith.constant dense<0.000000e+00> : vector<512xf32>
      %15 = vector.multi_reduction <add>, %12, %cst_13 [0] : vector<16x512xf32> to vector<512xf32>
      %16 = vector.shape_cast %15 : vector<512xf32> to vector<1x512xf32>
      %17 = arith.mulf %12, %12 : vector<16x512xf32>
      %cst_14 = arith.constant dense<0.000000e+00> : vector<512xf32>
      %18 = vector.multi_reduction <add>, %17, %cst_14 [0] : vector<16x512xf32> to vector<512xf32>
      %19 = vector.shape_cast %18 : vector<512xf32> to vector<1x512xf32>
      %cst_15 = arith.constant 0.000000e+00 : f32
      %20 = vector.broadcast %cst_15 : f32 to vector<6x512xf32>
      %21 = tpu.concatenate %16, %19, %20 in 0 : vector<1x512xf32>, vector<1x512xf32>, vector<6x512xf32> -> vector<8x512xf32>
      %c0_16 = arith.constant 0 : index
      %c0_17 = arith.constant 0 : index
      %c0_18 = arith.constant 0 : index
      %22 = vector.load %arg6[%c0_16, %c0_17, %c0_18] : memref<1x8x512xf32, #tpu.memory_space<vmem>>, vector<1x8x512xf32>
      %23 = vector.shape_cast %22 : vector<1x8x512xf32> to vector<8x512xf32>
      %24 = vector.shape_cast %21 : vector<8x512xf32> to vector<1x8x512xf32>
      tpu.vector_store %arg6[%c0_16, %c0_17, %c0_18], %24 {strides = array<i32>} : memref<1x8x512xf32, #tpu.memory_space<vmem>>, vector<1x8x512xf32>,
    } else {
    }
    return
  }
  func.func @transform_0(%arg0: i32, %arg1: i32, %arg2: i32) -> (i32, i32) {
    %c0_i32 = arith.constant 0 : i32
    return %arg0, %arg2 : i32, i32
  }
  func.func @transform_1(%arg0: i32, %arg1: i32, %arg2: i32) -> (i32, i32) {
    %c0_i32 = arith.constant 0 : i32
    return %arg2, %arg1 : i32, i32
  }
  func.func @transform_2(%arg0: i32, %arg1: i32, %arg2: i32) -> (i32, i32) {
    %c0_i32 = arith.constant 0 : i32
    return %arg0, %arg1 : i32, i32
  }
  func.func @transform_3(%arg0: i32, %arg1: i32, %arg2: i32) -> (i32, i32, i32) {
    %c0_i32 = arith.constant 0 : i32
    %c0_i32_0 = arith.constant 0 : i32
    return %arg0, %c0_i32, %arg1 : i32, i32, i32
  }
}

module attributes {stable_mosaic.version = 11 : i64} {
  func.func @_scale_shift_act_kernel(%arg0: i32, %arg1: memref<16x512xbf16, #tpu.memory_space<vmem>>, %arg2: memref<1x512xf32, #tpu.memory_space<vmem>>, %arg3: memref<1x512xf32, #tpu.memory_space<vmem>>, %arg4: memref<16x512xbf16, #tpu.memory_space<vmem>>) attributes {dimension_semantics = [#tpu.dimension_semantics<parallel>], iteration_bounds = array<i64: 1>, scalar_prefetch = 0 : i64, scratch_operands = 0 : i64, tpu.core_type = #tpu.core_type<tc>, window_params = [{transform_indices = @transform_0, window_bounds = array<i64: 16, 512>}, {pipeline_mode = #tpu.pipeline_mode<synchronous>, transform_indices = @transform_1, window_bounds = array<i64: 1, 512>}, {pipeline_mode = #tpu.pipeline_mode<synchronous>, transform_indices = @transform_2, window_bounds = array<i64: 1, 512>}, {transform_indices = @transform_3, window_bounds = array<i64: 16, 512>}]} {
    %c0 = arith.constant 0 : index
    %c0_0 = arith.constant 0 : index
    %0 = vector.load %arg1[%c0, %c0_0] : memref<16x512xbf16, #tpu.memory_space<vmem>>, vector<16x512xbf16>
    %1 = arith.extf %0 : vector<16x512xbf16> to vector<16x512xf32>
    %c0_1 = arith.constant 0 : index
    %c0_2 = arith.constant 0 : index
    %2 = vector.load %arg2[%c0_1, %c0_2] : memref<1x512xf32, #tpu.memory_space<vmem>>, vector<1x512xf32>
    %3 = vector.broadcast %2 : vector<1x512xf32> to vector<16x512xf32>
    %4 = arith.mulf %1, %3 : vector<16x512xf32>
    %c0_3 = arith.constant 0 : index
    %c0_4 = arith.constant 0 : index
    %5 = vector.load %arg3[%c0_3, %c0_4] : memref<1x512xf32, #tpu.memory_space<vmem>>, vector<1x512xf32>
    %6 = vector.broadcast %5 : vector<1x512xf32> to vector<16x512xf32>
    %7 = arith.addf %4, %6 : vector<16x512xf32>
    %cst = arith.constant 0.000000e+00 : f32
    %8 = vector.broadcast %cst : f32 to vector<16x512xf32>
    %9 = arith.maximumf %7, %8 : vector<16x512xf32>
    %10 = arith.truncf %9 : vector<16x512xf32> to vector<16x512xbf16>
    %c0_5 = arith.constant 0 : index
    %c0_6 = arith.constant 0 : index
    %11 = vector.load %arg4[%c0_5, %c0_6] : memref<16x512xbf16, #tpu.memory_space<vmem>>, vector<16x512xbf16>
    tpu.vector_store %arg4[%c0_5, %c0_6], %10 {strides = array<i32>} : memref<16x512xbf16, #tpu.memory_space<vmem>>, vector<16x512xbf16>,
    return
  }
  func.func @transform_0(%arg0: i32) -> (i32, i32) {
    %c0_i32 = arith.constant 0 : i32
    %c0_i32_0 = arith.constant 0 : i32
    return %arg0, %c0_i32 : i32, i32
  }
  func.func @transform_1(%arg0: i32) -> (i32, i32) {
    %c0_i32 = arith.constant 0 : i32
    %c0_i32_0 = arith.constant 0 : i32
    %c0_i32_1 = arith.constant 0 : i32
    return %c0_i32, %c0_i32_0 : i32, i32
  }
  func.func @transform_2(%arg0: i32) -> (i32, i32) {
    %c0_i32 = arith.constant 0 : i32
    %c0_i32_0 = arith.constant 0 : i32
    %c0_i32_1 = arith.constant 0 : i32
    return %c0_i32, %c0_i32_0 : i32, i32
  }
  func.func @transform_3(%arg0: i32) -> (i32, i32) {
    %c0_i32 = arith.constant 0 : i32
    %c0_i32_0 = arith.constant 0 : i32
    return %arg0, %c0_i32 : i32, i32
  }
}

module attributes {stable_mosaic.version = 11 : i64} {
  func.func @_mm_bn_kernel(%arg0: i32, %arg1: i32, %arg2: i32, %arg3: memref<16x256xbf16, #tpu.memory_space<vmem>>, %arg4: memref<256x512xbf16, #tpu.memory_space<vmem>>, %arg5: memref<16x512xbf16, #tpu.memory_space<vmem>>, %arg6: memref<1x8x512xf32, #tpu.memory_space<vmem>>, %arg7: memref<16x512xf32, #tpu.memory_space<vmem>>) attributes {dimension_semantics = [#tpu.dimension_semantics<parallel>, #tpu.dimension_semantics<parallel>, #tpu.dimension_semantics<arbitrary>], iteration_bounds = array<i64: 1, 1, 18>, scalar_prefetch = 0 : i64, scratch_operands = 1 : i64, tpu.core_type = #tpu.core_type<tc>, window_params = [{transform_indices = @transform_0, window_bounds = array<i64: 16, 256>}, {transform_indices = @transform_1, window_bounds = array<i64: 256, 512>}, {transform_indices = @transform_2, window_bounds = array<i64: 16, 512>}, {transform_indices = @transform_3, window_bounds = array<i64: 1, 8, 512>}]} {
    %c0_i32 = arith.constant 0 : i32
    %0 = arith.cmpi eq, %arg2, %c0_i32 : i32
    %1 = arith.extui %0 : i1 to i32
    %c0_i32_0 = arith.constant 0 : i32
    %2 = arith.cmpi ne, %1, %c0_i32_0 : i32
    scf.if %2 {
      %cst_9 = arith.constant 0.000000e+00 : f32
      %12 = vector.broadcast %cst_9 : f32 to vector<16x512xf32>
      %c0_10 = arith.constant 0 : index
      %c0_11 = arith.constant 0 : index
      %13 = vector.load %arg7[%c0_10, %c0_11] : memref<16x512xf32, #tpu.memory_space<vmem>>, vector<16x512xf32>
      tpu.vector_store %arg7[%c0_10, %c0_11], %12 {strides = array<i32>} : memref<16x512xf32, #tpu.memory_space<vmem>>, vector<16x512xf32>,
    } else {
    }
    %c0 = arith.constant 0 : index
    %c0_1 = arith.constant 0 : index
    %3 = vector.load %arg7[%c0, %c0_1] : memref<16x512xf32, #tpu.memory_space<vmem>>, vector<16x512xf32>
    %c0_2 = arith.constant 0 : index
    %c0_3 = arith.constant 0 : index
    %4 = vector.load %arg3[%c0_2, %c0_3] : memref<16x256xbf16, #tpu.memory_space<vmem>>, vector<16x256xbf16>
    %c0_4 = arith.constant 0 : index
    %c0_5 = arith.constant 0 : index
    %5 = vector.load %arg4[%c0_4, %c0_5] : memref<256x512xbf16, #tpu.memory_space<vmem>>, vector<256x512xbf16>
    %cst = arith.constant dense<0.000000e+00> : vector<16x512xf32>
    %6 = tpu.matmul %4, %5, %cst {dimension_numbers = #tpu.dot_dimension_numbers<[1], [0], [0], [1], [0, 0, 1, 1], [], []>} : vector<16x256xbf16>, vector<256x512xbf16>, vector<16x512xf32> -> vector<16x512xf32>
    %7 = arith.addf %3, %6 : vector<16x512xf32>
    %c0_6 = arith.constant 0 : index
    %c0_7 = arith.constant 0 : index
    %8 = vector.load %arg7[%c0_6, %c0_7] : memref<16x512xf32, #tpu.memory_space<vmem>>, vector<16x512xf32>
    tpu.vector_store %arg7[%c0_6, %c0_7], %7 {strides = array<i32>} : memref<16x512xf32, #tpu.memory_space<vmem>>, vector<16x512xf32>,
    %c17_i32 = arith.constant 17 : i32
    %9 = arith.cmpi eq, %arg2, %c17_i32 : i32
    %10 = arith.extui %9 : i1 to i32
    %c0_i32_8 = arith.constant 0 : i32
    %11 = arith.cmpi ne, %10, %c0_i32_8 : i32
    scf.if %11 {
      %c0_9 = arith.constant 0 : index
      %c0_10 = arith.constant 0 : index
      %12 = vector.load %arg7[%c0_9, %c0_10] : memref<16x512xf32, #tpu.memory_space<vmem>>, vector<16x512xf32>
      %13 = arith.truncf %12 : vector<16x512xf32> to vector<16x512xbf16>
      %c0_11 = arith.constant 0 : index
      %c0_12 = arith.constant 0 : index
      %14 = vector.load %arg5[%c0_11, %c0_12] : memref<16x512xbf16, #tpu.memory_space<vmem>>, vector<16x512xbf16>
      tpu.vector_store %arg5[%c0_11, %c0_12], %13 {strides = array<i32>} : memref<16x512xbf16, #tpu.memory_space<vmem>>, vector<16x512xbf16>,
      %cst_13 = arith.constant dense<0.000000e+00> : vector<512xf32>
      %15 = vector.multi_reduction <add>, %12, %cst_13 [0] : vector<16x512xf32> to vector<512xf32>
      %16 = vector.shape_cast %15 : vector<512xf32> to vector<1x512xf32>
      %17 = arith.mulf %12, %12 : vector<16x512xf32>
      %cst_14 = arith.constant dense<0.000000e+00> : vector<512xf32>
      %18 = vector.multi_reduction <add>, %17, %cst_14 [0] : vector<16x512xf32> to vector<512xf32>
      %19 = vector.shape_cast %18 : vector<512xf32> to vector<1x512xf32>
      %cst_15 = arith.constant 0.000000e+00 : f32
      %20 = vector.broadcast %cst_15 : f32 to vector<6x512xf32>
      %21 = tpu.concatenate %16, %19, %20 in 0 : vector<1x512xf32>, vector<1x512xf32>, vector<6x512xf32> -> vector<8x512xf32>
      %c0_16 = arith.constant 0 : index
      %c0_17 = arith.constant 0 : index
      %c0_18 = arith.constant 0 : index
      %22 = vector.load %arg6[%c0_16, %c0_17, %c0_18] : memref<1x8x512xf32, #tpu.memory_space<vmem>>, vector<1x8x512xf32>
      %23 = vector.shape_cast %22 : vector<1x8x512xf32> to vector<8x512xf32>
      %24 = vector.shape_cast %21 : vector<8x512xf32> to vector<1x8x512xf32>
      tpu.vector_store %arg6[%c0_16, %c0_17, %c0_18], %24 {strides = array<i32>} : memref<1x8x512xf32, #tpu.memory_space<vmem>>, vector<1x8x512xf32>,
    } else {
    }
    return
  }
  func.func @transform_0(%arg0: i32, %arg1: i32, %arg2: i32) -> (i32, i32) {
    %c0_i32 = arith.constant 0 : i32
    return %arg0, %arg2 : i32, i32
  }
  func.func @transform_1(%arg0: i32, %arg1: i32, %arg2: i32) -> (i32, i32) {
    %c0_i32 = arith.constant 0 : i32
    return %arg2, %arg1 : i32, i32
  }
  func.func @transform_2(%arg0: i32, %arg1: i32, %arg2: i32) -> (i32, i32) {
    %c0_i32 = arith.constant 0 : i32
    return %arg0, %arg1 : i32, i32
  }
  func.func @transform_3(%arg0: i32, %arg1: i32, %arg2: i32) -> (i32, i32, i32) {
    %c0_i32 = arith.constant 0 : i32
    %c0_i32_0 = arith.constant 0 : i32
    return %arg0, %c0_i32, %arg1 : i32, i32, i32
  }
}

module attributes {stable_mosaic.version = 11 : i64} {
  func.func @_mm_bn_kernel(%arg0: i32, %arg1: i32, %arg2: i32, %arg3: memref<32x256xbf16, #tpu.memory_space<vmem>>, %arg4: memref<256x512xbf16, #tpu.memory_space<vmem>>, %arg5: memref<32x512xbf16, #tpu.memory_space<vmem>>, %arg6: memref<1x8x512xf32, #tpu.memory_space<vmem>>, %arg7: memref<32x512xf32, #tpu.memory_space<vmem>>) attributes {dimension_semantics = [#tpu.dimension_semantics<parallel>, #tpu.dimension_semantics<parallel>, #tpu.dimension_semantics<arbitrary>], iteration_bounds = array<i64: 1, 1, 18>, scalar_prefetch = 0 : i64, scratch_operands = 1 : i64, tpu.core_type = #tpu.core_type<tc>, window_params = [{transform_indices = @transform_0, window_bounds = array<i64: 32, 256>}, {transform_indices = @transform_1, window_bounds = array<i64: 256, 512>}, {transform_indices = @transform_2, window_bounds = array<i64: 32, 512>}, {transform_indices = @transform_3, window_bounds = array<i64: 1, 8, 512>}]} {
    %c0_i32 = arith.constant 0 : i32
    %0 = arith.cmpi eq, %arg2, %c0_i32 : i32
    %1 = arith.extui %0 : i1 to i32
    %c0_i32_0 = arith.constant 0 : i32
    %2 = arith.cmpi ne, %1, %c0_i32_0 : i32
    scf.if %2 {
      %cst_9 = arith.constant 0.000000e+00 : f32
      %12 = vector.broadcast %cst_9 : f32 to vector<32x512xf32>
      %c0_10 = arith.constant 0 : index
      %c0_11 = arith.constant 0 : index
      %13 = vector.load %arg7[%c0_10, %c0_11] : memref<32x512xf32, #tpu.memory_space<vmem>>, vector<32x512xf32>
      tpu.vector_store %arg7[%c0_10, %c0_11], %12 {strides = array<i32>} : memref<32x512xf32, #tpu.memory_space<vmem>>, vector<32x512xf32>,
    } else {
    }
    %c0 = arith.constant 0 : index
    %c0_1 = arith.constant 0 : index
    %3 = vector.load %arg7[%c0, %c0_1] : memref<32x512xf32, #tpu.memory_space<vmem>>, vector<32x512xf32>
    %c0_2 = arith.constant 0 : index
    %c0_3 = arith.constant 0 : index
    %4 = vector.load %arg3[%c0_2, %c0_3] : memref<32x256xbf16, #tpu.memory_space<vmem>>, vector<32x256xbf16>
    %c0_4 = arith.constant 0 : index
    %c0_5 = arith.constant 0 : index
    %5 = vector.load %arg4[%c0_4, %c0_5] : memref<256x512xbf16, #tpu.memory_space<vmem>>, vector<256x512xbf16>
    %cst = arith.constant dense<0.000000e+00> : vector<32x512xf32>
    %6 = tpu.matmul %4, %5, %cst {dimension_numbers = #tpu.dot_dimension_numbers<[1], [0], [0], [1], [0, 0, 1, 1], [], []>} : vector<32x256xbf16>, vector<256x512xbf16>, vector<32x512xf32> -> vector<32x512xf32>
    %7 = arith.addf %3, %6 : vector<32x512xf32>
    %c0_6 = arith.constant 0 : index
    %c0_7 = arith.constant 0 : index
    %8 = vector.load %arg7[%c0_6, %c0_7] : memref<32x512xf32, #tpu.memory_space<vmem>>, vector<32x512xf32>
    tpu.vector_store %arg7[%c0_6, %c0_7], %7 {strides = array<i32>} : memref<32x512xf32, #tpu.memory_space<vmem>>, vector<32x512xf32>,
    %c17_i32 = arith.constant 17 : i32
    %9 = arith.cmpi eq, %arg2, %c17_i32 : i32
    %10 = arith.extui %9 : i1 to i32
    %c0_i32_8 = arith.constant 0 : i32
    %11 = arith.cmpi ne, %10, %c0_i32_8 : i32
    scf.if %11 {
      %c0_9 = arith.constant 0 : index
      %c0_10 = arith.constant 0 : index
      %12 = vector.load %arg7[%c0_9, %c0_10] : memref<32x512xf32, #tpu.memory_space<vmem>>, vector<32x512xf32>
      %13 = arith.truncf %12 : vector<32x512xf32> to vector<32x512xbf16>
      %c0_11 = arith.constant 0 : index
      %c0_12 = arith.constant 0 : index
      %14 = vector.load %arg5[%c0_11, %c0_12] : memref<32x512xbf16, #tpu.memory_space<vmem>>, vector<32x512xbf16>
      tpu.vector_store %arg5[%c0_11, %c0_12], %13 {strides = array<i32>} : memref<32x512xbf16, #tpu.memory_space<vmem>>, vector<32x512xbf16>,
      %cst_13 = arith.constant dense<0.000000e+00> : vector<512xf32>
      %15 = vector.multi_reduction <add>, %12, %cst_13 [0] : vector<32x512xf32> to vector<512xf32>
      %16 = vector.shape_cast %15 : vector<512xf32> to vector<1x512xf32>
      %17 = arith.mulf %12, %12 : vector<32x512xf32>
      %cst_14 = arith.constant dense<0.000000e+00> : vector<512xf32>
      %18 = vector.multi_reduction <add>, %17, %cst_14 [0] : vector<32x512xf32> to vector<512xf32>
      %19 = vector.shape_cast %18 : vector<512xf32> to vector<1x512xf32>
      %cst_15 = arith.constant 0.000000e+00 : f32
      %20 = vector.broadcast %cst_15 : f32 to vector<6x512xf32>
      %21 = tpu.concatenate %16, %19, %20 in 0 : vector<1x512xf32>, vector<1x512xf32>, vector<6x512xf32> -> vector<8x512xf32>
      %c0_16 = arith.constant 0 : index
      %c0_17 = arith.constant 0 : index
      %c0_18 = arith.constant 0 : index
      %22 = vector.load %arg6[%c0_16, %c0_17, %c0_18] : memref<1x8x512xf32, #tpu.memory_space<vmem>>, vector<1x8x512xf32>
      %23 = vector.shape_cast %22 : vector<1x8x512xf32> to vector<8x512xf32>
      %24 = vector.shape_cast %21 : vector<8x512xf32> to vector<1x8x512xf32>
      tpu.vector_store %arg6[%c0_16, %c0_17, %c0_18], %24 {strides = array<i32>} : memref<1x8x512xf32, #tpu.memory_space<vmem>>, vector<1x8x512xf32>,
    } else {
    }
    return
  }
  func.func @transform_0(%arg0: i32, %arg1: i32, %arg2: i32) -> (i32, i32) {
    %c0_i32 = arith.constant 0 : i32
    return %arg0, %arg2 : i32, i32
  }
  func.func @transform_1(%arg0: i32, %arg1: i32, %arg2: i32) -> (i32, i32) {
    %c0_i32 = arith.constant 0 : i32
    return %arg2, %arg1 : i32, i32
  }
  func.func @transform_2(%arg0: i32, %arg1: i32, %arg2: i32) -> (i32, i32) {
    %c0_i32 = arith.constant 0 : i32
    return %arg0, %arg1 : i32, i32
  }
  func.func @transform_3(%arg0: i32, %arg1: i32, %arg2: i32) -> (i32, i32, i32) {
    %c0_i32 = arith.constant 0 : i32
    %c0_i32_0 = arith.constant 0 : i32
    return %arg0, %c0_i32, %arg1 : i32, i32, i32
  }
}

module attributes {stable_mosaic.version = 11 : i64} {
  func.func @_scale_shift_act_kernel(%arg0: i32, %arg1: memref<32x512xbf16, #tpu.memory_space<vmem>>, %arg2: memref<1x512xf32, #tpu.memory_space<vmem>>, %arg3: memref<1x512xf32, #tpu.memory_space<vmem>>, %arg4: memref<32x512xbf16, #tpu.memory_space<vmem>>) attributes {dimension_semantics = [#tpu.dimension_semantics<parallel>], iteration_bounds = array<i64: 1>, scalar_prefetch = 0 : i64, scratch_operands = 0 : i64, tpu.core_type = #tpu.core_type<tc>, window_params = [{transform_indices = @transform_0, window_bounds = array<i64: 32, 512>}, {pipeline_mode = #tpu.pipeline_mode<synchronous>, transform_indices = @transform_1, window_bounds = array<i64: 1, 512>}, {pipeline_mode = #tpu.pipeline_mode<synchronous>, transform_indices = @transform_2, window_bounds = array<i64: 1, 512>}, {transform_indices = @transform_3, window_bounds = array<i64: 32, 512>}]} {
    %c0 = arith.constant 0 : index
    %c0_0 = arith.constant 0 : index
    %0 = vector.load %arg1[%c0, %c0_0] : memref<32x512xbf16, #tpu.memory_space<vmem>>, vector<32x512xbf16>
    %1 = arith.extf %0 : vector<32x512xbf16> to vector<32x512xf32>
    %c0_1 = arith.constant 0 : index
    %c0_2 = arith.constant 0 : index
    %2 = vector.load %arg2[%c0_1, %c0_2] : memref<1x512xf32, #tpu.memory_space<vmem>>, vector<1x512xf32>
    %3 = vector.broadcast %2 : vector<1x512xf32> to vector<32x512xf32>
    %4 = arith.mulf %1, %3 : vector<32x512xf32>
    %c0_3 = arith.constant 0 : index
    %c0_4 = arith.constant 0 : index
    %5 = vector.load %arg3[%c0_3, %c0_4] : memref<1x512xf32, #tpu.memory_space<vmem>>, vector<1x512xf32>
    %6 = vector.broadcast %5 : vector<1x512xf32> to vector<32x512xf32>
    %7 = arith.addf %4, %6 : vector<32x512xf32>
    %cst = arith.constant 0.000000e+00 : f32
    %8 = vector.broadcast %cst : f32 to vector<32x512xf32>
    %9 = arith.maximumf %7, %8 : vector<32x512xf32>
    %10 = arith.truncf %9 : vector<32x512xf32> to vector<32x512xbf16>
    %c0_5 = arith.constant 0 : index
    %c0_6 = arith.constant 0 : index
    %11 = vector.load %arg4[%c0_5, %c0_6] : memref<32x512xbf16, #tpu.memory_space<vmem>>, vector<32x512xbf16>
    tpu.vector_store %arg4[%c0_5, %c0_6], %10 {strides = array<i32>} : memref<32x512xbf16, #tpu.memory_space<vmem>>, vector<32x512xbf16>,
    return
  }
  func.func @transform_0(%arg0: i32) -> (i32, i32) {
    %c0_i32 = arith.constant 0 : i32
    %c0_i32_0 = arith.constant 0 : i32
    return %arg0, %c0_i32 : i32, i32
  }
  func.func @transform_1(%arg0: i32) -> (i32, i32) {
    %c0_i32 = arith.constant 0 : i32
    %c0_i32_0 = arith.constant 0 : i32
    %c0_i32_1 = arith.constant 0 : i32
    return %c0_i32, %c0_i32_0 : i32, i32
  }
  func.func @transform_2(%arg0: i32) -> (i32, i32) {
    %c0_i32 = arith.constant 0 : i32
    %c0_i32_0 = arith.constant 0 : i32
    %c0_i32_1 = arith.constant 0 : i32
    return %c0_i32, %c0_i32_0 : i32, i32
  }
  func.func @transform_3(%arg0: i32) -> (i32, i32) {
    %c0_i32 = arith.constant 0 : i32
    %c0_i32_0 = arith.constant 0 : i32
    return %arg0, %c0_i32 : i32, i32
  }
}

module attributes {stable_mosaic.version = 11 : i64} {
  func.func @_mm_bn_kernel(%arg0: i32, %arg1: i32, %arg2: i32, %arg3: memref<16x256xbf16, #tpu.memory_space<vmem>>, %arg4: memref<256x512xbf16, #tpu.memory_space<vmem>>, %arg5: memref<16x512xbf16, #tpu.memory_space<vmem>>, %arg6: memref<1x8x512xf32, #tpu.memory_space<vmem>>, %arg7: memref<16x512xf32, #tpu.memory_space<vmem>>) attributes {dimension_semantics = [#tpu.dimension_semantics<parallel>, #tpu.dimension_semantics<parallel>, #tpu.dimension_semantics<arbitrary>], iteration_bounds = array<i64: 1, 1, 36>, scalar_prefetch = 0 : i64, scratch_operands = 1 : i64, tpu.core_type = #tpu.core_type<tc>, window_params = [{transform_indices = @transform_0, window_bounds = array<i64: 16, 256>}, {transform_indices = @transform_1, window_bounds = array<i64: 256, 512>}, {transform_indices = @transform_2, window_bounds = array<i64: 16, 512>}, {transform_indices = @transform_3, window_bounds = array<i64: 1, 8, 512>}]} {
    %c0_i32 = arith.constant 0 : i32
    %0 = arith.cmpi eq, %arg2, %c0_i32 : i32
    %1 = arith.extui %0 : i1 to i32
    %c0_i32_0 = arith.constant 0 : i32
    %2 = arith.cmpi ne, %1, %c0_i32_0 : i32
    scf.if %2 {
      %cst_9 = arith.constant 0.000000e+00 : f32
      %12 = vector.broadcast %cst_9 : f32 to vector<16x512xf32>
      %c0_10 = arith.constant 0 : index
      %c0_11 = arith.constant 0 : index
      %13 = vector.load %arg7[%c0_10, %c0_11] : memref<16x512xf32, #tpu.memory_space<vmem>>, vector<16x512xf32>
      tpu.vector_store %arg7[%c0_10, %c0_11], %12 {strides = array<i32>} : memref<16x512xf32, #tpu.memory_space<vmem>>, vector<16x512xf32>,
    } else {
    }
    %c0 = arith.constant 0 : index
    %c0_1 = arith.constant 0 : index
    %3 = vector.load %arg7[%c0, %c0_1] : memref<16x512xf32, #tpu.memory_space<vmem>>, vector<16x512xf32>
    %c0_2 = arith.constant 0 : index
    %c0_3 = arith.constant 0 : index
    %4 = vector.load %arg3[%c0_2, %c0_3] : memref<16x256xbf16, #tpu.memory_space<vmem>>, vector<16x256xbf16>
    %c0_4 = arith.constant 0 : index
    %c0_5 = arith.constant 0 : index
    %5 = vector.load %arg4[%c0_4, %c0_5] : memref<256x512xbf16, #tpu.memory_space<vmem>>, vector<256x512xbf16>
    %cst = arith.constant dense<0.000000e+00> : vector<16x512xf32>
    %6 = tpu.matmul %4, %5, %cst {dimension_numbers = #tpu.dot_dimension_numbers<[1], [0], [0], [1], [0, 0, 1, 1], [], []>} : vector<16x256xbf16>, vector<256x512xbf16>, vector<16x512xf32> -> vector<16x512xf32>
    %7 = arith.addf %3, %6 : vector<16x512xf32>
    %c0_6 = arith.constant 0 : index
    %c0_7 = arith.constant 0 : index
    %8 = vector.load %arg7[%c0_6, %c0_7] : memref<16x512xf32, #tpu.memory_space<vmem>>, vector<16x512xf32>
    tpu.vector_store %arg7[%c0_6, %c0_7], %7 {strides = array<i32>} : memref<16x512xf32, #tpu.memory_space<vmem>>, vector<16x512xf32>,
    %c35_i32 = arith.constant 35 : i32
    %9 = arith.cmpi eq, %arg2, %c35_i32 : i32
    %10 = arith.extui %9 : i1 to i32
    %c0_i32_8 = arith.constant 0 : i32
    %11 = arith.cmpi ne, %10, %c0_i32_8 : i32
    scf.if %11 {
      %c0_9 = arith.constant 0 : index
      %c0_10 = arith.constant 0 : index
      %12 = vector.load %arg7[%c0_9, %c0_10] : memref<16x512xf32, #tpu.memory_space<vmem>>, vector<16x512xf32>
      %13 = arith.truncf %12 : vector<16x512xf32> to vector<16x512xbf16>
      %c0_11 = arith.constant 0 : index
      %c0_12 = arith.constant 0 : index
      %14 = vector.load %arg5[%c0_11, %c0_12] : memref<16x512xbf16, #tpu.memory_space<vmem>>, vector<16x512xbf16>
      tpu.vector_store %arg5[%c0_11, %c0_12], %13 {strides = array<i32>} : memref<16x512xbf16, #tpu.memory_space<vmem>>, vector<16x512xbf16>,
      %cst_13 = arith.constant dense<0.000000e+00> : vector<512xf32>
      %15 = vector.multi_reduction <add>, %12, %cst_13 [0] : vector<16x512xf32> to vector<512xf32>
      %16 = vector.shape_cast %15 : vector<512xf32> to vector<1x512xf32>
      %17 = arith.mulf %12, %12 : vector<16x512xf32>
      %cst_14 = arith.constant dense<0.000000e+00> : vector<512xf32>
      %18 = vector.multi_reduction <add>, %17, %cst_14 [0] : vector<16x512xf32> to vector<512xf32>
      %19 = vector.shape_cast %18 : vector<512xf32> to vector<1x512xf32>
      %cst_15 = arith.constant 0.000000e+00 : f32
      %20 = vector.broadcast %cst_15 : f32 to vector<6x512xf32>
      %21 = tpu.concatenate %16, %19, %20 in 0 : vector<1x512xf32>, vector<1x512xf32>, vector<6x512xf32> -> vector<8x512xf32>
      %c0_16 = arith.constant 0 : index
      %c0_17 = arith.constant 0 : index
      %c0_18 = arith.constant 0 : index
      %22 = vector.load %arg6[%c0_16, %c0_17, %c0_18] : memref<1x8x512xf32, #tpu.memory_space<vmem>>, vector<1x8x512xf32>
      %23 = vector.shape_cast %22 : vector<1x8x512xf32> to vector<8x512xf32>
      %24 = vector.shape_cast %21 : vector<8x512xf32> to vector<1x8x512xf32>
      tpu.vector_store %arg6[%c0_16, %c0_17, %c0_18], %24 {strides = array<i32>} : memref<1x8x512xf32, #tpu.memory_space<vmem>>, vector<1x8x512xf32>,
    } else {
    }
    return
  }
  func.func @transform_0(%arg0: i32, %arg1: i32, %arg2: i32) -> (i32, i32) {
    %c0_i32 = arith.constant 0 : i32
    return %arg0, %arg2 : i32, i32
  }
  func.func @transform_1(%arg0: i32, %arg1: i32, %arg2: i32) -> (i32, i32) {
    %c0_i32 = arith.constant 0 : i32
    return %arg2, %arg1 : i32, i32
  }
  func.func @transform_2(%arg0: i32, %arg1: i32, %arg2: i32) -> (i32, i32) {
    %c0_i32 = arith.constant 0 : i32
    return %arg0, %arg1 : i32, i32
  }
  func.func @transform_3(%arg0: i32, %arg1: i32, %arg2: i32) -> (i32, i32, i32) {
    %c0_i32 = arith.constant 0 : i32
    %c0_i32_0 = arith.constant 0 : i32
    return %arg0, %c0_i32, %arg1 : i32, i32, i32
  }
}

module attributes {stable_mosaic.version = 11 : i64} {
  func.func @_scale_shift_act_kernel(%arg0: i32, %arg1: memref<16x512xbf16, #tpu.memory_space<vmem>>, %arg2: memref<1x512xf32, #tpu.memory_space<vmem>>, %arg3: memref<1x512xf32, #tpu.memory_space<vmem>>, %arg4: memref<16x512xbf16, #tpu.memory_space<vmem>>) attributes {dimension_semantics = [#tpu.dimension_semantics<parallel>], iteration_bounds = array<i64: 1>, scalar_prefetch = 0 : i64, scratch_operands = 0 : i64, tpu.core_type = #tpu.core_type<tc>, window_params = [{transform_indices = @transform_0, window_bounds = array<i64: 16, 512>}, {pipeline_mode = #tpu.pipeline_mode<synchronous>, transform_indices = @transform_1, window_bounds = array<i64: 1, 512>}, {pipeline_mode = #tpu.pipeline_mode<synchronous>, transform_indices = @transform_2, window_bounds = array<i64: 1, 512>}, {transform_indices = @transform_3, window_bounds = array<i64: 16, 512>}]} {
    %c0 = arith.constant 0 : index
    %c0_0 = arith.constant 0 : index
    %0 = vector.load %arg1[%c0, %c0_0] : memref<16x512xbf16, #tpu.memory_space<vmem>>, vector<16x512xbf16>
    %1 = arith.extf %0 : vector<16x512xbf16> to vector<16x512xf32>
    %c0_1 = arith.constant 0 : index
    %c0_2 = arith.constant 0 : index
    %2 = vector.load %arg2[%c0_1, %c0_2] : memref<1x512xf32, #tpu.memory_space<vmem>>, vector<1x512xf32>
    %3 = vector.broadcast %2 : vector<1x512xf32> to vector<16x512xf32>
    %4 = arith.mulf %1, %3 : vector<16x512xf32>
    %c0_3 = arith.constant 0 : index
    %c0_4 = arith.constant 0 : index
    %5 = vector.load %arg3[%c0_3, %c0_4] : memref<1x512xf32, #tpu.memory_space<vmem>>, vector<1x512xf32>
    %6 = vector.broadcast %5 : vector<1x512xf32> to vector<16x512xf32>
    %7 = arith.addf %4, %6 : vector<16x512xf32>
    %cst = arith.constant 0.000000e+00 : f32
    %8 = vector.broadcast %cst : f32 to vector<16x512xf32>
    %9 = arith.cmpf ogt, %7, %8 : vector<16x512xf32>
    %cst_5 = arith.constant 2.000000e-01 : f32
    %10 = vector.broadcast %cst_5 : f32 to vector<16x512xf32>
    %11 = arith.mulf %10, %7 : vector<16x512xf32>
    %12 = arith.select %9, %7, %11 : vector<16x512xi1>, vector<16x512xf32>
    %13 = arith.truncf %12 : vector<16x512xf32> to vector<16x512xbf16>
    %c0_6 = arith.constant 0 : index
    %c0_7 = arith.constant 0 : index
    %14 = vector.load %arg4[%c0_6, %c0_7] : memref<16x512xbf16, #tpu.memory_space<vmem>>, vector<16x512xbf16>
    tpu.vector_store %arg4[%c0_6, %c0_7], %13 {strides = array<i32>} : memref<16x512xbf16, #tpu.memory_space<vmem>>, vector<16x512xbf16>,
    return
  }
  func.func @transform_0(%arg0: i32) -> (i32, i32) {
    %c0_i32 = arith.constant 0 : i32
    %c0_i32_0 = arith.constant 0 : i32
    return %arg0, %c0_i32 : i32, i32
  }
  func.func @transform_1(%arg0: i32) -> (i32, i32) {
    %c0_i32 = arith.constant 0 : i32
    %c0_i32_0 = arith.constant 0 : i32
    %c0_i32_1 = arith.constant 0 : i32
    return %c0_i32, %c0_i32_0 : i32, i32
  }
  func.func @transform_2(%arg0: i32) -> (i32, i32) {
    %c0_i32 = arith.constant 0 : i32
    %c0_i32_0 = arith.constant 0 : i32
    %c0_i32_1 = arith.constant 0 : i32
    return %c0_i32, %c0_i32_0 : i32, i32
  }
  func.func @transform_3(%arg0: i32) -> (i32, i32) {
    %c0_i32 = arith.constant 0 : i32
    %c0_i32_0 = arith.constant 0 : i32
    return %arg0, %c0_i32 : i32, i32
  }
}

module attributes {stable_mosaic.version = 11 : i64} {
  func.func @_mm_bn_kernel(%arg0: i32, %arg1: i32, %arg2: i32, %arg3: memref<16x256xbf16, #tpu.memory_space<vmem>>, %arg4: memref<256x256xbf16, #tpu.memory_space<vmem>>, %arg5: memref<16x256xbf16, #tpu.memory_space<vmem>>, %arg6: memref<1x8x256xf32, #tpu.memory_space<vmem>>, %arg7: memref<16x256xf32, #tpu.memory_space<vmem>>) attributes {dimension_semantics = [#tpu.dimension_semantics<parallel>, #tpu.dimension_semantics<parallel>, #tpu.dimension_semantics<arbitrary>], iteration_bounds = array<i64: 1, 1, 27>, scalar_prefetch = 0 : i64, scratch_operands = 1 : i64, tpu.core_type = #tpu.core_type<tc>, window_params = [{transform_indices = @transform_0, window_bounds = array<i64: 16, 256>}, {transform_indices = @transform_1, window_bounds = array<i64: 256, 256>}, {transform_indices = @transform_2, window_bounds = array<i64: 16, 256>}, {transform_indices = @transform_3, window_bounds = array<i64: 1, 8, 256>}]} {
    %c0_i32 = arith.constant 0 : i32
    %0 = arith.cmpi eq, %arg2, %c0_i32 : i32
    %1 = arith.extui %0 : i1 to i32
    %c0_i32_0 = arith.constant 0 : i32
    %2 = arith.cmpi ne, %1, %c0_i32_0 : i32
    scf.if %2 {
      %cst_9 = arith.constant 0.000000e+00 : f32
      %12 = vector.broadcast %cst_9 : f32 to vector<16x256xf32>
      %c0_10 = arith.constant 0 : index
      %c0_11 = arith.constant 0 : index
      %13 = vector.load %arg7[%c0_10, %c0_11] : memref<16x256xf32, #tpu.memory_space<vmem>>, vector<16x256xf32>
      tpu.vector_store %arg7[%c0_10, %c0_11], %12 {strides = array<i32>} : memref<16x256xf32, #tpu.memory_space<vmem>>, vector<16x256xf32>,
    } else {
    }
    %c0 = arith.constant 0 : index
    %c0_1 = arith.constant 0 : index
    %3 = vector.load %arg7[%c0, %c0_1] : memref<16x256xf32, #tpu.memory_space<vmem>>, vector<16x256xf32>
    %c0_2 = arith.constant 0 : index
    %c0_3 = arith.constant 0 : index
    %4 = vector.load %arg3[%c0_2, %c0_3] : memref<16x256xbf16, #tpu.memory_space<vmem>>, vector<16x256xbf16>
    %c0_4 = arith.constant 0 : index
    %c0_5 = arith.constant 0 : index
    %5 = vector.load %arg4[%c0_4, %c0_5] : memref<256x256xbf16, #tpu.memory_space<vmem>>, vector<256x256xbf16>
    %cst = arith.constant dense<0.000000e+00> : vector<16x256xf32>
    %6 = tpu.matmul %4, %5, %cst {dimension_numbers = #tpu.dot_dimension_numbers<[1], [0], [0], [1], [0, 0, 1, 1], [], []>} : vector<16x256xbf16>, vector<256x256xbf16>, vector<16x256xf32> -> vector<16x256xf32>
    %7 = arith.addf %3, %6 : vector<16x256xf32>
    %c0_6 = arith.constant 0 : index
    %c0_7 = arith.constant 0 : index
    %8 = vector.load %arg7[%c0_6, %c0_7] : memref<16x256xf32, #tpu.memory_space<vmem>>, vector<16x256xf32>
    tpu.vector_store %arg7[%c0_6, %c0_7], %7 {strides = array<i32>} : memref<16x256xf32, #tpu.memory_space<vmem>>, vector<16x256xf32>,
    %c26_i32 = arith.constant 26 : i32
    %9 = arith.cmpi eq, %arg2, %c26_i32 : i32
    %10 = arith.extui %9 : i1 to i32
    %c0_i32_8 = arith.constant 0 : i32
    %11 = arith.cmpi ne, %10, %c0_i32_8 : i32
    scf.if %11 {
      %c0_9 = arith.constant 0 : index
      %c0_10 = arith.constant 0 : index
      %12 = vector.load %arg7[%c0_9, %c0_10] : memref<16x256xf32, #tpu.memory_space<vmem>>, vector<16x256xf32>
      %13 = arith.truncf %12 : vector<16x256xf32> to vector<16x256xbf16>
      %c0_11 = arith.constant 0 : index
      %c0_12 = arith.constant 0 : index
      %14 = vector.load %arg5[%c0_11, %c0_12] : memref<16x256xbf16, #tpu.memory_space<vmem>>, vector<16x256xbf16>
      tpu.vector_store %arg5[%c0_11, %c0_12], %13 {strides = array<i32>} : memref<16x256xbf16, #tpu.memory_space<vmem>>, vector<16x256xbf16>,
      %cst_13 = arith.constant dense<0.000000e+00> : vector<256xf32>
      %15 = vector.multi_reduction <add>, %12, %cst_13 [0] : vector<16x256xf32> to vector<256xf32>
      %16 = vector.shape_cast %15 : vector<256xf32> to vector<1x256xf32>
      %17 = arith.mulf %12, %12 : vector<16x256xf32>
      %cst_14 = arith.constant dense<0.000000e+00> : vector<256xf32>
      %18 = vector.multi_reduction <add>, %17, %cst_14 [0] : vector<16x256xf32> to vector<256xf32>
      %19 = vector.shape_cast %18 : vector<256xf32> to vector<1x256xf32>
      %cst_15 = arith.constant 0.000000e+00 : f32
      %20 = vector.broadcast %cst_15 : f32 to vector<6x256xf32>
      %21 = tpu.concatenate %16, %19, %20 in 0 : vector<1x256xf32>, vector<1x256xf32>, vector<6x256xf32> -> vector<8x256xf32>
      %c0_16 = arith.constant 0 : index
      %c0_17 = arith.constant 0 : index
      %c0_18 = arith.constant 0 : index
      %22 = vector.load %arg6[%c0_16, %c0_17, %c0_18] : memref<1x8x256xf32, #tpu.memory_space<vmem>>, vector<1x8x256xf32>
      %23 = vector.shape_cast %22 : vector<1x8x256xf32> to vector<8x256xf32>
      %24 = vector.shape_cast %21 : vector<8x256xf32> to vector<1x8x256xf32>
      tpu.vector_store %arg6[%c0_16, %c0_17, %c0_18], %24 {strides = array<i32>} : memref<1x8x256xf32, #tpu.memory_space<vmem>>, vector<1x8x256xf32>,
    } else {
    }
    return
  }
  func.func @transform_0(%arg0: i32, %arg1: i32, %arg2: i32) -> (i32, i32) {
    %c0_i32 = arith.constant 0 : i32
    return %arg0, %arg2 : i32, i32
  }
  func.func @transform_1(%arg0: i32, %arg1: i32, %arg2: i32) -> (i32, i32) {
    %c0_i32 = arith.constant 0 : i32
    return %arg2, %arg1 : i32, i32
  }
  func.func @transform_2(%arg0: i32, %arg1: i32, %arg2: i32) -> (i32, i32) {
    %c0_i32 = arith.constant 0 : i32
    return %arg0, %arg1 : i32, i32
  }
  func.func @transform_3(%arg0: i32, %arg1: i32, %arg2: i32) -> (i32, i32, i32) {
    %c0_i32 = arith.constant 0 : i32
    %c0_i32_0 = arith.constant 0 : i32
    return %arg0, %c0_i32, %arg1 : i32, i32, i32
  }
}

module attributes {stable_mosaic.version = 11 : i64} {
  func.func @_scale_shift_act_kernel(%arg0: i32, %arg1: memref<16x256xbf16, #tpu.memory_space<vmem>>, %arg2: memref<1x256xf32, #tpu.memory_space<vmem>>, %arg3: memref<1x256xf32, #tpu.memory_space<vmem>>, %arg4: memref<16x256xbf16, #tpu.memory_space<vmem>>) attributes {dimension_semantics = [#tpu.dimension_semantics<parallel>], iteration_bounds = array<i64: 1>, scalar_prefetch = 0 : i64, scratch_operands = 0 : i64, tpu.core_type = #tpu.core_type<tc>, window_params = [{transform_indices = @transform_0, window_bounds = array<i64: 16, 256>}, {pipeline_mode = #tpu.pipeline_mode<synchronous>, transform_indices = @transform_1, window_bounds = array<i64: 1, 256>}, {pipeline_mode = #tpu.pipeline_mode<synchronous>, transform_indices = @transform_2, window_bounds = array<i64: 1, 256>}, {transform_indices = @transform_3, window_bounds = array<i64: 16, 256>}]} {
    %c0 = arith.constant 0 : index
    %c0_0 = arith.constant 0 : index
    %0 = vector.load %arg1[%c0, %c0_0] : memref<16x256xbf16, #tpu.memory_space<vmem>>, vector<16x256xbf16>
    %1 = arith.extf %0 : vector<16x256xbf16> to vector<16x256xf32>
    %c0_1 = arith.constant 0 : index
    %c0_2 = arith.constant 0 : index
    %2 = vector.load %arg2[%c0_1, %c0_2] : memref<1x256xf32, #tpu.memory_space<vmem>>, vector<1x256xf32>
    %3 = vector.broadcast %2 : vector<1x256xf32> to vector<16x256xf32>
    %4 = arith.mulf %1, %3 : vector<16x256xf32>
    %c0_3 = arith.constant 0 : index
    %c0_4 = arith.constant 0 : index
    %5 = vector.load %arg3[%c0_3, %c0_4] : memref<1x256xf32, #tpu.memory_space<vmem>>, vector<1x256xf32>
    %6 = vector.broadcast %5 : vector<1x256xf32> to vector<16x256xf32>
    %7 = arith.addf %4, %6 : vector<16x256xf32>
    %cst = arith.constant 0.000000e+00 : f32
    %8 = vector.broadcast %cst : f32 to vector<16x256xf32>
    %9 = arith.cmpf ogt, %7, %8 : vector<16x256xf32>
    %cst_5 = arith.constant 2.000000e-01 : f32
    %10 = vector.broadcast %cst_5 : f32 to vector<16x256xf32>
    %11 = arith.mulf %10, %7 : vector<16x256xf32>
    %12 = arith.select %9, %7, %11 : vector<16x256xi1>, vector<16x256xf32>
    %13 = arith.truncf %12 : vector<16x256xf32> to vector<16x256xbf16>
    %c0_6 = arith.constant 0 : index
    %c0_7 = arith.constant 0 : index
    %14 = vector.load %arg4[%c0_6, %c0_7] : memref<16x256xbf16, #tpu.memory_space<vmem>>, vector<16x256xbf16>
    tpu.vector_store %arg4[%c0_6, %c0_7], %13 {strides = array<i32>} : memref<16x256xbf16, #tpu.memory_space<vmem>>, vector<16x256xbf16>,
    return
  }
  func.func @transform_0(%arg0: i32) -> (i32, i32) {
    %c0_i32 = arith.constant 0 : i32
    %c0_i32_0 = arith.constant 0 : i32
    return %arg0, %c0_i32 : i32, i32
  }
  func.func @transform_1(%arg0: i32) -> (i32, i32) {
    %c0_i32 = arith.constant 0 : i32
    %c0_i32_0 = arith.constant 0 : i32
    %c0_i32_1 = arith.constant 0 : i32
    return %c0_i32, %c0_i32_0 : i32, i32
  }
  func.func @transform_2(%arg0: i32) -> (i32, i32) {
    %c0_i32 = arith.constant 0 : i32
    %c0_i32_0 = arith.constant 0 : i32
    %c0_i32_1 = arith.constant 0 : i32
    return %c0_i32, %c0_i32_0 : i32, i32
  }
  func.func @transform_3(%arg0: i32) -> (i32, i32) {
    %c0_i32 = arith.constant 0 : i32
    %c0_i32_0 = arith.constant 0 : i32
    return %arg0, %c0_i32 : i32, i32
  }
}

module attributes {stable_mosaic.version = 11 : i64} {
  func.func @_mm_bn_kernel(%arg0: i32, %arg1: i32, %arg2: i32, %arg3: memref<32x128xbf16, #tpu.memory_space<vmem>>, %arg4: memref<128x128xbf16, #tpu.memory_space<vmem>>, %arg5: memref<32x128xbf16, #tpu.memory_space<vmem>>, %arg6: memref<1x8x128xf32, #tpu.memory_space<vmem>>, %arg7: memref<32x128xf32, #tpu.memory_space<vmem>>) attributes {dimension_semantics = [#tpu.dimension_semantics<parallel>, #tpu.dimension_semantics<parallel>, #tpu.dimension_semantics<arbitrary>], iteration_bounds = array<i64: 1, 1, 27>, scalar_prefetch = 0 : i64, scratch_operands = 1 : i64, tpu.core_type = #tpu.core_type<tc>, window_params = [{transform_indices = @transform_0, window_bounds = array<i64: 32, 128>}, {transform_indices = @transform_1, window_bounds = array<i64: 128, 128>}, {transform_indices = @transform_2, window_bounds = array<i64: 32, 128>}, {transform_indices = @transform_3, window_bounds = array<i64: 1, 8, 128>}]} {
    %c0_i32 = arith.constant 0 : i32
    %0 = arith.cmpi eq, %arg2, %c0_i32 : i32
    %1 = arith.extui %0 : i1 to i32
    %c0_i32_0 = arith.constant 0 : i32
    %2 = arith.cmpi ne, %1, %c0_i32_0 : i32
    scf.if %2 {
      %cst_9 = arith.constant 0.000000e+00 : f32
      %12 = vector.broadcast %cst_9 : f32 to vector<32x128xf32>
      %c0_10 = arith.constant 0 : index
      %c0_11 = arith.constant 0 : index
      %13 = vector.load %arg7[%c0_10, %c0_11] : memref<32x128xf32, #tpu.memory_space<vmem>>, vector<32x128xf32>
      tpu.vector_store %arg7[%c0_10, %c0_11], %12 {strides = array<i32>} : memref<32x128xf32, #tpu.memory_space<vmem>>, vector<32x128xf32>,
    } else {
    }
    %c0 = arith.constant 0 : index
    %c0_1 = arith.constant 0 : index
    %3 = vector.load %arg7[%c0, %c0_1] : memref<32x128xf32, #tpu.memory_space<vmem>>, vector<32x128xf32>
    %c0_2 = arith.constant 0 : index
    %c0_3 = arith.constant 0 : index
    %4 = vector.load %arg3[%c0_2, %c0_3] : memref<32x128xbf16, #tpu.memory_space<vmem>>, vector<32x128xbf16>
    %c0_4 = arith.constant 0 : index
    %c0_5 = arith.constant 0 : index
    %5 = vector.load %arg4[%c0_4, %c0_5] : memref<128x128xbf16, #tpu.memory_space<vmem>>, vector<128x128xbf16>
    %cst = arith.constant dense<0.000000e+00> : vector<32x128xf32>
    %6 = tpu.matmul %4, %5, %cst {dimension_numbers = #tpu.dot_dimension_numbers<[1], [0], [0], [1], [0, 0, 1, 1], [], []>} : vector<32x128xbf16>, vector<128x128xbf16>, vector<32x128xf32> -> vector<32x128xf32>
    %7 = arith.addf %3, %6 : vector<32x128xf32>
    %c0_6 = arith.constant 0 : index
    %c0_7 = arith.constant 0 : index
    %8 = vector.load %arg7[%c0_6, %c0_7] : memref<32x128xf32, #tpu.memory_space<vmem>>, vector<32x128xf32>
    tpu.vector_store %arg7[%c0_6, %c0_7], %7 {strides = array<i32>} : memref<32x128xf32, #tpu.memory_space<vmem>>, vector<32x128xf32>,
    %c26_i32 = arith.constant 26 : i32
    %9 = arith.cmpi eq, %arg2, %c26_i32 : i32
    %10 = arith.extui %9 : i1 to i32
    %c0_i32_8 = arith.constant 0 : i32
    %11 = arith.cmpi ne, %10, %c0_i32_8 : i32
    scf.if %11 {
      %c0_9 = arith.constant 0 : index
      %c0_10 = arith.constant 0 : index
      %12 = vector.load %arg7[%c0_9, %c0_10] : memref<32x128xf32, #tpu.memory_space<vmem>>, vector<32x128xf32>
      %13 = arith.truncf %12 : vector<32x128xf32> to vector<32x128xbf16>
      %c0_11 = arith.constant 0 : index
      %c0_12 = arith.constant 0 : index
      %14 = vector.load %arg5[%c0_11, %c0_12] : memref<32x128xbf16, #tpu.memory_space<vmem>>, vector<32x128xbf16>
      tpu.vector_store %arg5[%c0_11, %c0_12], %13 {strides = array<i32>} : memref<32x128xbf16, #tpu.memory_space<vmem>>, vector<32x128xbf16>,
      %cst_13 = arith.constant dense<0.000000e+00> : vector<128xf32>
      %15 = vector.multi_reduction <add>, %12, %cst_13 [0] : vector<32x128xf32> to vector<128xf32>
      %16 = vector.shape_cast %15 : vector<128xf32> to vector<1x128xf32>
      %17 = arith.mulf %12, %12 : vector<32x128xf32>
      %cst_14 = arith.constant dense<0.000000e+00> : vector<128xf32>
      %18 = vector.multi_reduction <add>, %17, %cst_14 [0] : vector<32x128xf32> to vector<128xf32>
      %19 = vector.shape_cast %18 : vector<128xf32> to vector<1x128xf32>
      %cst_15 = arith.constant 0.000000e+00 : f32
      %20 = vector.broadcast %cst_15 : f32 to vector<6x128xf32>
      %21 = tpu.concatenate %16, %19, %20 in 0 : vector<1x128xf32>, vector<1x128xf32>, vector<6x128xf32> -> vector<8x128xf32>
      %c0_16 = arith.constant 0 : index
      %c0_17 = arith.constant 0 : index
      %c0_18 = arith.constant 0 : index
      %22 = vector.load %arg6[%c0_16, %c0_17, %c0_18] : memref<1x8x128xf32, #tpu.memory_space<vmem>>, vector<1x8x128xf32>
      %23 = vector.shape_cast %22 : vector<1x8x128xf32> to vector<8x128xf32>
      %24 = vector.shape_cast %21 : vector<8x128xf32> to vector<1x8x128xf32>
      tpu.vector_store %arg6[%c0_16, %c0_17, %c0_18], %24 {strides = array<i32>} : memref<1x8x128xf32, #tpu.memory_space<vmem>>, vector<1x8x128xf32>,
    } else {
    }
    return
  }
  func.func @transform_0(%arg0: i32, %arg1: i32, %arg2: i32) -> (i32, i32) {
    %c0_i32 = arith.constant 0 : i32
    return %arg0, %arg2 : i32, i32
  }
  func.func @transform_1(%arg0: i32, %arg1: i32, %arg2: i32) -> (i32, i32) {
    %c0_i32 = arith.constant 0 : i32
    return %arg2, %arg1 : i32, i32
  }
  func.func @transform_2(%arg0: i32, %arg1: i32, %arg2: i32) -> (i32, i32) {
    %c0_i32 = arith.constant 0 : i32
    return %arg0, %arg1 : i32, i32
  }
  func.func @transform_3(%arg0: i32, %arg1: i32, %arg2: i32) -> (i32, i32, i32) {
    %c0_i32 = arith.constant 0 : i32
    %c0_i32_0 = arith.constant 0 : i32
    return %arg0, %c0_i32, %arg1 : i32, i32, i32
  }
}

module attributes {stable_mosaic.version = 11 : i64} {
  func.func @_scale_shift_act_kernel(%arg0: i32, %arg1: memref<32x128xbf16, #tpu.memory_space<vmem>>, %arg2: memref<1x128xf32, #tpu.memory_space<vmem>>, %arg3: memref<1x128xf32, #tpu.memory_space<vmem>>, %arg4: memref<32x128xbf16, #tpu.memory_space<vmem>>) attributes {dimension_semantics = [#tpu.dimension_semantics<parallel>], iteration_bounds = array<i64: 1>, scalar_prefetch = 0 : i64, scratch_operands = 0 : i64, tpu.core_type = #tpu.core_type<tc>, window_params = [{transform_indices = @transform_0, window_bounds = array<i64: 32, 128>}, {pipeline_mode = #tpu.pipeline_mode<synchronous>, transform_indices = @transform_1, window_bounds = array<i64: 1, 128>}, {pipeline_mode = #tpu.pipeline_mode<synchronous>, transform_indices = @transform_2, window_bounds = array<i64: 1, 128>}, {transform_indices = @transform_3, window_bounds = array<i64: 32, 128>}]} {
    %c0 = arith.constant 0 : index
    %c0_0 = arith.constant 0 : index
    %0 = vector.load %arg1[%c0, %c0_0] : memref<32x128xbf16, #tpu.memory_space<vmem>>, vector<32x128xbf16>
    %1 = arith.extf %0 : vector<32x128xbf16> to vector<32x128xf32>
    %c0_1 = arith.constant 0 : index
    %c0_2 = arith.constant 0 : index
    %2 = vector.load %arg2[%c0_1, %c0_2] : memref<1x128xf32, #tpu.memory_space<vmem>>, vector<1x128xf32>
    %3 = vector.broadcast %2 : vector<1x128xf32> to vector<32x128xf32>
    %4 = arith.mulf %1, %3 : vector<32x128xf32>
    %c0_3 = arith.constant 0 : index
    %c0_4 = arith.constant 0 : index
    %5 = vector.load %arg3[%c0_3, %c0_4] : memref<1x128xf32, #tpu.memory_space<vmem>>, vector<1x128xf32>
    %6 = vector.broadcast %5 : vector<1x128xf32> to vector<32x128xf32>
    %7 = arith.addf %4, %6 : vector<32x128xf32>
    %cst = arith.constant 0.000000e+00 : f32
    %8 = vector.broadcast %cst : f32 to vector<32x128xf32>
    %9 = arith.cmpf ogt, %7, %8 : vector<32x128xf32>
    %cst_5 = arith.constant 2.000000e-01 : f32
    %10 = vector.broadcast %cst_5 : f32 to vector<32x128xf32>
    %11 = arith.mulf %10, %7 : vector<32x128xf32>
    %12 = arith.select %9, %7, %11 : vector<32x128xi1>, vector<32x128xf32>
    %13 = arith.truncf %12 : vector<32x128xf32> to vector<32x128xbf16>
    %c0_6 = arith.constant 0 : index
    %c0_7 = arith.constant 0 : index
    %14 = vector.load %arg4[%c0_6, %c0_7] : memref<32x128xbf16, #tpu.memory_space<vmem>>, vector<32x128xbf16>
    tpu.vector_store %arg4[%c0_6, %c0_7], %13 {strides = array<i32>} : memref<32x128xbf16, #tpu.memory_space<vmem>>, vector<32x128xbf16>,
    return
  }
  func.func @transform_0(%arg0: i32) -> (i32, i32) {
    %c0_i32 = arith.constant 0 : i32
    %c0_i32_0 = arith.constant 0 : i32
    return %arg0, %c0_i32 : i32, i32
  }
  func.func @transform_1(%arg0: i32) -> (i32, i32) {
    %c0_i32 = arith.constant 0 : i32
    %c0_i32_0 = arith.constant 0 : i32
    %c0_i32_1 = arith.constant 0 : i32
    return %c0_i32, %c0_i32_0 : i32, i32
  }
  func.func @transform_2(%arg0: i32) -> (i32, i32) {
    %c0_i32 = arith.constant 0 : i32
    %c0_i32_0 = arith.constant 0 : i32
    %c0_i32_1 = arith.constant 0 : i32
    return %c0_i32, %c0_i32_0 : i32, i32
  }
  func.func @transform_3(%arg0: i32) -> (i32, i32) {
    %c0_i32 = arith.constant 0 : i32
    %c0_i32_0 = arith.constant 0 : i32
    return %arg0, %c0_i32 : i32, i32
  }
}

module attributes {stable_mosaic.version = 11 : i64} {
  func.func @_mm_bn_kernel(%arg0: i32, %arg1: i32, %arg2: i32, %arg3: memref<128x256xbf16, #tpu.memory_space<vmem>>, %arg4: memref<256x128xbf16, #tpu.memory_space<vmem>>, %arg5: memref<128x128xbf16, #tpu.memory_space<vmem>>, %arg6: memref<1x8x128xf32, #tpu.memory_space<vmem>>, %arg7: memref<128x128xf32, #tpu.memory_space<vmem>>) attributes {dimension_semantics = [#tpu.dimension_semantics<parallel>, #tpu.dimension_semantics<parallel>, #tpu.dimension_semantics<arbitrary>], iteration_bounds = array<i64: 1, 1, 7>, scalar_prefetch = 0 : i64, scratch_operands = 1 : i64, tpu.core_type = #tpu.core_type<tc>, window_params = [{transform_indices = @transform_0, window_bounds = array<i64: 128, 256>}, {transform_indices = @transform_1, window_bounds = array<i64: 256, 128>}, {transform_indices = @transform_2, window_bounds = array<i64: 128, 128>}, {transform_indices = @transform_3, window_bounds = array<i64: 1, 8, 128>}]} {
    %c0_i32 = arith.constant 0 : i32
    %0 = arith.cmpi eq, %arg2, %c0_i32 : i32
    %1 = arith.extui %0 : i1 to i32
    %c0_i32_0 = arith.constant 0 : i32
    %2 = arith.cmpi ne, %1, %c0_i32_0 : i32
    scf.if %2 {
      %cst_9 = arith.constant 0.000000e+00 : f32
      %12 = vector.broadcast %cst_9 : f32 to vector<128x128xf32>
      %c0_10 = arith.constant 0 : index
      %c0_11 = arith.constant 0 : index
      %13 = vector.load %arg7[%c0_10, %c0_11] : memref<128x128xf32, #tpu.memory_space<vmem>>, vector<128x128xf32>
      tpu.vector_store %arg7[%c0_10, %c0_11], %12 {strides = array<i32>} : memref<128x128xf32, #tpu.memory_space<vmem>>, vector<128x128xf32>,
    } else {
    }
    %c0 = arith.constant 0 : index
    %c0_1 = arith.constant 0 : index
    %3 = vector.load %arg7[%c0, %c0_1] : memref<128x128xf32, #tpu.memory_space<vmem>>, vector<128x128xf32>
    %c0_2 = arith.constant 0 : index
    %c0_3 = arith.constant 0 : index
    %4 = vector.load %arg3[%c0_2, %c0_3] : memref<128x256xbf16, #tpu.memory_space<vmem>>, vector<128x256xbf16>
    %c0_4 = arith.constant 0 : index
    %c0_5 = arith.constant 0 : index
    %5 = vector.load %arg4[%c0_4, %c0_5] : memref<256x128xbf16, #tpu.memory_space<vmem>>, vector<256x128xbf16>
    %cst = arith.constant dense<0.000000e+00> : vector<128x128xf32>
    %6 = tpu.matmul %4, %5, %cst {dimension_numbers = #tpu.dot_dimension_numbers<[1], [0], [0], [1], [0, 0, 1, 1], [], []>} : vector<128x256xbf16>, vector<256x128xbf16>, vector<128x128xf32> -> vector<128x128xf32>
    %7 = arith.addf %3, %6 : vector<128x128xf32>
    %c0_6 = arith.constant 0 : index
    %c0_7 = arith.constant 0 : index
    %8 = vector.load %arg7[%c0_6, %c0_7] : memref<128x128xf32, #tpu.memory_space<vmem>>, vector<128x128xf32>
    tpu.vector_store %arg7[%c0_6, %c0_7], %7 {strides = array<i32>} : memref<128x128xf32, #tpu.memory_space<vmem>>, vector<128x128xf32>,
    %c6_i32 = arith.constant 6 : i32
    %9 = arith.cmpi eq, %arg2, %c6_i32 : i32
    %10 = arith.extui %9 : i1 to i32
    %c0_i32_8 = arith.constant 0 : i32
    %11 = arith.cmpi ne, %10, %c0_i32_8 : i32
    scf.if %11 {
      %c0_9 = arith.constant 0 : index
      %c0_10 = arith.constant 0 : index
      %12 = vector.load %arg7[%c0_9, %c0_10] : memref<128x128xf32, #tpu.memory_space<vmem>>, vector<128x128xf32>
      %13 = arith.truncf %12 : vector<128x128xf32> to vector<128x128xbf16>
      %c0_11 = arith.constant 0 : index
      %c0_12 = arith.constant 0 : index
      %14 = vector.load %arg5[%c0_11, %c0_12] : memref<128x128xbf16, #tpu.memory_space<vmem>>, vector<128x128xbf16>
      tpu.vector_store %arg5[%c0_11, %c0_12], %13 {strides = array<i32>} : memref<128x128xbf16, #tpu.memory_space<vmem>>, vector<128x128xbf16>,
      %cst_13 = arith.constant dense<0.000000e+00> : vector<128xf32>
      %15 = vector.multi_reduction <add>, %12, %cst_13 [0] : vector<128x128xf32> to vector<128xf32>
      %16 = vector.shape_cast %15 : vector<128xf32> to vector<1x128xf32>
      %17 = arith.mulf %12, %12 : vector<128x128xf32>
      %cst_14 = arith.constant dense<0.000000e+00> : vector<128xf32>
      %18 = vector.multi_reduction <add>, %17, %cst_14 [0] : vector<128x128xf32> to vector<128xf32>
      %19 = vector.shape_cast %18 : vector<128xf32> to vector<1x128xf32>
      %cst_15 = arith.constant 0.000000e+00 : f32
      %20 = vector.broadcast %cst_15 : f32 to vector<6x128xf32>
      %21 = tpu.concatenate %16, %19, %20 in 0 : vector<1x128xf32>, vector<1x128xf32>, vector<6x128xf32> -> vector<8x128xf32>
      %c0_16 = arith.constant 0 : index
      %c0_17 = arith.constant 0 : index
      %c0_18 = arith.constant 0 : index
      %22 = vector.load %arg6[%c0_16, %c0_17, %c0_18] : memref<1x8x128xf32, #tpu.memory_space<vmem>>, vector<1x8x128xf32>
      %23 = vector.shape_cast %22 : vector<1x8x128xf32> to vector<8x128xf32>
      %24 = vector.shape_cast %21 : vector<8x128xf32> to vector<1x8x128xf32>
      tpu.vector_store %arg6[%c0_16, %c0_17, %c0_18], %24 {strides = array<i32>} : memref<1x8x128xf32, #tpu.memory_space<vmem>>, vector<1x8x128xf32>,
    } else {
    }
    return
  }
  func.func @transform_0(%arg0: i32, %arg1: i32, %arg2: i32) -> (i32, i32) {
    %c0_i32 = arith.constant 0 : i32
    return %arg0, %arg2 : i32, i32
  }
  func.func @transform_1(%arg0: i32, %arg1: i32, %arg2: i32) -> (i32, i32) {
    %c0_i32 = arith.constant 0 : i32
    return %arg2, %arg1 : i32, i32
  }
  func.func @transform_2(%arg0: i32, %arg1: i32, %arg2: i32) -> (i32, i32) {
    %c0_i32 = arith.constant 0 : i32
    return %arg0, %arg1 : i32, i32
  }
  func.func @transform_3(%arg0: i32, %arg1: i32, %arg2: i32) -> (i32, i32, i32) {
    %c0_i32 = arith.constant 0 : i32
    %c0_i32_0 = arith.constant 0 : i32
    return %arg0, %c0_i32, %arg1 : i32, i32, i32
  }
}

module attributes {stable_mosaic.version = 11 : i64} {
  func.func @_scale_shift_act_kernel(%arg0: i32, %arg1: memref<128x128xbf16, #tpu.memory_space<vmem>>, %arg2: memref<1x128xf32, #tpu.memory_space<vmem>>, %arg3: memref<1x128xf32, #tpu.memory_space<vmem>>, %arg4: memref<128x128xbf16, #tpu.memory_space<vmem>>) attributes {dimension_semantics = [#tpu.dimension_semantics<parallel>], iteration_bounds = array<i64: 1>, scalar_prefetch = 0 : i64, scratch_operands = 0 : i64, tpu.core_type = #tpu.core_type<tc>, window_params = [{transform_indices = @transform_0, window_bounds = array<i64: 128, 128>}, {pipeline_mode = #tpu.pipeline_mode<synchronous>, transform_indices = @transform_1, window_bounds = array<i64: 1, 128>}, {pipeline_mode = #tpu.pipeline_mode<synchronous>, transform_indices = @transform_2, window_bounds = array<i64: 1, 128>}, {transform_indices = @transform_3, window_bounds = array<i64: 128, 128>}]} {
    %c0 = arith.constant 0 : index
    %c0_0 = arith.constant 0 : index
    %0 = vector.load %arg1[%c0, %c0_0] : memref<128x128xbf16, #tpu.memory_space<vmem>>, vector<128x128xbf16>
    %1 = arith.extf %0 : vector<128x128xbf16> to vector<128x128xf32>
    %c0_1 = arith.constant 0 : index
    %c0_2 = arith.constant 0 : index
    %2 = vector.load %arg2[%c0_1, %c0_2] : memref<1x128xf32, #tpu.memory_space<vmem>>, vector<1x128xf32>
    %3 = vector.broadcast %2 : vector<1x128xf32> to vector<128x128xf32>
    %4 = arith.mulf %1, %3 : vector<128x128xf32>
    %c0_3 = arith.constant 0 : index
    %c0_4 = arith.constant 0 : index
    %5 = vector.load %arg3[%c0_3, %c0_4] : memref<1x128xf32, #tpu.memory_space<vmem>>, vector<1x128xf32>
    %6 = vector.broadcast %5 : vector<1x128xf32> to vector<128x128xf32>
    %7 = arith.addf %4, %6 : vector<128x128xf32>
    %cst = arith.constant 0.000000e+00 : f32
    %8 = vector.broadcast %cst : f32 to vector<128x128xf32>
    %9 = arith.cmpf ogt, %7, %8 : vector<128x128xf32>
    %cst_5 = arith.constant 2.000000e-01 : f32
    %10 = vector.broadcast %cst_5 : f32 to vector<128x128xf32>
    %11 = arith.mulf %10, %7 : vector<128x128xf32>
    %12 = arith.select %9, %7, %11 : vector<128x128xi1>, vector<128x128xf32>
    %13 = arith.truncf %12 : vector<128x128xf32> to vector<128x128xbf16>
    %c0_6 = arith.constant 0 : index
    %c0_7 = arith.constant 0 : index
    %14 = vector.load %arg4[%c0_6, %c0_7] : memref<128x128xbf16, #tpu.memory_space<vmem>>, vector<128x128xbf16>
    tpu.vector_store %arg4[%c0_6, %c0_7], %13 {strides = array<i32>} : memref<128x128xbf16, #tpu.memory_space<vmem>>, vector<128x128xbf16>,
    return
  }
  func.func @transform_0(%arg0: i32) -> (i32, i32) {
    %c0_i32 = arith.constant 0 : i32
    %c0_i32_0 = arith.constant 0 : i32
    return %arg0, %c0_i32 : i32, i32
  }
  func.func @transform_1(%arg0: i32) -> (i32, i32) {
    %c0_i32 = arith.constant 0 : i32
    %c0_i32_0 = arith.constant 0 : i32
    %c0_i32_1 = arith.constant 0 : i32
    return %c0_i32, %c0_i32_0 : i32, i32
  }
  func.func @transform_2(%arg0: i32) -> (i32, i32) {
    %c0_i32 = arith.constant 0 : i32
    %c0_i32_0 = arith.constant 0 : i32
    %c0_i32_1 = arith.constant 0 : i32
    return %c0_i32, %c0_i32_0 : i32, i32
  }
  func.func @transform_3(%arg0: i32) -> (i32, i32) {
    %c0_i32 = arith.constant 0 : i32
    %c0_i32_0 = arith.constant 0 : i32
    return %arg0, %c0_i32 : i32, i32
  }
}

module attributes {stable_mosaic.version = 11 : i64} {
  func.func @_mm_bias_act_kernel(%arg0: i32, %arg1: i32, %arg2: i32, %arg3: memref<256x128xbf16, #tpu.memory_space<vmem>>, %arg4: memref<128x128xbf16, #tpu.memory_space<vmem>>, %arg5: memref<1x128xf32, #tpu.memory_space<vmem>>, %arg6: memref<256x128xf32, #tpu.memory_space<vmem>>, %arg7: memref<256x128xf32, #tpu.memory_space<vmem>>) attributes {dimension_semantics = [#tpu.dimension_semantics<parallel>, #tpu.dimension_semantics<parallel>, #tpu.dimension_semantics<arbitrary>], iteration_bounds = array<i64: 2, 1, 5>, scalar_prefetch = 0 : i64, scratch_operands = 1 : i64, tpu.core_type = #tpu.core_type<tc>, window_params = [{transform_indices = @transform_0, window_bounds = array<i64: 256, 128>}, {transform_indices = @transform_1, window_bounds = array<i64: 128, 128>}, {transform_indices = @transform_2, window_bounds = array<i64: 1, 128>}, {transform_indices = @transform_3, window_bounds = array<i64: 256, 128>}]} {
    %c0_i32 = arith.constant 0 : i32
    %0 = arith.cmpi eq, %arg2, %c0_i32 : i32
    %1 = arith.extui %0 : i1 to i32
    %c0_i32_0 = arith.constant 0 : i32
    %2 = arith.cmpi ne, %1, %c0_i32_0 : i32
    scf.if %2 {
      %cst_9 = arith.constant 0.000000e+00 : f32
      %12 = vector.broadcast %cst_9 : f32 to vector<256x128xf32>
      %c0_10 = arith.constant 0 : index
      %c0_11 = arith.constant 0 : index
      %13 = vector.load %arg7[%c0_10, %c0_11] : memref<256x128xf32, #tpu.memory_space<vmem>>, vector<256x128xf32>
      tpu.vector_store %arg7[%c0_10, %c0_11], %12 {strides = array<i32>} : memref<256x128xf32, #tpu.memory_space<vmem>>, vector<256x128xf32>,
    } else {
    }
    %c0 = arith.constant 0 : index
    %c0_1 = arith.constant 0 : index
    %3 = vector.load %arg7[%c0, %c0_1] : memref<256x128xf32, #tpu.memory_space<vmem>>, vector<256x128xf32>
    %c0_2 = arith.constant 0 : index
    %c0_3 = arith.constant 0 : index
    %4 = vector.load %arg3[%c0_2, %c0_3] : memref<256x128xbf16, #tpu.memory_space<vmem>>, vector<256x128xbf16>
    %c0_4 = arith.constant 0 : index
    %c0_5 = arith.constant 0 : index
    %5 = vector.load %arg4[%c0_4, %c0_5] : memref<128x128xbf16, #tpu.memory_space<vmem>>, vector<128x128xbf16>
    %cst = arith.constant dense<0.000000e+00> : vector<256x128xf32>
    %6 = tpu.matmul %4, %5, %cst {dimension_numbers = #tpu.dot_dimension_numbers<[1], [0], [0], [1], [0, 0, 1, 1], [], []>} : vector<256x128xbf16>, vector<128x128xbf16>, vector<256x128xf32> -> vector<256x128xf32>
    %7 = arith.addf %3, %6 : vector<256x128xf32>
    %c0_6 = arith.constant 0 : index
    %c0_7 = arith.constant 0 : index
    %8 = vector.load %arg7[%c0_6, %c0_7] : memref<256x128xf32, #tpu.memory_space<vmem>>, vector<256x128xf32>
    tpu.vector_store %arg7[%c0_6, %c0_7], %7 {strides = array<i32>} : memref<256x128xf32, #tpu.memory_space<vmem>>, vector<256x128xf32>,
    %c4_i32 = arith.constant 4 : i32
    %9 = arith.cmpi eq, %arg2, %c4_i32 : i32
    %10 = arith.extui %9 : i1 to i32
    %c0_i32_8 = arith.constant 0 : i32
    %11 = arith.cmpi ne, %10, %c0_i32_8 : i32
    scf.if %11 {
      %c0_9 = arith.constant 0 : index
      %c0_10 = arith.constant 0 : index
      %12 = vector.load %arg7[%c0_9, %c0_10] : memref<256x128xf32, #tpu.memory_space<vmem>>, vector<256x128xf32>
      %c0_11 = arith.constant 0 : index
      %c0_12 = arith.constant 0 : index
      %13 = vector.load %arg5[%c0_11, %c0_12] : memref<1x128xf32, #tpu.memory_space<vmem>>, vector<1x128xf32>
      %14 = vector.broadcast %13 : vector<1x128xf32> to vector<256x128xf32>
      %15 = arith.addf %12, %14 : vector<256x128xf32>
      %c0_13 = arith.constant 0 : index
      %c0_14 = arith.constant 0 : index
      %16 = vector.load %arg6[%c0_13, %c0_14] : memref<256x128xf32, #tpu.memory_space<vmem>>, vector<256x128xf32>
      tpu.vector_store %arg6[%c0_13, %c0_14], %15 {strides = array<i32>} : memref<256x128xf32, #tpu.memory_space<vmem>>, vector<256x128xf32>,
    } else {
    }
    return
  }
  func.func @transform_0(%arg0: i32, %arg1: i32, %arg2: i32) -> (i32, i32) {
    %c0_i32 = arith.constant 0 : i32
    return %arg0, %arg2 : i32, i32
  }
  func.func @transform_1(%arg0: i32, %arg1: i32, %arg2: i32) -> (i32, i32) {
    %c0_i32 = arith.constant 0 : i32
    return %arg2, %arg1 : i32, i32
  }
  func.func @transform_2(%arg0: i32, %arg1: i32, %arg2: i32) -> (i32, i32) {
    %c0_i32 = arith.constant 0 : i32
    %c0_i32_0 = arith.constant 0 : i32
    return %c0_i32, %arg1 : i32, i32
  }
  func.func @transform_3(%arg0: i32, %arg1: i32, %arg2: i32) -> (i32, i32) {
    %c0_i32 = arith.constant 0 : i32
    return %arg0, %arg1 : i32, i32
  }
}

</mosaic_0001>

<bundles_post_ra>
// kernel: conv_unet_forward.30
= control target key start
LH: loop header
LB: loop body
LE: loop exit
PB: predicated region body
PF: predicated region fallthrough
CT: control target
= control target key end

     0   :  { %s928_s1 = inlined_call_operand.vmem [shape: bf16[256,128], index: 1, kind: input, shape index: {}]   ;;  %s929_s0 = inlined_call_operand.vmem [shape: bf16[128,256], index: 0, kind: input, shape index: {}]   ;;  %s930_s2 = inlined_call_operand.vmem [shape: f32[1,128], index: 2, kind: input, shape index: {}]   ;;  %s931_s3 = inlined_call_operand.vmem [shape: bf16[128,128], index: 3, kind: output, shape index: {}]  }
   0x1   :  { %v646_v0 = vld [vmem:[%s928_s1 + $0x38] sm:$0xff]  ;;  %v645_v2 = vld [vmem:[%s928_s1 + $0x30] sm:$0xff]  ;;  %v644_v4 = vld [vmem:[%s928_s1 + $0x28] sm:$0xff] }
   0x2   :  { %v654_v1 = vld [vmem:[%s928_s1 + $0x78] sm:$0xff]  ;;  %274 = vmatpush.bf16.msra.mxu0 %v646_v0  ;;  %702 = vmatpush.bf16.msra.mxu2 %v646_v0  ;;  %v653_v3 = vld [vmem:[%s928_s1 + $0x70] sm:$0xff]  ;;  %v652_v5 = vld [vmem:[%s928_s1 + $0x68] sm:$0xff] }
   0x3   :  { %323 = vmatpush.bf16.msra.mxu1 %v654_v1  ;;  %710 = vmatpush.bf16.msra.mxu3 %v654_v1  ;;  %v643_v6 = vld [vmem:[%s928_s1 + $0x20] sm:$0xff]  ;;  %v642_v8 = vld [vmem:[%s928_s1 + $0x18] sm:$0xff]  ;;  %v641_v10 = vld [vmem:[%s928_s1 + $0x10] sm:$0xff] }
   0x4   :  { %v651_v7 = vld [vmem:[%s928_s1 + $0x60] sm:$0xff]  ;;  %v650_v9 = vld [vmem:[%s928_s1 + $0x58] sm:$0xff]  ;;  %v649_v11 = vld [vmem:[%s928_s1 + $0x50] sm:$0xff] }
   0x5   :  { %v640_v12 = vld [vmem:[%s928_s1 + $0x8] sm:$0xff]  ;;  %v639_v14 = vld [vmem:[%s928_s1] sm:$0xff]  ;;  %v505_v28 = vld [vmem:[%s929_s0 + $0x10] sm:$0xf] }
   0x6   :  { %275 = vmatpush.bf16.msra.mxu0 %v645_v2  ;;  %703 = vmatpush.bf16.msra.mxu2 %v645_v2  ;;  %v648_v13 = vld [vmem:[%s928_s1 + $0x48] sm:$0xff]  ;;  %v647_v15 = vld [vmem:[%s928_s1 + $0x40] sm:$0xff]  ;;  %v626_v29 = vld [vmem:[%s929_s0 + $0x14] sm:$0xf0] }
   0x7   :  { %324 = vmatpush.bf16.msra.mxu1 %v653_v3  ;;  %711 = vmatpush.bf16.msra.mxu3 %v653_v3  ;;  %v497_v16 = vld [vmem:[%s929_s0] sm:$0xf]  ;;  %v624_v17 = vld [vmem:[%s929_s0 + $0x4] sm:$0xf0]  ;;  %v623_v20 = vld [vmem:[%s929_s0 + $0x4] sm:$0xf]  ;;  %v506_v36 = vor.u32 %v626_v29, %v505_v28 }
   0x8   :  { %v529_v18 = vld [vmem:[%s929_s0 + $0x40] sm:$0xf]  ;;  %v632_v19 = vld [vmem:[%s929_s0 + $0x44] sm:$0xf0]  ;;  %v499_v21 = vld [vmem:[%s929_s0 + $0x8] sm:$0xf0]  ;;  %v498_v24 = vor.u32 %v624_v17, %v497_v16 }
   0x9   :  { %v631_v22 = vld [vmem:[%s929_s0 + $0x44] sm:$0xf]  ;;  %v531_v23 = vld [vmem:[%s929_s0 + $0x48] sm:$0xf0]  ;;  %v530_v25 = vor.u32 %v632_v19, %v529_v18  ;;  %v502_v26 = vor.u32 %v623_v20, %v499_v21  ;;  %v537_v30 = vld [vmem:[%s929_s0 + $0x50] sm:$0xf] }
   0xa   :  { %276 = vmatpush.bf16.msra.mxu0 %v644_v4  ;;  %704 = vmatpush.bf16.msra.mxu2 %v644_v4  ;;  %v534_v27 = vor.u32 %v631_v22, %v531_v23  ;;  %v634_v31 = vld [vmem:[%s929_s0 + $0x54] sm:$0xf0]  ;;  %v625_v32 = vld [vmem:[%s929_s0 + $0x14] sm:$0xf]  ;;  %v507_v33 = vld [vmem:[%s929_s0 + $0x18] sm:$0xf0] }
   0xb   :  { %325 = vmatpush.bf16.msra.mxu1 %v652_v5  ;;  %712 = vmatpush.bf16.msra.mxu3 %v652_v5  ;;  %v633_v34 = vld [vmem:[%s929_s0 + $0x54] sm:$0xf]  ;;  %v539_v35 = vld [vmem:[%s929_s0 + $0x58] sm:$0xf0]  ;;  %v538_v37 = vor.u32 %v634_v31, %v537_v30  ;;  %v510_v38 = vor.u32 %v625_v32, %v507_v33  ;;  %v513_v40 = vld [vmem:[%s929_s0 + $0x20] sm:$0xf] }
   0xc   :  { %v542_v39 = vor.u32 %v633_v34, %v539_v35  ;;  %v628_v41 = vld [vmem:[%s929_s0 + $0x24] sm:$0xf0]  ;;  %v545_v42 = vld [vmem:[%s929_s0 + $0x60] sm:$0xf]  ;;  %v627_v44 = vld [vmem:[%s929_s0 + $0x24] sm:$0xf] }
   0xd   :  { %v636_v43 = vld [vmem:[%s929_s0 + $0x64] sm:$0xf0]  ;;  %v515_v45 = vld [vmem:[%s929_s0 + $0x28] sm:$0xf0]  ;;  %v635_v46 = vld [vmem:[%s929_s0 + $0x64] sm:$0xf]  ;;  %v514_v48 = vor.u32 %v628_v41, %v513_v40 }
   0xe   :  { %277 = vmatpush.bf16.msra.mxu0 %v643_v6  ;;  %705 = vmatpush.bf16.msra.mxu2 %v643_v6  ;;  %v547_v47 = vld [vmem:[%s929_s0 + $0x68] sm:$0xf0]  ;;  %v546_v49 = vor.u32 %v636_v43, %v545_v42  ;;  %v518_v50 = vor.u32 %v627_v44, %v515_v45  ;;  %v521_v52 = vld [vmem:[%s929_s0 + $0x30] sm:$0xf]  ;;  %v630_v53 = vld [vmem:[%s929_s0 + $0x34] sm:$0xf0] }
   0xf   :  { %326 = vmatpush.bf16.msra.mxu1 %v651_v7  ;;  %713 = vmatpush.bf16.msra.mxu3 %v651_v7  ;;  %v550_v51 = vor.u32 %v635_v46, %v547_v47  ;;  %v553_v54 = vld [vmem:[%s929_s0 + $0x70] sm:$0xf]  ;;  %v638_v55 = vld [vmem:[%s929_s0 + $0x74] sm:$0xf0]  ;;  %v629_v56 = vld [vmem:[%s929_s0 + $0x34] sm:$0xf]  ;;  %v522_v60 = vor.u32 %v630_v53, %v521_v52 }
  0x10   :  { %v523_v57 = vld [vmem:[%s929_s0 + $0x38] sm:$0xf0]  ;;  %v637_v58 = vld [vmem:[%s929_s0 + $0x74] sm:$0xf]  ;;  %v554_v61 = vor.u32 %v638_v55, %v553_v54  ;;  %v886_v3 = vld [vmem:[%s930_s2] ss:$0 sm:$0xff] }
  0x11   :  { %v555_v59 = vld [vmem:[%s929_s0 + $0x78] sm:$0xf0]  ;;  %v526_v62 = vor.u32 %v629_v56, %v523_v57 }
  0x12   :  { %278 = vmatpush.bf16.msra.mxu0 %v642_v8  ;;  %706 = vmatpush.bf16.msra.mxu2 %v642_v8  ;;  %v558_v63 = vor.u32 %v637_v58, %v555_v59 }
  0x13   :  { %327 = vmatpush.bf16.msra.mxu1 %v650_v9  ;;  %714 = vmatpush.bf16.msra.mxu3 %v650_v9 }
  0x16   :  { %279 = vmatpush.bf16.msra.mxu0 %v641_v10  ;;  %707 = vmatpush.bf16.msra.mxu2 %v641_v10 }
  0x17   :  { %328 = vmatpush.bf16.msra.mxu1 %v649_v11  ;;  %715 = vmatpush.bf16.msra.mxu3 %v649_v11 }
  0x1a   :  { %280 = vmatpush.bf16.msra.mxu0 %v640_v12  ;;  %708 = vmatpush.bf16.msra.mxu2 %v640_v12 }
  0x1b   :  { %329 = vmatpush.bf16.msra.mxu1 %v648_v13  ;;  %716 = vmatpush.bf16.msra.mxu3 %v648_v13 }
  0x1e   :  { %281 = vmatpush.bf16.msra.mxu0 %v639_v14  ;;  %709 = vmatpush.bf16.msra.mxu2 %v639_v14 }
  0x1f   :  { %330 = vmatpush.bf16.msra.mxu1 %v647_v15  ;;  %717 = vmatpush.bf16.msra.mxu3 %v647_v15 }
  0x21   :  { %282 = vmatmul.bf16.vlgmr.msra.gmra.mxu0 %v498_v24  ;;  %302 = vmatmul.bf16.vlgmr.msra.gmra.mxu2 %v530_v25 }
  0x22   :  { %331 = vmatmul.bf16.vlgmr.msra.gmra.mxu1 %v502_v26  ;;  %351 = vmatmul.bf16.vlgmr.msra.gmra.mxu3 %v534_v27 }
  0x31   :  { %287 = vmatmul.bf16.gmra.mxu0 %v506_v36  ;;  %307 = vmatmul.bf16.gmra.mxu2 %v538_v37 }
  0x32   :  { %336 = vmatmul.bf16.gmra.mxu1 %v510_v38  ;;  %356 = vmatmul.bf16.gmra.mxu3 %v542_v39 }
  0x41   :  { %292 = vmatmul.bf16.gmra.mxu0 %v514_v48  ;;  %312 = vmatmul.bf16.gmra.mxu2 %v546_v49 }
  0x42   :  { %341 = vmatmul.bf16.gmra.mxu1 %v518_v50  ;;  %361 = vmatmul.bf16.gmra.mxu3 %v550_v51 }
  0x51   :  { %297 = vmatmul.bf16.gmra.mxu0 %v522_v60  ;;  %317 = vmatmul.bf16.gmra.mxu2 %v554_v61 }
  0x52   :  { %346 = vmatmul.bf16.gmra.mxu1 %v526_v62  ;;  %366 = vmatmul.bf16.gmra.mxu3 %v558_v63 }
  0x9e   :  { %v283_v0 = vpop.f32.mrf.mxu0 }
  0x9f   :  { %v332_v1 = vpop.f32.mrf.mxu1 }
  0xa0   :  { %v333_v2 = vadd.f32 %v332_v1, %v283_v0 }
  0xa2   :  { %v427_v8 = vadd.f32 %v886_v3, %v333_v2 }
  0xa4   :  { %v303_v4 = vpop.f32.mrf.mxu2  ;;  %v443_v12 = vmax.f32 %v427_v8, 0.0 }
  0xa5   :  { %v352_v5 = vpop.f32.mrf.mxu3 }
  0xa6   :  { %v285_v6 = vpop.f32.mrf.mxu0  ;;  %v353_v10 = vadd.f32 %v352_v5, %v303_v4 }
  0xa7   :  { %v334_v7 = vpop.f32.mrf.mxu1 }
  0xa8   :  { %v335_v9 = vadd.f32 %v334_v7, %v285_v6  ;;  %v435_v16 = vadd.f32 %v886_v3, %v353_v10 }
  0xaa   :  { %v428_v11 = vadd.f32 %v886_v3, %v335_v9  ;;  %v451_v22 = vmax.f32 %v435_v16, 0.0 }
  0xac   :  { %v444_v13 = vmax.f32 %v428_v11, 0.0  ;;  %v305_v14 = vpop.f32.mrf.mxu2 }
  0xad   :  { %v354_v15 = vpop.f32.mrf.mxu3 }
  0xae   :  { %v658_v17 = vpack.c.bf16 %v444_v13, %v443_v12  ;;  %v355_v18 = vadd.f32 %v354_v15, %v305_v14  ;;  %v288_v19 = vpop.f32.mrf.mxu0 }
  0xaf   :  { %v337_v20 = vpop.f32.mrf.mxu1 }
  0xb0   :  { %659 = vst [vmem:[%s931_s3] sm:$0xff] %v658_v17   ;;  %v436_v21 = vadd.f32 %v886_v3, %v355_v18  ;;  %v338_v25 = vadd.f32 %v337_v20, %v288_v19 }
  0xb2   :  { %v452_v23 = vmax.f32 %v436_v21, 0.0  ;;  %v429_v30 = vadd.f32 %v886_v3, %v338_v25 }
  0xb4   :  { %v678_v24 = vpack.c.bf16 %v452_v23, %v451_v22  ;;  %v308_v26 = vpop.f32.mrf.mxu2  ;;  %v445_v34 = vmax.f32 %v429_v30, 0.0 }
  0xb5   :  { %v357_v27 = vpop.f32.mrf.mxu3 }
  0xb6   :  { %698 = vst [vmem:[%s931_s3 + $0x20] sm:$0xff] %v678_v24   ;;  %v290_v28 = vpop.f32.mrf.mxu0  ;;  %v358_v32 = vadd.f32 %v357_v27, %v308_v26 }
  0xb7   :  { %v339_v29 = vpop.f32.mrf.mxu1 }
  0xb8   :  { %v340_v31 = vadd.f32 %v339_v29, %v290_v28  ;;  %v437_v38 = vadd.f32 %v886_v3, %v358_v32 }
  0xba   :  { %v430_v33 = vadd.f32 %v886_v3, %v340_v31  ;;  %v453_v44 = vmax.f32 %v437_v38, 0.0 }
  0xbc   :  { %v446_v35 = vmax.f32 %v430_v33, 0.0  ;;  %v310_v36 = vpop.f32.mrf.mxu2 }
  0xbd   :  { %v359_v37 = vpop.f32.mrf.mxu3 }
  0xbe   :  { %v663_v39 = vpack.c.bf16 %v446_v35, %v445_v34  ;;  %v360_v40 = vadd.f32 %v359_v37, %v310_v36  ;;  %v293_v41 = vpop.f32.mrf.mxu0 }
  0xbf   :  { %v342_v42 = vpop.f32.mrf.mxu1 }
  0xc0   :  { %695 = vst [vmem:[%s931_s3 + $0x8] sm:$0xff] %v663_v39   ;;  %v438_v43 = vadd.f32 %v886_v3, %v360_v40  ;;  %v343_v47 = vadd.f32 %v342_v42, %v293_v41 }
  0xc2   :  { %v454_v45 = vmax.f32 %v438_v43, 0.0  ;;  %v431_v52 = vadd.f32 %v886_v3, %v343_v47 }
  0xc4   :  { %v683_v46 = vpack.c.bf16 %v454_v45, %v453_v44  ;;  %v313_v48 = vpop.f32.mrf.mxu2  ;;  %v447_v56 = vmax.f32 %v431_v52, 0.0 }
  0xc5   :  { %v362_v49 = vpop.f32.mrf.mxu3 }
  0xc6   :  { %699 = vst [vmem:[%s931_s3 + $0x28] sm:$0xff] %v683_v46   ;;  %v295_v50 = vpop.f32.mrf.mxu0  ;;  %v363_v54 = vadd.f32 %v362_v49, %v313_v48 }
  0xc7   :  { %v344_v51 = vpop.f32.mrf.mxu1 }
  0xc8   :  { %v345_v53 = vadd.f32 %v344_v51, %v295_v50  ;;  %v439_v60 = vadd.f32 %v886_v3, %v363_v54 }
  0xca   :  { %v432_v55 = vadd.f32 %v886_v3, %v345_v53  ;;  %v455_v2 = vmax.f32 %v439_v60, 0.0 }
  0xcc   :  { %v448_v57 = vmax.f32 %v432_v55, 0.0  ;;  %v315_v58 = vpop.f32.mrf.mxu2 }
  0xcd   :  { %v364_v59 = vpop.f32.mrf.mxu3 }
  0xce   :  { %v668_v61 = vpack.c.bf16 %v448_v57, %v447_v56  ;;  %v365_v62 = vadd.f32 %v364_v59, %v315_v58  ;;  %v298_v63 = vpop.f32.mrf.mxu0 }
  0xcf   :  { %v347_v0 = vpop.f32.mrf.mxu1 }
  0xd0   :  { %696 = vst [vmem:[%s931_s3 + $0x10] sm:$0xff] %v668_v61   ;;  %v440_v1 = vadd.f32 %v886_v3, %v365_v62  ;;  %v348_v6 = vadd.f32 %v347_v0, %v298_v63 }
  0xd2   :  { %v456_v4 = vmax.f32 %v440_v1, 0.0  ;;  %v433_v11 = vadd.f32 %v886_v3, %v348_v6 }
  0xd4   :  { %v688_v5 = vpack.c.bf16 %v456_v4, %v455_v2  ;;  %v318_v7 = vpop.f32.mrf.mxu2  ;;  %v449_v15 = vmax.f32 %v433_v11, 0.0 }
  0xd5   :  { %v367_v8 = vpop.f32.mrf.mxu3 }
  0xd6   :  { %700 = vst [vmem:[%s931_s3 + $0x30] sm:$0xff] %v688_v5   ;;  %v300_v9 = vpop.f32.mrf.mxu0  ;;  %v368_v13 = vadd.f32 %v367_v8, %v318_v7 }
  0xd7   :  { %v349_v10 = vpop.f32.mrf.mxu1 }
  0xd8   :  { %v350_v12 = vadd.f32 %v349_v10, %v300_v9  ;;  %v441_v19 = vadd.f32 %v886_v3, %v368_v13 }
  0xda   :  { %v434_v14 = vadd.f32 %v886_v3, %v350_v12  ;;  %v457_v23 = vmax.f32 %v441_v19, 0.0 }
  0xdc   :  { %v450_v16 = vmax.f32 %v434_v14, 0.0  ;;  %v320_v17 = vpop.f32.mrf.mxu2 }
  0xdd   :  { %v369_v18 = vpop.f32.mrf.mxu3 }
  0xde   :  { %v673_v20 = vpack.c.bf16 %v450_v16, %v449_v15  ;;  %v370_v21 = vadd.f32 %v369_v18, %v320_v17 }
  0xe0   :  { %697 = vst [vmem:[%s931_s3 + $0x18] sm:$0xff] %v673_v20   ;;  %v442_v22 = vadd.f32 %v886_v3, %v370_v21 }
  0xe2   :  { %v458_v24 = vmax.f32 %v442_v22, 0.0 }
  0xe4   :  { %v693_v25 = vpack.c.bf16 %v458_v24, %v457_v23 }
  0xe6   :  { %701 = vst [vmem:[%s931_s3 + $0x38] sm:$0xff] %v693_v25  }

// kernel: conv_unet_forward.31
= control target key start
LH: loop header
LB: loop body
LE: loop exit
PB: predicated region body
PF: predicated region fallthrough
CT: control target
= control target key end

     0   :  { %s797_s12 = smov 0   ;;  %s799_s13 = smov 0   ;;  %s890_s0 = inlined_call_operand.vmem [shape: bf16[32,1664], index: 0, kind: input, shape index: {}]   ;;  %s891_s1 = inlined_call_operand.vmem [shape: bf16[1664,128], index: 1, kind: input, shape index: {}]   ;;  %s892_s2 = inlined_call_operand.vmem [shape: bf16[32,128], index: 2, kind: output, shape index: {0}]   ;;  %s893_s3 = inlined_call_operand.vmem [shape: f32[1,8,128], index: 3, kind: output, shape index: {1}]  }
   0x1   :  { %s801_s14 = smov 0   ;;  %s803_s15 = smov 0  }
   0x2   :  { %s805_s16 = smov 0  }
   0x3 LB: > { %s26_s17 = sadd.s32 1, %s770_s15  ;;  %p49_p1 = scmp.ne.s32.totalorder %s762_s13, %s758_s12  ;;  %s774_s16 = sphi %s805_s16, %s14_s16   ;;  %s770_s15 = sphi %s803_s15, %s897_s15   ;;  %s766_s14 = sphi %s801_s14, %s896_s14   ;;  %s762_s13 = sphi %s799_s13, %s895_s13   ;;  %s758_s12 = sphi %s797_s12, %s894_s12  }
   0x4   : > { %p27_p0 = scmp.ge.s32.totalorder %s26_s17, 13  ;;  %p50_p2 = scmp.eq.s32.totalorder %s774_s16, 0 }
   0x5   : > { %s42_s19 = sadd.s32 1, %s762_s13  ;;  %p612_p5 = scmp.ge.s32.totalorder %s774_s16, 13 }
   0x6   : > { %s899_s17 = smov (%p27_p0, %s26_s17), 0  ;;  %p51_p3 = por %p50_p2, %p49_p1 }
   0x7   : > { %s38_s18 = ssub.s32 %s770_s15, %s899_s17  ;;  %159 = sbr.rel (%p612_p5) target bundleno = 20 (0x14), region = 16 }
   0x8   : > { %p40_p4 = scmp.eq.s32.totalorder %s38_s18, 0 }
   0xa   : > { %s832_s20 = scalar_select %p40_p4, %s762_s13, %s42_s19  }
   0xc   : > { %162 = sbr.rel (!%p51_p3) target bundleno = 20 (0x14), region = 20  ;;  %s164_s21 = sand.u32 (%p51_p3), 1, %s762_s13  }
   0xd   : > { %s614_s22 = sshll.u32 (%p51_p3), %s770_s15, 2  ;;  %s613_s23 = sshll.u32 (%p51_p3), %s164_s21, 4 }
   0xe   : > { %s171_s26 = scalar_lea.vmem (%p51_p3), %s890_s0, %s614_s22  ;;  %s166_s27 = scalar_lea.vmem (%p51_p3), [#allocation3], %s613_s23 }
   0xf   : > { %v188_v0 = vld [vmem:[%s171_s26] sm:$0xf] (%p51_p3)  ;;  %v190_v1 = vld [vmem:[%s171_s26 + $0x34] sm:$0xf] (%p51_p3)  ;;  %v192_v2 = vld [vmem:[%s171_s26 + $0x68] sm:$0xf] (%p51_p3) }
  0x10   : > { %189 = vst [vmem:[%s166_s27] sm:$0xf] (%p51_p3), %v188_v0  ;;  %v194_v3 = vld [vmem:[%s171_s26 + $0x9c] sm:$0xf] (%p51_p3) }
  0x11   : > { %191 = vst [vmem:[%s166_s27 + $0x4] sm:$0xf] %v190_v1 }
  0x12   : > { %193 = vst [vmem:[%s166_s27 + $0x8] sm:$0xf] %v192_v2 }
  0x13   : > { %195 = vst [vmem:[%s166_s27 + $0xc] sm:$0xf] %v194_v3 }
  0x14 PF: > { %p615_p6 = scmp.ge.s32.totalorder %s774_s16, 1  ;;  %p238_p7 = scmp.lt.s32.totalorder %s774_s16, 14 }
  0x16   : > { %p239_p8 = pnand %p615_p6, %p238_p7 }
  0x17   : > { %s245_s28 = sand.u32 (!%p239_p8), 1, %s758_s12   ;;  %s617_s29 = sshll.u32 (!%p239_p8), %s766_s14, 4 }
  0x18   : > { %242 = sbr.rel (%p239_p8) target bundleno = 238 (0xee), region = 65  ;;  %s844_s30 = sshll.u32 (!%p239_p8), %s245_s28, 4 }
  0x19   : > { %p288_p9 = scmp.lt.s32.totalorder (!%p239_p8), %s617_s29, 207  ;;  %s247_s8 = scalar_lea.vmem (!%p239_p8), [#allocation3], %s844_s30 }
  0x1a   : > { %p619_p10 = scmp.ne.s32.totalorder (!%p239_p8), %s766_s14, 0 }
  0x1d   : > { %s901_s29 = smov (!%p288_p9, %s617_s29), 207  ;;  %315 = sbr.rel (%p619_p10) target bundleno = 39 (0x27), region = 73 }
  0x1e   : > { %s618_s4 = sshll.u32 %s901_s29, 2 }
  0x1f   : > { %s849_s7 = scalar_lea.vmem %s891_s1, %s618_s4 }
  0x22   : > { %v776_v4 = vmov 0.0  }
  0x23   : > { %316 = vst [vmem:[#allocation2 + $0x10] sm:$0xff] %v776_v4 }
  0x24   : > { %317 = vst [vmem:[#allocation2] sm:$0xff] %v776_v4 }
  0x25   : > { %318 = vst [vmem:[#allocation2 + $0x18] sm:$0xff] %v776_v4 }
  0x26   : > { %319 = vst [vmem:[#allocation2 + $0x8] sm:$0xff] %v776_v4 }
  0x27 PF: > { %v675_v5 = vld [vmem:[%s849_s7 + $0x38] sm:$0xff]  ;;  %v674_v6 = vld [vmem:[%s849_s7 + $0x30] sm:$0xff]  ;;  %v673_v7 = vld [vmem:[%s849_s7 + $0x28] sm:$0xff]  ;;  %p660_p11 = scmp.ne.s32.totalorder %s766_s14, 12 }
  0x28   : > { %404 = vmatpush.bf16.msra.mxu0 %v675_v5  ;;  %687 = vmatpush.bf16.msra.mxu1 %v675_v5  ;;  %v672_v8 = vld [vmem:[%s849_s7 + $0x20] sm:$0xff]  ;;  %v671_v9 = vld [vmem:[%s849_s7 + $0x18] sm:$0xff]  ;;  %v670_v10 = vld [vmem:[%s849_s7 + $0x10] sm:$0xff] }
  0x29   : > { %v669_v11 = vld [vmem:[%s849_s7 + $0x8] sm:$0xff]  ;;  %v668_v12 = vld [vmem:[%s849_s7] sm:$0xff] }
  0x2a   : > { %v666_v13 = vld [vmem:[%s247_s8] sm:$0xff]  ;;  %v667_v14 = vld [vmem:[%s247_s8 + $0x8] sm:$0xff] }
  0x2b   : > { %v320_v15 = vld [vmem:[#allocation2 + $0x10] sm:$0xff]  ;;  %v321_v21 = vld [vmem:[#allocation2] sm:$0xff] }
  0x2c   : > { %405 = vmatpush.bf16.msra.mxu0 %v674_v6  ;;  %688 = vmatpush.bf16.msra.mxu1 %v674_v6  ;;  %v322_v16 = vld [vmem:[#allocation2 + $0x18] sm:$0xff] }
  0x2d   : > { %v323_v22 = vld [vmem:[#allocation2 + $0x8] sm:$0xff] }
  0x30   : > { %406 = vmatpush.bf16.msra.mxu0 %v673_v7  ;;  %689 = vmatpush.bf16.msra.mxu1 %v673_v7 }
  0x34   : > { %407 = vmatpush.bf16.msra.mxu0 %v672_v8  ;;  %690 = vmatpush.bf16.msra.mxu1 %v672_v8 }
  0x38   : > { %408 = vmatpush.bf16.msra.mxu0 %v671_v9  ;;  %691 = vmatpush.bf16.msra.mxu1 %v671_v9 }
  0x3c   : > { %409 = vmatpush.bf16.msra.mxu0 %v670_v10  ;;  %692 = vmatpush.bf16.msra.mxu1 %v670_v10 }
  0x40   : > { %410 = vmatpush.bf16.msra.mxu0 %v669_v11  ;;  %693 = vmatpush.bf16.msra.mxu1 %v669_v11 }
  0x44   : > { %411 = vmatpush.bf16.msra.mxu0 %v668_v12  ;;  %694 = vmatpush.bf16.msra.mxu1 %v668_v12 }
  0x47   : > { %412 = vmatmul.bf16.vlgmr.msra.gmra.mxu0 %v666_v13  ;;  %417 = vmatmul.bf16.vlgmr.msra.gmra.mxu1 %v667_v14 }
  0xc4   : > { %v413_v17 = vpop.f32.mrf.mxu0  ;;  %v418_v18 = vpop.f32.mrf.mxu1 }
  0xc5   : > { %v423_v19 = vadd.f32 %v413_v17, %v320_v15  ;;  %v425_v20 = vadd.f32 %v418_v18, %v322_v16 }
  0xc7   : > { %427 = vst [vmem:[#allocation2 + $0x10] sm:$0xff] %v423_v19 }
  0xc8   : > { %429 = vst [vmem:[#allocation2 + $0x18] sm:$0xff] %v425_v20 }
  0xcc   : > { %v415_v23 = vpop.f32.mrf.mxu0  ;;  %v420_v24 = vpop.f32.mrf.mxu1  ;;  %434 = sbr.rel (%p660_p11) target bundleno = 238 (0xee), region = 77 }
  0xcd   : > { %v424_v25 = vadd.f32 %v415_v23, %v321_v21  ;;  %v426_v26 = vadd.f32 %v420_v24, %v323_v22 }
  0xcf   : > { %428 = vst [vmem:[#allocation2] sm:$0xff] %v424_v25 }
  0xd0   : > { %430 = vst [vmem:[#allocation2 + $0x8] sm:$0xff] %v426_v26 }
  0xd1   : > { %v435_v27 = vld [vmem:[#allocation2 + $0x10] sm:$0xff]  ;;  %v437_v29 = vld [vmem:[#allocation2 + $0x18] sm:$0xff]  ;;  %vm469_vm0 = vcmask 1040384   ;;  %vm471_vm1 = vcmask 1041408  }
  0xd2   : > { %v456_v32 = vmul.f32 %v435_v27, %v435_v27  ;;  %v458_v36 = vmul.f32 %v437_v29, %v437_v29 }
  0xd6   : > { %v436_v28 = vld [vmem:[#allocation2] sm:$0xff] }
  0xd7   : > { %v679_v30 = vpack.c.bf16 %v436_v28, %v435_v27  ;;  %v447_v31 = vadd.f32 %v436_v28, %v435_v27  ;;  %v457_v33 = vmul.f32 %v436_v28, %v436_v28  ;;  %v438_v34 = vld [vmem:[#allocation2 + $0x8] sm:$0xff] }
  0xd8   : > { %v684_v35 = vpack.c.bf16 %v438_v34, %v437_v29  ;;  %v459_v39 = vmul.f32 %v438_v34, %v438_v34 }
  0xd9   : > { %680 = vst [vmem:[%s892_s2] sm:$0xff] %v679_v30   ;;  %v460_v37 = vadd.f32 %v457_v33, %v456_v32  ;;  %v448_v38 = vadd.f32 %v447_v31, %v437_v29 }
  0xda   : > { %686 = vst [vmem:[%s892_s2 + $0x8] sm:$0xff] %v684_v35  }
  0xdb   : > { %v449_v40 = vadd.f32 %v448_v38, %v438_v34  ;;  %v461_v41 = vadd.f32 %v460_v37, %v458_v36 }
  0xdd   : > { %v450_v42 = vrot.slane %v449_v40, 4  ;;  %v462_v43 = vadd.f32 %v461_v41, %v459_v39 }
  0xdf   : > { %v451_v44 = vadd.f32 %v450_v42, %v449_v40  ;;  %v463_v45 = vrot.slane %v462_v43, 4 }
  0xe1   : > { %v452_v46 = vrot.slane %v451_v44, 2  ;;  %v464_v47 = vadd.f32 %v463_v45, %v462_v43 }
  0xe3   : > { %v453_v48 = vadd.f32 %v452_v46, %v451_v44  ;;  %v465_v49 = vrot.slane %v464_v47, 2 }
  0xe5   : > { %v454_v50 = vrot.slane %v453_v48, 1  ;;  %v466_v51 = vadd.f32 %v465_v49, %v464_v47 }
  0xe7   : > { %v455_v52 = vadd.f32 %v454_v50, %v453_v48  ;;  %v467_v53 = vrot.slane %v466_v51, 1 }
  0xe9   : > { %v468_v54 = vadd.f32 %v467_v53, %v466_v51 }
  0xeb   : > { %v470_v55 = vsel %vm469_vm0, %v455_v52, %v468_v54 }
  0xec   : > { %v472_v56 = vsel %vm471_vm1, %v470_v55, 0.0 }
  0xed   : > { %473 = vst [vmem:[%s893_s3] sm:$0xff] %v472_v56 }
  0xee PF: > { %s14_s16 = sadd.s32 1, %s774_s16   ;;  %s894_s12 = smov %s762_s13 }
  0xef   : > { %p11_p12 = scmp.ge.s32.totalorder %s14_s16, 15   ;;  %s895_s13 = smov %s832_s20 }
  0xf0   : > { %s896_s14 = smov %s770_s15  ;;  %s897_s15 = smov %s899_s17 }
  0xf1   :  { %13 = sbr.rel (!%p11_p12) target bundleno = 3 (0x3), region = 127 }

// kernel: conv_unet_forward.32
= control target key start
LH: loop header
LB: loop body
LE: loop exit
PB: predicated region body
PF: predicated region fallthrough
CT: control target
= control target key end

     0   :  { %s114_s0 = inlined_call_operand.vmem [shape: bf16[32,128], index: 0, kind: input, shape index: {}]   ;;  %s115_s1 = inlined_call_operand.vmem [shape: f32[1,128], index: 1, kind: input, shape index: {}]   ;;  %s116_s2 = inlined_call_operand.vmem [shape: f32[1,128], index: 2, kind: input, shape index: {}]   ;;  %s117_s3 = inlined_call_operand.vmem [shape: bf16[32,128], index: 3, kind: output, shape index: {}]  }
   0x1   :  { %v55_v0 = vld [vmem:[%s114_s0] sm:$0xff]   ;;  %v72_v5 = vld [vmem:[%s114_s0 + $0x8] sm:$0xff]  }
   0x2   :  { %v74_v1 = vld [vmem:[%s115_s1] ss:$0 sm:$0xff]  ;;  %v56_v2 = vunpack.c.l.bf16 %v55_v0  ;;  %v57_v3 = vunpack.c.h.bf16 %v55_v0  ;;  %v60_v6 = vunpack.c.l.bf16 %v72_v5  ;;  %v61_v7 = vunpack.c.h.bf16 %v72_v5 }
   0x3   :  { %v75_v4 = vld [vmem:[%s116_s2] ss:$0 sm:$0xff] }
   0x4   :  { %v26_v8 = vmul.f32 %v74_v1, %v56_v2  ;;  %v27_v9 = vmul.f32 %v74_v1, %v57_v3  ;;  %v28_v10 = vmul.f32 %v74_v1, %v60_v6  ;;  %v29_v11 = vmul.f32 %v74_v1, %v61_v7 }
   0x6   :  { %v34_v12 = vadd.f32 %v75_v4, %v26_v8  ;;  %v35_v13 = vadd.f32 %v75_v4, %v27_v9  ;;  %v36_v14 = vadd.f32 %v75_v4, %v28_v10  ;;  %v37_v15 = vadd.f32 %v75_v4, %v29_v11 }
   0x8   :  { %v38_v16 = vmax.f32 %v34_v12, 0.0  ;;  %v39_v17 = vmax.f32 %v35_v13, 0.0  ;;  %v40_v18 = vmax.f32 %v36_v14, 0.0  ;;  %v41_v19 = vmax.f32 %v37_v15, 0.0 }
   0xa   :  { %v65_v20 = vpack.c.bf16 %v39_v17, %v38_v16  ;;  %v70_v21 = vpack.c.bf16 %v41_v19, %v40_v18 }
   0xc   :  { %66 = vst [vmem:[%s117_s3] sm:$0xff] %v65_v20  }
   0xd   :  { %73 = vst [vmem:[%s117_s3 + $0x8] sm:$0xff] %v70_v21  }

// kernel: conv_unet_forward.33
= control target key start
LH: loop header
LB: loop body
LE: loop exit
PB: predicated region body
PF: predicated region fallthrough
CT: control target
= control target key end

     0   :  { %s889_s12 = smov 0   ;;  %s891_s13 = smov 0   ;;  %s1007_s0 = inlined_call_operand.vmem [shape: bf16[16,1152], index: 0, kind: input, shape index: {}]   ;;  %s1008_s1 = inlined_call_operand.vmem [shape: bf16[1152,256], index: 1, kind: input, shape index: {}]   ;;  %s1009_s2 = inlined_call_operand.vmem [shape: bf16[16,256], index: 2, kind: output, shape index: {0}]   ;;  %s1010_s3 = inlined_call_operand.vmem [shape: f32[1,8,256], index: 3, kind: output, shape index: {1}]  }
   0x1   :  { %s893_s14 = smov 0   ;;  %s895_s15 = smov 0  }
   0x2   :  { %s897_s16 = smov 0  }
   0x3 LB: > { %s26_s17 = sadd.s32 1, %s862_s15  ;;  %p49_p1 = scmp.ne.s32.totalorder %s854_s13, %s850_s12  ;;  %s866_s16 = sphi %s897_s16, %s14_s16   ;;  %s862_s15 = sphi %s895_s15, %s1014_s15   ;;  %s858_s14 = sphi %s893_s14, %s1013_s14   ;;  %s854_s13 = sphi %s891_s13, %s1012_s13   ;;  %s850_s12 = sphi %s889_s12, %s1011_s12  }
   0x4   : > { %p27_p0 = scmp.ge.s32.totalorder %s26_s17, 9  ;;  %p50_p2 = scmp.eq.s32.totalorder %s866_s16, 0 }
   0x5   : > { %s42_s19 = sadd.s32 1, %s854_s13  ;;  %p685_p5 = scmp.ge.s32.totalorder %s866_s16, 9 }
   0x6   : > { %s1016_s17 = smov (%p27_p0, %s26_s17), 0  ;;  %p51_p3 = por %p50_p2, %p49_p1 }
   0x7   : > { %s38_s18 = ssub.s32 %s862_s15, %s1016_s17  ;;  %159 = sbr.rel (%p685_p5) target bundleno = 18 (0x12), region = 16 }
   0x8   : > { %p40_p4 = scmp.eq.s32.totalorder %s38_s18, 0 }
   0xa   : > { %s924_s20 = scalar_select %p40_p4, %s854_s13, %s42_s19  }
   0xc   : > { %162 = sbr.rel (!%p51_p3) target bundleno = 18 (0x12), region = 20  ;;  %s164_s21 = sand.u32 (%p51_p3), 1, %s854_s13  }
   0xd   : > { %s687_s22 = sshll.u32 (%p51_p3), %s862_s15, 2  ;;  %s686_s23 = sshll.u32 (%p51_p3), %s164_s21, 3 }
   0xe   : > { %s171_s26 = scalar_lea.vmem (%p51_p3), %s1007_s0, %s687_s22  ;;  %s166_s27 = scalar_lea.vmem (%p51_p3), [#allocation3], %s686_s23 }
   0xf   : > { %v188_v0 = vld [vmem:[%s171_s26] sm:$0xf] (%p51_p3)  ;;  %v190_v1 = vld [vmem:[%s171_s26 + $0x24] sm:$0xf] (%p51_p3) }
  0x10   : > { %189 = vst [vmem:[%s166_s27] sm:$0xf] (%p51_p3), %v188_v0 }
  0x11   : > { %191 = vst [vmem:[%s166_s27 + $0x4] sm:$0xf] %v190_v1 }
  0x12 PF: > { %p688_p6 = scmp.ge.s32.totalorder %s866_s16, 1  ;;  %p233_p7 = scmp.lt.s32.totalorder %s866_s16, 10 }
  0x14   : > { %p234_p8 = pnand %p688_p6, %p233_p7 }
  0x15   : > { %s240_s28 = sand.u32 (!%p234_p8), 1, %s850_s12   ;;  %s690_s29 = sshll.u32 (!%p234_p8), %s858_s14, 4 }
  0x16   : > { %237 = sbr.rel (%p234_p8) target bundleno = 235 (0xeb), region = 65  ;;  %s936_s30 = sshll.u32 (!%p234_p8), %s240_s28, 3 }
  0x17   : > { %p290_p9 = scmp.lt.s32.totalorder (!%p234_p8), %s690_s29, 143  ;;  %s242_s8 = scalar_lea.vmem (!%p234_p8), [#allocation3], %s936_s30 }
  0x18   : > { %p693_p10 = scmp.ne.s32.totalorder (!%p234_p8), %s858_s14, 0 }
  0x1b   : > { %s1018_s29 = smov (!%p290_p9, %s690_s29), 143  ;;  %325 = sbr.rel (%p693_p10) target bundleno = 37 (0x25), region = 73 }
  0x1c   : > { %s769_s4 = sshll.u32 %s1018_s29, 3 }
  0x1d   : > { %s941_s7 = scalar_lea.vmem %s1008_s1, %s769_s4 }
  0x20   : > { %v868_v2 = vmov 0.0  }
  0x21   : > { %326 = vst [vmem:[#allocation2 + $0x10] sm:$0xff] %v868_v2 }
  0x22   : > { %327 = vst [vmem:[#allocation2] sm:$0xff] %v868_v2 }
  0x23   : > { %328 = vst [vmem:[#allocation2 + $0x18] sm:$0xff] %v868_v2 }
  0x24   : > { %329 = vst [vmem:[#allocation2 + $0x8] sm:$0xff] %v868_v2 }
  0x25 PF: > { %v756_v3 = vld [vmem:[%s941_s7 + $0x70] sm:$0xf]  ;;  %v786_v4 = vld [vmem:[%s941_s7 + $0x74] sm:$0xf0]  ;;  %v785_v5 = vld [vmem:[%s941_s7 + $0x74] sm:$0xf] }
  0x26   : > { %v757_v6 = vor.u32 %v786_v4, %v756_v3  ;;  %v758_v7 = vld [vmem:[%s941_s7 + $0x78] sm:$0xf0]  ;;  %v748_v8 = vld [vmem:[%s941_s7 + $0x60] sm:$0xf]  ;;  %v784_v9 = vld [vmem:[%s941_s7 + $0x64] sm:$0xf0] }
  0x27   : > { %v761_v10 = vor.u32 %v785_v5, %v758_v7  ;;  %v783_v11 = vld [vmem:[%s941_s7 + $0x64] sm:$0xf]  ;;  %v750_v12 = vld [vmem:[%s941_s7 + $0x68] sm:$0xf0]  ;;  %v749_v13 = vor.u32 %v784_v9, %v748_v8  ;;  %v740_v15 = vld [vmem:[%s941_s7 + $0x50] sm:$0xf] }
  0x28   : > { %438 = vmatpush.bf16.msra.mxu0 %v757_v6  ;;  %v753_v14 = vor.u32 %v783_v11, %v750_v12  ;;  %v782_v16 = vld [vmem:[%s941_s7 + $0x54] sm:$0xf0]  ;;  %v781_v17 = vld [vmem:[%s941_s7 + $0x54] sm:$0xf]  ;;  %v742_v18 = vld [vmem:[%s941_s7 + $0x58] sm:$0xf0] }
  0x29   : > { %452 = vmatpush.bf16.msra.mxu1 %v761_v10  ;;  %v741_v19 = vor.u32 %v782_v16, %v740_v15  ;;  %v745_v20 = vor.u32 %v781_v17, %v742_v18  ;;  %v732_v21 = vld [vmem:[%s941_s7 + $0x40] sm:$0xf]  ;;  %v780_v22 = vld [vmem:[%s941_s7 + $0x44] sm:$0xf0]  ;;  %v779_v23 = vld [vmem:[%s941_s7 + $0x44] sm:$0xf] }
  0x2a   : > { %v734_v24 = vld [vmem:[%s941_s7 + $0x48] sm:$0xf0]  ;;  %v733_v25 = vor.u32 %v780_v22, %v732_v21  ;;  %v724_v27 = vld [vmem:[%s941_s7 + $0x30] sm:$0xf]  ;;  %v778_v28 = vld [vmem:[%s941_s7 + $0x34] sm:$0xf0] }
  0x2b   : > { %v737_v26 = vor.u32 %v779_v23, %v734_v24  ;;  %v777_v29 = vld [vmem:[%s941_s7 + $0x34] sm:$0xf]  ;;  %v726_v30 = vld [vmem:[%s941_s7 + $0x38] sm:$0xf0]  ;;  %v725_v31 = vor.u32 %v778_v28, %v724_v27  ;;  %v716_v33 = vld [vmem:[%s941_s7 + $0x20] sm:$0xf] }
  0x2c   : > { %439 = vmatpush.bf16.msra.mxu0 %v749_v13  ;;  %v729_v32 = vor.u32 %v777_v29, %v726_v30  ;;  %v776_v34 = vld [vmem:[%s941_s7 + $0x24] sm:$0xf0]  ;;  %v775_v35 = vld [vmem:[%s941_s7 + $0x24] sm:$0xf]  ;;  %v718_v36 = vld [vmem:[%s941_s7 + $0x28] sm:$0xf0] }
  0x2d   : > { %453 = vmatpush.bf16.msra.mxu1 %v753_v14  ;;  %v717_v37 = vor.u32 %v776_v34, %v716_v33  ;;  %v721_v38 = vor.u32 %v775_v35, %v718_v36  ;;  %v708_v39 = vld [vmem:[%s941_s7 + $0x10] sm:$0xf]  ;;  %v774_v40 = vld [vmem:[%s941_s7 + $0x14] sm:$0xf0]  ;;  %v773_v41 = vld [vmem:[%s941_s7 + $0x14] sm:$0xf] }
  0x2e   : > { %v710_v42 = vld [vmem:[%s941_s7 + $0x18] sm:$0xf0]  ;;  %v709_v43 = vor.u32 %v774_v40, %v708_v39  ;;  %v700_v45 = vld [vmem:[%s941_s7] sm:$0xf]  ;;  %v772_v46 = vld [vmem:[%s941_s7 + $0x4] sm:$0xf0] }
  0x2f   : > { %v713_v44 = vor.u32 %v773_v41, %v710_v42  ;;  %v771_v47 = vld [vmem:[%s941_s7 + $0x4] sm:$0xf]  ;;  %v702_v48 = vld [vmem:[%s941_s7 + $0x8] sm:$0xf0]  ;;  %v701_v49 = vor.u32 %v772_v46, %v700_v45  ;;  %v330_v52 = vld [vmem:[#allocation2 + $0x10] sm:$0xff]  ;;  %p762_p11 = scmp.ne.s32.totalorder %s858_s14, 8 }
  0x30   : > { %440 = vmatpush.bf16.msra.mxu0 %v741_v19  ;;  %v705_v50 = vor.u32 %v771_v47, %v702_v48  ;;  %v770_v51 = vld [vmem:[%s242_s8] sm:$0xff]  ;;  %v332_v58 = vld [vmem:[#allocation2 + $0x18] sm:$0xff] }
  0x31   : > { %454 = vmatpush.bf16.msra.mxu1 %v745_v20  ;;  %v331_v53 = vld [vmem:[#allocation2] sm:$0xff]  ;;  %v333_v59 = vld [vmem:[#allocation2 + $0x8] sm:$0xff] }
  0x34   : > { %441 = vmatpush.bf16.msra.mxu0 %v733_v25 }
  0x35   : > { %455 = vmatpush.bf16.msra.mxu1 %v737_v26 }
  0x38   : > { %442 = vmatpush.bf16.msra.mxu0 %v725_v31 }
  0x39   : > { %456 = vmatpush.bf16.msra.mxu1 %v729_v32 }
  0x3c   : > { %443 = vmatpush.bf16.msra.mxu0 %v717_v37 }
  0x3d   : > { %457 = vmatpush.bf16.msra.mxu1 %v721_v38 }
  0x40   : > { %444 = vmatpush.bf16.msra.mxu0 %v709_v43 }
  0x41   : > { %458 = vmatpush.bf16.msra.mxu1 %v713_v44 }
  0x44   : > { %445 = vmatpush.bf16.msra.mxu0 %v701_v49 }
  0x45   : > { %459 = vmatpush.bf16.msra.mxu1 %v705_v50 }
  0x47   : > { %446 = vmatmul.bf16.vlgmr.msra.gmra.mxu0 %v770_v51 }
  0x48   : > { %460 = vmatmul.bf16.vlgmr.msra.gmra.mxu1 %v770_v51 }
  0xc4   : > { %v447_v54 = vpop.f32.mrf.mxu0 }
  0xc5   : > { %v466_v55 = vadd.f32 %v447_v54, %v330_v52  ;;  %v461_v56 = vpop.f32.mrf.mxu1 }
  0xc6   : > { %v467_v57 = vadd.f32 %v461_v56, %v331_v53 }
  0xc7   : > { %470 = vst [vmem:[#allocation2 + $0x10] sm:$0xff] %v466_v55 }
  0xc8   : > { %471 = vst [vmem:[#allocation2] sm:$0xff] %v467_v57 }
  0xcc   : > { %v449_v60 = vpop.f32.mrf.mxu0  ;;  %477 = sbr.rel (%p762_p11) target bundleno = 235 (0xeb), region = 77 }
  0xcd   : > { %v468_v61 = vadd.f32 %v449_v60, %v332_v58  ;;  %v463_v62 = vpop.f32.mrf.mxu1 }
  0xce   : > { %v469_v63 = vadd.f32 %v463_v62, %v333_v59 }
  0xcf   : > { %472 = vst [vmem:[#allocation2 + $0x18] sm:$0xff] %v468_v61 }
  0xd0   : > { %473 = vst [vmem:[#allocation2 + $0x8] sm:$0xff] %v469_v63 }
  0xd1   : > { %v478_v0 = vld [vmem:[#allocation2 + $0x10] sm:$0xff]  ;;  %v479_v1 = vld [vmem:[#allocation2] sm:$0xff]  ;;  %vm518_vm0 = vcmask 1040384   ;;  %vm521_vm1 = vcmask 1041408  }
  0xd2   : > { %v482_v3 = vpack.c.bf16 %v479_v1, %v478_v0  ;;  %v500_v4 = vmul.f32 %v478_v0, %v478_v0  ;;  %v501_v5 = vmul.f32 %v479_v1, %v479_v1 }
  0xd4   : > { %484 = vst [vmem:[%s1009_s2] sm:$0xff] %v482_v3 }
  0xd6   : > { %v480_v2 = vld [vmem:[#allocation2 + $0x18] sm:$0xff] }
  0xd7   : > { %v481_v6 = vld [vmem:[#allocation2 + $0x8] sm:$0xff]  ;;  %v486_v7 = vadd.f32 %v480_v2, %v478_v0  ;;  %v502_v10 = vmul.f32 %v480_v2, %v480_v2 }
  0xd8   : > { %v483_v8 = vpack.c.bf16 %v481_v6, %v480_v2  ;;  %v493_v9 = vadd.f32 %v481_v6, %v479_v1  ;;  %v503_v11 = vmul.f32 %v481_v6, %v481_v6 }
  0xd9   : > { %v487_v12 = vrot.slane %v486_v7, 4  ;;  %v504_v14 = vadd.f32 %v502_v10, %v500_v4 }
  0xda   : > { %485 = vst [vmem:[%s1009_s2 + $0x8] sm:$0xff] %v483_v8  ;;  %v494_v13 = vrot.slane %v493_v9, 4  ;;  %v511_v15 = vadd.f32 %v503_v11, %v501_v5 }
  0xdb   : > { %v488_v16 = vadd.f32 %v487_v12, %v486_v7  ;;  %v505_v18 = vrot.slane %v504_v14, 4 }
  0xdc   : > { %v495_v17 = vadd.f32 %v494_v13, %v493_v9  ;;  %v512_v19 = vrot.slane %v511_v15, 4 }
  0xdd   : > { %v489_v20 = vrot.slane %v488_v16, 2  ;;  %v506_v22 = vadd.f32 %v505_v18, %v504_v14 }
  0xde   : > { %v496_v21 = vrot.slane %v495_v17, 2  ;;  %v513_v23 = vadd.f32 %v512_v19, %v511_v15 }
  0xdf   : > { %v490_v24 = vadd.f32 %v489_v20, %v488_v16  ;;  %v507_v25 = vrot.slane %v506_v22, 2 }
  0xe0   : > { %v497_v26 = vadd.f32 %v496_v21, %v495_v17  ;;  %v514_v27 = vrot.slane %v513_v23, 2 }
  0xe1   : > { %v491_v28 = vrot.slane %v490_v24, 1  ;;  %v508_v29 = vadd.f32 %v507_v25, %v506_v22 }
  0xe2   : > { %v498_v30 = vrot.slane %v497_v26, 1  ;;  %v515_v31 = vadd.f32 %v514_v27, %v513_v23 }
  0xe3   : > { %v492_v32 = vadd.f32 %v491_v28, %v490_v24  ;;  %v509_v33 = vrot.slane %v508_v29, 1 }
  0xe4   : > { %v499_v34 = vadd.f32 %v498_v30, %v497_v26  ;;  %v516_v35 = vrot.slane %v515_v31, 1 }
  0xe5   : > { %v510_v36 = vadd.f32 %v509_v33, %v508_v29 }
  0xe6   : > { %v517_v37 = vadd.f32 %v516_v35, %v515_v31 }
  0xe7   : > { %v519_v38 = vsel %vm518_vm0, %v492_v32, %v510_v36 }
  0xe8   : > { %v520_v39 = vsel %vm518_vm0, %v499_v34, %v517_v37  ;;  %v522_v40 = vsel %vm521_vm1, %v519_v38, 0.0 }
  0xe9   : > { %v523_v41 = vsel %vm521_vm1, %v520_v39, 0.0  ;;  %524 = vst [vmem:[%s1010_s3] sm:$0xff] %v522_v40 }
  0xea   : > { %525 = vst [vmem:[%s1010_s3 + $0x8] sm:$0xff] %v523_v41 }
  0xeb PF: > { %s14_s16 = sadd.s32 1, %s866_s16   ;;  %s1011_s12 = smov %s854_s13 }
  0xec   : > { %p11_p12 = scmp.ge.s32.totalorder %s14_s16, 11   ;;  %s1012_s13 = smov %s924_s20 }
  0xed   : > { %s1013_s14 = smov %s862_s15  ;;  %s1014_s15 = smov %s1016_s17 }
  0xee   :  { %13 = sbr.rel (!%p11_p12) target bundleno = 3 (0x3), region = 127 }

// kernel: conv_unet_forward.34
= control target key start
LH: loop header
LB: loop body
LE: loop exit
PB: predicated region body
PF: predicated region fallthrough
CT: control target
= control target key end

     0   :  { %s90_s0 = inlined_call_operand.vmem [shape: bf16[16,256], index: 0, kind: input, shape index: {}]   ;;  %s91_s1 = inlined_call_operand.vmem [shape: f32[1,256], index: 1, kind: input, shape index: {}]   ;;  %s92_s2 = inlined_call_operand.vmem [shape: f32[1,256], index: 2, kind: input, shape index: {}]   ;;  %s93_s3 = inlined_call_operand.vmem [shape: bf16[16,256], index: 3, kind: output, shape index: {}]  }
   0x1   :  { %v14_v0 = vld [vmem:[%s90_s0] sm:$0xff]  ;;  %v15_v7 = vld [vmem:[%s90_s0 + $0x8] sm:$0xff] }
   0x2   :  { %v20_v1 = vld [vmem:[%s91_s1] sm:$0x3]  ;;  %v16_v3 = vunpack.c.l.bf16 %v14_v0  ;;  %v17_v4 = vunpack.c.h.bf16 %v14_v0  ;;  %v18_v10 = vunpack.c.l.bf16 %v15_v7  ;;  %v19_v11 = vunpack.c.h.bf16 %v15_v7 }
   0x3   :  { %v30_v2 = vld [vmem:[%s92_s2] sm:$0x3]  ;;  %v22_v5 = vperm.slane %v20_v1, 0  ;;  %v23_v6 = vperm.slane %v20_v1, 1 }
   0x4   :  { %v32_v8 = vperm.slane %v30_v2, 0  ;;  %v33_v9 = vperm.slane %v30_v2, 1 }
   0x5   :  { %v26_v12 = vmul.f32 %v22_v5, %v16_v3  ;;  %v27_v13 = vmul.f32 %v23_v6, %v17_v4  ;;  %v28_v14 = vmul.f32 %v22_v5, %v18_v10  ;;  %v29_v15 = vmul.f32 %v23_v6, %v19_v11 }
   0x7   :  { %v36_v16 = vadd.f32 %v32_v8, %v26_v12  ;;  %v37_v17 = vadd.f32 %v33_v9, %v27_v13  ;;  %v38_v18 = vadd.f32 %v32_v8, %v28_v14  ;;  %v39_v19 = vadd.f32 %v33_v9, %v29_v15 }
   0x9   :  { %v40_v20 = vmax.f32 %v36_v16, 0.0  ;;  %v41_v21 = vmax.f32 %v37_v17, 0.0  ;;  %v42_v22 = vmax.f32 %v38_v18, 0.0  ;;  %v43_v23 = vmax.f32 %v39_v19, 0.0 }
   0xb   :  { %v44_v24 = vpack.c.bf16 %v41_v21, %v40_v20  ;;  %v45_v25 = vpack.c.bf16 %v43_v23, %v42_v22 }
   0xd   :  { %46 = vst [vmem:[%s93_s3] sm:$0xff] %v44_v24 }
   0xe   :  { %47 = vst [vmem:[%s93_s3 + $0x8] sm:$0xff] %v45_v25 }

// kernel: conv_unet_forward.35
= control target key start
LH: loop header
LB: loop body
LE: loop exit
PB: predicated region body
PF: predicated region fallthrough
CT: control target
= control target key end

     0   :  { %s1569_s12 = smov 0   ;;  %s1571_s13 = smov 0   ;;  %s1816_s0 = inlined_call_operand.vmem [shape: bf16[16,2304], index: 0, kind: input, shape index: {}]   ;;  %s1817_s1 = inlined_call_operand.vmem [shape: bf16[2304,512], index: 1, kind: input, shape index: {}]   ;;  %s1818_s2 = inlined_call_operand.vmem [shape: bf16[16,512], index: 2, kind: output, shape index: {0}]   ;;  %s1819_s3 = inlined_call_operand.vmem [shape: f32[1,8,512], index: 3, kind: output, shape index: {1}]  }
   0x1   :  { %s1573_s14 = smov 0   ;;  %s1575_s15 = smov 0  }
   0x2   :  { %s1577_s16 = smov 0  }
   0x3 LB: > { %s26_s17 = sadd.s32 1, %s1542_s15  ;;  %p49_p1 = scmp.ne.s32.totalorder %s1534_s13, %s1530_s12  ;;  %s1546_s16 = sphi %s1577_s16, %s14_s16   ;;  %s1542_s15 = sphi %s1575_s15, %s1823_s15   ;;  %s1538_s14 = sphi %s1573_s14, %s1822_s14   ;;  %s1534_s13 = sphi %s1571_s13, %s1821_s13   ;;  %s1530_s12 = sphi %s1569_s12, %s1820_s12  }
   0x4   : > { %p27_p0 = scmp.ge.s32.totalorder %s26_s17, 9  ;;  %p50_p2 = scmp.eq.s32.totalorder %s1546_s16, 0 }
   0x5   : > { %s42_s19 = sadd.s32 1, %s1534_s13  ;;  %p1118_p5 = scmp.ge.s32.totalorder %s1546_s16, 9 }
   0x6   : > { %s1825_s17 = smov (%p27_p0, %s26_s17), 0  ;;  %p51_p3 = por %p50_p2, %p49_p1 }
   0x7   : > { %s38_s18 = ssub.s32 %s1542_s15, %s1825_s17  ;;  %159 = sbr.rel (%p1118_p5) target bundleno = 18 (0x12), region = 16 }
   0x8   : > { %p40_p4 = scmp.eq.s32.totalorder %s38_s18, 0 }
   0xa   : > { %s1604_s20 = scalar_select %p40_p4, %s1534_s13, %s42_s19  }
   0xc   : > { %162 = sbr.rel (!%p51_p3) target bundleno = 18 (0x12), region = 20  ;;  %s164_s21 = sand.u32 (%p51_p3), 1, %s1534_s13  }
   0xd   : > { %s1399_s22 = sshll.u32 (%p51_p3), %s1542_s15, 3  ;;  %s1119_s23 = sshll.u32 (%p51_p3), %s164_s21, 4 }
   0xe   : > { %s172_s26 = scalar_lea.vmem (%p51_p3), %s1816_s0, %s1399_s22  ;;  %s166_s27 = scalar_lea.vmem (%p51_p3), [#allocation3], %s1119_s23 }
   0xf   : > { %v203_v0 = vld [vmem:[%s172_s26] sm:$0xff] (%p51_p3)  ;;  %v205_v1 = vld [vmem:[%s172_s26 + $0x48] sm:$0xff] (%p51_p3) }
  0x10   : > { %204 = vst [vmem:[%s166_s27] sm:$0xff] (%p51_p3), %v203_v0 }
  0x11   : > { %206 = vst [vmem:[%s166_s27 + $0x8] sm:$0xff] %v205_v1 }
  0x12 PF: > { %p1122_p6 = scmp.ge.s32.totalorder %s1546_s16, 1  ;;  %p226_p7 = scmp.lt.s32.totalorder %s1546_s16, 10 }
  0x14   : > { %p227_p8 = pnand %p1122_p6, %p226_p7 }
  0x15   : > { %s233_s28 = sand.u32 (!%p227_p8), 1, %s1530_s12   ;;  %s1124_s29 = sshll.u32 (!%p227_p8), %s1538_s14, 5 }
  0x16   : > { %230 = sbr.rel (%p227_p8) target bundleno = 280 (0x118), region = 62  ;;  %s1123_s30 = sshll.u32 (!%p227_p8), %s233_s28, 4 }
  0x17   : > { %p284_p9 = scmp.lt.s32.totalorder (!%p227_p8), %s1124_s29, 287  ;;  %s1621_s8 = scalar_lea.vmem (!%p227_p8), [#allocation3], %s1123_s30 }
  0x18   : > { %p1127_p10 = scmp.ne.s32.totalorder (!%p227_p8), %s1538_s14, 0 }
  0x1b   : > { %s1827_s29 = smov (!%p284_p9, %s1124_s29), 287  ;;  %319 = sbr.rel (%p1127_p10) target bundleno = 41 (0x29), region = 70 }
  0x1c   : > { %s1400_s4 = sshll.u32 %s1827_s29, 4 }
  0x1d   : > { %s1619_s7 = scalar_lea.vmem %s1817_s1, %s1400_s4 }
  0x20   : > { %v1548_v2 = vmov 0.0  }
  0x21   : > { %320 = vst [vmem:[#allocation2 + $0x30] sm:$0xff] %v1548_v2 }
  0x22   : > { %321 = vst [vmem:[#allocation2] sm:$0xff] %v1548_v2 }
  0x23   : > { %322 = vst [vmem:[#allocation2 + $0x18] sm:$0xff] %v1548_v2 }
  0x24   : > { %323 = vst [vmem:[#allocation2 + $0x10] sm:$0xff] %v1548_v2 }
  0x25   : > { %324 = vst [vmem:[#allocation2 + $0x8] sm:$0xff] %v1548_v2 }
  0x26   : > { %325 = vst [vmem:[#allocation2 + $0x20] sm:$0xff] %v1548_v2 }
  0x27   : > { %326 = vst [vmem:[#allocation2 + $0x28] sm:$0xff] %v1548_v2 }
  0x28   : > { %327 = vst [vmem:[#allocation2 + $0x38] sm:$0xff] %v1548_v2 }
  0x29 PF: > { %v1250_v3 = vld [vmem:[%s1619_s7 + $0xe0] sm:$0xf]  ;;  %v1433_v4 = vld [vmem:[%s1619_s7 + $0xec] sm:$0xf0]  ;;  %v1431_v8 = vld [vmem:[%s1619_s7 + $0xe4] sm:$0xf] }
  0x2a   : > { %v1378_v5 = vld [vmem:[%s1619_s7 + $0x1e0] sm:$0xf]  ;;  %v1251_v6 = vor.u32 %v1433_v4, %v1250_v3  ;;  %v1465_v7 = vld [vmem:[%s1619_s7 + $0x1ec] sm:$0xf0]  ;;  %v1252_v9 = vld [vmem:[%s1619_s7 + $0xf0] sm:$0xf0] }
  0x2b   : > { %v1379_v10 = vor.u32 %v1465_v7, %v1378_v5  ;;  %v1255_v11 = vor.u32 %v1431_v8, %v1252_v9  ;;  %v1463_v12 = vld [vmem:[%s1619_s7 + $0x1e4] sm:$0xf]  ;;  %v1380_v13 = vld [vmem:[%s1619_s7 + $0x1f0] sm:$0xf0]  ;;  %v1234_v14 = vld [vmem:[%s1619_s7 + $0xc0] sm:$0xf] }
  0x2c   : > { %732 = vmatpush.bf16.msra.mxu0 %v1251_v6  ;;  %v1383_v15 = vor.u32 %v1463_v12, %v1380_v13  ;;  %v1429_v16 = vld [vmem:[%s1619_s7 + $0xcc] sm:$0xf0]  ;;  %v1362_v17 = vld [vmem:[%s1619_s7 + $0x1c0] sm:$0xf]  ;;  %v1427_v21 = vld [vmem:[%s1619_s7 + $0xc4] sm:$0xf] }
  0x2d   : > { %v1461_v18 = vld [vmem:[%s1619_s7 + $0x1cc] sm:$0xf0]  ;;  %746 = vmatpush.bf16.msra.mxu1 %v1379_v10  ;;  %760 = vmatpush.bf16.msra.mxu2 %v1255_v11  ;;  %v1235_v19 = vor.u32 %v1429_v16, %v1234_v14  ;;  %v1236_v22 = vld [vmem:[%s1619_s7 + $0xd0] sm:$0xf0]  ;;  %v1459_v23 = vld [vmem:[%s1619_s7 + $0x1c4] sm:$0xf] }
  0x2e   : > { %v1363_v20 = vor.u32 %v1461_v18, %v1362_v17  ;;  %774 = vmatpush.bf16.msra.mxu3 %v1383_v15  ;;  %v1239_v24 = vor.u32 %v1427_v21, %v1236_v22  ;;  %v1364_v25 = vld [vmem:[%s1619_s7 + $0x1d0] sm:$0xf0]  ;;  %v1218_v26 = vld [vmem:[%s1619_s7 + $0xa0] sm:$0xf]  ;;  %v1425_v27 = vld [vmem:[%s1619_s7 + $0xac] sm:$0xf0] }
  0x2f   : > { %v1367_v28 = vor.u32 %v1459_v23, %v1364_v25  ;;  %v1346_v29 = vld [vmem:[%s1619_s7 + $0x1a0] sm:$0xf]  ;;  %v1457_v30 = vld [vmem:[%s1619_s7 + $0x1ac] sm:$0xf0]  ;;  %v1423_v31 = vld [vmem:[%s1619_s7 + $0xa4] sm:$0xf]  ;;  %v1219_v32 = vor.u32 %v1425_v27, %v1218_v26 }
  0x30   : > { %733 = vmatpush.bf16.msra.mxu0 %v1235_v19  ;;  %v1220_v33 = vld [vmem:[%s1619_s7 + $0xb0] sm:$0xf0]  ;;  %v1455_v34 = vld [vmem:[%s1619_s7 + $0x1a4] sm:$0xf]  ;;  %v1347_v36 = vor.u32 %v1457_v30, %v1346_v29  ;;  %v1202_v38 = vld [vmem:[%s1619_s7 + $0x80] sm:$0xf] }
  0x31   : > { %v1348_v35 = vld [vmem:[%s1619_s7 + $0x1b0] sm:$0xf0]  ;;  %747 = vmatpush.bf16.msra.mxu1 %v1363_v20  ;;  %761 = vmatpush.bf16.msra.mxu2 %v1239_v24  ;;  %v1223_v37 = vor.u32 %v1423_v31, %v1220_v33  ;;  %v1421_v39 = vld [vmem:[%s1619_s7 + $0x8c] sm:$0xf0]  ;;  %v1330_v40 = vld [vmem:[%s1619_s7 + $0x180] sm:$0xf] }
  0x32   : > { %775 = vmatpush.bf16.msra.mxu3 %v1367_v28  ;;  %v1351_v41 = vor.u32 %v1455_v34, %v1348_v35  ;;  %v1453_v42 = vld [vmem:[%s1619_s7 + $0x18c] sm:$0xf0]  ;;  %v1419_v43 = vld [vmem:[%s1619_s7 + $0x84] sm:$0xf]  ;;  %v1204_v44 = vld [vmem:[%s1619_s7 + $0x90] sm:$0xf0]  ;;  %v1203_v47 = vor.u32 %v1421_v39, %v1202_v38 }
  0x33   : > { %v1451_v45 = vld [vmem:[%s1619_s7 + $0x184] sm:$0xf]  ;;  %v1332_v46 = vld [vmem:[%s1619_s7 + $0x190] sm:$0xf0]  ;;  %v1331_v48 = vor.u32 %v1453_v42, %v1330_v40  ;;  %v1207_v49 = vor.u32 %v1419_v43, %v1204_v44  ;;  %v1186_v50 = vld [vmem:[%s1619_s7 + $0x60] sm:$0xf] }
  0x34   : > { %734 = vmatpush.bf16.msra.mxu0 %v1219_v32  ;;  %v1417_v51 = vld [vmem:[%s1619_s7 + $0x6c] sm:$0xf0]  ;;  %v1314_v52 = vld [vmem:[%s1619_s7 + $0x160] sm:$0xf]  ;;  %v1335_v53 = vor.u32 %v1451_v45, %v1332_v46  ;;  %v1415_v55 = vld [vmem:[%s1619_s7 + $0x64] sm:$0xf] }
  0x35   : > { %748 = vmatpush.bf16.msra.mxu1 %v1347_v36  ;;  %762 = vmatpush.bf16.msra.mxu2 %v1223_v37  ;;  %v1449_v54 = vld [vmem:[%s1619_s7 + $0x16c] sm:$0xf0]  ;;  %v1188_v56 = vld [vmem:[%s1619_s7 + $0x70] sm:$0xf0]  ;;  %v1447_v57 = vld [vmem:[%s1619_s7 + $0x164] sm:$0xf]  ;;  %v1187_v59 = vor.u32 %v1417_v51, %v1186_v50 }
  0x36   : > { %776 = vmatpush.bf16.msra.mxu3 %v1351_v41  ;;  %v1316_v58 = vld [vmem:[%s1619_s7 + $0x170] sm:$0xf0]  ;;  %v1315_v60 = vor.u32 %v1449_v54, %v1314_v52  ;;  %v1191_v61 = vor.u32 %v1415_v55, %v1188_v56  ;;  %v1170_v62 = vld [vmem:[%s1619_s7 + $0x40] sm:$0xf]  ;;  %v1413_v63 = vld [vmem:[%s1619_s7 + $0x4c] sm:$0xf0] }
  0x37   : > { %v1298_v0 = vld [vmem:[%s1619_s7 + $0x140] sm:$0xf]  ;;  %v1319_v1 = vor.u32 %v1447_v57, %v1316_v58  ;;  %v1445_v2 = vld [vmem:[%s1619_s7 + $0x14c] sm:$0xf0]  ;;  %v1411_v3 = vld [vmem:[%s1619_s7 + $0x44] sm:$0xf]  ;;  %v1171_v7 = vor.u32 %v1413_v63, %v1170_v62 }
  0x38   : > { %735 = vmatpush.bf16.msra.mxu0 %v1203_v47  ;;  %v1172_v4 = vld [vmem:[%s1619_s7 + $0x50] sm:$0xf0]  ;;  %v1443_v5 = vld [vmem:[%s1619_s7 + $0x144] sm:$0xf]  ;;  %v1299_v8 = vor.u32 %v1445_v2, %v1298_v0  ;;  %v1154_v10 = vld [vmem:[%s1619_s7 + $0x20] sm:$0xf] }
  0x39   : > { %749 = vmatpush.bf16.msra.mxu1 %v1331_v48  ;;  %763 = vmatpush.bf16.msra.mxu2 %v1207_v49  ;;  %v1300_v6 = vld [vmem:[%s1619_s7 + $0x150] sm:$0xf0]  ;;  %v1175_v9 = vor.u32 %v1411_v3, %v1172_v4  ;;  %v1409_v11 = vld [vmem:[%s1619_s7 + $0x2c] sm:$0xf0]  ;;  %v1282_v12 = vld [vmem:[%s1619_s7 + $0x120] sm:$0xf] }
  0x3a   : > { %777 = vmatpush.bf16.msra.mxu3 %v1335_v53  ;;  %v1303_v13 = vor.u32 %v1443_v5, %v1300_v6  ;;  %v1441_v14 = vld [vmem:[%s1619_s7 + $0x12c] sm:$0xf0]  ;;  %v1407_v15 = vld [vmem:[%s1619_s7 + $0x24] sm:$0xf]  ;;  %v1156_v16 = vld [vmem:[%s1619_s7 + $0x30] sm:$0xf0]  ;;  %v1155_v19 = vor.u32 %v1409_v11, %v1154_v10 }
  0x3b   : > { %v1439_v17 = vld [vmem:[%s1619_s7 + $0x124] sm:$0xf]  ;;  %v1284_v18 = vld [vmem:[%s1619_s7 + $0x130] sm:$0xf0]  ;;  %v1138_v20 = vld [vmem:[%s1619_s7] sm:$0xf]  ;;  %v1283_v23 = vor.u32 %v1441_v14, %v1282_v12  ;;  %v1159_v24 = vor.u32 %v1407_v15, %v1156_v16 }
  0x3c   : > { %736 = vmatpush.bf16.msra.mxu0 %v1187_v59  ;;  %v1405_v21 = vld [vmem:[%s1619_s7 + $0xc] sm:$0xf0]  ;;  %v1266_v22 = vld [vmem:[%s1619_s7 + $0x100] sm:$0xf]  ;;  %v1403_v26 = vld [vmem:[%s1619_s7 + $0x4] sm:$0xf]  ;;  %v1287_v28 = vor.u32 %v1439_v17, %v1284_v18 }
  0x3d   : > { %750 = vmatpush.bf16.msra.mxu1 %v1315_v60  ;;  %764 = vmatpush.bf16.msra.mxu2 %v1191_v61  ;;  %v1437_v25 = vld [vmem:[%s1619_s7 + $0x10c] sm:$0xf0]  ;;  %v1140_v27 = vld [vmem:[%s1619_s7 + $0x10] sm:$0xf0]  ;;  %v1435_v29 = vld [vmem:[%s1619_s7 + $0x104] sm:$0xf]  ;;  %v1139_v35 = vor.u32 %v1405_v21, %v1138_v20 }
  0x3e   : > { %778 = vmatpush.bf16.msra.mxu3 %v1319_v1  ;;  %v1268_v30 = vld [vmem:[%s1619_s7 + $0x110] sm:$0xf0]  ;;  %v1258_v31 = vld [vmem:[%s1619_s7 + $0xe8] sm:$0xf]  ;;  %v1434_v32 = vld [vmem:[%s1619_s7 + $0xf4] sm:$0xf0]  ;;  %v1267_v39 = vor.u32 %v1437_v25, %v1266_v22  ;;  %v1143_v40 = vor.u32 %v1403_v26, %v1140_v27 }
  0x3f   : > { %v1386_v33 = vld [vmem:[%s1619_s7 + $0x1e8] sm:$0xf]  ;;  %v1466_v34 = vld [vmem:[%s1619_s7 + $0x1f4] sm:$0xf0]  ;;  %v1432_v36 = vld [vmem:[%s1619_s7 + $0xec] sm:$0xf]  ;;  %v1271_v44 = vor.u32 %v1435_v29, %v1268_v30  ;;  %v1259_v45 = vor.u32 %v1434_v32, %v1258_v31 }
  0x40   : > { %737 = vmatpush.bf16.msra.mxu0 %v1171_v7  ;;  %v1260_v37 = vld [vmem:[%s1619_s7 + $0xf8] sm:$0xf0]  ;;  %v1464_v38 = vld [vmem:[%s1619_s7 + $0x1ec] sm:$0xf]  ;;  %v1130_v42 = vld [vmem:[%s1621_s8] sm:$0xf]  ;;  %v1387_v48 = vor.u32 %v1466_v34, %v1386_v33 }
  0x41   : > { %751 = vmatpush.bf16.msra.mxu1 %v1299_v8  ;;  %765 = vmatpush.bf16.msra.mxu2 %v1175_v9  ;;  %v1388_v41 = vld [vmem:[%s1619_s7 + $0x1f8] sm:$0xf0]  ;;  %v1402_v43 = vld [vmem:[%s1621_s8 + $0x4] sm:$0xf0]  ;;  %v1401_v46 = vld [vmem:[%s1621_s8 + $0x4] sm:$0xf]  ;;  %v1263_v49 = vor.u32 %v1432_v36, %v1260_v37 }
  0x42   : > { %779 = vmatpush.bf16.msra.mxu3 %v1303_v13  ;;  %v1132_v47 = vld [vmem:[%s1621_s8 + $0x8] sm:$0xf0]  ;;  %v1242_v50 = vld [vmem:[%s1619_s7 + $0xc8] sm:$0xf]  ;;  %v1430_v51 = vld [vmem:[%s1619_s7 + $0xd4] sm:$0xf0]  ;;  %v1391_v53 = vor.u32 %v1464_v38, %v1388_v41  ;;  %v1706_v57 = vor.u32 %v1402_v43, %v1130_v42 }
  0x43   : > { %v1370_v52 = vld [vmem:[%s1619_s7 + $0x1c8] sm:$0xf]  ;;  %v1462_v54 = vld [vmem:[%s1619_s7 + $0x1d4] sm:$0xf0]  ;;  %v1428_v55 = vld [vmem:[%s1619_s7 + $0xcc] sm:$0xf]  ;;  %v1710_v60 = vor.u32 %v1401_v46, %v1132_v47  ;;  %v1243_v61 = vor.u32 %v1430_v51, %v1242_v50 }
  0x44   : > { %738 = vmatpush.bf16.msra.mxu0 %v1155_v19  ;;  %v1244_v56 = vld [vmem:[%s1619_s7 + $0xd8] sm:$0xf0]  ;;  %v1460_v58 = vld [vmem:[%s1619_s7 + $0x1cc] sm:$0xf]  ;;  %v1371_v62 = vor.u32 %v1462_v54, %v1370_v52  ;;  %v1226_v0 = vld [vmem:[%s1619_s7 + $0xa8] sm:$0xf] }
  0x45   : > { %752 = vmatpush.bf16.msra.mxu1 %v1283_v23  ;;  %766 = vmatpush.bf16.msra.mxu2 %v1159_v24  ;;  %v1372_v59 = vld [vmem:[%s1619_s7 + $0x1d8] sm:$0xf0]  ;;  %v1247_v63 = vor.u32 %v1428_v55, %v1244_v56  ;;  %v1426_v1 = vld [vmem:[%s1619_s7 + $0xb4] sm:$0xf0]  ;;  %v1354_v2 = vld [vmem:[%s1619_s7 + $0x1a8] sm:$0xf] }
  0x46   : > { %780 = vmatpush.bf16.msra.mxu3 %v1287_v28  ;;  %v1375_v3 = vor.u32 %v1460_v58, %v1372_v59  ;;  %v1458_v4 = vld [vmem:[%s1619_s7 + $0x1b4] sm:$0xf0]  ;;  %v1424_v5 = vld [vmem:[%s1619_s7 + $0xac] sm:$0xf]  ;;  %v1228_v6 = vld [vmem:[%s1619_s7 + $0xb8] sm:$0xf0]  ;;  %v1227_v9 = vor.u32 %v1426_v1, %v1226_v0 }
  0x47   : > { %v1456_v7 = vld [vmem:[%s1619_s7 + $0x1ac] sm:$0xf]  ;;  %v1356_v8 = vld [vmem:[%s1619_s7 + $0x1b8] sm:$0xf0]  ;;  %v1355_v10 = vor.u32 %v1458_v4, %v1354_v2  ;;  %v1231_v11 = vor.u32 %v1424_v5, %v1228_v6  ;;  %v1210_v12 = vld [vmem:[%s1619_s7 + $0x88] sm:$0xf] }
  0x48   : > { %739 = vmatpush.bf16.msra.mxu0 %v1139_v35  ;;  %v1422_v13 = vld [vmem:[%s1619_s7 + $0x94] sm:$0xf0]  ;;  %v1338_v14 = vld [vmem:[%s1619_s7 + $0x188] sm:$0xf]  ;;  %v1359_v15 = vor.u32 %v1456_v7, %v1356_v8  ;;  %v1420_v17 = vld [vmem:[%s1619_s7 + $0x8c] sm:$0xf] }
  0x49   : > { %753 = vmatpush.bf16.msra.mxu1 %v1267_v39  ;;  %767 = vmatpush.bf16.msra.mxu2 %v1143_v40  ;;  %v1454_v16 = vld [vmem:[%s1619_s7 + $0x194] sm:$0xf0]  ;;  %v1212_v18 = vld [vmem:[%s1619_s7 + $0x98] sm:$0xf0]  ;;  %v1452_v19 = vld [vmem:[%s1619_s7 + $0x18c] sm:$0xf]  ;;  %v1211_v21 = vor.u32 %v1422_v13, %v1210_v12 }
  0x4a   : > { %781 = vmatpush.bf16.msra.mxu3 %v1271_v44  ;;  %v1340_v20 = vld [vmem:[%s1619_s7 + $0x198] sm:$0xf0]  ;;  %v1339_v22 = vor.u32 %v1454_v16, %v1338_v14  ;;  %v1215_v23 = vor.u32 %v1420_v17, %v1212_v18  ;;  %v1194_v24 = vld [vmem:[%s1619_s7 + $0x68] sm:$0xf]  ;;  %v1418_v25 = vld [vmem:[%s1619_s7 + $0x74] sm:$0xf0] }
  0x4b   : > { %740 = vmatmul.bf16.vlgmr.msra.gmra.mxu0 %v1706_v57  ;;  %v1322_v26 = vld [vmem:[%s1619_s7 + $0x168] sm:$0xf]  ;;  %v1343_v27 = vor.u32 %v1452_v19, %v1340_v20  ;;  %v1450_v28 = vld [vmem:[%s1619_s7 + $0x174] sm:$0xf0]  ;;  %v1416_v29 = vld [vmem:[%s1619_s7 + $0x6c] sm:$0xf]  ;;  %v1195_v33 = vor.u32 %v1418_v25, %v1194_v24 }
  0x4c   : > { %788 = vmatpush.bf16.msrb.mxu0 %v1259_v45  ;;  %768 = vmatmul.bf16.vlgmr.msra.gmra.mxu2 %v1706_v57  ;;  %v1196_v30 = vld [vmem:[%s1619_s7 + $0x78] sm:$0xf0]  ;;  %v1448_v31 = vld [vmem:[%s1619_s7 + $0x16c] sm:$0xf]  ;;  %v1323_v34 = vor.u32 %v1450_v28, %v1322_v26  ;;  %v1178_v36 = vld [vmem:[%s1619_s7 + $0x48] sm:$0xf] }
  0x4d   : > { %802 = vmatpush.bf16.msrb.mxu1 %v1387_v48  ;;  %816 = vmatpush.bf16.msrb.mxu2 %v1263_v49  ;;  %v1324_v32 = vld [vmem:[%s1619_s7 + $0x178] sm:$0xf0]  ;;  %v1199_v35 = vor.u32 %v1416_v29, %v1196_v30  ;;  %v1414_v37 = vld [vmem:[%s1619_s7 + $0x54] sm:$0xf0]  ;;  %v1306_v38 = vld [vmem:[%s1619_s7 + $0x148] sm:$0xf] }
  0x4e   : > { %830 = vmatpush.bf16.msrb.mxu3 %v1391_v53  ;;  %754 = vmatmul.bf16.vlgmr.msra.gmra.mxu1 %v1710_v60  ;;  %v1327_v39 = vor.u32 %v1448_v31, %v1324_v32  ;;  %v1446_v40 = vld [vmem:[%s1619_s7 + $0x154] sm:$0xf0]  ;;  %v1412_v41 = vld [vmem:[%s1619_s7 + $0x4c] sm:$0xf]  ;;  %v1180_v42 = vld [vmem:[%s1619_s7 + $0x58] sm:$0xf0]  ;;  %v1179_v45 = vor.u32 %v1414_v37, %v1178_v36 }
  0x4f   : > { %782 = vmatmul.bf16.vlgmr.msra.gmra.mxu3 %v1710_v60  ;;  %v1444_v43 = vld [vmem:[%s1619_s7 + $0x14c] sm:$0xf]  ;;  %v1308_v44 = vld [vmem:[%s1619_s7 + $0x158] sm:$0xf0]  ;;  %v1307_v46 = vor.u32 %v1446_v40, %v1306_v38  ;;  %v1183_v47 = vor.u32 %v1412_v41, %v1180_v42  ;;  %v1162_v48 = vld [vmem:[%s1619_s7 + $0x28] sm:$0xf] }
  0x50   : > { %789 = vmatpush.bf16.msrb.mxu0 %v1243_v61  ;;  %v1410_v49 = vld [vmem:[%s1619_s7 + $0x34] sm:$0xf0]  ;;  %v1290_v50 = vld [vmem:[%s1619_s7 + $0x128] sm:$0xf]  ;;  %v1311_v51 = vor.u32 %v1444_v43, %v1308_v44  ;;  %v1408_v53 = vld [vmem:[%s1619_s7 + $0x2c] sm:$0xf] }
  0x51   : > { %803 = vmatpush.bf16.msrb.mxu1 %v1371_v62  ;;  %817 = vmatpush.bf16.msrb.mxu2 %v1247_v63  ;;  %v1442_v52 = vld [vmem:[%s1619_s7 + $0x134] sm:$0xf0]  ;;  %v1164_v54 = vld [vmem:[%s1619_s7 + $0x38] sm:$0xf0]  ;;  %v1440_v55 = vld [vmem:[%s1619_s7 + $0x12c] sm:$0xf]  ;;  %v1163_v58 = vor.u32 %v1410_v49, %v1162_v48 }
  0x52   : > { %831 = vmatpush.bf16.msrb.mxu3 %v1375_v3  ;;  %v1292_v56 = vld [vmem:[%s1619_s7 + $0x138] sm:$0xf0]  ;;  %v1291_v59 = vor.u32 %v1442_v52, %v1290_v50  ;;  %v1167_v61 = vor.u32 %v1408_v53, %v1164_v54  ;;  %v1146_v62 = vld [vmem:[%s1619_s7 + $0x8] sm:$0xf]  ;;  %v1406_v63 = vld [vmem:[%s1619_s7 + $0x14] sm:$0xf0] }
  0x53   : > { %v1274_v0 = vld [vmem:[%s1619_s7 + $0x108] sm:$0xf]  ;;  %v1295_v1 = vor.u32 %v1440_v55, %v1292_v56  ;;  %v1438_v2 = vld [vmem:[%s1619_s7 + $0x114] sm:$0xf0]  ;;  %v1404_v3 = vld [vmem:[%s1619_s7 + $0xc] sm:$0xf]  ;;  %v1147_v7 = vor.u32 %v1406_v63, %v1146_v62 }
  0x54   : > { %790 = vmatpush.bf16.msrb.mxu0 %v1227_v9  ;;  %v1148_v4 = vld [vmem:[%s1619_s7 + $0x18] sm:$0xf0]  ;;  %v1436_v5 = vld [vmem:[%s1619_s7 + $0x10c] sm:$0xf]  ;;  %v1275_v8 = vor.u32 %v1438_v2, %v1274_v0  ;;  %v328_v12 = vld [vmem:[#allocation2 + $0x30] sm:$0xff]  ;;  %p1392_p11 = scmp.ne.s32.totalorder %s1538_s14, 8 }
  0x55   : > { %804 = vmatpush.bf16.msrb.mxu1 %v1355_v10  ;;  %818 = vmatpush.bf16.msrb.mxu2 %v1231_v11  ;;  %v1276_v6 = vld [vmem:[%s1619_s7 + $0x118] sm:$0xf0]  ;;  %v1151_v9 = vor.u32 %v1404_v3, %v1148_v4  ;;  %v329_v17 = vld [vmem:[#allocation2] sm:$0xff] }
  0x56   : > { %832 = vmatpush.bf16.msrb.mxu3 %v1359_v15  ;;  %v1279_v10 = vor.u32 %v1436_v5, %v1276_v6  ;;  %v330_v30 = vld [vmem:[#allocation2 + $0x18] sm:$0xff] }
  0x58   : > { %791 = vmatpush.bf16.msrb.mxu0 %v1211_v21 }
  0x59   : > { %805 = vmatpush.bf16.msrb.mxu1 %v1339_v22  ;;  %819 = vmatpush.bf16.msrb.mxu2 %v1215_v23  ;;  %v332_v22 = vld [vmem:[#allocation2 + $0x8] sm:$0xff] }
  0x5a   : > { %833 = vmatpush.bf16.msrb.mxu3 %v1343_v27 }
  0x5c   : > { %792 = vmatpush.bf16.msrb.mxu0 %v1195_v33 }
  0x5d   : > { %806 = vmatpush.bf16.msrb.mxu1 %v1323_v34  ;;  %820 = vmatpush.bf16.msrb.mxu2 %v1199_v35  ;;  %v331_v35 = vld [vmem:[#allocation2 + $0x10] sm:$0xff] }
  0x5e   : > { %834 = vmatpush.bf16.msrb.mxu3 %v1327_v39  ;;  %v334_v39 = vld [vmem:[#allocation2 + $0x28] sm:$0xff] }
  0x60   : > { %793 = vmatpush.bf16.msrb.mxu0 %v1179_v45  ;;  %v335_v45 = vld [vmem:[#allocation2 + $0x38] sm:$0xff] }
  0x61   : > { %807 = vmatpush.bf16.msrb.mxu1 %v1307_v46  ;;  %821 = vmatpush.bf16.msrb.mxu2 %v1183_v47 }
  0x62   : > { %835 = vmatpush.bf16.msrb.mxu3 %v1311_v51 }
  0x64   : > { %794 = vmatpush.bf16.msrb.mxu0 %v1163_v58 }
  0x65   : > { %808 = vmatpush.bf16.msrb.mxu1 %v1291_v59  ;;  %822 = vmatpush.bf16.msrb.mxu2 %v1167_v61 }
  0x66   : > { %836 = vmatpush.bf16.msrb.mxu3 %v1295_v1 }
  0x68   : > { %795 = vmatpush.bf16.msrb.mxu0 %v1147_v7 }
  0x69   : > { %809 = vmatpush.bf16.msrb.mxu1 %v1275_v8  ;;  %823 = vmatpush.bf16.msrb.mxu2 %v1151_v9 }
  0x6a   : > { %837 = vmatpush.bf16.msrb.mxu3 %v1279_v10 }
  0x6b   : > { %796 = vmatmul.bf16.vlgmr.msrb.gmra.mxu0 %v1706_v57 }
  0x6c   : > { %810 = vmatmul.bf16.vlgmr.msrb.gmra.mxu1 %v1710_v60  ;;  %824 = vmatmul.bf16.vlgmr.msrb.gmra.mxu2 %v1706_v57 }
  0x6d   : > { %838 = vmatmul.bf16.vlgmr.msrb.gmra.mxu3 %v1710_v60  ;;  %v333_v60 = vld [vmem:[#allocation2 + $0x20] sm:$0xff] }
  0xc8   : > { %v741_v11 = vpop.f32.mrf.mxu0 }
  0xcb   : > { %v755_v13 = vpop.f32.mrf.mxu1 }
  0xcc   : > { %v756_v14 = vadd.f32 %v755_v13, %v741_v11 }
  0xce   : > { %v844_v15 = vadd.f32 %v756_v14, %v328_v12 }
  0xcf   : > { %v769_v16 = vpop.f32.mrf.mxu2 }
  0xd0   : > { %852 = vst [vmem:[#allocation2 + $0x30] sm:$0xff] %v844_v15  ;;  %v743_v20 = vpop.f32.mrf.mxu0 }
  0xd2   : > { %v783_v18 = vpop.f32.mrf.mxu3 }
  0xd3   : > { %v784_v19 = vadd.f32 %v783_v18, %v769_v16  ;;  %v757_v23 = vpop.f32.mrf.mxu1 }
  0xd4   : > { %v758_v24 = vadd.f32 %v757_v23, %v743_v20 }
  0xd5   : > { %v845_v21 = vadd.f32 %v784_v19, %v329_v17 }
  0xd6   : > { %v848_v25 = vadd.f32 %v758_v24, %v332_v22 }
  0xd7   : > { %853 = vst [vmem:[#allocation2] sm:$0xff] %v845_v21  ;;  %v771_v57 = vpop.f32.mrf.mxu2 }
  0xd8   : > { %856 = vst [vmem:[#allocation2 + $0x8] sm:$0xff] %v848_v25 }
  0xda   : > { %v785_v26 = vpop.f32.mrf.mxu3 }
  0xdb   : > { %v786_v27 = vadd.f32 %v785_v26, %v771_v57 }
  0xdd   : > { %v849_v28 = vadd.f32 %v786_v27, %v333_v60 }
  0xdf   : > { %857 = vst [vmem:[#allocation2 + $0x20] sm:$0xff] %v849_v28 }
  0xe8   : > { %v797_v29 = vpop.f32.mrf.mxu0 }
  0xe9   : > { %v811_v31 = vpop.f32.mrf.mxu1 }
  0xea   : > { %v812_v32 = vadd.f32 %v811_v31, %v797_v29 }
  0xec   : > { %v846_v33 = vadd.f32 %v812_v32, %v330_v30 }
  0xee   : > { %854 = vst [vmem:[#allocation2 + $0x18] sm:$0xff] %v846_v33 }
  0xef   : > { %v825_v34 = vpop.f32.mrf.mxu2 }
  0xf0   : > { %v839_v36 = vpop.f32.mrf.mxu3  ;;  %v799_v37 = vpop.f32.mrf.mxu0 }
  0xf1   : > { %v840_v38 = vadd.f32 %v839_v36, %v825_v34  ;;  %v813_v40 = vpop.f32.mrf.mxu1 }
  0xf2   : > { %v814_v41 = vadd.f32 %v813_v40, %v799_v37 }
  0xf3   : > { %v847_v42 = vadd.f32 %v840_v38, %v331_v35 }
  0xf4   : > { %v850_v43 = vadd.f32 %v814_v41, %v334_v39 }
  0xf5   : > { %855 = vst [vmem:[#allocation2 + $0x10] sm:$0xff] %v847_v42 }
  0xf6   : > { %858 = vst [vmem:[#allocation2 + $0x28] sm:$0xff] %v850_v43 }
  0xf7   : > { %v827_v44 = vpop.f32.mrf.mxu2 }
  0xf8   : > { %v841_v46 = vpop.f32.mrf.mxu3 }
  0xf9   : > { %v842_v47 = vadd.f32 %v841_v46, %v827_v44  ;;  %863 = sbr.rel (%p1392_p11) target bundleno = 280 (0x118), region = 74 }
  0xfb   : > { %v851_v48 = vadd.f32 %v842_v47, %v335_v45 }
  0xfd   : > { %859 = vst [vmem:[#allocation2 + $0x38] sm:$0xff] %v851_v48 }
  0xfe   : > { %v864_v49 = vld [vmem:[#allocation2 + $0x30] sm:$0xff]  ;;  %v865_v50 = vld [vmem:[#allocation2] sm:$0xff]  ;;  %v866_v51 = vld [vmem:[#allocation2 + $0x18] sm:$0xff]  ;;  %vm944_vm0 = vcmask 1040384   ;;  %vm949_vm1 = vcmask 1041408  }
  0xff   : > { %v872_v52 = vpack.c.bf16 %v865_v50, %v864_v49  ;;  %v908_v53 = vmul.f32 %v864_v49, %v864_v49  ;;  %v909_v54 = vmul.f32 %v865_v50, %v865_v50  ;;  %v867_v55 = vld [vmem:[#allocation2 + $0x10] sm:$0xff]  ;;  %v910_v56 = vmul.f32 %v866_v51, %v866_v51  ;;  %v868_v58 = vld [vmem:[#allocation2 + $0x8] sm:$0xff]  ;;  %v869_v59 = vld [vmem:[#allocation2 + $0x20] sm:$0xff] }
 0x100   : > { %v873_v61 = vpack.c.bf16 %v867_v55, %v866_v51  ;;  %v911_v62 = vmul.f32 %v867_v55, %v867_v55  ;;  %v874_v63 = vpack.c.bf16 %v869_v59, %v868_v58  ;;  %v880_v0 = vadd.f32 %v868_v58, %v864_v49  ;;  %v870_v1 = vld [vmem:[#allocation2 + $0x28] sm:$0xff] }
 0x101   : > { %876 = vst [vmem:[%s1818_s2] sm:$0xff] %v872_v52  ;;  %v887_v3 = vadd.f32 %v869_v59, %v865_v50  ;;  %v912_v4 = vmul.f32 %v868_v58, %v868_v58  ;;  %v913_v5 = vmul.f32 %v869_v59, %v869_v59  ;;  %v894_v8 = vadd.f32 %v870_v1, %v866_v51 }
 0x102   : > { %877 = vst [vmem:[%s1818_s2 + $0x8] sm:$0xff] %v873_v61  ;;  %v881_v7 = vrot.slane %v880_v0, 4  ;;  %v914_v10 = vmul.f32 %v870_v1, %v870_v1 }
 0x103   : > { %878 = vst [vmem:[%s1818_s2 + $0x10] sm:$0xff] %v874_v63  ;;  %v888_v11 = vrot.slane %v887_v3, 4  ;;  %v916_v12 = vadd.f32 %v912_v4, %v908_v53  ;;  %v923_v13 = vadd.f32 %v913_v5, %v909_v54  ;;  %v895_v16 = vrot.slane %v894_v8, 4 }
 0x104   : > { %v871_v2 = vld [vmem:[#allocation2 + $0x38] sm:$0xff]  ;;  %v882_v15 = vadd.f32 %v881_v7, %v880_v0  ;;  %v930_v18 = vadd.f32 %v914_v10, %v910_v56 }
 0x105   : > { %v875_v6 = vpack.c.bf16 %v871_v2, %v870_v1  ;;  %v901_v9 = vadd.f32 %v871_v2, %v867_v55  ;;  %v915_v14 = vmul.f32 %v871_v2, %v871_v2  ;;  %v889_v19 = vadd.f32 %v888_v11, %v887_v3 }
 0x106   : > { %v917_v20 = vrot.slane %v916_v12, 4  ;;  %v924_v21 = vrot.slane %v923_v13, 4  ;;  %v883_v23 = vrot.slane %v882_v15, 2  ;;  %v896_v24 = vadd.f32 %v895_v16, %v894_v8 }
 0x107   : > { %879 = vst [vmem:[%s1818_s2 + $0x18] sm:$0xff] %v875_v6  ;;  %v902_v17 = vrot.slane %v901_v9, 4  ;;  %v937_v22 = vadd.f32 %v915_v14, %v911_v62  ;;  %v931_v57 = vrot.slane %v930_v18, 4  ;;  %v890_v60 = vrot.slane %v889_v19, 2 }
 0x108   : > { %v918_v26 = vadd.f32 %v917_v20, %v916_v12  ;;  %v925_v27 = vadd.f32 %v924_v21, %v923_v13  ;;  %v897_v29 = vrot.slane %v896_v24, 2  ;;  %v884_v32 = vadd.f32 %v883_v23, %v882_v15 }
 0x109   : > { %v903_v25 = vadd.f32 %v902_v17, %v901_v9  ;;  %v938_v28 = vrot.slane %v937_v22, 4  ;;  %v932_v31 = vadd.f32 %v931_v57, %v930_v18  ;;  %v891_v35 = vadd.f32 %v890_v60, %v889_v19 }
 0x10a   : > { %v919_v34 = vrot.slane %v918_v26, 2  ;;  %v926_v36 = vrot.slane %v925_v27, 2  ;;  %v885_v37 = vrot.slane %v884_v32, 1  ;;  %v898_v38 = vadd.f32 %v897_v29, %v896_v24 }
 0x10b   : > { %v904_v30 = vrot.slane %v903_v25, 2  ;;  %v939_v33 = vadd.f32 %v938_v28, %v937_v22  ;;  %v933_v39 = vrot.slane %v932_v31, 2  ;;  %v892_v42 = vrot.slane %v891_v35, 1 }
 0x10c   : > { %v920_v41 = vadd.f32 %v919_v34, %v918_v26  ;;  %v927_v43 = vadd.f32 %v926_v36, %v925_v27  ;;  %v886_v45 = vadd.f32 %v885_v37, %v884_v32  ;;  %v899_v46 = vrot.slane %v898_v38, 1 }
 0x10d   : > { %v905_v40 = vadd.f32 %v904_v30, %v903_v25  ;;  %v940_v44 = vrot.slane %v939_v33, 2  ;;  %v934_v47 = vadd.f32 %v933_v39, %v932_v31  ;;  %v893_v50 = vadd.f32 %v892_v42, %v891_v35 }
 0x10e   : > { %v921_v49 = vrot.slane %v920_v41, 1  ;;  %v928_v51 = vrot.slane %v927_v43, 1  ;;  %v900_v53 = vadd.f32 %v899_v46, %v898_v38 }
 0x10f   : > { %v906_v48 = vrot.slane %v905_v40, 1  ;;  %v941_v52 = vadd.f32 %v940_v44, %v939_v33  ;;  %v935_v54 = vrot.slane %v934_v47, 1 }
 0x110   : > { %v922_v55 = vadd.f32 %v921_v49, %v920_v41  ;;  %v929_v56 = vadd.f32 %v928_v51, %v927_v43 }
 0x111   : > { %v907_v58 = vadd.f32 %v906_v48, %v905_v40  ;;  %v942_v59 = vrot.slane %v941_v52, 1  ;;  %v936_v61 = vadd.f32 %v935_v54, %v934_v47 }
 0x112   : > { %v945_v62 = vsel %vm944_vm0, %v886_v45, %v922_v55  ;;  %v946_v63 = vsel %vm944_vm0, %v893_v50, %v929_v56 }
 0x113   : > { %v943_v0 = vadd.f32 %v942_v59, %v941_v52  ;;  %v950_v1 = vsel %vm949_vm1, %v945_v62, 0.0  ;;  %v951_v2 = vsel %vm949_vm1, %v946_v63, 0.0  ;;  %v947_v3 = vsel %vm944_vm0, %v900_v53, %v936_v61 }
 0x114   : > { %954 = vst [vmem:[%s1819_s3] sm:$0xff] %v950_v1  ;;  %v952_v4 = vsel %vm949_vm1, %v947_v3, 0.0 }
 0x115   : > { %v948_v5 = vsel %vm944_vm0, %v907_v58, %v943_v0  ;;  %955 = vst [vmem:[%s1819_s3 + $0x8] sm:$0xff] %v951_v2 }
 0x116   : > { %v953_v6 = vsel %vm949_vm1, %v948_v5, 0.0  ;;  %956 = vst [vmem:[%s1819_s3 + $0x10] sm:$0xff] %v952_v4 }
 0x117   : > { %957 = vst [vmem:[%s1819_s3 + $0x18] sm:$0xff] %v953_v6 }
 0x118 PF: > { %s14_s16 = sadd.s32 1, %s1546_s16   ;;  %s1820_s12 = smov %s1534_s13 }
 0x119   : > { %p11_p12 = scmp.ge.s32.totalorder %s14_s16, 11   ;;  %s1821_s13 = smov %s1604_s20 }
 0x11a   : > { %s1822_s14 = smov %s1542_s15  ;;  %s1823_s15 = smov %s1825_s17 }
 0x11b   :  { %13 = sbr.rel (!%p11_p12) target bundleno = 3 (0x3), region = 124 }

// kernel: conv_unet_forward.36
= control target key start
LH: loop header
LB: loop body
LE: loop exit
PB: predicated region body
PF: predicated region fallthrough
CT: control target
= control target key end

     0   :  { %s132_s0 = inlined_call_operand.vmem [shape: bf16[16,512], index: 0, kind: input, shape index: {}]   ;;  %s133_s1 = inlined_call_operand.vmem [shape: f32[1,512], index: 1, kind: input, shape index: {}]   ;;  %s134_s2 = inlined_call_operand.vmem [shape: f32[1,512], index: 2, kind: input, shape index: {}]   ;;  %s135_s3 = inlined_call_operand.vmem [shape: bf16[16,512], index: 3, kind: output, shape index: {}]  }
   0x1   :  { %v14_v0 = vld [vmem:[%s132_s0] sm:$0xff]  ;;  %v15_v7 = vld [vmem:[%s132_s0 + $0x8] sm:$0xff]  ;;  %v16_v8 = vld [vmem:[%s132_s0 + $0x10] sm:$0xff] }
   0x2   :  { %v26_v1 = vld [vmem:[%s133_s1] sm:$0xf]  ;;  %v18_v3 = vunpack.c.l.bf16 %v14_v0  ;;  %v19_v4 = vunpack.c.h.bf16 %v14_v0  ;;  %v20_v11 = vunpack.c.l.bf16 %v15_v7  ;;  %v21_v12 = vunpack.c.h.bf16 %v15_v7  ;;  %v17_v17 = vld [vmem:[%s132_s0 + $0x18] sm:$0xff] }
   0x3   :  { %v44_v2 = vld [vmem:[%s134_s2] sm:$0xf]  ;;  %v28_v5 = vperm.slane %v26_v1, 0  ;;  %v29_v6 = vperm.slane %v26_v1, 1  ;;  %v30_v15 = vperm.slane %v26_v1, 2  ;;  %v31_v16 = vperm.slane %v26_v1, 3 }
   0x4   :  { %v46_v9 = vperm.slane %v44_v2, 0  ;;  %v47_v10 = vperm.slane %v44_v2, 1  ;;  %v48_v18 = vperm.slane %v44_v2, 2  ;;  %v49_v19 = vperm.slane %v44_v2, 3 }
   0x5   :  { %v36_v13 = vmul.f32 %v28_v5, %v18_v3  ;;  %v37_v14 = vmul.f32 %v29_v6, %v19_v4  ;;  %v22_v20 = vunpack.c.l.bf16 %v16_v8  ;;  %v23_v21 = vunpack.c.h.bf16 %v16_v8 }
   0x6   :  { %v38_v24 = vmul.f32 %v30_v15, %v20_v11  ;;  %v39_v25 = vmul.f32 %v31_v16, %v21_v12  ;;  %v24_v28 = vunpack.c.l.bf16 %v17_v17  ;;  %v25_v29 = vunpack.c.h.bf16 %v17_v17 }
   0x7   :  { %v54_v22 = vadd.f32 %v46_v9, %v36_v13  ;;  %v55_v23 = vadd.f32 %v47_v10, %v37_v14  ;;  %v40_v26 = vmul.f32 %v28_v5, %v22_v20  ;;  %v41_v27 = vmul.f32 %v29_v6, %v23_v21 }
   0x8   :  { %v56_v32 = vadd.f32 %v48_v18, %v38_v24  ;;  %v57_v33 = vadd.f32 %v49_v19, %v39_v25  ;;  %v42_v36 = vmul.f32 %v30_v15, %v24_v28  ;;  %v43_v37 = vmul.f32 %v31_v16, %v25_v29 }
   0x9   :  { %v62_v30 = vmax.f32 %v54_v22, 0.0  ;;  %v63_v31 = vmax.f32 %v55_v23, 0.0  ;;  %v58_v34 = vadd.f32 %v46_v9, %v40_v26  ;;  %v59_v35 = vadd.f32 %v47_v10, %v41_v27 }
   0xa   :  { %v64_v39 = vmax.f32 %v56_v32, 0.0  ;;  %v65_v40 = vmax.f32 %v57_v33, 0.0  ;;  %v60_v43 = vadd.f32 %v48_v18, %v42_v36  ;;  %v61_v44 = vadd.f32 %v49_v19, %v43_v37 }
   0xb   :  { %v70_v38 = vpack.c.bf16 %v63_v31, %v62_v30  ;;  %v66_v41 = vmax.f32 %v58_v34, 0.0  ;;  %v67_v42 = vmax.f32 %v59_v35, 0.0 }
   0xc   :  { %v71_v45 = vpack.c.bf16 %v65_v40, %v64_v39  ;;  %v68_v47 = vmax.f32 %v60_v43, 0.0  ;;  %v69_v48 = vmax.f32 %v61_v44, 0.0 }
   0xd   :  { %74 = vst [vmem:[%s135_s3] sm:$0xff] %v70_v38  ;;  %v72_v46 = vpack.c.bf16 %v67_v42, %v66_v41 }
   0xe   :  { %75 = vst [vmem:[%s135_s3 + $0x8] sm:$0xff] %v71_v45  ;;  %v73_v49 = vpack.c.bf16 %v69_v48, %v68_v47 }
   0xf   :  { %76 = vst [vmem:[%s135_s3 + $0x10] sm:$0xff] %v72_v46 }
  0x10   :  { %77 = vst [vmem:[%s135_s3 + $0x18] sm:$0xff] %v73_v49 }

// kernel: conv_unet_forward.37
= control target key start
LH: loop header
LB: loop body
LE: loop exit
PB: predicated region body
PF: predicated region fallthrough
CT: control target
= control target key end

     0   :  { %s1569_s12 = smov 0   ;;  %s1571_s13 = smov 0   ;;  %s1816_s0 = inlined_call_operand.vmem [shape: bf16[16,4608], index: 0, kind: input, shape index: {}]   ;;  %s1817_s1 = inlined_call_operand.vmem [shape: bf16[4608,512], index: 1, kind: input, shape index: {}]   ;;  %s1818_s2 = inlined_call_operand.vmem [shape: bf16[16,512], index: 2, kind: output, shape index: {0}]   ;;  %s1819_s3 = inlined_call_operand.vmem [shape: f32[1,8,512], index: 3, kind: output, shape index: {1}]  }
   0x1   :  { %s1573_s14 = smov 0   ;;  %s1575_s15 = smov 0  }
   0x2   :  { %s1577_s16 = smov 0  }
   0x3 LB: > { %s26_s17 = sadd.s32 1, %s1542_s15  ;;  %p49_p1 = scmp.ne.s32.totalorder %s1534_s13, %s1530_s12  ;;  %s1546_s16 = sphi %s1577_s16, %s14_s16   ;;  %s1542_s15 = sphi %s1575_s15, %s1823_s15   ;;  %s1538_s14 = sphi %s1573_s14, %s1822_s14   ;;  %s1534_s13 = sphi %s1571_s13, %s1821_s13   ;;  %s1530_s12 = sphi %s1569_s12, %s1820_s12  }
   0x4   : > { %p27_p0 = scmp.ge.s32.totalorder %s26_s17, 18  ;;  %p50_p2 = scmp.eq.s32.totalorder %s1546_s16, 0 }
   0x5   : > { %s42_s19 = sadd.s32 1, %s1534_s13  ;;  %p1118_p5 = scmp.ge.s32.totalorder %s1546_s16, 18 }
   0x6   : > { %s1825_s17 = smov (%p27_p0, %s26_s17), 0  ;;  %p51_p3 = por %p50_p2, %p49_p1 }
   0x7   : > { %s38_s18 = ssub.s32 %s1542_s15, %s1825_s17  ;;  %159 = sbr.rel (%p1118_p5) target bundleno = 18 (0x12), region = 16 }
   0x8   : > { %p40_p4 = scmp.eq.s32.totalorder %s38_s18, 0 }
   0xa   : > { %s1604_s20 = scalar_select %p40_p4, %s1534_s13, %s42_s19  }
   0xc   : > { %162 = sbr.rel (!%p51_p3) target bundleno = 18 (0x12), region = 20  ;;  %s164_s21 = sand.u32 (%p51_p3), 1, %s1534_s13  }
   0xd   : > { %s1399_s22 = sshll.u32 (%p51_p3), %s1542_s15, 3  ;;  %s1119_s23 = sshll.u32 (%p51_p3), %s164_s21, 4 }
   0xe   : > { %s172_s26 = scalar_lea.vmem (%p51_p3), %s1816_s0, %s1399_s22  ;;  %s166_s27 = scalar_lea.vmem (%p51_p3), [#allocation3], %s1119_s23 }
   0xf   : > { %v203_v0 = vld [vmem:[%s172_s26] sm:$0xff] (%p51_p3)  ;;  %v205_v1 = vld [vmem:[%s172_s26 + $0x90] sm:$0xff] (%p51_p3) }
  0x10   : > { %204 = vst [vmem:[%s166_s27] sm:$0xff] (%p51_p3), %v203_v0 }
  0x11   : > { %206 = vst [vmem:[%s166_s27 + $0x8] sm:$0xff] %v205_v1 }
  0x12 PF: > { %p1122_p6 = scmp.ge.s32.totalorder %s1546_s16, 1  ;;  %p226_p7 = scmp.lt.s32.totalorder %s1546_s16, 19 }
  0x14   : > { %p227_p8 = pnand %p1122_p6, %p226_p7 }
  0x15   : > { %s233_s28 = sand.u32 (!%p227_p8), 1, %s1530_s12   ;;  %s1124_s29 = sshll.u32 (!%p227_p8), %s1538_s14, 5 }
  0x16   : > { %230 = sbr.rel (%p227_p8) target bundleno = 280 (0x118), region = 62  ;;  %s1123_s30 = sshll.u32 (!%p227_p8), %s233_s28, 4 }
  0x17   : > { %p284_p9 = scmp.lt.s32.totalorder (!%p227_p8), %s1124_s29, 575  ;;  %s1621_s8 = scalar_lea.vmem (!%p227_p8), [#allocation3], %s1123_s30 }
  0x18   : > { %p1127_p10 = scmp.ne.s32.totalorder (!%p227_p8), %s1538_s14, 0 }
  0x1b   : > { %s1827_s29 = smov (!%p284_p9, %s1124_s29), 575  ;;  %319 = sbr.rel (%p1127_p10) target bundleno = 41 (0x29), region = 70 }
  0x1c   : > { %s1400_s4 = sshll.u32 %s1827_s29, 4 }
  0x1d   : > { %s1619_s7 = scalar_lea.vmem %s1817_s1, %s1400_s4 }
  0x20   : > { %v1548_v2 = vmov 0.0  }
  0x21   : > { %320 = vst [vmem:[#allocation2 + $0x30] sm:$0xff] %v1548_v2 }
  0x22   : > { %321 = vst [vmem:[#allocation2] sm:$0xff] %v1548_v2 }
  0x23   : > { %322 = vst [vmem:[#allocation2 + $0x18] sm:$0xff] %v1548_v2 }
  0x24   : > { %323 = vst [vmem:[#allocation2 + $0x10] sm:$0xff] %v1548_v2 }
  0x25   : > { %324 = vst [vmem:[#allocation2 + $0x8] sm:$0xff] %v1548_v2 }
  0x26   : > { %325 = vst [vmem:[#allocation2 + $0x20] sm:$0xff] %v1548_v2 }
  0x27   : > { %326 = vst [vmem:[#allocation2 + $0x28] sm:$0xff] %v1548_v2 }
  0x28   : > { %327 = vst [vmem:[#allocation2 + $0x38] sm:$0xff] %v1548_v2 }
  0x29 PF: > { %v1250_v3 = vld [vmem:[%s1619_s7 + $0xe0] sm:$0xf]  ;;  %v1433_v4 = vld [vmem:[%s1619_s7 + $0xec] sm:$0xf0]  ;;  %v1431_v8 = vld [vmem:[%s1619_s7 + $0xe4] sm:$0xf] }
  0x2a   : > { %v1378_v5 = vld [vmem:[%s1619_s7 + $0x1e0] sm:$0xf]  ;;  %v1251_v6 = vor.u32 %v1433_v4, %v1250_v3  ;;  %v1465_v7 = vld [vmem:[%s1619_s7 + $0x1ec] sm:$0xf0]  ;;  %v1252_v9 = vld [vmem:[%s1619_s7 + $0xf0] sm:$0xf0] }
  0x2b   : > { %v1379_v10 = vor.u32 %v1465_v7, %v1378_v5  ;;  %v1255_v11 = vor.u32 %v1431_v8, %v1252_v9  ;;  %v1463_v12 = vld [vmem:[%s1619_s7 + $0x1e4] sm:$0xf]  ;;  %v1380_v13 = vld [vmem:[%s1619_s7 + $0x1f0] sm:$0xf0]  ;;  %v1234_v14 = vld [vmem:[%s1619_s7 + $0xc0] sm:$0xf] }
  0x2c   : > { %732 = vmatpush.bf16.msra.mxu0 %v1251_v6  ;;  %v1383_v15 = vor.u32 %v1463_v12, %v1380_v13  ;;  %v1429_v16 = vld [vmem:[%s1619_s7 + $0xcc] sm:$0xf0]  ;;  %v1362_v17 = vld [vmem:[%s1619_s7 + $0x1c0] sm:$0xf]  ;;  %v1427_v21 = vld [vmem:[%s1619_s7 + $0xc4] sm:$0xf] }
  0x2d   : > { %v1461_v18 = vld [vmem:[%s1619_s7 + $0x1cc] sm:$0xf0]  ;;  %746 = vmatpush.bf16.msra.mxu1 %v1379_v10  ;;  %760 = vmatpush.bf16.msra.mxu2 %v1255_v11  ;;  %v1235_v19 = vor.u32 %v1429_v16, %v1234_v14  ;;  %v1236_v22 = vld [vmem:[%s1619_s7 + $0xd0] sm:$0xf0]  ;;  %v1459_v23 = vld [vmem:[%s1619_s7 + $0x1c4] sm:$0xf] }
  0x2e   : > { %v1363_v20 = vor.u32 %v1461_v18, %v1362_v17  ;;  %774 = vmatpush.bf16.msra.mxu3 %v1383_v15  ;;  %v1239_v24 = vor.u32 %v1427_v21, %v1236_v22  ;;  %v1364_v25 = vld [vmem:[%s1619_s7 + $0x1d0] sm:$0xf0]  ;;  %v1218_v26 = vld [vmem:[%s1619_s7 + $0xa0] sm:$0xf]  ;;  %v1425_v27 = vld [vmem:[%s1619_s7 + $0xac] sm:$0xf0] }
  0x2f   : > { %v1367_v28 = vor.u32 %v1459_v23, %v1364_v25  ;;  %v1346_v29 = vld [vmem:[%s1619_s7 + $0x1a0] sm:$0xf]  ;;  %v1457_v30 = vld [vmem:[%s1619_s7 + $0x1ac] sm:$0xf0]  ;;  %v1423_v31 = vld [vmem:[%s1619_s7 + $0xa4] sm:$0xf]  ;;  %v1219_v32 = vor.u32 %v1425_v27, %v1218_v26 }
  0x30   : > { %733 = vmatpush.bf16.msra.mxu0 %v1235_v19  ;;  %v1220_v33 = vld [vmem:[%s1619_s7 + $0xb0] sm:$0xf0]  ;;  %v1455_v34 = vld [vmem:[%s1619_s7 + $0x1a4] sm:$0xf]  ;;  %v1347_v36 = vor.u32 %v1457_v30, %v1346_v29  ;;  %v1202_v38 = vld [vmem:[%s1619_s7 + $0x80] sm:$0xf] }
  0x31   : > { %v1348_v35 = vld [vmem:[%s1619_s7 + $0x1b0] sm:$0xf0]  ;;  %747 = vmatpush.bf16.msra.mxu1 %v1363_v20  ;;  %761 = vmatpush.bf16.msra.mxu2 %v1239_v24  ;;  %v1223_v37 = vor.u32 %v1423_v31, %v1220_v33  ;;  %v1421_v39 = vld [vmem:[%s1619_s7 + $0x8c] sm:$0xf0]  ;;  %v1330_v40 = vld [vmem:[%s1619_s7 + $0x180] sm:$0xf] }
  0x32   : > { %775 = vmatpush.bf16.msra.mxu3 %v1367_v28  ;;  %v1351_v41 = vor.u32 %v1455_v34, %v1348_v35  ;;  %v1453_v42 = vld [vmem:[%s1619_s7 + $0x18c] sm:$0xf0]  ;;  %v1419_v43 = vld [vmem:[%s1619_s7 + $0x84] sm:$0xf]  ;;  %v1204_v44 = vld [vmem:[%s1619_s7 + $0x90] sm:$0xf0]  ;;  %v1203_v47 = vor.u32 %v1421_v39, %v1202_v38 }
  0x33   : > { %v1451_v45 = vld [vmem:[%s1619_s7 + $0x184] sm:$0xf]  ;;  %v1332_v46 = vld [vmem:[%s1619_s7 + $0x190] sm:$0xf0]  ;;  %v1331_v48 = vor.u32 %v1453_v42, %v1330_v40  ;;  %v1207_v49 = vor.u32 %v1419_v43, %v1204_v44  ;;  %v1186_v50 = vld [vmem:[%s1619_s7 + $0x60] sm:$0xf] }
  0x34   : > { %734 = vmatpush.bf16.msra.mxu0 %v1219_v32  ;;  %v1417_v51 = vld [vmem:[%s1619_s7 + $0x6c] sm:$0xf0]  ;;  %v1314_v52 = vld [vmem:[%s1619_s7 + $0x160] sm:$0xf]  ;;  %v1335_v53 = vor.u32 %v1451_v45, %v1332_v46  ;;  %v1415_v55 = vld [vmem:[%s1619_s7 + $0x64] sm:$0xf] }
  0x35   : > { %748 = vmatpush.bf16.msra.mxu1 %v1347_v36  ;;  %762 = vmatpush.bf16.msra.mxu2 %v1223_v37  ;;  %v1449_v54 = vld [vmem:[%s1619_s7 + $0x16c] sm:$0xf0]  ;;  %v1188_v56 = vld [vmem:[%s1619_s7 + $0x70] sm:$0xf0]  ;;  %v1447_v57 = vld [vmem:[%s1619_s7 + $0x164] sm:$0xf]  ;;  %v1187_v59 = vor.u32 %v1417_v51, %v1186_v50 }
  0x36   : > { %776 = vmatpush.bf16.msra.mxu3 %v1351_v41  ;;  %v1316_v58 = vld [vmem:[%s1619_s7 + $0x170] sm:$0xf0]  ;;  %v1315_v60 = vor.u32 %v1449_v54, %v1314_v52  ;;  %v1191_v61 = vor.u32 %v1415_v55, %v1188_v56  ;;  %v1170_v62 = vld [vmem:[%s1619_s7 + $0x40] sm:$0xf]  ;;  %v1413_v63 = vld [vmem:[%s1619_s7 + $0x4c] sm:$0xf0] }
  0x37   : > { %v1298_v0 = vld [vmem:[%s1619_s7 + $0x140] sm:$0xf]  ;;  %v1319_v1 = vor.u32 %v1447_v57, %v1316_v58  ;;  %v1445_v2 = vld [vmem:[%s1619_s7 + $0x14c] sm:$0xf0]  ;;  %v1411_v3 = vld [vmem:[%s1619_s7 + $0x44] sm:$0xf]  ;;  %v1171_v7 = vor.u32 %v1413_v63, %v1170_v62 }
  0x38   : > { %735 = vmatpush.bf16.msra.mxu0 %v1203_v47  ;;  %v1172_v4 = vld [vmem:[%s1619_s7 + $0x50] sm:$0xf0]  ;;  %v1443_v5 = vld [vmem:[%s1619_s7 + $0x144] sm:$0xf]  ;;  %v1299_v8 = vor.u32 %v1445_v2, %v1298_v0  ;;  %v1154_v10 = vld [vmem:[%s1619_s7 + $0x20] sm:$0xf] }
  0x39   : > { %749 = vmatpush.bf16.msra.mxu1 %v1331_v48  ;;  %763 = vmatpush.bf16.msra.mxu2 %v1207_v49  ;;  %v1300_v6 = vld [vmem:[%s1619_s7 + $0x150] sm:$0xf0]  ;;  %v1175_v9 = vor.u32 %v1411_v3, %v1172_v4  ;;  %v1409_v11 = vld [vmem:[%s1619_s7 + $0x2c] sm:$0xf0]  ;;  %v1282_v12 = vld [vmem:[%s1619_s7 + $0x120] sm:$0xf] }
  0x3a   : > { %777 = vmatpush.bf16.msra.mxu3 %v1335_v53  ;;  %v1303_v13 = vor.u32 %v1443_v5, %v1300_v6  ;;  %v1441_v14 = vld [vmem:[%s1619_s7 + $0x12c] sm:$0xf0]  ;;  %v1407_v15 = vld [vmem:[%s1619_s7 + $0x24] sm:$0xf]  ;;  %v1156_v16 = vld [vmem:[%s1619_s7 + $0x30] sm:$0xf0]  ;;  %v1155_v19 = vor.u32 %v1409_v11, %v1154_v10 }
  0x3b   : > { %v1439_v17 = vld [vmem:[%s1619_s7 + $0x124] sm:$0xf]  ;;  %v1284_v18 = vld [vmem:[%s1619_s7 + $0x130] sm:$0xf0]  ;;  %v1138_v20 = vld [vmem:[%s1619_s7] sm:$0xf]  ;;  %v1283_v23 = vor.u32 %v1441_v14, %v1282_v12  ;;  %v1159_v24 = vor.u32 %v1407_v15, %v1156_v16 }
  0x3c   : > { %736 = vmatpush.bf16.msra.mxu0 %v1187_v59  ;;  %v1405_v21 = vld [vmem:[%s1619_s7 + $0xc] sm:$0xf0]  ;;  %v1266_v22 = vld [vmem:[%s1619_s7 + $0x100] sm:$0xf]  ;;  %v1403_v26 = vld [vmem:[%s1619_s7 + $0x4] sm:$0xf]  ;;  %v1287_v28 = vor.u32 %v1439_v17, %v1284_v18 }
  0x3d   : > { %750 = vmatpush.bf16.msra.mxu1 %v1315_v60  ;;  %764 = vmatpush.bf16.msra.mxu2 %v1191_v61  ;;  %v1437_v25 = vld [vmem:[%s1619_s7 + $0x10c] sm:$0xf0]  ;;  %v1140_v27 = vld [vmem:[%s1619_s7 + $0x10] sm:$0xf0]  ;;  %v1435_v29 = vld [vmem:[%s1619_s7 + $0x104] sm:$0xf]  ;;  %v1139_v35 = vor.u32 %v1405_v21, %v1138_v20 }
  0x3e   : > { %778 = vmatpush.bf16.msra.mxu3 %v1319_v1  ;;  %v1268_v30 = vld [vmem:[%s1619_s7 + $0x110] sm:$0xf0]  ;;  %v1258_v31 = vld [vmem:[%s1619_s7 + $0xe8] sm:$0xf]  ;;  %v1434_v32 = vld [vmem:[%s1619_s7 + $0xf4] sm:$0xf0]  ;;  %v1267_v39 = vor.u32 %v1437_v25, %v1266_v22  ;;  %v1143_v40 = vor.u32 %v1403_v26, %v1140_v27 }
  0x3f   : > { %v1386_v33 = vld [vmem:[%s1619_s7 + $0x1e8] sm:$0xf]  ;;  %v1466_v34 = vld [vmem:[%s1619_s7 + $0x1f4] sm:$0xf0]  ;;  %v1432_v36 = vld [vmem:[%s1619_s7 + $0xec] sm:$0xf]  ;;  %v1271_v44 = vor.u32 %v1435_v29, %v1268_v30  ;;  %v1259_v45 = vor.u32 %v1434_v32, %v1258_v31 }
  0x40   : > { %737 = vmatpush.bf16.msra.mxu0 %v1171_v7  ;;  %v1260_v37 = vld [vmem:[%s1619_s7 + $0xf8] sm:$0xf0]  ;;  %v1464_v38 = vld [vmem:[%s1619_s7 + $0x1ec] sm:$0xf]  ;;  %v1130_v42 = vld [vmem:[%s1621_s8] sm:$0xf]  ;;  %v1387_v48 = vor.u32 %v1466_v34, %v1386_v33 }
  0x41   : > { %751 = vmatpush.bf16.msra.mxu1 %v1299_v8  ;;  %765 = vmatpush.bf16.msra.mxu2 %v1175_v9  ;;  %v1388_v41 = vld [vmem:[%s1619_s7 + $0x1f8] sm:$0xf0]  ;;  %v1402_v43 = vld [vmem:[%s1621_s8 + $0x4] sm:$0xf0]  ;;  %v1401_v46 = vld [vmem:[%s1621_s8 + $0x4] sm:$0xf]  ;;  %v1263_v49 = vor.u32 %v1432_v36, %v1260_v37 }
  0x42   : > { %779 = vmatpush.bf16.msra.mxu3 %v1303_v13  ;;  %v1132_v47 = vld [vmem:[%s1621_s8 + $0x8] sm:$0xf0]  ;;  %v1242_v50 = vld [vmem:[%s1619_s7 + $0xc8] sm:$0xf]  ;;  %v1430_v51 = vld [vmem:[%s1619_s7 + $0xd4] sm:$0xf0]  ;;  %v1391_v53 = vor.u32 %v1464_v38, %v1388_v41  ;;  %v1706_v57 = vor.u32 %v1402_v43, %v1130_v42 }
  0x43   : > { %v1370_v52 = vld [vmem:[%s1619_s7 + $0x1c8] sm:$0xf]  ;;  %v1462_v54 = vld [vmem:[%s1619_s7 + $0x1d4] sm:$0xf0]  ;;  %v1428_v55 = vld [vmem:[%s1619_s7 + $0xcc] sm:$0xf]  ;;  %v1710_v60 = vor.u32 %v1401_v46, %v1132_v47  ;;  %v1243_v61 = vor.u32 %v1430_v51, %v1242_v50 }
  0x44   : > { %738 = vmatpush.bf16.msra.mxu0 %v1155_v19  ;;  %v1244_v56 = vld [vmem:[%s1619_s7 + $0xd8] sm:$0xf0]  ;;  %v1460_v58 = vld [vmem:[%s1619_s7 + $0x1cc] sm:$0xf]  ;;  %v1371_v62 = vor.u32 %v1462_v54, %v1370_v52  ;;  %v1226_v0 = vld [vmem:[%s1619_s7 + $0xa8] sm:$0xf] }
  0x45   : > { %752 = vmatpush.bf16.msra.mxu1 %v1283_v23  ;;  %766 = vmatpush.bf16.msra.mxu2 %v1159_v24  ;;  %v1372_v59 = vld [vmem:[%s1619_s7 + $0x1d8] sm:$0xf0]  ;;  %v1247_v63 = vor.u32 %v1428_v55, %v1244_v56  ;;  %v1426_v1 = vld [vmem:[%s1619_s7 + $0xb4] sm:$0xf0]  ;;  %v1354_v2 = vld [vmem:[%s1619_s7 + $0x1a8] sm:$0xf] }
  0x46   : > { %780 = vmatpush.bf16.msra.mxu3 %v1287_v28  ;;  %v1375_v3 = vor.u32 %v1460_v58, %v1372_v59  ;;  %v1458_v4 = vld [vmem:[%s1619_s7 + $0x1b4] sm:$0xf0]  ;;  %v1424_v5 = vld [vmem:[%s1619_s7 + $0xac] sm:$0xf]  ;;  %v1228_v6 = vld [vmem:[%s1619_s7 + $0xb8] sm:$0xf0]  ;;  %v1227_v9 = vor.u32 %v1426_v1, %v1226_v0 }
  0x47   : > { %v1456_v7 = vld [vmem:[%s1619_s7 + $0x1ac] sm:$0xf]  ;;  %v1356_v8 = vld [vmem:[%s1619_s7 + $0x1b8] sm:$0xf0]  ;;  %v1355_v10 = vor.u32 %v1458_v4, %v1354_v2  ;;  %v1231_v11 = vor.u32 %v1424_v5, %v1228_v6  ;;  %v1210_v12 = vld [vmem:[%s1619_s7 + $0x88] sm:$0xf] }
  0x48   : > { %739 = vmatpush.bf16.msra.mxu0 %v1139_v35  ;;  %v1422_v13 = vld [vmem:[%s1619_s7 + $0x94] sm:$0xf0]  ;;  %v1338_v14 = vld [vmem:[%s1619_s7 + $0x188] sm:$0xf]  ;;  %v1359_v15 = vor.u32 %v1456_v7, %v1356_v8  ;;  %v1420_v17 = vld [vmem:[%s1619_s7 + $0x8c] sm:$0xf] }
  0x49   : > { %753 = vmatpush.bf16.msra.mxu1 %v1267_v39  ;;  %767 = vmatpush.bf16.msra.mxu2 %v1143_v40  ;;  %v1454_v16 = vld [vmem:[%s1619_s7 + $0x194] sm:$0xf0]  ;;  %v1212_v18 = vld [vmem:[%s1619_s7 + $0x98] sm:$0xf0]  ;;  %v1452_v19 = vld [vmem:[%s1619_s7 + $0x18c] sm:$0xf]  ;;  %v1211_v21 = vor.u32 %v1422_v13, %v1210_v12 }
  0x4a   : > { %781 = vmatpush.bf16.msra.mxu3 %v1271_v44  ;;  %v1340_v20 = vld [vmem:[%s1619_s7 + $0x198] sm:$0xf0]  ;;  %v1339_v22 = vor.u32 %v1454_v16, %v1338_v14  ;;  %v1215_v23 = vor.u32 %v1420_v17, %v1212_v18  ;;  %v1194_v24 = vld [vmem:[%s1619_s7 + $0x68] sm:$0xf]  ;;  %v1418_v25 = vld [vmem:[%s1619_s7 + $0x74] sm:$0xf0] }
  0x4b   : > { %740 = vmatmul.bf16.vlgmr.msra.gmra.mxu0 %v1706_v57  ;;  %v1322_v26 = vld [vmem:[%s1619_s7 + $0x168] sm:$0xf]  ;;  %v1343_v27 = vor.u32 %v1452_v19, %v1340_v20  ;;  %v1450_v28 = vld [vmem:[%s1619_s7 + $0x174] sm:$0xf0]  ;;  %v1416_v29 = vld [vmem:[%s1619_s7 + $0x6c] sm:$0xf]  ;;  %v1195_v33 = vor.u32 %v1418_v25, %v1194_v24 }
  0x4c   : > { %788 = vmatpush.bf16.msrb.mxu0 %v1259_v45  ;;  %768 = vmatmul.bf16.vlgmr.msra.gmra.mxu2 %v1706_v57  ;;  %v1196_v30 = vld [vmem:[%s1619_s7 + $0x78] sm:$0xf0]  ;;  %v1448_v31 = vld [vmem:[%s1619_s7 + $0x16c] sm:$0xf]  ;;  %v1323_v34 = vor.u32 %v1450_v28, %v1322_v26  ;;  %v1178_v36 = vld [vmem:[%s1619_s7 + $0x48] sm:$0xf] }
  0x4d   : > { %802 = vmatpush.bf16.msrb.mxu1 %v1387_v48  ;;  %816 = vmatpush.bf16.msrb.mxu2 %v1263_v49  ;;  %v1324_v32 = vld [vmem:[%s1619_s7 + $0x178] sm:$0xf0]  ;;  %v1199_v35 = vor.u32 %v1416_v29, %v1196_v30  ;;  %v1414_v37 = vld [vmem:[%s1619_s7 + $0x54] sm:$0xf0]  ;;  %v1306_v38 = vld [vmem:[%s1619_s7 + $0x148] sm:$0xf] }
  0x4e   : > { %830 = vmatpush.bf16.msrb.mxu3 %v1391_v53  ;;  %754 = vmatmul.bf16.vlgmr.msra.gmra.mxu1 %v1710_v60  ;;  %v1327_v39 = vor.u32 %v1448_v31, %v1324_v32  ;;  %v1446_v40 = vld [vmem:[%s1619_s7 + $0x154] sm:$0xf0]  ;;  %v1412_v41 = vld [vmem:[%s1619_s7 + $0x4c] sm:$0xf]  ;;  %v1180_v42 = vld [vmem:[%s1619_s7 + $0x58] sm:$0xf0]  ;;  %v1179_v45 = vor.u32 %v1414_v37, %v1178_v36 }
  0x4f   : > { %782 = vmatmul.bf16.vlgmr.msra.gmra.mxu3 %v1710_v60  ;;  %v1444_v43 = vld [vmem:[%s1619_s7 + $0x14c] sm:$0xf]  ;;  %v1308_v44 = vld [vmem:[%s1619_s7 + $0x158] sm:$0xf0]  ;;  %v1307_v46 = vor.u32 %v1446_v40, %v1306_v38  ;;  %v1183_v47 = vor.u32 %v1412_v41, %v1180_v42  ;;  %v1162_v48 = vld [vmem:[%s1619_s7 + $0x28] sm:$0xf] }
  0x50   : > { %789 = vmatpush.bf16.msrb.mxu0 %v1243_v61  ;;  %v1410_v49 = vld [vmem:[%s1619_s7 + $0x34] sm:$0xf0]  ;;  %v1290_v50 = vld [vmem:[%s1619_s7 + $0x128] sm:$0xf]  ;;  %v1311_v51 = vor.u32 %v1444_v43, %v1308_v44  ;;  %v1408_v53 = vld [vmem:[%s1619_s7 + $0x2c] sm:$0xf] }
  0x51   : > { %803 = vmatpush.bf16.msrb.mxu1 %v1371_v62  ;;  %817 = vmatpush.bf16.msrb.mxu2 %v1247_v63  ;;  %v1442_v52 = vld [vmem:[%s1619_s7 + $0x134] sm:$0xf0]  ;;  %v1164_v54 = vld [vmem:[%s1619_s7 + $0x38] sm:$0xf0]  ;;  %v1440_v55 = vld [vmem:[%s1619_s7 + $0x12c] sm:$0xf]  ;;  %v1163_v58 = vor.u32 %v1410_v49, %v1162_v48 }
  0x52   : > { %831 = vmatpush.bf16.msrb.mxu3 %v1375_v3  ;;  %v1292_v56 = vld [vmem:[%s1619_s7 + $0x138] sm:$0xf0]  ;;  %v1291_v59 = vor.u32 %v1442_v52, %v1290_v50  ;;  %v1167_v61 = vor.u32 %v1408_v53, %v1164_v54  ;;  %v1146_v62 = vld [vmem:[%s1619_s7 + $0x8] sm:$0xf]  ;;  %v1406_v63 = vld [vmem:[%s1619_s7 + $0x14] sm:$0xf0] }
  0x53   : > { %v1274_v0 = vld [vmem:[%s1619_s7 + $0x108] sm:$0xf]  ;;  %v1295_v1 = vor.u32 %v1440_v55, %v1292_v56  ;;  %v1438_v2 = vld [vmem:[%s1619_s7 + $0x114] sm:$0xf0]  ;;  %v1404_v3 = vld [vmem:[%s1619_s7 + $0xc] sm:$0xf]  ;;  %v1147_v7 = vor.u32 %v1406_v63, %v1146_v62 }
  0x54   : > { %790 = vmatpush.bf16.msrb.mxu0 %v1227_v9  ;;  %v1148_v4 = vld [vmem:[%s1619_s7 + $0x18] sm:$0xf0]  ;;  %v1436_v5 = vld [vmem:[%s1619_s7 + $0x10c] sm:$0xf]  ;;  %v1275_v8 = vor.u32 %v1438_v2, %v1274_v0  ;;  %v328_v12 = vld [vmem:[#allocation2 + $0x30] sm:$0xff]  ;;  %p1392_p11 = scmp.ne.s32.totalorder %s1538_s14, 17 }
  0x55   : > { %804 = vmatpush.bf16.msrb.mxu1 %v1355_v10  ;;  %818 = vmatpush.bf16.msrb.mxu2 %v1231_v11  ;;  %v1276_v6 = vld [vmem:[%s1619_s7 + $0x118] sm:$0xf0]  ;;  %v1151_v9 = vor.u32 %v1404_v3, %v1148_v4  ;;  %v329_v17 = vld [vmem:[#allocation2] sm:$0xff] }
  0x56   : > { %832 = vmatpush.bf16.msrb.mxu3 %v1359_v15  ;;  %v1279_v10 = vor.u32 %v1436_v5, %v1276_v6  ;;  %v330_v30 = vld [vmem:[#allocation2 + $0x18] sm:$0xff] }
  0x58   : > { %791 = vmatpush.bf16.msrb.mxu0 %v1211_v21 }
  0x59   : > { %805 = vmatpush.bf16.msrb.mxu1 %v1339_v22  ;;  %819 = vmatpush.bf16.msrb.mxu2 %v1215_v23  ;;  %v332_v22 = vld [vmem:[#allocation2 + $0x8] sm:$0xff] }
  0x5a   : > { %833 = vmatpush.bf16.msrb.mxu3 %v1343_v27 }
  0x5c   : > { %792 = vmatpush.bf16.msrb.mxu0 %v1195_v33 }
  0x5d   : > { %806 = vmatpush.bf16.msrb.mxu1 %v1323_v34  ;;  %820 = vmatpush.bf16.msrb.mxu2 %v1199_v35  ;;  %v331_v35 = vld [vmem:[#allocation2 + $0x10] sm:$0xff] }
  0x5e   : > { %834 = vmatpush.bf16.msrb.mxu3 %v1327_v39  ;;  %v334_v39 = vld [vmem:[#allocation2 + $0x28] sm:$0xff] }
  0x60   : > { %793 = vmatpush.bf16.msrb.mxu0 %v1179_v45  ;;  %v335_v45 = vld [vmem:[#allocation2 + $0x38] sm:$0xff] }
  0x61   : > { %807 = vmatpush.bf16.msrb.mxu1 %v1307_v46  ;;  %821 = vmatpush.bf16.msrb.mxu2 %v1183_v47 }
  0x62   : > { %835 = vmatpush.bf16.msrb.mxu3 %v1311_v51 }
  0x64   : > { %794 = vmatpush.bf16.msrb.mxu0 %v1163_v58 }
  0x65   : > { %808 = vmatpush.bf16.msrb.mxu1 %v1291_v59  ;;  %822 = vmatpush.bf16.msrb.mxu2 %v1167_v61 }
  0x66   : > { %836 = vmatpush.bf16.msrb.mxu3 %v1295_v1 }
  0x68   : > { %795 = vmatpush.bf16.msrb.mxu0 %v1147_v7 }
  0x69   : > { %809 = vmatpush.bf16.msrb.mxu1 %v1275_v8  ;;  %823 = vmatpush.bf16.msrb.mxu2 %v1151_v9 }
  0x6a   : > { %837 = vmatpush.bf16.msrb.mxu3 %v1279_v10 }
  0x6b   : > { %796 = vmatmul.bf16.vlgmr.msrb.gmra.mxu0 %v1706_v57 }
  0x6c   : > { %810 = vmatmul.bf16.vlgmr.msrb.gmra.mxu1 %v1710_v60  ;;  %824 = vmatmul.bf16.vlgmr.msrb.gmra.mxu2 %v1706_v57 }
  0x6d   : > { %838 = vmatmul.bf16.vlgmr.msrb.gmra.mxu3 %v1710_v60  ;;  %v333_v60 = vld [vmem:[#allocation2 + $0x20] sm:$0xff] }
  0xc8   : > { %v741_v11 = vpop.f32.mrf.mxu0 }
  0xcb   : > { %v755_v13 = vpop.f32.mrf.mxu1 }
  0xcc   : > { %v756_v14 = vadd.f32 %v755_v13, %v741_v11 }
  0xce   : > { %v844_v15 = vadd.f32 %v756_v14, %v328_v12 }
  0xcf   : > { %v769_v16 = vpop.f32.mrf.mxu2 }
  0xd0   : > { %852 = vst [vmem:[#allocation2 + $0x30] sm:$0xff] %v844_v15  ;;  %v743_v20 = vpop.f32.mrf.mxu0 }
  0xd2   : > { %v783_v18 = vpop.f32.mrf.mxu3 }
  0xd3   : > { %v784_v19 = vadd.f32 %v783_v18, %v769_v16  ;;  %v757_v23 = vpop.f32.mrf.mxu1 }
  0xd4   : > { %v758_v24 = vadd.f32 %v757_v23, %v743_v20 }
  0xd5   : > { %v845_v21 = vadd.f32 %v784_v19, %v329_v17 }
  0xd6   : > { %v848_v25 = vadd.f32 %v758_v24, %v332_v22 }
  0xd7   : > { %853 = vst [vmem:[#allocation2] sm:$0xff] %v845_v21  ;;  %v771_v57 = vpop.f32.mrf.mxu2 }
  0xd8   : > { %856 = vst [vmem:[#allocation2 + $0x8] sm:$0xff] %v848_v25 }
  0xda   : > { %v785_v26 = vpop.f32.mrf.mxu3 }
  0xdb   : > { %v786_v27 = vadd.f32 %v785_v26, %v771_v57 }
  0xdd   : > { %v849_v28 = vadd.f32 %v786_v27, %v333_v60 }
  0xdf   : > { %857 = vst [vmem:[#allocation2 + $0x20] sm:$0xff] %v849_v28 }
  0xe8   : > { %v797_v29 = vpop.f32.mrf.mxu0 }
  0xe9   : > { %v811_v31 = vpop.f32.mrf.mxu1 }
  0xea   : > { %v812_v32 = vadd.f32 %v811_v31, %v797_v29 }
  0xec   : > { %v846_v33 = vadd.f32 %v812_v32, %v330_v30 }
  0xee   : > { %854 = vst [vmem:[#allocation2 + $0x18] sm:$0xff] %v846_v33 }
  0xef   : > { %v825_v34 = vpop.f32.mrf.mxu2 }
  0xf0   : > { %v839_v36 = vpop.f32.mrf.mxu3  ;;  %v799_v37 = vpop.f32.mrf.mxu0 }
  0xf1   : > { %v840_v38 = vadd.f32 %v839_v36, %v825_v34  ;;  %v813_v40 = vpop.f32.mrf.mxu1 }
  0xf2   : > { %v814_v41 = vadd.f32 %v813_v40, %v799_v37 }
  0xf3   : > { %v847_v42 = vadd.f32 %v840_v38, %v331_v35 }
  0xf4   : > { %v850_v43 = vadd.f32 %v814_v41, %v334_v39 }
  0xf5   : > { %855 = vst [vmem:[#allocation2 + $0x10] sm:$0xff] %v847_v42 }
  0xf6   : > { %858 = vst [vmem:[#allocation2 + $0x28] sm:$0xff] %v850_v43 }
  0xf7   : > { %v827_v44 = vpop.f32.mrf.mxu2 }
  0xf8   : > { %v841_v46 = vpop.f32.mrf.mxu3 }
  0xf9   : > { %v842_v47 = vadd.f32 %v841_v46, %v827_v44  ;;  %863 = sbr.rel (%p1392_p11) target bundleno = 280 (0x118), region = 74 }
  0xfb   : > { %v851_v48 = vadd.f32 %v842_v47, %v335_v45 }
  0xfd   : > { %859 = vst [vmem:[#allocation2 + $0x38] sm:$0xff] %v851_v48 }
  0xfe   : > { %v864_v49 = vld [vmem:[#allocation2 + $0x30] sm:$0xff]  ;;  %v865_v50 = vld [vmem:[#allocation2] sm:$0xff]  ;;  %v866_v51 = vld [vmem:[#allocation2 + $0x18] sm:$0xff]  ;;  %vm944_vm0 = vcmask 1040384   ;;  %vm949_vm1 = vcmask 1041408  }
  0xff   : > { %v872_v52 = vpack.c.bf16 %v865_v50, %v864_v49  ;;  %v908_v53 = vmul.f32 %v864_v49, %v864_v49  ;;  %v909_v54 = vmul.f32 %v865_v50, %v865_v50  ;;  %v867_v55 = vld [vmem:[#allocation2 + $0x10] sm:$0xff]  ;;  %v910_v56 = vmul.f32 %v866_v51, %v866_v51  ;;  %v868_v58 = vld [vmem:[#allocation2 + $0x8] sm:$0xff]  ;;  %v869_v59 = vld [vmem:[#allocation2 + $0x20] sm:$0xff] }
 0x100   : > { %v873_v61 = vpack.c.bf16 %v867_v55, %v866_v51  ;;  %v911_v62 = vmul.f32 %v867_v55, %v867_v55  ;;  %v874_v63 = vpack.c.bf16 %v869_v59, %v868_v58  ;;  %v880_v0 = vadd.f32 %v868_v58, %v864_v49  ;;  %v870_v1 = vld [vmem:[#allocation2 + $0x28] sm:$0xff] }
 0x101   : > { %876 = vst [vmem:[%s1818_s2] sm:$0xff] %v872_v52  ;;  %v887_v3 = vadd.f32 %v869_v59, %v865_v50  ;;  %v912_v4 = vmul.f32 %v868_v58, %v868_v58  ;;  %v913_v5 = vmul.f32 %v869_v59, %v869_v59  ;;  %v894_v8 = vadd.f32 %v870_v1, %v866_v51 }
 0x102   : > { %877 = vst [vmem:[%s1818_s2 + $0x8] sm:$0xff] %v873_v61  ;;  %v881_v7 = vrot.slane %v880_v0, 4  ;;  %v914_v10 = vmul.f32 %v870_v1, %v870_v1 }
 0x103   : > { %878 = vst [vmem:[%s1818_s2 + $0x10] sm:$0xff] %v874_v63  ;;  %v888_v11 = vrot.slane %v887_v3, 4  ;;  %v916_v12 = vadd.f32 %v912_v4, %v908_v53  ;;  %v923_v13 = vadd.f32 %v913_v5, %v909_v54  ;;  %v895_v16 = vrot.slane %v894_v8, 4 }
 0x104   : > { %v871_v2 = vld [vmem:[#allocation2 + $0x38] sm:$0xff]  ;;  %v882_v15 = vadd.f32 %v881_v7, %v880_v0  ;;  %v930_v18 = vadd.f32 %v914_v10, %v910_v56 }
 0x105   : > { %v875_v6 = vpack.c.bf16 %v871_v2, %v870_v1  ;;  %v901_v9 = vadd.f32 %v871_v2, %v867_v55  ;;  %v915_v14 = vmul.f32 %v871_v2, %v871_v2  ;;  %v889_v19 = vadd.f32 %v888_v11, %v887_v3 }
 0x106   : > { %v917_v20 = vrot.slane %v916_v12, 4  ;;  %v924_v21 = vrot.slane %v923_v13, 4  ;;  %v883_v23 = vrot.slane %v882_v15, 2  ;;  %v896_v24 = vadd.f32 %v895_v16, %v894_v8 }
 0x107   : > { %879 = vst [vmem:[%s1818_s2 + $0x18] sm:$0xff] %v875_v6  ;;  %v902_v17 = vrot.slane %v901_v9, 4  ;;  %v937_v22 = vadd.f32 %v915_v14, %v911_v62  ;;  %v931_v57 = vrot.slane %v930_v18, 4  ;;  %v890_v60 = vrot.slane %v889_v19, 2 }
 0x108   : > { %v918_v26 = vadd.f32 %v917_v20, %v916_v12  ;;  %v925_v27 = vadd.f32 %v924_v21, %v923_v13  ;;  %v897_v29 = vrot.slane %v896_v24, 2  ;;  %v884_v32 = vadd.f32 %v883_v23, %v882_v15 }
 0x109   : > { %v903_v25 = vadd.f32 %v902_v17, %v901_v9  ;;  %v938_v28 = vrot.slane %v937_v22, 4  ;;  %v932_v31 = vadd.f32 %v931_v57, %v930_v18  ;;  %v891_v35 = vadd.f32 %v890_v60, %v889_v19 }
 0x10a   : > { %v919_v34 = vrot.slane %v918_v26, 2  ;;  %v926_v36 = vrot.slane %v925_v27, 2  ;;  %v885_v37 = vrot.slane %v884_v32, 1  ;;  %v898_v38 = vadd.f32 %v897_v29, %v896_v24 }
 0x10b   : > { %v904_v30 = vrot.slane %v903_v25, 2  ;;  %v939_v33 = vadd.f32 %v938_v28, %v937_v22  ;;  %v933_v39 = vrot.slane %v932_v31, 2  ;;  %v892_v42 = vrot.slane %v891_v35, 1 }
 0x10c   : > { %v920_v41 = vadd.f32 %v919_v34, %v918_v26  ;;  %v927_v43 = vadd.f32 %v926_v36, %v925_v27  ;;  %v886_v45 = vadd.f32 %v885_v37, %v884_v32  ;;  %v899_v46 = vrot.slane %v898_v38, 1 }
 0x10d   : > { %v905_v40 = vadd.f32 %v904_v30, %v903_v25  ;;  %v940_v44 = vrot.slane %v939_v33, 2  ;;  %v934_v47 = vadd.f32 %v933_v39, %v932_v31  ;;  %v893_v50 = vadd.f32 %v892_v42, %v891_v35 }
 0x10e   : > { %v921_v49 = vrot.slane %v920_v41, 1  ;;  %v928_v51 = vrot.slane %v927_v43, 1  ;;  %v900_v53 = vadd.f32 %v899_v46, %v898_v38 }
 0x10f   : > { %v906_v48 = vrot.slane %v905_v40, 1  ;;  %v941_v52 = vadd.f32 %v940_v44, %v939_v33  ;;  %v935_v54 = vrot.slane %v934_v47, 1 }
 0x110   : > { %v922_v55 = vadd.f32 %v921_v49, %v920_v41  ;;  %v929_v56 = vadd.f32 %v928_v51, %v927_v43 }
 0x111   : > { %v907_v58 = vadd.f32 %v906_v48, %v905_v40  ;;  %v942_v59 = vrot.slane %v941_v52, 1  ;;  %v936_v61 = vadd.f32 %v935_v54, %v934_v47 }
 0x112   : > { %v945_v62 = vsel %vm944_vm0, %v886_v45, %v922_v55  ;;  %v946_v63 = vsel %vm944_vm0, %v893_v50, %v929_v56 }
 0x113   : > { %v943_v0 = vadd.f32 %v942_v59, %v941_v52  ;;  %v950_v1 = vsel %vm949_vm1, %v945_v62, 0.0  ;;  %v951_v2 = vsel %vm949_vm1, %v946_v63, 0.0  ;;  %v947_v3 = vsel %vm944_vm0, %v900_v53, %v936_v61 }
 0x114   : > { %954 = vst [vmem:[%s1819_s3] sm:$0xff] %v950_v1  ;;  %v952_v4 = vsel %vm949_vm1, %v947_v3, 0.0 }
 0x115   : > { %v948_v5 = vsel %vm944_vm0, %v907_v58, %v943_v0  ;;  %955 = vst [vmem:[%s1819_s3 + $0x8] sm:$0xff] %v951_v2 }
 0x116   : > { %v953_v6 = vsel %vm949_vm1, %v948_v5, 0.0  ;;  %956 = vst [vmem:[%s1819_s3 + $0x10] sm:$0xff] %v952_v4 }
 0x117   : > { %957 = vst [vmem:[%s1819_s3 + $0x18] sm:$0xff] %v953_v6 }
 0x118 PF: > { %s14_s16 = sadd.s32 1, %s1546_s16   ;;  %s1820_s12 = smov %s1534_s13 }
 0x119   : > { %p11_p12 = scmp.ge.s32.totalorder %s14_s16, 20   ;;  %s1821_s13 = smov %s1604_s20 }
 0x11a   : > { %s1822_s14 = smov %s1542_s15  ;;  %s1823_s15 = smov %s1825_s17 }
 0x11b   :  { %13 = sbr.rel (!%p11_p12) target bundleno = 3 (0x3), region = 124 }

// kernel: conv_unet_forward.43
= control target key start
LH: loop header
LB: loop body
LE: loop exit
PB: predicated region body
PF: predicated region fallthrough
CT: control target
= control target key end

     0   :  { %s1711_s12 = smov 0   ;;  %s1713_s13 = smov 0   ;;  %s1986_s0 = inlined_call_operand.vmem [shape: bf16[32,4608], index: 0, kind: input, shape index: {}]   ;;  %s1987_s1 = inlined_call_operand.vmem [shape: bf16[4608,512], index: 1, kind: input, shape index: {}]   ;;  %s1988_s2 = inlined_call_operand.vmem [shape: bf16[32,512], index: 2, kind: output, shape index: {0}]   ;;  %s1989_s3 = inlined_call_operand.vmem [shape: f32[1,8,512], index: 3, kind: output, shape index: {1}]  }
   0x1   :  { %s1715_s14 = smov 0   ;;  %s1717_s15 = smov 0  }
   0x2   :  { %s1719_s16 = smov 0  }
   0x3 LB: > { %s26_s17 = sadd.s32 1, %s1684_s15  ;;  %p49_p1 = scmp.ne.s32.totalorder %s1676_s13, %s1672_s12  ;;  %s1688_s16 = sphi %s1719_s16, %s14_s16   ;;  %s1684_s15 = sphi %s1717_s15, %s1993_s15   ;;  %s1680_s14 = sphi %s1715_s14, %s1992_s14   ;;  %s1676_s13 = sphi %s1713_s13, %s1991_s13   ;;  %s1672_s12 = sphi %s1711_s12, %s1990_s12  }
   0x4   : > { %p27_p0 = scmp.ge.s32.totalorder %s26_s17, 18  ;;  %p50_p2 = scmp.eq.s32.totalorder %s1688_s16, 0 }
   0x5   : > { %s42_s19 = sadd.s32 1, %s1676_s13  ;;  %p1250_p5 = scmp.ge.s32.totalorder %s1688_s16, 18 }
   0x6   : > { %s1995_s17 = smov (%p27_p0, %s26_s17), 0  ;;  %p51_p3 = por %p50_p2, %p49_p1 }
   0x7   : > { %s38_s18 = ssub.s32 %s1684_s15, %s1995_s17  ;;  %159 = sbr.rel (%p1250_p5) target bundleno = 20 (0x14), region = 16 }
   0x8   : > { %p40_p4 = scmp.eq.s32.totalorder %s38_s18, 0 }
   0xa   : > { %s1746_s20 = scalar_select %p40_p4, %s1676_s13, %s42_s19  }
   0xc   : > { %162 = sbr.rel (!%p51_p3) target bundleno = 20 (0x14), region = 20  ;;  %s164_s21 = sand.u32 (%p51_p3), 1, %s1676_s13  }
   0xd   : > { %s1539_s22 = sshll.u32 (%p51_p3), %s1684_s15, 3  ;;  %s1251_s23 = sshll.u32 (%p51_p3), %s164_s21, 5 }
   0xe   : > { %s172_s26 = scalar_lea.vmem (%p51_p3), %s1986_s0, %s1539_s22  ;;  %s166_s27 = scalar_lea.vmem (%p51_p3), [#allocation3], %s1251_s23 }
   0xf   : > { %v207_v0 = vld [vmem:[%s172_s26] sm:$0xff] (%p51_p3)  ;;  %v209_v1 = vld [vmem:[%s172_s26 + $0x90] sm:$0xff] (%p51_p3) }
  0x10   : > { %v211_v2 = vld [vmem:[%s172_s26 + $0x120] sm:$0xff] (%p51_p3)  ;;  %208 = vst [vmem:[%s166_s27] sm:$0xff] (%p51_p3), %v207_v0  ;;  %v213_v3 = vld [vmem:[%s172_s26 + $0x1b0] sm:$0xff] (%p51_p3) }
  0x11   : > { %210 = vst [vmem:[%s166_s27 + $0x8] sm:$0xff] %v209_v1 }
  0x12   : > { %212 = vst [vmem:[%s166_s27 + $0x10] sm:$0xff] %v211_v2 }
  0x13   : > { %214 = vst [vmem:[%s166_s27 + $0x18] sm:$0xff] %v213_v3 }
  0x14 PF: > { %p1254_p6 = scmp.ge.s32.totalorder %s1688_s16, 1  ;;  %p234_p7 = scmp.lt.s32.totalorder %s1688_s16, 19 }
  0x16   : > { %p235_p8 = pnand %p1254_p6, %p234_p7 }
  0x17   : > { %s241_s28 = sand.u32 (!%p235_p8), 1, %s1672_s12   ;;  %s1256_s29 = sshll.u32 (!%p235_p8), %s1680_s14, 5 }
  0x18   : > { %238 = sbr.rel (%p235_p8) target bundleno = 312 (0x138), region = 62  ;;  %s1255_s30 = sshll.u32 (!%p235_p8), %s241_s28, 5 }
  0x19   : > { %p292_p9 = scmp.lt.s32.totalorder (!%p235_p8), %s1256_s29, 575  ;;  %s1763_s8 = scalar_lea.vmem (!%p235_p8), [#allocation3], %s1255_s30 }
  0x1a   : > { %p1259_p10 = scmp.ne.s32.totalorder (!%p235_p8), %s1680_s14, 0 }
  0x1d   : > { %s1997_s29 = smov (!%p292_p9, %s1256_s29), 575  ;;  %327 = sbr.rel (%p1259_p10) target bundleno = 51 (0x33), region = 70 }
  0x1e   : > { %s1540_s4 = sshll.u32 %s1997_s29, 4 }
  0x1f   : > { %s1761_s7 = scalar_lea.vmem %s1987_s1, %s1540_s4 }
  0x22   : > { %v1690_v4 = vmov 0.0  }
  0x23   : > { %328 = vst [vmem:[#allocation2 + $0x30] sm:$0xff] %v1690_v4 }
  0x24   : > { %329 = vst [vmem:[#allocation2] sm:$0xff] %v1690_v4 }
  0x25   : > { %330 = vst [vmem:[#allocation2 + $0x58] sm:$0xff] %v1690_v4 }
  0x26   : > { %331 = vst [vmem:[#allocation2 + $0x18] sm:$0xff] %v1690_v4 }
  0x27   : > { %332 = vst [vmem:[#allocation2 + $0x50] sm:$0xff] %v1690_v4 }
  0x28   : > { %333 = vst [vmem:[#allocation2 + $0x68] sm:$0xff] %v1690_v4 }
  0x29   : > { %334 = vst [vmem:[#allocation2 + $0x8] sm:$0xff] %v1690_v4 }
  0x2a   : > { %335 = vst [vmem:[#allocation2 + $0x48] sm:$0xff] %v1690_v4 }
  0x2b   : > { %336 = vst [vmem:[#allocation2 + $0x40] sm:$0xff] %v1690_v4 }
  0x2c   : > { %337 = vst [vmem:[#allocation2 + $0x20] sm:$0xff] %v1690_v4 }
  0x2d   : > { %338 = vst [vmem:[#allocation2 + $0x10] sm:$0xff] %v1690_v4 }
  0x2e   : > { %339 = vst [vmem:[#allocation2 + $0x38] sm:$0xff] %v1690_v4 }
  0x2f   : > { %340 = vst [vmem:[#allocation2 + $0x60] sm:$0xff] %v1690_v4 }
  0x30   : > { %341 = vst [vmem:[#allocation2 + $0x70] sm:$0xff] %v1690_v4 }
  0x31   : > { %342 = vst [vmem:[#allocation2 + $0x78] sm:$0xff] %v1690_v4 }
  0x32   : > { %343 = vst [vmem:[#allocation2 + $0x28] sm:$0xff] %v1690_v4 }
  0x33 PF: > { %v1390_v5 = vld [vmem:[%s1761_s7 + $0xe0] sm:$0xf]  ;;  %v1575_v6 = vld [vmem:[%s1761_s7 + $0xec] sm:$0xf0]  ;;  %v1573_v10 = vld [vmem:[%s1761_s7 + $0xe4] sm:$0xf] }
  0x34   : > { %v1518_v7 = vld [vmem:[%s1761_s7 + $0x1e0] sm:$0xf]  ;;  %v1391_v8 = vor.u32 %v1575_v6, %v1390_v5  ;;  %v1607_v9 = vld [vmem:[%s1761_s7 + $0x1ec] sm:$0xf0]  ;;  %v1392_v11 = vld [vmem:[%s1761_s7 + $0xf0] sm:$0xf0] }
  0x35   : > { %v1519_v12 = vor.u32 %v1607_v9, %v1518_v7  ;;  %v1395_v13 = vor.u32 %v1573_v10, %v1392_v11  ;;  %v1605_v14 = vld [vmem:[%s1761_s7 + $0x1e4] sm:$0xf]  ;;  %v1520_v15 = vld [vmem:[%s1761_s7 + $0x1f0] sm:$0xf0]  ;;  %v1374_v16 = vld [vmem:[%s1761_s7 + $0xc0] sm:$0xf] }
  0x36   : > { %768 = vmatpush.bf16.msra.mxu0 %v1391_v8  ;;  %v1523_v17 = vor.u32 %v1605_v14, %v1520_v15  ;;  %v1571_v18 = vld [vmem:[%s1761_s7 + $0xcc] sm:$0xf0]  ;;  %v1502_v19 = vld [vmem:[%s1761_s7 + $0x1c0] sm:$0xf]  ;;  %v1569_v23 = vld [vmem:[%s1761_s7 + $0xc4] sm:$0xf] }
  0x37   : > { %v1603_v20 = vld [vmem:[%s1761_s7 + $0x1cc] sm:$0xf0]  ;;  %787 = vmatpush.bf16.msra.mxu1 %v1519_v12  ;;  %806 = vmatpush.bf16.msra.mxu2 %v1395_v13  ;;  %v1375_v21 = vor.u32 %v1571_v18, %v1374_v16  ;;  %v1376_v24 = vld [vmem:[%s1761_s7 + $0xd0] sm:$0xf0]  ;;  %v1601_v25 = vld [vmem:[%s1761_s7 + $0x1c4] sm:$0xf] }
  0x38   : > { %v1503_v22 = vor.u32 %v1603_v20, %v1502_v19  ;;  %825 = vmatpush.bf16.msra.mxu3 %v1523_v17  ;;  %v1379_v26 = vor.u32 %v1569_v23, %v1376_v24  ;;  %v1504_v27 = vld [vmem:[%s1761_s7 + $0x1d0] sm:$0xf0]  ;;  %v1358_v28 = vld [vmem:[%s1761_s7 + $0xa0] sm:$0xf]  ;;  %v1567_v29 = vld [vmem:[%s1761_s7 + $0xac] sm:$0xf0] }
  0x39   : > { %v1507_v30 = vor.u32 %v1601_v25, %v1504_v27  ;;  %v1486_v31 = vld [vmem:[%s1761_s7 + $0x1a0] sm:$0xf]  ;;  %v1599_v32 = vld [vmem:[%s1761_s7 + $0x1ac] sm:$0xf0]  ;;  %v1565_v33 = vld [vmem:[%s1761_s7 + $0xa4] sm:$0xf]  ;;  %v1359_v34 = vor.u32 %v1567_v29, %v1358_v28 }
  0x3a   : > { %769 = vmatpush.bf16.msra.mxu0 %v1375_v21  ;;  %v1360_v35 = vld [vmem:[%s1761_s7 + $0xb0] sm:$0xf0]  ;;  %v1597_v36 = vld [vmem:[%s1761_s7 + $0x1a4] sm:$0xf]  ;;  %v1487_v38 = vor.u32 %v1599_v32, %v1486_v31  ;;  %v1342_v40 = vld [vmem:[%s1761_s7 + $0x80] sm:$0xf] }
  0x3b   : > { %v1488_v37 = vld [vmem:[%s1761_s7 + $0x1b0] sm:$0xf0]  ;;  %788 = vmatpush.bf16.msra.mxu1 %v1503_v22  ;;  %807 = vmatpush.bf16.msra.mxu2 %v1379_v26  ;;  %v1363_v39 = vor.u32 %v1565_v33, %v1360_v35  ;;  %v1563_v41 = vld [vmem:[%s1761_s7 + $0x8c] sm:$0xf0]  ;;  %v1470_v42 = vld [vmem:[%s1761_s7 + $0x180] sm:$0xf] }
  0x3c   : > { %826 = vmatpush.bf16.msra.mxu3 %v1507_v30  ;;  %v1491_v43 = vor.u32 %v1597_v36, %v1488_v37  ;;  %v1595_v44 = vld [vmem:[%s1761_s7 + $0x18c] sm:$0xf0]  ;;  %v1561_v45 = vld [vmem:[%s1761_s7 + $0x84] sm:$0xf]  ;;  %v1344_v46 = vld [vmem:[%s1761_s7 + $0x90] sm:$0xf0]  ;;  %v1343_v49 = vor.u32 %v1563_v41, %v1342_v40 }
  0x3d   : > { %v1593_v47 = vld [vmem:[%s1761_s7 + $0x184] sm:$0xf]  ;;  %v1472_v48 = vld [vmem:[%s1761_s7 + $0x190] sm:$0xf0]  ;;  %v1471_v50 = vor.u32 %v1595_v44, %v1470_v42  ;;  %v1347_v51 = vor.u32 %v1561_v45, %v1344_v46  ;;  %v1326_v52 = vld [vmem:[%s1761_s7 + $0x60] sm:$0xf] }
  0x3e   : > { %770 = vmatpush.bf16.msra.mxu0 %v1359_v34  ;;  %v1559_v53 = vld [vmem:[%s1761_s7 + $0x6c] sm:$0xf0]  ;;  %v1454_v54 = vld [vmem:[%s1761_s7 + $0x160] sm:$0xf]  ;;  %v1475_v55 = vor.u32 %v1593_v47, %v1472_v48  ;;  %v1557_v57 = vld [vmem:[%s1761_s7 + $0x64] sm:$0xf] }
  0x3f   : > { %789 = vmatpush.bf16.msra.mxu1 %v1487_v38  ;;  %808 = vmatpush.bf16.msra.mxu2 %v1363_v39  ;;  %v1591_v56 = vld [vmem:[%s1761_s7 + $0x16c] sm:$0xf0]  ;;  %v1328_v58 = vld [vmem:[%s1761_s7 + $0x70] sm:$0xf0]  ;;  %v1589_v59 = vld [vmem:[%s1761_s7 + $0x164] sm:$0xf]  ;;  %v1327_v61 = vor.u32 %v1559_v53, %v1326_v52 }
  0x40   : > { %827 = vmatpush.bf16.msra.mxu3 %v1491_v43  ;;  %v1456_v60 = vld [vmem:[%s1761_s7 + $0x170] sm:$0xf0]  ;;  %v1455_v62 = vor.u32 %v1591_v56, %v1454_v54  ;;  %v1331_v63 = vor.u32 %v1557_v57, %v1328_v58  ;;  %v1310_v0 = vld [vmem:[%s1761_s7 + $0x40] sm:$0xf]  ;;  %v1555_v1 = vld [vmem:[%s1761_s7 + $0x4c] sm:$0xf0] }
  0x41   : > { %v1438_v2 = vld [vmem:[%s1761_s7 + $0x140] sm:$0xf]  ;;  %v1459_v3 = vor.u32 %v1589_v59, %v1456_v60  ;;  %v1587_v4 = vld [vmem:[%s1761_s7 + $0x14c] sm:$0xf0]  ;;  %v1553_v5 = vld [vmem:[%s1761_s7 + $0x44] sm:$0xf]  ;;  %v1311_v9 = vor.u32 %v1555_v1, %v1310_v0 }
  0x42   : > { %771 = vmatpush.bf16.msra.mxu0 %v1343_v49  ;;  %v1312_v6 = vld [vmem:[%s1761_s7 + $0x50] sm:$0xf0]  ;;  %v1585_v7 = vld [vmem:[%s1761_s7 + $0x144] sm:$0xf]  ;;  %v1439_v10 = vor.u32 %v1587_v4, %v1438_v2  ;;  %v1294_v12 = vld [vmem:[%s1761_s7 + $0x20] sm:$0xf] }
  0x43   : > { %790 = vmatpush.bf16.msra.mxu1 %v1471_v50  ;;  %809 = vmatpush.bf16.msra.mxu2 %v1347_v51  ;;  %v1440_v8 = vld [vmem:[%s1761_s7 + $0x150] sm:$0xf0]  ;;  %v1315_v11 = vor.u32 %v1553_v5, %v1312_v6  ;;  %v1551_v13 = vld [vmem:[%s1761_s7 + $0x2c] sm:$0xf0]  ;;  %v1422_v14 = vld [vmem:[%s1761_s7 + $0x120] sm:$0xf] }
  0x44   : > { %828 = vmatpush.bf16.msra.mxu3 %v1475_v55  ;;  %v1443_v15 = vor.u32 %v1585_v7, %v1440_v8  ;;  %v1583_v16 = vld [vmem:[%s1761_s7 + $0x12c] sm:$0xf0]  ;;  %v1549_v17 = vld [vmem:[%s1761_s7 + $0x24] sm:$0xf]  ;;  %v1296_v18 = vld [vmem:[%s1761_s7 + $0x30] sm:$0xf0]  ;;  %v1295_v21 = vor.u32 %v1551_v13, %v1294_v12 }
  0x45   : > { %v1581_v19 = vld [vmem:[%s1761_s7 + $0x124] sm:$0xf]  ;;  %v1424_v20 = vld [vmem:[%s1761_s7 + $0x130] sm:$0xf0]  ;;  %v1278_v22 = vld [vmem:[%s1761_s7] sm:$0xf]  ;;  %v1423_v24 = vor.u32 %v1583_v16, %v1422_v14  ;;  %v1299_v25 = vor.u32 %v1549_v17, %v1296_v18 }
  0x46   : > { %772 = vmatpush.bf16.msra.mxu0 %v1327_v61  ;;  %v1547_v23 = vld [vmem:[%s1761_s7 + $0xc] sm:$0xf0]  ;;  %v1406_v26 = vld [vmem:[%s1761_s7 + $0x100] sm:$0xf]  ;;  %v1545_v28 = vld [vmem:[%s1761_s7 + $0x4] sm:$0xf]  ;;  %v1427_v29 = vor.u32 %v1581_v19, %v1424_v20 }
  0x47   : > { %791 = vmatpush.bf16.msra.mxu1 %v1455_v62  ;;  %810 = vmatpush.bf16.msra.mxu2 %v1331_v63  ;;  %v1579_v27 = vld [vmem:[%s1761_s7 + $0x10c] sm:$0xf0]  ;;  %v1280_v30 = vld [vmem:[%s1761_s7 + $0x10] sm:$0xf0]  ;;  %v1577_v31 = vld [vmem:[%s1761_s7 + $0x104] sm:$0xf]  ;;  %v1279_v36 = vor.u32 %v1547_v23, %v1278_v22 }
  0x48   : > { %829 = vmatpush.bf16.msra.mxu3 %v1459_v3  ;;  %v1408_v32 = vld [vmem:[%s1761_s7 + $0x110] sm:$0xf0]  ;;  %v1262_v33 = vld [vmem:[%s1763_s8] sm:$0xf]  ;;  %v1574_v34 = vld [vmem:[%s1761_s7 + $0xec] sm:$0xf]  ;;  %v1407_v40 = vor.u32 %v1579_v27, %v1406_v26  ;;  %v1283_v41 = vor.u32 %v1545_v28, %v1280_v30 }
  0x49   : > { %v1400_v35 = vld [vmem:[%s1761_s7 + $0xf8] sm:$0xf0]  ;;  %v1542_v37 = vld [vmem:[%s1763_s8 + $0x4] sm:$0xf0]  ;;  %v1606_v38 = vld [vmem:[%s1761_s7 + $0x1ec] sm:$0xf]  ;;  %v1411_v44 = vor.u32 %v1577_v31, %v1408_v32 }
  0x4a   : > { %773 = vmatpush.bf16.msra.mxu0 %v1311_v9  ;;  %v1528_v39 = vld [vmem:[%s1761_s7 + $0x1f8] sm:$0xf0]  ;;  %v1541_v42 = vld [vmem:[%s1763_s8 + $0x4] sm:$0xf]  ;;  %v1264_v43 = vld [vmem:[%s1763_s8 + $0x8] sm:$0xf0]  ;;  %v1403_v45 = vor.u32 %v1574_v34, %v1400_v35  ;;  %v1841_v49 = vor.u32 %v1542_v37, %v1262_v33 }
  0x4b   : > { %792 = vmatpush.bf16.msra.mxu1 %v1439_v10  ;;  %811 = vmatpush.bf16.msra.mxu2 %v1315_v11  ;;  %v1398_v46 = vld [vmem:[%s1761_s7 + $0xe8] sm:$0xf]  ;;  %v1576_v47 = vld [vmem:[%s1761_s7 + $0xf4] sm:$0xf0]  ;;  %v1531_v50 = vor.u32 %v1606_v38, %v1528_v39  ;;  %v1570_v52 = vld [vmem:[%s1761_s7 + $0xcc] sm:$0xf]  ;;  %v1846_v54 = vor.u32 %v1541_v42, %v1264_v43 }
  0x4c   : > { %830 = vmatpush.bf16.msra.mxu3 %v1443_v15  ;;  %v1526_v48 = vld [vmem:[%s1761_s7 + $0x1e8] sm:$0xf]  ;;  %v1608_v51 = vld [vmem:[%s1761_s7 + $0x1f4] sm:$0xf0]  ;;  %v1384_v53 = vld [vmem:[%s1761_s7 + $0xd8] sm:$0xf0]  ;;  %v1399_v57 = vor.u32 %v1576_v47, %v1398_v46 }
  0x4d   : > { %v1602_v55 = vld [vmem:[%s1761_s7 + $0x1cc] sm:$0xf]  ;;  %v1512_v56 = vld [vmem:[%s1761_s7 + $0x1d8] sm:$0xf0]  ;;  %v1527_v58 = vor.u32 %v1608_v51, %v1526_v48  ;;  %v1387_v59 = vor.u32 %v1570_v52, %v1384_v53  ;;  %v1382_v60 = vld [vmem:[%s1761_s7 + $0xc8] sm:$0xf] }
  0x4e   : > { %774 = vmatpush.bf16.msra.mxu0 %v1295_v21  ;;  %v1572_v61 = vld [vmem:[%s1761_s7 + $0xd4] sm:$0xf0]  ;;  %v1510_v62 = vld [vmem:[%s1761_s7 + $0x1c8] sm:$0xf]  ;;  %v1515_v63 = vor.u32 %v1602_v55, %v1512_v56  ;;  %v1566_v1 = vld [vmem:[%s1761_s7 + $0xac] sm:$0xf] }
  0x4f   : > { %793 = vmatpush.bf16.msra.mxu1 %v1423_v24  ;;  %812 = vmatpush.bf16.msra.mxu2 %v1299_v25  ;;  %v1604_v0 = vld [vmem:[%s1761_s7 + $0x1d4] sm:$0xf0]  ;;  %v1368_v2 = vld [vmem:[%s1761_s7 + $0xb8] sm:$0xf0]  ;;  %v1598_v3 = vld [vmem:[%s1761_s7 + $0x1ac] sm:$0xf]  ;;  %v1383_v5 = vor.u32 %v1572_v61, %v1382_v60 }
  0x50   : > { %831 = vmatpush.bf16.msra.mxu3 %v1427_v29  ;;  %v1496_v4 = vld [vmem:[%s1761_s7 + $0x1b8] sm:$0xf0]  ;;  %v1511_v6 = vor.u32 %v1604_v0, %v1510_v62  ;;  %v1371_v7 = vor.u32 %v1566_v1, %v1368_v2  ;;  %v1366_v8 = vld [vmem:[%s1761_s7 + $0xa8] sm:$0xf]  ;;  %v1568_v9 = vld [vmem:[%s1761_s7 + $0xb4] sm:$0xf0] }
  0x51   : > { %v1494_v10 = vld [vmem:[%s1761_s7 + $0x1a8] sm:$0xf]  ;;  %v1499_v11 = vor.u32 %v1598_v3, %v1496_v4  ;;  %v1600_v12 = vld [vmem:[%s1761_s7 + $0x1b4] sm:$0xf0]  ;;  %v1562_v13 = vld [vmem:[%s1761_s7 + $0x8c] sm:$0xf]  ;;  %v1367_v17 = vor.u32 %v1568_v9, %v1366_v8 }
  0x52   : > { %775 = vmatpush.bf16.msra.mxu0 %v1279_v36  ;;  %v1352_v14 = vld [vmem:[%s1761_s7 + $0x98] sm:$0xf0]  ;;  %v1594_v15 = vld [vmem:[%s1761_s7 + $0x18c] sm:$0xf]  ;;  %v1350_v18 = vld [vmem:[%s1761_s7 + $0x88] sm:$0xf]  ;;  %v1495_v19 = vor.u32 %v1600_v12, %v1494_v10 }
  0x53   : > { %794 = vmatpush.bf16.msra.mxu1 %v1407_v40  ;;  %813 = vmatpush.bf16.msra.mxu2 %v1283_v41  ;;  %v1480_v16 = vld [vmem:[%s1761_s7 + $0x198] sm:$0xf0]  ;;  %v1355_v20 = vor.u32 %v1562_v13, %v1352_v14  ;;  %v1564_v21 = vld [vmem:[%s1761_s7 + $0x94] sm:$0xf0]  ;;  %v1478_v22 = vld [vmem:[%s1761_s7 + $0x188] sm:$0xf] }
  0x54   : > { %832 = vmatpush.bf16.msra.mxu3 %v1411_v44  ;;  %v1596_v23 = vld [vmem:[%s1761_s7 + $0x194] sm:$0xf0]  ;;  %v1483_v24 = vor.u32 %v1594_v15, %v1480_v16  ;;  %v1270_v25 = vld [vmem:[%s1763_s8 + $0x10] sm:$0xf]  ;;  %v1558_v26 = vld [vmem:[%s1761_s7 + $0x6c] sm:$0xf]  ;;  %v1351_v31 = vor.u32 %v1564_v21, %v1350_v18 }
  0x55   : > { %776 = vmatmul.bf16.vlgmr.msra.gmra.mxu0 %v1841_v49  ;;  %v1336_v27 = vld [vmem:[%s1761_s7 + $0x78] sm:$0xf0]  ;;  %v1544_v28 = vld [vmem:[%s1763_s8 + $0x14] sm:$0xf0]  ;;  %v1590_v29 = vld [vmem:[%s1761_s7 + $0x16c] sm:$0xf]  ;;  %v1479_v34 = vor.u32 %v1596_v23, %v1478_v22 }
  0x56   : > { %795 = vmatmul.bf16.vlgmr.msra.gmra.mxu1 %v1846_v54  ;;  %814 = vmatmul.bf16.vlgmr.msra.gmra.mxu2 %v1841_v49  ;;  %v1464_v30 = vld [vmem:[%s1761_s7 + $0x178] sm:$0xf0]  ;;  %v1543_v32 = vld [vmem:[%s1763_s8 + $0x14] sm:$0xf]  ;;  %v1339_v35 = vor.u32 %v1558_v26, %v1336_v27  ;;  %v1334_v36 = vld [vmem:[%s1761_s7 + $0x68] sm:$0xf]  ;;  %v1885_v39 = vor.u32 %v1544_v28, %v1270_v25 }
  0x57   : > { %882 = vmatpush.bf16.msrb.mxu2 %v1403_v45  ;;  %833 = vmatmul.bf16.vlgmr.msra.gmra.mxu3 %v1846_v54  ;;  %v1272_v33 = vld [vmem:[%s1763_s8 + $0x18] sm:$0xf0]  ;;  %v1560_v37 = vld [vmem:[%s1761_s7 + $0x74] sm:$0xf0]  ;;  %v1462_v38 = vld [vmem:[%s1761_s7 + $0x168] sm:$0xf]  ;;  %v1467_v40 = vor.u32 %v1590_v29, %v1464_v30 }
  0x58   : > { %901 = vmatpush.bf16.msrb.mxu3 %v1531_v50  ;;  %844 = vmatpush.bf16.msrb.mxu0 %v1399_v57  ;;  %v1592_v41 = vld [vmem:[%s1761_s7 + $0x174] sm:$0xf0]  ;;  %v1554_v42 = vld [vmem:[%s1761_s7 + $0x4c] sm:$0xf]  ;;  %v1320_v43 = vld [vmem:[%s1761_s7 + $0x58] sm:$0xf0]  ;;  %v1890_v44 = vor.u32 %v1543_v32, %v1272_v33  ;;  %v1335_v47 = vor.u32 %v1560_v37, %v1334_v36 }
  0x59   : > { %863 = vmatpush.bf16.msrb.mxu1 %v1527_v58  ;;  %v1586_v45 = vld [vmem:[%s1761_s7 + $0x14c] sm:$0xf]  ;;  %v1448_v46 = vld [vmem:[%s1761_s7 + $0x158] sm:$0xf0]  ;;  %v1463_v48 = vor.u32 %v1592_v41, %v1462_v38  ;;  %v1323_v50 = vor.u32 %v1554_v42, %v1320_v43  ;;  %v1318_v51 = vld [vmem:[%s1761_s7 + $0x48] sm:$0xf] }
  0x5a   : > { %v1556_v52 = vld [vmem:[%s1761_s7 + $0x54] sm:$0xf0]  ;;  %v1446_v53 = vld [vmem:[%s1761_s7 + $0x148] sm:$0xf]  ;;  %v1451_v55 = vor.u32 %v1586_v45, %v1448_v46  ;;  %v1550_v57 = vld [vmem:[%s1761_s7 + $0x2c] sm:$0xf] }
  0x5b   : > { %883 = vmatpush.bf16.msrb.mxu2 %v1387_v59  ;;  %v1588_v56 = vld [vmem:[%s1761_s7 + $0x154] sm:$0xf0]  ;;  %v1304_v58 = vld [vmem:[%s1761_s7 + $0x38] sm:$0xf0]  ;;  %v1582_v59 = vld [vmem:[%s1761_s7 + $0x12c] sm:$0xf]  ;;  %v1319_v61 = vor.u32 %v1556_v52, %v1318_v51 }
  0x5c   : > { %902 = vmatpush.bf16.msrb.mxu3 %v1515_v63  ;;  %845 = vmatpush.bf16.msrb.mxu0 %v1383_v5  ;;  %v1432_v60 = vld [vmem:[%s1761_s7 + $0x138] sm:$0xf0]  ;;  %v1447_v62 = vor.u32 %v1588_v56, %v1446_v53  ;;  %v1307_v63 = vor.u32 %v1550_v57, %v1304_v58  ;;  %v1302_v0 = vld [vmem:[%s1761_s7 + $0x28] sm:$0xf]  ;;  %v1552_v1 = vld [vmem:[%s1761_s7 + $0x34] sm:$0xf0] }
  0x5d   : > { %864 = vmatpush.bf16.msrb.mxu1 %v1511_v6  ;;  %v1430_v2 = vld [vmem:[%s1761_s7 + $0x128] sm:$0xf]  ;;  %v1435_v3 = vor.u32 %v1582_v59, %v1432_v60  ;;  %v1584_v4 = vld [vmem:[%s1761_s7 + $0x134] sm:$0xf0]  ;;  %v1546_v5 = vld [vmem:[%s1761_s7 + $0xc] sm:$0xf]  ;;  %v1303_v9 = vor.u32 %v1552_v1, %v1302_v0 }
  0x5e   : > { %v1288_v6 = vld [vmem:[%s1761_s7 + $0x18] sm:$0xf0]  ;;  %v1431_v10 = vor.u32 %v1584_v4, %v1430_v2  ;;  %v1286_v12 = vld [vmem:[%s1761_s7 + $0x8] sm:$0xf]  ;;  %v1548_v13 = vld [vmem:[%s1761_s7 + $0x14] sm:$0xf0] }
  0x5f   : > { %884 = vmatpush.bf16.msrb.mxu2 %v1371_v7  ;;  %v1578_v7 = vld [vmem:[%s1761_s7 + $0x10c] sm:$0xf]  ;;  %v1416_v8 = vld [vmem:[%s1761_s7 + $0x118] sm:$0xf0]  ;;  %v1414_v15 = vld [vmem:[%s1761_s7 + $0x108] sm:$0xf] }
  0x60   : > { %903 = vmatpush.bf16.msrb.mxu3 %v1499_v11  ;;  %846 = vmatpush.bf16.msrb.mxu0 %v1367_v17  ;;  %v1291_v11 = vor.u32 %v1546_v5, %v1288_v6  ;;  %v1419_v14 = vor.u32 %v1578_v7, %v1416_v8  ;;  %v1580_v16 = vld [vmem:[%s1761_s7 + $0x114] sm:$0xf0]  ;;  %v1287_v17 = vor.u32 %v1548_v13, %v1286_v12  ;;  %v349_v33 = vld [vmem:[#allocation2 + $0x68] sm:$0xff]  ;;  %v352_v37 = vld [vmem:[#allocation2 + $0x40] sm:$0xff]  ;;  %p1532_p11 = scmp.ne.s32.totalorder %s1680_s14, 17 }
  0x61   : > { %865 = vmatpush.bf16.msrb.mxu1 %v1495_v19  ;;  %v1415_v18 = vor.u32 %v1580_v16, %v1414_v15  ;;  %v353_v43 = vld [vmem:[#allocation2 + $0x20] sm:$0xff]  ;;  %v346_v59 = vld [vmem:[#allocation2 + $0x58] sm:$0xff]  ;;  %v350_v5 = vld [vmem:[#allocation2 + $0x8] sm:$0xff] }
  0x62   : > { %v347_v1 = vld [vmem:[#allocation2 + $0x18] sm:$0xff]  ;;  %v354_v15 = vld [vmem:[#allocation2 + $0x10] sm:$0xff] }
  0x63   : > { %885 = vmatpush.bf16.msrb.mxu2 %v1355_v20  ;;  %v344_v20 = vld [vmem:[#allocation2 + $0x30] sm:$0xff] }
  0x64   : > { %904 = vmatpush.bf16.msrb.mxu3 %v1483_v24  ;;  %847 = vmatpush.bf16.msrb.mxu0 %v1351_v31 }
  0x65   : > { %866 = vmatpush.bf16.msrb.mxu1 %v1479_v34  ;;  %781 = vmatmul.bf16.gmra.mxu0 %v1885_v39 }
  0x66   : > { %800 = vmatmul.bf16.gmra.mxu1 %v1890_v44  ;;  %819 = vmatmul.bf16.gmra.mxu2 %v1885_v39 }
  0x67   : > { %886 = vmatpush.bf16.msrb.mxu2 %v1339_v35  ;;  %838 = vmatmul.bf16.gmra.mxu3 %v1890_v44 }
  0x68   : > { %905 = vmatpush.bf16.msrb.mxu3 %v1467_v40  ;;  %848 = vmatpush.bf16.msrb.mxu0 %v1335_v47  ;;  %v356_v47 = vld [vmem:[#allocation2 + $0x60] sm:$0xff] }
  0x69   : > { %867 = vmatpush.bf16.msrb.mxu1 %v1463_v48 }
  0x6b   : > { %887 = vmatpush.bf16.msrb.mxu2 %v1323_v50 }
  0x6c   : > { %906 = vmatpush.bf16.msrb.mxu3 %v1451_v55  ;;  %849 = vmatpush.bf16.msrb.mxu0 %v1319_v61  ;;  %v357_v55 = vld [vmem:[#allocation2 + $0x70] sm:$0xff] }
  0x6d   : > { %868 = vmatpush.bf16.msrb.mxu1 %v1447_v62 }
  0x6f   : > { %888 = vmatpush.bf16.msrb.mxu2 %v1307_v63 }
  0x70   : > { %907 = vmatpush.bf16.msrb.mxu3 %v1435_v3  ;;  %850 = vmatpush.bf16.msrb.mxu0 %v1303_v9 }
  0x71   : > { %869 = vmatpush.bf16.msrb.mxu1 %v1431_v10 }
  0x73   : > { %889 = vmatpush.bf16.msrb.mxu2 %v1291_v11  ;;  %v351_v11 = vld [vmem:[#allocation2 + $0x48] sm:$0xff] }
  0x74   : > { %908 = vmatpush.bf16.msrb.mxu3 %v1419_v14  ;;  %851 = vmatpush.bf16.msrb.mxu0 %v1287_v17 }
  0x75   : > { %870 = vmatpush.bf16.msrb.mxu1 %v1415_v18 }
  0x76   : > { %890 = vmatmul.bf16.vlgmr.msrb.gmra.mxu2 %v1841_v49 }
  0x77   : > { %852 = vmatmul.bf16.vlgmr.msrb.gmra.mxu0 %v1841_v49  ;;  %909 = vmatmul.bf16.vlgmr.msrb.gmra.mxu3 %v1846_v54  ;;  %v345_v49 = vld [vmem:[#allocation2] sm:$0xff] }
  0x78   : > { %871 = vmatmul.bf16.vlgmr.msrb.gmra.mxu1 %v1846_v54  ;;  %v348_v54 = vld [vmem:[#allocation2 + $0x50] sm:$0xff] }
  0x86   : > { %895 = vmatmul.bf16.gmra.mxu2 %v1885_v39 }
  0x87   : > { %857 = vmatmul.bf16.gmra.mxu0 %v1885_v39  ;;  %914 = vmatmul.bf16.gmra.mxu3 %v1890_v44 }
  0x88   : > { %876 = vmatmul.bf16.gmra.mxu1 %v1890_v44 }
  0xd2   : > { %v777_v19 = vpop.f32.mrf.mxu0 }
  0xd3   : > { %v796_v21 = vpop.f32.mrf.mxu1 }
  0xd4   : > { %v797_v22 = vadd.f32 %v796_v21, %v777_v19  ;;  %v355_v21 = vld [vmem:[#allocation2 + $0x38] sm:$0xff] }
  0xd6   : > { %v920_v23 = vadd.f32 %v797_v22, %v344_v20 }
  0xd8   : > { %936 = vst [vmem:[#allocation2 + $0x30] sm:$0xff] %v920_v23 }
  0xd9   : > { %v815_v24 = vpop.f32.mrf.mxu2 }
  0xda   : > { %v834_v25 = vpop.f32.mrf.mxu3  ;;  %v779_v26 = vpop.f32.mrf.mxu0 }
  0xdb   : > { %v835_v27 = vadd.f32 %v834_v25, %v815_v24  ;;  %v798_v28 = vpop.f32.mrf.mxu1 }
  0xdc   : > { %v799_v29 = vadd.f32 %v798_v28, %v779_v26 }
  0xdd   : > { %v921_v30 = vadd.f32 %v835_v27, %v345_v49  ;;  %v358_v49 = vld [vmem:[#allocation2 + $0x78] sm:$0xff] }
  0xde   : > { %v924_v31 = vadd.f32 %v799_v29, %v348_v54  ;;  %v359_v29 = vld [vmem:[#allocation2 + $0x28] sm:$0xff] }
  0xdf   : > { %937 = vst [vmem:[#allocation2] sm:$0xff] %v921_v30 }
  0xe0   : > { %940 = vst [vmem:[#allocation2 + $0x50] sm:$0xff] %v924_v31 }
  0xe1   : > { %v817_v32 = vpop.f32.mrf.mxu2 }
  0xe2   : > { %v836_v34 = vpop.f32.mrf.mxu3  ;;  %v782_v35 = vpop.f32.mrf.mxu0 }
  0xe3   : > { %v837_v36 = vadd.f32 %v836_v34, %v817_v32  ;;  %v801_v38 = vpop.f32.mrf.mxu1 }
  0xe4   : > { %v802_v39 = vadd.f32 %v801_v38, %v782_v35 }
  0xe5   : > { %v925_v40 = vadd.f32 %v837_v36, %v349_v33 }
  0xe6   : > { %v928_v41 = vadd.f32 %v802_v39, %v352_v37 }
  0xe7   : > { %941 = vst [vmem:[#allocation2 + $0x68] sm:$0xff] %v925_v40 }
  0xe8   : > { %944 = vst [vmem:[#allocation2 + $0x40] sm:$0xff] %v928_v41 }
  0xe9   : > { %v820_v42 = vpop.f32.mrf.mxu2 }
  0xea   : > { %v839_v44 = vpop.f32.mrf.mxu3  ;;  %v784_v45 = vpop.f32.mrf.mxu0 }
  0xeb   : > { %v840_v46 = vadd.f32 %v839_v44, %v820_v42  ;;  %v803_v48 = vpop.f32.mrf.mxu1 }
  0xec   : > { %v804_v50 = vadd.f32 %v803_v48, %v784_v45 }
  0xed   : > { %v929_v51 = vadd.f32 %v840_v46, %v353_v43 }
  0xee   : > { %v932_v52 = vadd.f32 %v804_v50, %v356_v47 }
  0xef   : > { %945 = vst [vmem:[#allocation2 + $0x20] sm:$0xff] %v929_v51 }
  0xf0   : > { %948 = vst [vmem:[#allocation2 + $0x60] sm:$0xff] %v932_v52 }
  0xf1   : > { %v822_v53 = vpop.f32.mrf.mxu2 }
  0xf2   : > { %v841_v56 = vpop.f32.mrf.mxu3 }
  0xf3   : > { %v842_v57 = vadd.f32 %v841_v56, %v822_v53 }
  0xf4   : > { %v853_v58 = vpop.f32.mrf.mxu0 }
  0xf5   : > { %v872_v60 = vpop.f32.mrf.mxu1  ;;  %v933_v61 = vadd.f32 %v842_v57, %v357_v55 }
  0xf6   : > { %v873_v62 = vadd.f32 %v872_v60, %v853_v58 }
  0xf7   : > { %949 = vst [vmem:[#allocation2 + $0x70] sm:$0xff] %v933_v61 }
  0xf8   : > { %v922_v63 = vadd.f32 %v873_v62, %v346_v59 }
  0xf9   : > { %v891_v0 = vpop.f32.mrf.mxu2 }
  0xfa   : > { %938 = vst [vmem:[#allocation2 + $0x58] sm:$0xff] %v922_v63  ;;  %v910_v2 = vpop.f32.mrf.mxu3 }
  0xfb   : > { %v911_v3 = vadd.f32 %v910_v2, %v891_v0 }
  0xfc   : > { %v855_v4 = vpop.f32.mrf.mxu0 }
  0xfd   : > { %v874_v6 = vpop.f32.mrf.mxu1  ;;  %v923_v7 = vadd.f32 %v911_v3, %v347_v1 }
  0xfe   : > { %v875_v8 = vadd.f32 %v874_v6, %v855_v4 }
  0xff   : > { %939 = vst [vmem:[#allocation2 + $0x18] sm:$0xff] %v923_v7 }
 0x100   : > { %v926_v9 = vadd.f32 %v875_v8, %v350_v5 }
 0x101   : > { %v893_v10 = vpop.f32.mrf.mxu2 }
 0x102   : > { %942 = vst [vmem:[#allocation2 + $0x8] sm:$0xff] %v926_v9  ;;  %v912_v12 = vpop.f32.mrf.mxu3 }
 0x103   : > { %v913_v13 = vadd.f32 %v912_v12, %v893_v10 }
 0x104   : > { %v858_v14 = vpop.f32.mrf.mxu0 }
 0x105   : > { %v877_v16 = vpop.f32.mrf.mxu1  ;;  %v927_v17 = vadd.f32 %v913_v13, %v351_v11 }
 0x106   : > { %v878_v18 = vadd.f32 %v877_v16, %v858_v14 }
 0x107   : > { %943 = vst [vmem:[#allocation2 + $0x48] sm:$0xff] %v927_v17 }
 0x108   : > { %v930_v19 = vadd.f32 %v878_v18, %v354_v15 }
 0x109   : > { %v896_v20 = vpop.f32.mrf.mxu2 }
 0x10a   : > { %946 = vst [vmem:[#allocation2 + $0x10] sm:$0xff] %v930_v19  ;;  %v915_v22 = vpop.f32.mrf.mxu3 }
 0x10b   : > { %v916_v23 = vadd.f32 %v915_v22, %v896_v20 }
 0x10c   : > { %v860_v24 = vpop.f32.mrf.mxu0 }
 0x10d   : > { %v879_v25 = vpop.f32.mrf.mxu1  ;;  %v931_v26 = vadd.f32 %v916_v23, %v355_v21 }
 0x10e   : > { %v880_v27 = vadd.f32 %v879_v25, %v860_v24 }
 0x10f   : > { %947 = vst [vmem:[#allocation2 + $0x38] sm:$0xff] %v931_v26 }
 0x110   : > { %v934_v54 = vadd.f32 %v880_v27, %v358_v49 }
 0x111   : > { %v898_v28 = vpop.f32.mrf.mxu2 }
 0x112   : > { %950 = vst [vmem:[#allocation2 + $0x78] sm:$0xff] %v934_v54  ;;  %v917_v30 = vpop.f32.mrf.mxu3 }
 0x113   : > { %v918_v31 = vadd.f32 %v917_v30, %v898_v28  ;;  %955 = sbr.rel (%p1532_p11) target bundleno = 312 (0x138), region = 74 }
 0x115   : > { %v935_v32 = vadd.f32 %v918_v31, %v359_v29 }
 0x117   : > { %951 = vst [vmem:[#allocation2 + $0x28] sm:$0xff] %v935_v32 }
 0x118   : > { %v956_v33 = vld [vmem:[#allocation2 + $0x30] sm:$0xff]  ;;  %v957_v34 = vld [vmem:[#allocation2] sm:$0xff]  ;;  %v958_v35 = vld [vmem:[#allocation2 + $0x58] sm:$0xff]  ;;  %vm1076_vm0 = vcmask 1040384   ;;  %vm1081_vm1 = vcmask 1041408  }
 0x119   : > { %v972_v36 = vpack.c.bf16 %v957_v34, %v956_v33  ;;  %v1024_v37 = vmul.f32 %v956_v33, %v956_v33  ;;  %v1025_v38 = vmul.f32 %v957_v34, %v957_v34  ;;  %v959_v39 = vld [vmem:[#allocation2 + $0x18] sm:$0xff]  ;;  %v1026_v40 = vmul.f32 %v958_v35, %v958_v35  ;;  %v960_v41 = vld [vmem:[#allocation2 + $0x50] sm:$0xff]  ;;  %v961_v42 = vld [vmem:[#allocation2 + $0x68] sm:$0xff] }
 0x11a   : > { %v973_v43 = vpack.c.bf16 %v959_v39, %v958_v35  ;;  %v1027_v44 = vmul.f32 %v959_v39, %v959_v39  ;;  %v974_v45 = vpack.c.bf16 %v961_v42, %v960_v41  ;;  %v988_v46 = vadd.f32 %v960_v41, %v956_v33  ;;  %v962_v47 = vld [vmem:[#allocation2 + $0x8] sm:$0xff]  ;;  %v964_v55 = vld [vmem:[#allocation2 + $0x40] sm:$0xff]  ;;  %v966_v1 = vld [vmem:[#allocation2 + $0x10] sm:$0xff] }
 0x11b   : > { %v963_v48 = vld [vmem:[#allocation2 + $0x48] sm:$0xff]  ;;  %980 = vst [vmem:[%s1988_s2] sm:$0xff] %v972_v36  ;;  %v997_v50 = vadd.f32 %v961_v42, %v957_v34  ;;  %v1028_v51 = vmul.f32 %v960_v41, %v960_v41  ;;  %v1029_v52 = vmul.f32 %v961_v42, %v961_v42  ;;  %v1006_v56 = vadd.f32 %v962_v47, %v958_v35  ;;  %v965_v60 = vld [vmem:[#allocation2 + $0x20] sm:$0xff]  ;;  %v967_v2 = vld [vmem:[#allocation2 + $0x38] sm:$0xff] }
 0x11c   : > { %v975_v53 = vpack.c.bf16 %v963_v48, %v962_v47  ;;  %981 = vst [vmem:[%s1988_s2 + $0x8] sm:$0xff] %v973_v43  ;;  %v1015_v57 = vadd.f32 %v963_v48, %v959_v39  ;;  %v1030_v58 = vmul.f32 %v962_v47, %v962_v47  ;;  %v1031_v59 = vmul.f32 %v963_v48, %v963_v48  ;;  %v968_v7 = vld [vmem:[#allocation2 + $0x60] sm:$0xff]  ;;  %v969_v12 = vld [vmem:[#allocation2 + $0x70] sm:$0xff]  ;;  %v970_v21 = vld [vmem:[#allocation2 + $0x78] sm:$0xff] }
 0x11d   : > { %982 = vst [vmem:[%s1988_s2 + $0x10] sm:$0xff] %v974_v45  ;;  %v1040_v61 = vadd.f32 %v1028_v51, %v1024_v37  ;;  %v1049_v62 = vadd.f32 %v1029_v52, %v1025_v38  ;;  %v976_v63 = vpack.c.bf16 %v965_v60, %v964_v55  ;;  %v989_v0 = vadd.f32 %v988_v46, %v964_v55 }
 0x11e   : > { %983 = vst [vmem:[%s1988_s2 + $0x18] sm:$0xff] %v975_v53  ;;  %v1058_v3 = vadd.f32 %v1030_v58, %v1026_v40  ;;  %v1067_v4 = vadd.f32 %v1031_v59, %v1027_v44  ;;  %v998_v5 = vadd.f32 %v997_v50, %v965_v60  ;;  %v1032_v6 = vmul.f32 %v964_v55, %v964_v55  ;;  %v971_v22 = vld [vmem:[#allocation2 + $0x28] sm:$0xff] }
 0x11f   : > { %984 = vst [vmem:[%s1988_s2 + $0x20] sm:$0xff] %v976_v63  ;;  %v1033_v8 = vmul.f32 %v965_v60, %v965_v60  ;;  %v977_v9 = vpack.c.bf16 %v967_v2, %v966_v1  ;;  %v1007_v10 = vadd.f32 %v1006_v56, %v966_v1  ;;  %v1016_v11 = vadd.f32 %v1015_v57, %v967_v2 }
 0x120   : > { %v1041_v13 = vadd.f32 %v1040_v61, %v1032_v6  ;;  %v1034_v14 = vmul.f32 %v966_v1, %v966_v1  ;;  %v1035_v15 = vmul.f32 %v967_v2, %v967_v2  ;;  %v978_v16 = vpack.c.bf16 %v969_v12, %v968_v7 }
 0x121   : > { %v1050_v17 = vadd.f32 %v1049_v62, %v1033_v8  ;;  %985 = vst [vmem:[%s1988_s2 + $0x28] sm:$0xff] %v977_v9  ;;  %v990_v18 = vadd.f32 %v989_v0, %v968_v7  ;;  %v999_v19 = vadd.f32 %v998_v5, %v969_v12  ;;  %v1036_v20 = vmul.f32 %v968_v7, %v968_v7 }
 0x122   : > { %v1059_v23 = vadd.f32 %v1058_v3, %v1034_v14  ;;  %v1068_v24 = vadd.f32 %v1067_v4, %v1035_v15  ;;  %986 = vst [vmem:[%s1988_s2 + $0x30] sm:$0xff] %v978_v16  ;;  %v1037_v49 = vmul.f32 %v969_v12, %v969_v12  ;;  %v979_v25 = vpack.c.bf16 %v971_v22, %v970_v21 }
 0x123   : > { %v991_v26 = vrot.slane %v990_v18, 4  ;;  %v1000_v27 = vrot.slane %v999_v19, 4  ;;  %v1042_v54 = vadd.f32 %v1041_v13, %v1036_v20  ;;  %v1008_v28 = vadd.f32 %v1007_v10, %v970_v21 }
 0x124   : > { %v1051_v29 = vadd.f32 %v1050_v17, %v1037_v49  ;;  %987 = vst [vmem:[%s1988_s2 + $0x38] sm:$0xff] %v979_v25  ;;  %v1017_v30 = vadd.f32 %v1016_v11, %v971_v22  ;;  %v1038_v31 = vmul.f32 %v970_v21, %v970_v21  ;;  %v1039_v32 = vmul.f32 %v971_v22, %v971_v22 }
 0x125   : > { %v992_v33 = vadd.f32 %v991_v26, %v990_v18  ;;  %v1001_v34 = vadd.f32 %v1000_v27, %v999_v19  ;;  %v1043_v35 = vrot.slane %v1042_v54, 4  ;;  %v1009_v36 = vrot.slane %v1008_v28, 4 }
 0x126   : > { %v1052_v37 = vrot.slane %v1051_v29, 4  ;;  %v1018_v38 = vrot.slane %v1017_v30, 4  ;;  %v1060_v39 = vadd.f32 %v1059_v23, %v1038_v31  ;;  %v1069_v40 = vadd.f32 %v1068_v24, %v1039_v32 }
 0x127   : > { %v993_v41 = vrot.slane %v992_v33, 2  ;;  %v1002_v42 = vrot.slane %v1001_v34, 2  ;;  %v1044_v43 = vadd.f32 %v1043_v35, %v1042_v54  ;;  %v1010_v44 = vadd.f32 %v1009_v36, %v1008_v28 }
 0x128   : > { %v1053_v45 = vadd.f32 %v1052_v37, %v1051_v29  ;;  %v1019_v46 = vadd.f32 %v1018_v38, %v1017_v30  ;;  %v1061_v47 = vrot.slane %v1060_v39, 4  ;;  %v1070_v48 = vrot.slane %v1069_v40, 4 }
 0x129   : > { %v1011_v50 = vrot.slane %v1010_v44, 2  ;;  %v994_v51 = vadd.f32 %v993_v41, %v992_v33  ;;  %v1045_v52 = vrot.slane %v1044_v43, 2  ;;  %v1003_v53 = vadd.f32 %v1002_v42, %v1001_v34 }
 0x12a   : > { %v1020_v55 = vrot.slane %v1019_v46, 2  ;;  %v1062_v56 = vadd.f32 %v1061_v47, %v1060_v39  ;;  %v1071_v57 = vadd.f32 %v1070_v48, %v1069_v40  ;;  %v1054_v58 = vrot.slane %v1053_v45, 2 }
 0x12b   : > { %v995_v59 = vrot.slane %v994_v51, 1  ;;  %v1046_v60 = vadd.f32 %v1045_v52, %v1044_v43  ;;  %v1004_v61 = vrot.slane %v1003_v53, 1  ;;  %v1012_v62 = vadd.f32 %v1011_v50, %v1010_v44 }
 0x12c   : > { %v1055_v63 = vadd.f32 %v1054_v58, %v1053_v45  ;;  %v1063_v0 = vrot.slane %v1062_v56, 2  ;;  %v1021_v1 = vadd.f32 %v1020_v55, %v1019_v46  ;;  %v1072_v2 = vrot.slane %v1071_v57, 2 }
 0x12d   : > { %v996_v3 = vadd.f32 %v995_v59, %v994_v51  ;;  %v1047_v4 = vrot.slane %v1046_v60, 1  ;;  %v1005_v5 = vadd.f32 %v1004_v61, %v1003_v53  ;;  %v1013_v6 = vrot.slane %v1012_v62, 1 }
 0x12e   : > { %v1056_v7 = vrot.slane %v1055_v63, 1  ;;  %v1064_v8 = vadd.f32 %v1063_v0, %v1062_v56  ;;  %v1022_v9 = vrot.slane %v1021_v1, 1  ;;  %v1073_v10 = vadd.f32 %v1072_v2, %v1071_v57 }
 0x12f   : > { %v1048_v11 = vadd.f32 %v1047_v4, %v1046_v60  ;;  %v1014_v12 = vadd.f32 %v1013_v6, %v1012_v62 }
 0x130   : > { %v1057_v13 = vadd.f32 %v1056_v7, %v1055_v63  ;;  %v1065_v14 = vrot.slane %v1064_v8, 1  ;;  %v1023_v15 = vadd.f32 %v1022_v9, %v1021_v1  ;;  %v1074_v16 = vrot.slane %v1073_v10, 1 }
 0x131   : > { %v1077_v17 = vsel %vm1076_vm0, %v996_v3, %v1048_v11 }
 0x132   : > { %v1082_v18 = vsel %vm1081_vm1, %v1077_v17, 0.0  ;;  %v1078_v19 = vsel %vm1076_vm0, %v1005_v5, %v1057_v13  ;;  %v1066_v20 = vadd.f32 %v1065_v14, %v1064_v8  ;;  %v1075_v21 = vadd.f32 %v1074_v16, %v1073_v10 }
 0x133   : > { %1086 = vst [vmem:[%s1989_s3] sm:$0xff] %v1082_v18  ;;  %v1083_v22 = vsel %vm1081_vm1, %v1078_v19, 0.0 }
 0x134   : > { %1087 = vst [vmem:[%s1989_s3 + $0x8] sm:$0xff] %v1083_v22  ;;  %v1079_v23 = vsel %vm1076_vm0, %v1014_v12, %v1066_v20  ;;  %v1080_v24 = vsel %vm1076_vm0, %v1023_v15, %v1075_v21 }
 0x135   : > { %v1084_v49 = vsel %vm1081_vm1, %v1079_v23, 0.0  ;;  %v1085_v25 = vsel %vm1081_vm1, %v1080_v24, 0.0 }
 0x136   : > { %1088 = vst [vmem:[%s1989_s3 + $0x10] sm:$0xff] %v1084_v49 }
 0x137   : > { %1089 = vst [vmem:[%s1989_s3 + $0x18] sm:$0xff] %v1085_v25 }
 0x138 PF: > { %s14_s16 = sadd.s32 1, %s1688_s16   ;;  %s1990_s12 = smov %s1676_s13 }
 0x139   : > { %p11_p12 = scmp.ge.s32.totalorder %s14_s16, 20   ;;  %s1991_s13 = smov %s1746_s20 }
 0x13a   : > { %s1992_s14 = smov %s1684_s15  ;;  %s1993_s15 = smov %s1995_s17 }
 0x13b   :  { %13 = sbr.rel (!%p11_p12) target bundleno = 3 (0x3), region = 124 }

// kernel: conv_unet_forward.44
= control target key start
LH: loop header
LB: loop body
LE: loop exit
PB: predicated region body
PF: predicated region fallthrough
CT: control target
= control target key end

     0   :  { %s248_s0 = inlined_call_operand.vmem [shape: bf16[32,512], index: 0, kind: input, shape index: {}]   ;;  %s249_s1 = inlined_call_operand.vmem [shape: f32[1,512], index: 1, kind: input, shape index: {}]   ;;  %s250_s2 = inlined_call_operand.vmem [shape: f32[1,512], index: 2, kind: input, shape index: {}]   ;;  %s251_s3 = inlined_call_operand.vmem [shape: bf16[32,512], index: 3, kind: output, shape index: {}]  }
   0x1   :  { %v14_v0 = vld [vmem:[%s248_s0] sm:$0xff]  ;;  %v15_v7 = vld [vmem:[%s248_s0 + $0x8] sm:$0xff]  ;;  %v16_v8 = vld [vmem:[%s248_s0 + $0x10] sm:$0xff] }
   0x2   :  { %v38_v1 = vld [vmem:[%s249_s1] sm:$0xf]  ;;  %v22_v3 = vunpack.c.l.bf16 %v14_v0  ;;  %v23_v4 = vunpack.c.h.bf16 %v14_v0  ;;  %v24_v11 = vunpack.c.l.bf16 %v15_v7  ;;  %v25_v12 = vunpack.c.h.bf16 %v15_v7  ;;  %v17_v17 = vld [vmem:[%s248_s0 + $0x18] sm:$0xff]  ;;  %v19_v39 = vld [vmem:[%s248_s0 + $0x28] sm:$0xff] }
   0x3   :  { %v64_v2 = vld [vmem:[%s250_s2] sm:$0xf]  ;;  %v155_v5 = vperm.slane %v38_v1, 0  ;;  %v157_v6 = vperm.slane %v38_v1, 1  ;;  %v171_v15 = vperm.slane %v38_v1, 2  ;;  %v173_v16 = vperm.slane %v38_v1, 3 }
   0x4   :  { %v165_v9 = vperm.slane %v64_v2, 0  ;;  %v167_v10 = vperm.slane %v64_v2, 1  ;;  %v178_v18 = vperm.slane %v64_v2, 2  ;;  %v180_v19 = vperm.slane %v64_v2, 3  ;;  %v18_v30 = vld [vmem:[%s248_s0 + $0x20] sm:$0xff]  ;;  %v20_v48 = vld [vmem:[%s248_s0 + $0x30] sm:$0xff] }
   0x5   :  { %v48_v13 = vmul.f32 %v155_v5, %v22_v3  ;;  %v49_v14 = vmul.f32 %v157_v6, %v23_v4  ;;  %v26_v20 = vunpack.c.l.bf16 %v16_v8  ;;  %v27_v21 = vunpack.c.h.bf16 %v16_v8  ;;  %v21_v53 = vld [vmem:[%s248_s0 + $0x38] sm:$0xff] }
   0x6   :  { %v50_v24 = vmul.f32 %v171_v15, %v24_v11  ;;  %v51_v25 = vmul.f32 %v173_v16, %v25_v12  ;;  %v28_v28 = vunpack.c.l.bf16 %v17_v17  ;;  %v29_v29 = vunpack.c.h.bf16 %v17_v17 }
   0x7   :  { %v74_v22 = vadd.f32 %v165_v9, %v48_v13  ;;  %v75_v23 = vadd.f32 %v167_v10, %v49_v14  ;;  %v52_v26 = vmul.f32 %v155_v5, %v26_v20  ;;  %v53_v27 = vmul.f32 %v157_v6, %v27_v21 }
   0x8   :  { %v76_v33 = vadd.f32 %v178_v18, %v50_v24  ;;  %v77_v34 = vadd.f32 %v180_v19, %v51_v25  ;;  %v54_v37 = vmul.f32 %v171_v15, %v28_v28  ;;  %v55_v38 = vmul.f32 %v173_v16, %v29_v29 }
   0x9   :  { %v90_v31 = vmax.f32 %v74_v22, 0.0  ;;  %v91_v32 = vmax.f32 %v75_v23, 0.0  ;;  %v78_v35 = vadd.f32 %v165_v9, %v52_v26  ;;  %v79_v36 = vadd.f32 %v167_v10, %v53_v27 }
   0xa   :  { %v92_v41 = vmax.f32 %v76_v33, 0.0  ;;  %v93_v42 = vmax.f32 %v77_v34, 0.0  ;;  %v30_v43 = vunpack.c.l.bf16 %v18_v30  ;;  %v80_v46 = vadd.f32 %v178_v18, %v54_v37 }
   0xb   :  { %v106_v40 = vpack.c.bf16 %v91_v32, %v90_v31  ;;  %v94_v44 = vmax.f32 %v78_v35, 0.0  ;;  %v95_v45 = vmax.f32 %v79_v36, 0.0  ;;  %v81_v47 = vadd.f32 %v180_v19, %v55_v38 }
   0xc   :  { %v107_v49 = vpack.c.bf16 %v93_v42, %v92_v41  ;;  %v31_v50 = vunpack.c.h.bf16 %v18_v30  ;;  %v56_v51 = vmul.f32 %v155_v5, %v30_v43  ;;  %v32_v52 = vunpack.c.l.bf16 %v19_v39 }
   0xd   :  { %114 = vst [vmem:[%s251_s3] sm:$0xff] %v106_v40  ;;  %v108_v54 = vpack.c.bf16 %v95_v45, %v94_v44  ;;  %v96_v55 = vmax.f32 %v80_v46, 0.0  ;;  %v97_v56 = vmax.f32 %v81_v47, 0.0  ;;  %v33_v57 = vunpack.c.h.bf16 %v19_v39 }
   0xe   :  { %115 = vst [vmem:[%s251_s3 + $0x8] sm:$0xff] %v107_v49  ;;  %v57_v58 = vmul.f32 %v157_v6, %v31_v50  ;;  %v82_v59 = vadd.f32 %v165_v9, %v56_v51  ;;  %v58_v60 = vmul.f32 %v171_v15, %v32_v52  ;;  %v34_v61 = vunpack.c.l.bf16 %v20_v48 }
   0xf   :  { %116 = vst [vmem:[%s251_s3 + $0x10] sm:$0xff] %v108_v54  ;;  %v109_v62 = vpack.c.bf16 %v97_v56, %v96_v55  ;;  %v59_v63 = vmul.f32 %v173_v16, %v33_v57  ;;  %v35_v0 = vunpack.c.h.bf16 %v20_v48  ;;  %v36_v1 = vunpack.c.l.bf16 %v21_v53 }
  0x10   :  { %v83_v2 = vadd.f32 %v167_v10, %v57_v58  ;;  %v98_v3 = vmax.f32 %v82_v59, 0.0  ;;  %v84_v4 = vadd.f32 %v178_v18, %v58_v60  ;;  %v60_v7 = vmul.f32 %v155_v5, %v34_v61 }
  0x11   :  { %117 = vst [vmem:[%s251_s3 + $0x18] sm:$0xff] %v109_v62  ;;  %v85_v8 = vadd.f32 %v180_v19, %v59_v63  ;;  %v61_v11 = vmul.f32 %v157_v6, %v35_v0  ;;  %v37_v12 = vunpack.c.h.bf16 %v21_v53  ;;  %v62_v13 = vmul.f32 %v171_v15, %v36_v1 }
  0x12   :  { %v99_v14 = vmax.f32 %v83_v2, 0.0  ;;  %v100_v17 = vmax.f32 %v84_v4, 0.0  ;;  %v86_v20 = vadd.f32 %v165_v9, %v60_v7 }
  0x13   :  { %v101_v21 = vmax.f32 %v85_v8, 0.0  ;;  %v87_v22 = vadd.f32 %v167_v10, %v61_v11  ;;  %v63_v5 = vmul.f32 %v173_v16, %v37_v12  ;;  %v88_v23 = vadd.f32 %v178_v18, %v62_v13 }
  0x14   :  { %v110_v24 = vpack.c.bf16 %v99_v14, %v98_v3  ;;  %v102_v25 = vmax.f32 %v86_v20, 0.0 }
  0x15   :  { %v111_v26 = vpack.c.bf16 %v101_v21, %v100_v17  ;;  %v103_v27 = vmax.f32 %v87_v22, 0.0  ;;  %v89_v6 = vadd.f32 %v180_v19, %v63_v5  ;;  %v104_v28 = vmax.f32 %v88_v23, 0.0 }
  0x16   :  { %118 = vst [vmem:[%s251_s3 + $0x20] sm:$0xff] %v110_v24 }
  0x17   :  { %119 = vst [vmem:[%s251_s3 + $0x28] sm:$0xff] %v111_v26  ;;  %v112_v9 = vpack.c.bf16 %v103_v27, %v102_v25  ;;  %v105_v10 = vmax.f32 %v89_v6, 0.0 }
  0x19   :  { %120 = vst [vmem:[%s251_s3 + $0x30] sm:$0xff] %v112_v9  ;;  %v113_v15 = vpack.c.bf16 %v105_v10, %v104_v28 }
  0x1b   :  { %121 = vst [vmem:[%s251_s3 + $0x38] sm:$0xff] %v113_v15 }

// kernel: conv_unet_forward.45
= control target key start
LH: loop header
LB: loop body
LE: loop exit
PB: predicated region body
PF: predicated region fallthrough
CT: control target
= control target key end

     0   :  { %s1569_s12 = smov 0   ;;  %s1571_s13 = smov 0   ;;  %s1816_s0 = inlined_call_operand.vmem [shape: bf16[16,9216], index: 0, kind: input, shape index: {}]   ;;  %s1817_s1 = inlined_call_operand.vmem [shape: bf16[9216,512], index: 1, kind: input, shape index: {}]   ;;  %s1818_s2 = inlined_call_operand.vmem [shape: bf16[16,512], index: 2, kind: output, shape index: {0}]   ;;  %s1819_s3 = inlined_call_operand.vmem [shape: f32[1,8,512], index: 3, kind: output, shape index: {1}]  }
   0x1   :  { %s1573_s14 = smov 0   ;;  %s1575_s15 = smov 0  }
   0x2   :  { %s1577_s16 = smov 0  }
   0x3 LB: > { %s26_s17 = sadd.s32 1, %s1542_s15  ;;  %p49_p1 = scmp.ne.s32.totalorder %s1534_s13, %s1530_s12  ;;  %s1546_s16 = sphi %s1577_s16, %s14_s16   ;;  %s1542_s15 = sphi %s1575_s15, %s1823_s15   ;;  %s1538_s14 = sphi %s1573_s14, %s1822_s14   ;;  %s1534_s13 = sphi %s1571_s13, %s1821_s13   ;;  %s1530_s12 = sphi %s1569_s12, %s1820_s12  }
   0x4   : > { %p27_p0 = scmp.ge.s32.totalorder %s26_s17, 36  ;;  %p50_p2 = scmp.eq.s32.totalorder %s1546_s16, 0 }
   0x5   : > { %s42_s19 = sadd.s32 1, %s1534_s13  ;;  %p1118_p5 = scmp.ge.s32.totalorder %s1546_s16, 36 }
   0x6   : > { %s1825_s17 = smov (%p27_p0, %s26_s17), 0  ;;  %p51_p3 = por %p50_p2, %p49_p1 }
   0x7   : > { %s38_s18 = ssub.s32 %s1542_s15, %s1825_s17  ;;  %159 = sbr.rel (%p1118_p5) target bundleno = 18 (0x12), region = 16 }
   0x8   : > { %p40_p4 = scmp.eq.s32.totalorder %s38_s18, 0 }
   0xa   : > { %s1604_s20 = scalar_select %p40_p4, %s1534_s13, %s42_s19  }
   0xc   : > { %162 = sbr.rel (!%p51_p3) target bundleno = 18 (0x12), region = 20  ;;  %s164_s21 = sand.u32 (%p51_p3), 1, %s1534_s13  }
   0xd   : > { %s1399_s22 = sshll.u32 (%p51_p3), %s1542_s15, 3  ;;  %s1119_s23 = sshll.u32 (%p51_p3), %s164_s21, 4 }
   0xe   : > { %s172_s26 = scalar_lea.vmem (%p51_p3), %s1816_s0, %s1399_s22  ;;  %s166_s27 = scalar_lea.vmem (%p51_p3), [#allocation3], %s1119_s23 }
   0xf   : > { %v203_v0 = vld [vmem:[%s172_s26] sm:$0xff] (%p51_p3) }
  0x10   : > { %v205_v1 = vld [vmem:[%s172_s26 + $0x120] sm:$0xff] (%p51_p3)  ;;  %204 = vst [vmem:[%s166_s27] sm:$0xff] (%p51_p3), %v203_v0 }
  0x11   : > { %206 = vst [vmem:[%s166_s27 + $0x8] sm:$0xff] %v205_v1 }
  0x12 PF: > { %p1122_p6 = scmp.ge.s32.totalorder %s1546_s16, 1  ;;  %p226_p7 = scmp.lt.s32.totalorder %s1546_s16, 37 }
  0x14   : > { %p227_p8 = pnand %p1122_p6, %p226_p7 }
  0x15   : > { %s233_s28 = sand.u32 (!%p227_p8), 1, %s1530_s12   ;;  %s1124_s29 = sshll.u32 (!%p227_p8), %s1538_s14, 5 }
  0x16   : > { %230 = sbr.rel (%p227_p8) target bundleno = 280 (0x118), region = 62  ;;  %s1123_s30 = sshll.u32 (!%p227_p8), %s233_s28, 4 }
  0x17   : > { %p284_p9 = scmp.lt.s32.totalorder (!%p227_p8), %s1124_s29, 1151  ;;  %s1621_s8 = scalar_lea.vmem (!%p227_p8), [#allocation3], %s1123_s30 }
  0x18   : > { %p1127_p10 = scmp.ne.s32.totalorder (!%p227_p8), %s1538_s14, 0 }
  0x1b   : > { %s1827_s29 = smov (!%p284_p9, %s1124_s29), 1151  ;;  %319 = sbr.rel (%p1127_p10) target bundleno = 41 (0x29), region = 70 }
  0x1c   : > { %s1400_s4 = sshll.u32 %s1827_s29, 4 }
  0x1d   : > { %s1619_s7 = scalar_lea.vmem %s1817_s1, %s1400_s4 }
  0x20   : > { %v1548_v2 = vmov 0.0  }
  0x21   : > { %320 = vst [vmem:[#allocation2 + $0x30] sm:$0xff] %v1548_v2 }
  0x22   : > { %321 = vst [vmem:[#allocation2] sm:$0xff] %v1548_v2 }
  0x23   : > { %322 = vst [vmem:[#allocation2 + $0x18] sm:$0xff] %v1548_v2 }
  0x24   : > { %323 = vst [vmem:[#allocation2 + $0x10] sm:$0xff] %v1548_v2 }
  0x25   : > { %324 = vst [vmem:[#allocation2 + $0x8] sm:$0xff] %v1548_v2 }
  0x26   : > { %325 = vst [vmem:[#allocation2 + $0x20] sm:$0xff] %v1548_v2 }
  0x27   : > { %326 = vst [vmem:[#allocation2 + $0x28] sm:$0xff] %v1548_v2 }
  0x28   : > { %327 = vst [vmem:[#allocation2 + $0x38] sm:$0xff] %v1548_v2 }
  0x29 PF: > { %v1250_v3 = vld [vmem:[%s1619_s7 + $0xe0] sm:$0xf]  ;;  %v1433_v4 = vld [vmem:[%s1619_s7 + $0xec] sm:$0xf0]  ;;  %v1431_v8 = vld [vmem:[%s1619_s7 + $0xe4] sm:$0xf] }
  0x2a   : > { %v1378_v5 = vld [vmem:[%s1619_s7 + $0x1e0] sm:$0xf]  ;;  %v1251_v6 = vor.u32 %v1433_v4, %v1250_v3  ;;  %v1465_v7 = vld [vmem:[%s1619_s7 + $0x1ec] sm:$0xf0]  ;;  %v1252_v9 = vld [vmem:[%s1619_s7 + $0xf0] sm:$0xf0] }
  0x2b   : > { %v1379_v10 = vor.u32 %v1465_v7, %v1378_v5  ;;  %v1255_v11 = vor.u32 %v1431_v8, %v1252_v9  ;;  %v1463_v12 = vld [vmem:[%s1619_s7 + $0x1e4] sm:$0xf]  ;;  %v1380_v13 = vld [vmem:[%s1619_s7 + $0x1f0] sm:$0xf0]  ;;  %v1234_v14 = vld [vmem:[%s1619_s7 + $0xc0] sm:$0xf] }
  0x2c   : > { %732 = vmatpush.bf16.msra.mxu0 %v1251_v6  ;;  %v1383_v15 = vor.u32 %v1463_v12, %v1380_v13  ;;  %v1429_v16 = vld [vmem:[%s1619_s7 + $0xcc] sm:$0xf0]  ;;  %v1362_v17 = vld [vmem:[%s1619_s7 + $0x1c0] sm:$0xf]  ;;  %v1427_v21 = vld [vmem:[%s1619_s7 + $0xc4] sm:$0xf] }
  0x2d   : > { %v1461_v18 = vld [vmem:[%s1619_s7 + $0x1cc] sm:$0xf0]  ;;  %746 = vmatpush.bf16.msra.mxu1 %v1379_v10  ;;  %760 = vmatpush.bf16.msra.mxu2 %v1255_v11  ;;  %v1235_v19 = vor.u32 %v1429_v16, %v1234_v14  ;;  %v1236_v22 = vld [vmem:[%s1619_s7 + $0xd0] sm:$0xf0]  ;;  %v1459_v23 = vld [vmem:[%s1619_s7 + $0x1c4] sm:$0xf] }
  0x2e   : > { %v1363_v20 = vor.u32 %v1461_v18, %v1362_v17  ;;  %774 = vmatpush.bf16.msra.mxu3 %v1383_v15  ;;  %v1239_v24 = vor.u32 %v1427_v21, %v1236_v22  ;;  %v1364_v25 = vld [vmem:[%s1619_s7 + $0x1d0] sm:$0xf0]  ;;  %v1218_v26 = vld [vmem:[%s1619_s7 + $0xa0] sm:$0xf]  ;;  %v1425_v27 = vld [vmem:[%s1619_s7 + $0xac] sm:$0xf0] }
  0x2f   : > { %v1367_v28 = vor.u32 %v1459_v23, %v1364_v25  ;;  %v1346_v29 = vld [vmem:[%s1619_s7 + $0x1a0] sm:$0xf]  ;;  %v1457_v30 = vld [vmem:[%s1619_s7 + $0x1ac] sm:$0xf0]  ;;  %v1423_v31 = vld [vmem:[%s1619_s7 + $0xa4] sm:$0xf]  ;;  %v1219_v32 = vor.u32 %v1425_v27, %v1218_v26 }
  0x30   : > { %733 = vmatpush.bf16.msra.mxu0 %v1235_v19  ;;  %v1220_v33 = vld [vmem:[%s1619_s7 + $0xb0] sm:$0xf0]  ;;  %v1455_v34 = vld [vmem:[%s1619_s7 + $0x1a4] sm:$0xf]  ;;  %v1347_v36 = vor.u32 %v1457_v30, %v1346_v29  ;;  %v1202_v38 = vld [vmem:[%s1619_s7 + $0x80] sm:$0xf] }
  0x31   : > { %v1348_v35 = vld [vmem:[%s1619_s7 + $0x1b0] sm:$0xf0]  ;;  %747 = vmatpush.bf16.msra.mxu1 %v1363_v20  ;;  %761 = vmatpush.bf16.msra.mxu2 %v1239_v24  ;;  %v1223_v37 = vor.u32 %v1423_v31, %v1220_v33  ;;  %v1421_v39 = vld [vmem:[%s1619_s7 + $0x8c] sm:$0xf0]  ;;  %v1330_v40 = vld [vmem:[%s1619_s7 + $0x180] sm:$0xf] }
  0x32   : > { %775 = vmatpush.bf16.msra.mxu3 %v1367_v28  ;;  %v1351_v41 = vor.u32 %v1455_v34, %v1348_v35  ;;  %v1453_v42 = vld [vmem:[%s1619_s7 + $0x18c] sm:$0xf0]  ;;  %v1419_v43 = vld [vmem:[%s1619_s7 + $0x84] sm:$0xf]  ;;  %v1204_v44 = vld [vmem:[%s1619_s7 + $0x90] sm:$0xf0]  ;;  %v1203_v47 = vor.u32 %v1421_v39, %v1202_v38 }
  0x33   : > { %v1451_v45 = vld [vmem:[%s1619_s7 + $0x184] sm:$0xf]  ;;  %v1332_v46 = vld [vmem:[%s1619_s7 + $0x190] sm:$0xf0]  ;;  %v1331_v48 = vor.u32 %v1453_v42, %v1330_v40  ;;  %v1207_v49 = vor.u32 %v1419_v43, %v1204_v44  ;;  %v1186_v50 = vld [vmem:[%s1619_s7 + $0x60] sm:$0xf] }
  0x34   : > { %734 = vmatpush.bf16.msra.mxu0 %v1219_v32  ;;  %v1417_v51 = vld [vmem:[%s1619_s7 + $0x6c] sm:$0xf0]  ;;  %v1314_v52 = vld [vmem:[%s1619_s7 + $0x160] sm:$0xf]  ;;  %v1335_v53 = vor.u32 %v1451_v45, %v1332_v46  ;;  %v1415_v55 = vld [vmem:[%s1619_s7 + $0x64] sm:$0xf] }
  0x35   : > { %748 = vmatpush.bf16.msra.mxu1 %v1347_v36  ;;  %762 = vmatpush.bf16.msra.mxu2 %v1223_v37  ;;  %v1449_v54 = vld [vmem:[%s1619_s7 + $0x16c] sm:$0xf0]  ;;  %v1188_v56 = vld [vmem:[%s1619_s7 + $0x70] sm:$0xf0]  ;;  %v1447_v57 = vld [vmem:[%s1619_s7 + $0x164] sm:$0xf]  ;;  %v1187_v59 = vor.u32 %v1417_v51, %v1186_v50 }
  0x36   : > { %776 = vmatpush.bf16.msra.mxu3 %v1351_v41  ;;  %v1316_v58 = vld [vmem:[%s1619_s7 + $0x170] sm:$0xf0]  ;;  %v1315_v60 = vor.u32 %v1449_v54, %v1314_v52  ;;  %v1191_v61 = vor.u32 %v1415_v55, %v1188_v56  ;;  %v1170_v62 = vld [vmem:[%s1619_s7 + $0x40] sm:$0xf]  ;;  %v1413_v63 = vld [vmem:[%s1619_s7 + $0x4c] sm:$0xf0] }
  0x37   : > { %v1298_v0 = vld [vmem:[%s1619_s7 + $0x140] sm:$0xf]  ;;  %v1319_v1 = vor.u32 %v1447_v57, %v1316_v58  ;;  %v1445_v2 = vld [vmem:[%s1619_s7 + $0x14c] sm:$0xf0]  ;;  %v1411_v3 = vld [vmem:[%s1619_s7 + $0x44] sm:$0xf]  ;;  %v1171_v7 = vor.u32 %v1413_v63, %v1170_v62 }
  0x38   : > { %735 = vmatpush.bf16.msra.mxu0 %v1203_v47  ;;  %v1172_v4 = vld [vmem:[%s1619_s7 + $0x50] sm:$0xf0]  ;;  %v1443_v5 = vld [vmem:[%s1619_s7 + $0x144] sm:$0xf]  ;;  %v1299_v8 = vor.u32 %v1445_v2, %v1298_v0  ;;  %v1154_v10 = vld [vmem:[%s1619_s7 + $0x20] sm:$0xf] }
  0x39   : > { %749 = vmatpush.bf16.msra.mxu1 %v1331_v48  ;;  %763 = vmatpush.bf16.msra.mxu2 %v1207_v49  ;;  %v1300_v6 = vld [vmem:[%s1619_s7 + $0x150] sm:$0xf0]  ;;  %v1175_v9 = vor.u32 %v1411_v3, %v1172_v4  ;;  %v1409_v11 = vld [vmem:[%s1619_s7 + $0x2c] sm:$0xf0]  ;;  %v1282_v12 = vld [vmem:[%s1619_s7 + $0x120] sm:$0xf] }
  0x3a   : > { %777 = vmatpush.bf16.msra.mxu3 %v1335_v53  ;;  %v1303_v13 = vor.u32 %v1443_v5, %v1300_v6  ;;  %v1441_v14 = vld [vmem:[%s1619_s7 + $0x12c] sm:$0xf0]  ;;  %v1407_v15 = vld [vmem:[%s1619_s7 + $0x24] sm:$0xf]  ;;  %v1156_v16 = vld [vmem:[%s1619_s7 + $0x30] sm:$0xf0]  ;;  %v1155_v19 = vor.u32 %v1409_v11, %v1154_v10 }
  0x3b   : > { %v1439_v17 = vld [vmem:[%s1619_s7 + $0x124] sm:$0xf]  ;;  %v1284_v18 = vld [vmem:[%s1619_s7 + $0x130] sm:$0xf0]  ;;  %v1138_v20 = vld [vmem:[%s1619_s7] sm:$0xf]  ;;  %v1283_v23 = vor.u32 %v1441_v14, %v1282_v12  ;;  %v1159_v24 = vor.u32 %v1407_v15, %v1156_v16 }
  0x3c   : > { %736 = vmatpush.bf16.msra.mxu0 %v1187_v59  ;;  %v1405_v21 = vld [vmem:[%s1619_s7 + $0xc] sm:$0xf0]  ;;  %v1266_v22 = vld [vmem:[%s1619_s7 + $0x100] sm:$0xf]  ;;  %v1403_v26 = vld [vmem:[%s1619_s7 + $0x4] sm:$0xf]  ;;  %v1287_v28 = vor.u32 %v1439_v17, %v1284_v18 }
  0x3d   : > { %750 = vmatpush.bf16.msra.mxu1 %v1315_v60  ;;  %764 = vmatpush.bf16.msra.mxu2 %v1191_v61  ;;  %v1437_v25 = vld [vmem:[%s1619_s7 + $0x10c] sm:$0xf0]  ;;  %v1140_v27 = vld [vmem:[%s1619_s7 + $0x10] sm:$0xf0]  ;;  %v1435_v29 = vld [vmem:[%s1619_s7 + $0x104] sm:$0xf]  ;;  %v1139_v35 = vor.u32 %v1405_v21, %v1138_v20 }
  0x3e   : > { %778 = vmatpush.bf16.msra.mxu3 %v1319_v1  ;;  %v1268_v30 = vld [vmem:[%s1619_s7 + $0x110] sm:$0xf0]  ;;  %v1258_v31 = vld [vmem:[%s1619_s7 + $0xe8] sm:$0xf]  ;;  %v1434_v32 = vld [vmem:[%s1619_s7 + $0xf4] sm:$0xf0]  ;;  %v1267_v39 = vor.u32 %v1437_v25, %v1266_v22  ;;  %v1143_v40 = vor.u32 %v1403_v26, %v1140_v27 }
  0x3f   : > { %v1386_v33 = vld [vmem:[%s1619_s7 + $0x1e8] sm:$0xf]  ;;  %v1466_v34 = vld [vmem:[%s1619_s7 + $0x1f4] sm:$0xf0]  ;;  %v1432_v36 = vld [vmem:[%s1619_s7 + $0xec] sm:$0xf]  ;;  %v1271_v44 = vor.u32 %v1435_v29, %v1268_v30  ;;  %v1259_v45 = vor.u32 %v1434_v32, %v1258_v31 }
  0x40   : > { %737 = vmatpush.bf16.msra.mxu0 %v1171_v7  ;;  %v1260_v37 = vld [vmem:[%s1619_s7 + $0xf8] sm:$0xf0]  ;;  %v1464_v38 = vld [vmem:[%s1619_s7 + $0x1ec] sm:$0xf]  ;;  %v1130_v42 = vld [vmem:[%s1621_s8] sm:$0xf]  ;;  %v1387_v48 = vor.u32 %v1466_v34, %v1386_v33 }
  0x41   : > { %751 = vmatpush.bf16.msra.mxu1 %v1299_v8  ;;  %765 = vmatpush.bf16.msra.mxu2 %v1175_v9  ;;  %v1388_v41 = vld [vmem:[%s1619_s7 + $0x1f8] sm:$0xf0]  ;;  %v1402_v43 = vld [vmem:[%s1621_s8 + $0x4] sm:$0xf0]  ;;  %v1401_v46 = vld [vmem:[%s1621_s8 + $0x4] sm:$0xf]  ;;  %v1263_v49 = vor.u32 %v1432_v36, %v1260_v37 }
  0x42   : > { %779 = vmatpush.bf16.msra.mxu3 %v1303_v13  ;;  %v1132_v47 = vld [vmem:[%s1621_s8 + $0x8] sm:$0xf0]  ;;  %v1242_v50 = vld [vmem:[%s1619_s7 + $0xc8] sm:$0xf]  ;;  %v1430_v51 = vld [vmem:[%s1619_s7 + $0xd4] sm:$0xf0]  ;;  %v1391_v53 = vor.u32 %v1464_v38, %v1388_v41  ;;  %v1706_v57 = vor.u32 %v1402_v43, %v1130_v42 }
  0x43   : > { %v1370_v52 = vld [vmem:[%s1619_s7 + $0x1c8] sm:$0xf]  ;;  %v1462_v54 = vld [vmem:[%s1619_s7 + $0x1d4] sm:$0xf0]  ;;  %v1428_v55 = vld [vmem:[%s1619_s7 + $0xcc] sm:$0xf]  ;;  %v1710_v60 = vor.u32 %v1401_v46, %v1132_v47  ;;  %v1243_v61 = vor.u32 %v1430_v51, %v1242_v50 }
  0x44   : > { %738 = vmatpush.bf16.msra.mxu0 %v1155_v19  ;;  %v1244_v56 = vld [vmem:[%s1619_s7 + $0xd8] sm:$0xf0]  ;;  %v1460_v58 = vld [vmem:[%s1619_s7 + $0x1cc] sm:$0xf]  ;;  %v1371_v62 = vor.u32 %v1462_v54, %v1370_v52  ;;  %v1226_v0 = vld [vmem:[%s1619_s7 + $0xa8] sm:$0xf] }
  0x45   : > { %752 = vmatpush.bf16.msra.mxu1 %v1283_v23  ;;  %766 = vmatpush.bf16.msra.mxu2 %v1159_v24  ;;  %v1372_v59 = vld [vmem:[%s1619_s7 + $0x1d8] sm:$0xf0]  ;;  %v1247_v63 = vor.u32 %v1428_v55, %v1244_v56  ;;  %v1426_v1 = vld [vmem:[%s1619_s7 + $0xb4] sm:$0xf0]  ;;  %v1354_v2 = vld [vmem:[%s1619_s7 + $0x1a8] sm:$0xf] }
  0x46   : > { %780 = vmatpush.bf16.msra.mxu3 %v1287_v28  ;;  %v1375_v3 = vor.u32 %v1460_v58, %v1372_v59  ;;  %v1458_v4 = vld [vmem:[%s1619_s7 + $0x1b4] sm:$0xf0]  ;;  %v1424_v5 = vld [vmem:[%s1619_s7 + $0xac] sm:$0xf]  ;;  %v1228_v6 = vld [vmem:[%s1619_s7 + $0xb8] sm:$0xf0]  ;;  %v1227_v9 = vor.u32 %v1426_v1, %v1226_v0 }
  0x47   : > { %v1456_v7 = vld [vmem:[%s1619_s7 + $0x1ac] sm:$0xf]  ;;  %v1356_v8 = vld [vmem:[%s1619_s7 + $0x1b8] sm:$0xf0]  ;;  %v1355_v10 = vor.u32 %v1458_v4, %v1354_v2  ;;  %v1231_v11 = vor.u32 %v1424_v5, %v1228_v6  ;;  %v1210_v12 = vld [vmem:[%s1619_s7 + $0x88] sm:$0xf] }
  0x48   : > { %739 = vmatpush.bf16.msra.mxu0 %v1139_v35  ;;  %v1422_v13 = vld [vmem:[%s1619_s7 + $0x94] sm:$0xf0]  ;;  %v1338_v14 = vld [vmem:[%s1619_s7 + $0x188] sm:$0xf]  ;;  %v1359_v15 = vor.u32 %v1456_v7, %v1356_v8  ;;  %v1420_v17 = vld [vmem:[%s1619_s7 + $0x8c] sm:$0xf] }
  0x49   : > { %753 = vmatpush.bf16.msra.mxu1 %v1267_v39  ;;  %767 = vmatpush.bf16.msra.mxu2 %v1143_v40  ;;  %v1454_v16 = vld [vmem:[%s1619_s7 + $0x194] sm:$0xf0]  ;;  %v1212_v18 = vld [vmem:[%s1619_s7 + $0x98] sm:$0xf0]  ;;  %v1452_v19 = vld [vmem:[%s1619_s7 + $0x18c] sm:$0xf]  ;;  %v1211_v21 = vor.u32 %v1422_v13, %v1210_v12 }
  0x4a   : > { %781 = vmatpush.bf16.msra.mxu3 %v1271_v44  ;;  %v1340_v20 = vld [vmem:[%s1619_s7 + $0x198] sm:$0xf0]  ;;  %v1339_v22 = vor.u32 %v1454_v16, %v1338_v14  ;;  %v1215_v23 = vor.u32 %v1420_v17, %v1212_v18  ;;  %v1194_v24 = vld [vmem:[%s1619_s7 + $0x68] sm:$0xf]  ;;  %v1418_v25 = vld [vmem:[%s1619_s7 + $0x74] sm:$0xf0] }
  0x4b   : > { %740 = vmatmul.bf16.vlgmr.msra.gmra.mxu0 %v1706_v57  ;;  %v1322_v26 = vld [vmem:[%s1619_s7 + $0x168] sm:$0xf]  ;;  %v1343_v27 = vor.u32 %v1452_v19, %v1340_v20  ;;  %v1450_v28 = vld [vmem:[%s1619_s7 + $0x174] sm:$0xf0]  ;;  %v1416_v29 = vld [vmem:[%s1619_s7 + $0x6c] sm:$0xf]  ;;  %v1195_v33 = vor.u32 %v1418_v25, %v1194_v24 }
  0x4c   : > { %788 = vmatpush.bf16.msrb.mxu0 %v1259_v45  ;;  %768 = vmatmul.bf16.vlgmr.msra.gmra.mxu2 %v1706_v57  ;;  %v1196_v30 = vld [vmem:[%s1619_s7 + $0x78] sm:$0xf0]  ;;  %v1448_v31 = vld [vmem:[%s1619_s7 + $0x16c] sm:$0xf]  ;;  %v1323_v34 = vor.u32 %v1450_v28, %v1322_v26  ;;  %v1178_v36 = vld [vmem:[%s1619_s7 + $0x48] sm:$0xf] }
  0x4d   : > { %802 = vmatpush.bf16.msrb.mxu1 %v1387_v48  ;;  %816 = vmatpush.bf16.msrb.mxu2 %v1263_v49  ;;  %v1324_v32 = vld [vmem:[%s1619_s7 + $0x178] sm:$0xf0]  ;;  %v1199_v35 = vor.u32 %v1416_v29, %v1196_v30  ;;  %v1414_v37 = vld [vmem:[%s1619_s7 + $0x54] sm:$0xf0]  ;;  %v1306_v38 = vld [vmem:[%s1619_s7 + $0x148] sm:$0xf] }
  0x4e   : > { %830 = vmatpush.bf16.msrb.mxu3 %v1391_v53  ;;  %754 = vmatmul.bf16.vlgmr.msra.gmra.mxu1 %v1710_v60  ;;  %v1327_v39 = vor.u32 %v1448_v31, %v1324_v32  ;;  %v1446_v40 = vld [vmem:[%s1619_s7 + $0x154] sm:$0xf0]  ;;  %v1412_v41 = vld [vmem:[%s1619_s7 + $0x4c] sm:$0xf]  ;;  %v1180_v42 = vld [vmem:[%s1619_s7 + $0x58] sm:$0xf0]  ;;  %v1179_v45 = vor.u32 %v1414_v37, %v1178_v36 }
  0x4f   : > { %782 = vmatmul.bf16.vlgmr.msra.gmra.mxu3 %v1710_v60  ;;  %v1444_v43 = vld [vmem:[%s1619_s7 + $0x14c] sm:$0xf]  ;;  %v1308_v44 = vld [vmem:[%s1619_s7 + $0x158] sm:$0xf0]  ;;  %v1307_v46 = vor.u32 %v1446_v40, %v1306_v38  ;;  %v1183_v47 = vor.u32 %v1412_v41, %v1180_v42  ;;  %v1162_v48 = vld [vmem:[%s1619_s7 + $0x28] sm:$0xf] }
  0x50   : > { %789 = vmatpush.bf16.msrb.mxu0 %v1243_v61  ;;  %v1410_v49 = vld [vmem:[%s1619_s7 + $0x34] sm:$0xf0]  ;;  %v1290_v50 = vld [vmem:[%s1619_s7 + $0x128] sm:$0xf]  ;;  %v1311_v51 = vor.u32 %v1444_v43, %v1308_v44  ;;  %v1408_v53 = vld [vmem:[%s1619_s7 + $0x2c] sm:$0xf] }
  0x51   : > { %803 = vmatpush.bf16.msrb.mxu1 %v1371_v62  ;;  %817 = vmatpush.bf16.msrb.mxu2 %v1247_v63  ;;  %v1442_v52 = vld [vmem:[%s1619_s7 + $0x134] sm:$0xf0]  ;;  %v1164_v54 = vld [vmem:[%s1619_s7 + $0x38] sm:$0xf0]  ;;  %v1440_v55 = vld [vmem:[%s1619_s7 + $0x12c] sm:$0xf]  ;;  %v1163_v58 = vor.u32 %v1410_v49, %v1162_v48 }
  0x52   : > { %831 = vmatpush.bf16.msrb.mxu3 %v1375_v3  ;;  %v1292_v56 = vld [vmem:[%s1619_s7 + $0x138] sm:$0xf0]  ;;  %v1291_v59 = vor.u32 %v1442_v52, %v1290_v50  ;;  %v1167_v61 = vor.u32 %v1408_v53, %v1164_v54  ;;  %v1146_v62 = vld [vmem:[%s1619_s7 + $0x8] sm:$0xf]  ;;  %v1406_v63 = vld [vmem:[%s1619_s7 + $0x14] sm:$0xf0] }
  0x53   : > { %v1274_v0 = vld [vmem:[%s1619_s7 + $0x108] sm:$0xf]  ;;  %v1295_v1 = vor.u32 %v1440_v55, %v1292_v56  ;;  %v1438_v2 = vld [vmem:[%s1619_s7 + $0x114] sm:$0xf0]  ;;  %v1404_v3 = vld [vmem:[%s1619_s7 + $0xc] sm:$0xf]  ;;  %v1147_v7 = vor.u32 %v1406_v63, %v1146_v62 }
  0x54   : > { %790 = vmatpush.bf16.msrb.mxu0 %v1227_v9  ;;  %v1148_v4 = vld [vmem:[%s1619_s7 + $0x18] sm:$0xf0]  ;;  %v1436_v5 = vld [vmem:[%s1619_s7 + $0x10c] sm:$0xf]  ;;  %v1275_v8 = vor.u32 %v1438_v2, %v1274_v0  ;;  %v328_v12 = vld [vmem:[#allocation2 + $0x30] sm:$0xff]  ;;  %p1392_p11 = scmp.ne.s32.totalorder %s1538_s14, 35 }
  0x55   : > { %804 = vmatpush.bf16.msrb.mxu1 %v1355_v10  ;;  %818 = vmatpush.bf16.msrb.mxu2 %v1231_v11  ;;  %v1276_v6 = vld [vmem:[%s1619_s7 + $0x118] sm:$0xf0]  ;;  %v1151_v9 = vor.u32 %v1404_v3, %v1148_v4  ;;  %v329_v17 = vld [vmem:[#allocation2] sm:$0xff] }
  0x56   : > { %832 = vmatpush.bf16.msrb.mxu3 %v1359_v15  ;;  %v1279_v10 = vor.u32 %v1436_v5, %v1276_v6  ;;  %v330_v30 = vld [vmem:[#allocation2 + $0x18] sm:$0xff] }
  0x58   : > { %791 = vmatpush.bf16.msrb.mxu0 %v1211_v21 }
  0x59   : > { %805 = vmatpush.bf16.msrb.mxu1 %v1339_v22  ;;  %819 = vmatpush.bf16.msrb.mxu2 %v1215_v23  ;;  %v332_v22 = vld [vmem:[#allocation2 + $0x8] sm:$0xff] }
  0x5a   : > { %833 = vmatpush.bf16.msrb.mxu3 %v1343_v27 }
  0x5c   : > { %792 = vmatpush.bf16.msrb.mxu0 %v1195_v33 }
  0x5d   : > { %806 = vmatpush.bf16.msrb.mxu1 %v1323_v34  ;;  %820 = vmatpush.bf16.msrb.mxu2 %v1199_v35  ;;  %v331_v35 = vld [vmem:[#allocation2 + $0x10] sm:$0xff] }
  0x5e   : > { %834 = vmatpush.bf16.msrb.mxu3 %v1327_v39  ;;  %v334_v39 = vld [vmem:[#allocation2 + $0x28] sm:$0xff] }
  0x60   : > { %793 = vmatpush.bf16.msrb.mxu0 %v1179_v45  ;;  %v335_v45 = vld [vmem:[#allocation2 + $0x38] sm:$0xff] }
  0x61   : > { %807 = vmatpush.bf16.msrb.mxu1 %v1307_v46  ;;  %821 = vmatpush.bf16.msrb.mxu2 %v1183_v47 }
  0x62   : > { %835 = vmatpush.bf16.msrb.mxu3 %v1311_v51 }
  0x64   : > { %794 = vmatpush.bf16.msrb.mxu0 %v1163_v58 }
  0x65   : > { %808 = vmatpush.bf16.msrb.mxu1 %v1291_v59  ;;  %822 = vmatpush.bf16.msrb.mxu2 %v1167_v61 }
  0x66   : > { %836 = vmatpush.bf16.msrb.mxu3 %v1295_v1 }
  0x68   : > { %795 = vmatpush.bf16.msrb.mxu0 %v1147_v7 }
  0x69   : > { %809 = vmatpush.bf16.msrb.mxu1 %v1275_v8  ;;  %823 = vmatpush.bf16.msrb.mxu2 %v1151_v9 }
  0x6a   : > { %837 = vmatpush.bf16.msrb.mxu3 %v1279_v10 }
  0x6b   : > { %796 = vmatmul.bf16.vlgmr.msrb.gmra.mxu0 %v1706_v57 }
  0x6c   : > { %810 = vmatmul.bf16.vlgmr.msrb.gmra.mxu1 %v1710_v60  ;;  %824 = vmatmul.bf16.vlgmr.msrb.gmra.mxu2 %v1706_v57 }
  0x6d   : > { %838 = vmatmul.bf16.vlgmr.msrb.gmra.mxu3 %v1710_v60  ;;  %v333_v60 = vld [vmem:[#allocation2 + $0x20] sm:$0xff] }
  0xc8   : > { %v741_v11 = vpop.f32.mrf.mxu0 }
  0xcb   : > { %v755_v13 = vpop.f32.mrf.mxu1 }
  0xcc   : > { %v756_v14 = vadd.f32 %v755_v13, %v741_v11 }
  0xce   : > { %v844_v15 = vadd.f32 %v756_v14, %v328_v12 }
  0xcf   : > { %v769_v16 = vpop.f32.mrf.mxu2 }
  0xd0   : > { %852 = vst [vmem:[#allocation2 + $0x30] sm:$0xff] %v844_v15  ;;  %v743_v20 = vpop.f32.mrf.mxu0 }
  0xd2   : > { %v783_v18 = vpop.f32.mrf.mxu3 }
  0xd3   : > { %v784_v19 = vadd.f32 %v783_v18, %v769_v16  ;;  %v757_v23 = vpop.f32.mrf.mxu1 }
  0xd4   : > { %v758_v24 = vadd.f32 %v757_v23, %v743_v20 }
  0xd5   : > { %v845_v21 = vadd.f32 %v784_v19, %v329_v17 }
  0xd6   : > { %v848_v25 = vadd.f32 %v758_v24, %v332_v22 }
  0xd7   : > { %853 = vst [vmem:[#allocation2] sm:$0xff] %v845_v21  ;;  %v771_v57 = vpop.f32.mrf.mxu2 }
  0xd8   : > { %856 = vst [vmem:[#allocation2 + $0x8] sm:$0xff] %v848_v25 }
  0xda   : > { %v785_v26 = vpop.f32.mrf.mxu3 }
  0xdb   : > { %v786_v27 = vadd.f32 %v785_v26, %v771_v57 }
  0xdd   : > { %v849_v28 = vadd.f32 %v786_v27, %v333_v60 }
  0xdf   : > { %857 = vst [vmem:[#allocation2 + $0x20] sm:$0xff] %v849_v28 }
  0xe8   : > { %v797_v29 = vpop.f32.mrf.mxu0 }
  0xe9   : > { %v811_v31 = vpop.f32.mrf.mxu1 }
  0xea   : > { %v812_v32 = vadd.f32 %v811_v31, %v797_v29 }
  0xec   : > { %v846_v33 = vadd.f32 %v812_v32, %v330_v30 }
  0xee   : > { %854 = vst [vmem:[#allocation2 + $0x18] sm:$0xff] %v846_v33 }
  0xef   : > { %v825_v34 = vpop.f32.mrf.mxu2 }
  0xf0   : > { %v839_v36 = vpop.f32.mrf.mxu3  ;;  %v799_v37 = vpop.f32.mrf.mxu0 }
  0xf1   : > { %v840_v38 = vadd.f32 %v839_v36, %v825_v34  ;;  %v813_v40 = vpop.f32.mrf.mxu1 }
  0xf2   : > { %v814_v41 = vadd.f32 %v813_v40, %v799_v37 }
  0xf3   : > { %v847_v42 = vadd.f32 %v840_v38, %v331_v35 }
  0xf4   : > { %v850_v43 = vadd.f32 %v814_v41, %v334_v39 }
  0xf5   : > { %855 = vst [vmem:[#allocation2 + $0x10] sm:$0xff] %v847_v42 }
  0xf6   : > { %858 = vst [vmem:[#allocation2 + $0x28] sm:$0xff] %v850_v43 }
  0xf7   : > { %v827_v44 = vpop.f32.mrf.mxu2 }
  0xf8   : > { %v841_v46 = vpop.f32.mrf.mxu3 }
  0xf9   : > { %v842_v47 = vadd.f32 %v841_v46, %v827_v44  ;;  %863 = sbr.rel (%p1392_p11) target bundleno = 280 (0x118), region = 74 }
  0xfb   : > { %v851_v48 = vadd.f32 %v842_v47, %v335_v45 }
  0xfd   : > { %859 = vst [vmem:[#allocation2 + $0x38] sm:$0xff] %v851_v48 }
  0xfe   : > { %v864_v49 = vld [vmem:[#allocation2 + $0x30] sm:$0xff]  ;;  %v865_v50 = vld [vmem:[#allocation2] sm:$0xff]  ;;  %v866_v51 = vld [vmem:[#allocation2 + $0x18] sm:$0xff]  ;;  %vm944_vm0 = vcmask 1040384   ;;  %vm949_vm1 = vcmask 1041408  }
  0xff   : > { %v872_v52 = vpack.c.bf16 %v865_v50, %v864_v49  ;;  %v908_v53 = vmul.f32 %v864_v49, %v864_v49  ;;  %v909_v54 = vmul.f32 %v865_v50, %v865_v50  ;;  %v867_v55 = vld [vmem:[#allocation2 + $0x10] sm:$0xff]  ;;  %v910_v56 = vmul.f32 %v866_v51, %v866_v51  ;;  %v868_v58 = vld [vmem:[#allocation2 + $0x8] sm:$0xff]  ;;  %v869_v59 = vld [vmem:[#allocation2 + $0x20] sm:$0xff] }
 0x100   : > { %v873_v61 = vpack.c.bf16 %v867_v55, %v866_v51  ;;  %v911_v62 = vmul.f32 %v867_v55, %v867_v55  ;;  %v874_v63 = vpack.c.bf16 %v869_v59, %v868_v58  ;;  %v880_v0 = vadd.f32 %v868_v58, %v864_v49  ;;  %v870_v1 = vld [vmem:[#allocation2 + $0x28] sm:$0xff] }
 0x101   : > { %876 = vst [vmem:[%s1818_s2] sm:$0xff] %v872_v52  ;;  %v887_v3 = vadd.f32 %v869_v59, %v865_v50  ;;  %v912_v4 = vmul.f32 %v868_v58, %v868_v58  ;;  %v913_v5 = vmul.f32 %v869_v59, %v869_v59  ;;  %v894_v8 = vadd.f32 %v870_v1, %v866_v51 }
 0x102   : > { %877 = vst [vmem:[%s1818_s2 + $0x8] sm:$0xff] %v873_v61  ;;  %v881_v7 = vrot.slane %v880_v0, 4  ;;  %v914_v10 = vmul.f32 %v870_v1, %v870_v1 }
 0x103   : > { %878 = vst [vmem:[%s1818_s2 + $0x10] sm:$0xff] %v874_v63  ;;  %v888_v11 = vrot.slane %v887_v3, 4  ;;  %v916_v12 = vadd.f32 %v912_v4, %v908_v53  ;;  %v923_v13 = vadd.f32 %v913_v5, %v909_v54  ;;  %v895_v16 = vrot.slane %v894_v8, 4 }
 0x104   : > { %v871_v2 = vld [vmem:[#allocation2 + $0x38] sm:$0xff]  ;;  %v882_v15 = vadd.f32 %v881_v7, %v880_v0  ;;  %v930_v18 = vadd.f32 %v914_v10, %v910_v56 }
 0x105   : > { %v875_v6 = vpack.c.bf16 %v871_v2, %v870_v1  ;;  %v901_v9 = vadd.f32 %v871_v2, %v867_v55  ;;  %v915_v14 = vmul.f32 %v871_v2, %v871_v2  ;;  %v889_v19 = vadd.f32 %v888_v11, %v887_v3 }
 0x106   : > { %v917_v20 = vrot.slane %v916_v12, 4  ;;  %v924_v21 = vrot.slane %v923_v13, 4  ;;  %v883_v23 = vrot.slane %v882_v15, 2  ;;  %v896_v24 = vadd.f32 %v895_v16, %v894_v8 }
 0x107   : > { %879 = vst [vmem:[%s1818_s2 + $0x18] sm:$0xff] %v875_v6  ;;  %v902_v17 = vrot.slane %v901_v9, 4  ;;  %v937_v22 = vadd.f32 %v915_v14, %v911_v62  ;;  %v931_v57 = vrot.slane %v930_v18, 4  ;;  %v890_v60 = vrot.slane %v889_v19, 2 }
 0x108   : > { %v918_v26 = vadd.f32 %v917_v20, %v916_v12  ;;  %v925_v27 = vadd.f32 %v924_v21, %v923_v13  ;;  %v897_v29 = vrot.slane %v896_v24, 2  ;;  %v884_v32 = vadd.f32 %v883_v23, %v882_v15 }
 0x109   : > { %v903_v25 = vadd.f32 %v902_v17, %v901_v9  ;;  %v938_v28 = vrot.slane %v937_v22, 4  ;;  %v932_v31 = vadd.f32 %v931_v57, %v930_v18  ;;  %v891_v35 = vadd.f32 %v890_v60, %v889_v19 }
 0x10a   : > { %v919_v34 = vrot.slane %v918_v26, 2  ;;  %v926_v36 = vrot.slane %v925_v27, 2  ;;  %v885_v37 = vrot.slane %v884_v32, 1  ;;  %v898_v38 = vadd.f32 %v897_v29, %v896_v24 }
 0x10b   : > { %v904_v30 = vrot.slane %v903_v25, 2  ;;  %v939_v33 = vadd.f32 %v938_v28, %v937_v22  ;;  %v933_v39 = vrot.slane %v932_v31, 2  ;;  %v892_v42 = vrot.slane %v891_v35, 1 }
 0x10c   : > { %v920_v41 = vadd.f32 %v919_v34, %v918_v26  ;;  %v927_v43 = vadd.f32 %v926_v36, %v925_v27  ;;  %v886_v45 = vadd.f32 %v885_v37, %v884_v32  ;;  %v899_v46 = vrot.slane %v898_v38, 1 }
 0x10d   : > { %v905_v40 = vadd.f32 %v904_v30, %v903_v25  ;;  %v940_v44 = vrot.slane %v939_v33, 2  ;;  %v934_v47 = vadd.f32 %v933_v39, %v932_v31  ;;  %v893_v50 = vadd.f32 %v892_v42, %v891_v35 }
 0x10e   : > { %v921_v49 = vrot.slane %v920_v41, 1  ;;  %v928_v51 = vrot.slane %v927_v43, 1  ;;  %v900_v53 = vadd.f32 %v899_v46, %v898_v38 }
 0x10f   : > { %v906_v48 = vrot.slane %v905_v40, 1  ;;  %v941_v52 = vadd.f32 %v940_v44, %v939_v33  ;;  %v935_v54 = vrot.slane %v934_v47, 1 }
 0x110   : > { %v922_v55 = vadd.f32 %v921_v49, %v920_v41  ;;  %v929_v56 = vadd.f32 %v928_v51, %v927_v43 }
 0x111   : > { %v907_v58 = vadd.f32 %v906_v48, %v905_v40  ;;  %v942_v59 = vrot.slane %v941_v52, 1  ;;  %v936_v61 = vadd.f32 %v935_v54, %v934_v47 }
 0x112   : > { %v945_v62 = vsel %vm944_vm0, %v886_v45, %v922_v55  ;;  %v946_v63 = vsel %vm944_vm0, %v893_v50, %v929_v56 }
 0x113   : > { %v943_v0 = vadd.f32 %v942_v59, %v941_v52  ;;  %v950_v1 = vsel %vm949_vm1, %v945_v62, 0.0  ;;  %v951_v2 = vsel %vm949_vm1, %v946_v63, 0.0  ;;  %v947_v3 = vsel %vm944_vm0, %v900_v53, %v936_v61 }
 0x114   : > { %954 = vst [vmem:[%s1819_s3] sm:$0xff] %v950_v1  ;;  %v952_v4 = vsel %vm949_vm1, %v947_v3, 0.0 }
 0x115   : > { %v948_v5 = vsel %vm944_vm0, %v907_v58, %v943_v0  ;;  %955 = vst [vmem:[%s1819_s3 + $0x8] sm:$0xff] %v951_v2 }
 0x116   : > { %v953_v6 = vsel %vm949_vm1, %v948_v5, 0.0  ;;  %956 = vst [vmem:[%s1819_s3 + $0x10] sm:$0xff] %v952_v4 }
 0x117   : > { %957 = vst [vmem:[%s1819_s3 + $0x18] sm:$0xff] %v953_v6 }
 0x118 PF: > { %s14_s16 = sadd.s32 1, %s1546_s16   ;;  %s1820_s12 = smov %s1534_s13 }
 0x119   : > { %p11_p12 = scmp.ge.s32.totalorder %s14_s16, 38   ;;  %s1821_s13 = smov %s1604_s20 }
 0x11a   : > { %s1822_s14 = smov %s1542_s15  ;;  %s1823_s15 = smov %s1825_s17 }
 0x11b   :  { %13 = sbr.rel (!%p11_p12) target bundleno = 3 (0x3), region = 124 }

// kernel: conv_unet_forward.46
= control target key start
LH: loop header
LB: loop body
LE: loop exit
PB: predicated region body
PF: predicated region fallthrough
CT: control target
= control target key end

     0   :  { %s148_s0 = inlined_call_operand.vmem [shape: bf16[16,512], index: 0, kind: input, shape index: {}]   ;;  %s149_s1 = inlined_call_operand.vmem [shape: f32[1,512], index: 1, kind: input, shape index: {}]   ;;  %s150_s2 = inlined_call_operand.vmem [shape: f32[1,512], index: 2, kind: input, shape index: {}]   ;;  %s151_s3 = inlined_call_operand.vmem [shape: bf16[16,512], index: 3, kind: output, shape index: {}]  }
   0x1   :  { %v14_v0 = vld [vmem:[%s148_s0] sm:$0xff]  ;;  %v15_v7 = vld [vmem:[%s148_s0 + $0x8] sm:$0xff]  ;;  %v16_v8 = vld [vmem:[%s148_s0 + $0x10] sm:$0xff] }
   0x2   :  { %v26_v1 = vld [vmem:[%s149_s1] sm:$0xf]  ;;  %v18_v3 = vunpack.c.l.bf16 %v14_v0  ;;  %v19_v4 = vunpack.c.h.bf16 %v14_v0  ;;  %v20_v11 = vunpack.c.l.bf16 %v15_v7  ;;  %v21_v12 = vunpack.c.h.bf16 %v15_v7  ;;  %v17_v17 = vld [vmem:[%s148_s0 + $0x18] sm:$0xff] }
   0x3   :  { %v44_v2 = vld [vmem:[%s150_s2] sm:$0xf]  ;;  %v28_v5 = vperm.slane %v26_v1, 0  ;;  %v29_v6 = vperm.slane %v26_v1, 1  ;;  %v30_v15 = vperm.slane %v26_v1, 2  ;;  %v31_v16 = vperm.slane %v26_v1, 3 }
   0x4   :  { %v46_v9 = vperm.slane %v44_v2, 0  ;;  %v47_v10 = vperm.slane %v44_v2, 1  ;;  %v48_v18 = vperm.slane %v44_v2, 2  ;;  %v49_v19 = vperm.slane %v44_v2, 3 }
   0x5   :  { %v36_v13 = vmul.f32 %v28_v5, %v18_v3  ;;  %v37_v14 = vmul.f32 %v29_v6, %v19_v4  ;;  %v22_v20 = vunpack.c.l.bf16 %v16_v8  ;;  %v23_v21 = vunpack.c.h.bf16 %v16_v8 }
   0x6   :  { %v38_v24 = vmul.f32 %v30_v15, %v20_v11  ;;  %v39_v25 = vmul.f32 %v31_v16, %v21_v12  ;;  %v24_v28 = vunpack.c.l.bf16 %v17_v17  ;;  %v25_v29 = vunpack.c.h.bf16 %v17_v17 }
   0x7   :  { %v54_v22 = vadd.f32 %v46_v9, %v36_v13  ;;  %v55_v23 = vadd.f32 %v47_v10, %v37_v14  ;;  %v40_v26 = vmul.f32 %v28_v5, %v22_v20  ;;  %v41_v27 = vmul.f32 %v29_v6, %v23_v21 }
   0x8   :  { %v56_v32 = vadd.f32 %v48_v18, %v38_v24  ;;  %v57_v33 = vadd.f32 %v49_v19, %v39_v25  ;;  %v42_v38 = vmul.f32 %v30_v15, %v24_v28  ;;  %v43_v39 = vmul.f32 %v31_v16, %v25_v29 }
   0x9   :  { %vm62_vm0 = vcmp.gt.f32.partialorder %v54_v22, 0.0  ;;  %vm63_vm1 = vcmp.gt.f32.partialorder %v55_v23, 0.0  ;;  %v70_v30 = vmul.f32 0.2, %v54_v22  ;;  %v71_v31 = vmul.f32 0.2, %v55_v23 }
   0xa   :  { %v58_v34 = vadd.f32 %v46_v9, %v40_v26  ;;  %v59_v35 = vadd.f32 %v47_v10, %v41_v27  ;;  %vm64_vm2 = vcmp.gt.f32.partialorder %v56_v32, 0.0  ;;  %vm65_vm3 = vcmp.gt.f32.partialorder %v57_v33, 0.0 }
   0xb   :  { %v78_v36 = vsel %vm62_vm0, %v54_v22, %v70_v30  ;;  %v79_v37 = vsel %vm63_vm1, %v55_v23, %v71_v31  ;;  %v72_v41 = vmul.f32 0.2, %v56_v32  ;;  %v73_v42 = vmul.f32 0.2, %v57_v33 }
   0xc   :  { %v86_v40 = vpack.c.bf16 %v79_v37, %v78_v36  ;;  %vm66_vm4 = vcmp.gt.f32.partialorder %v58_v34, 0.0  ;;  %vm67_vm5 = vcmp.gt.f32.partialorder %v59_v35, 0.0  ;;  %v74_v43 = vmul.f32 0.2, %v58_v34 }
   0xd   :  { %v80_v44 = vsel %vm64_vm2, %v56_v32, %v72_v41  ;;  %v75_v45 = vmul.f32 0.2, %v59_v35  ;;  %v60_v46 = vadd.f32 %v48_v18, %v42_v38  ;;  %v61_v47 = vadd.f32 %v49_v19, %v43_v39 }
   0xe   :  { %90 = vst [vmem:[%s151_s3] sm:$0xff] %v86_v40  ;;  %v81_v48 = vsel %vm65_vm3, %v57_v33, %v73_v42  ;;  %v82_v49 = vsel %vm66_vm4, %v58_v34, %v74_v43 }
   0xf   :  { %v87_v50 = vpack.c.bf16 %v81_v48, %v80_v44  ;;  %v83_v51 = vsel %vm67_vm5, %v59_v35, %v75_v45  ;;  %vm68_vm6 = vcmp.gt.f32.partialorder %v60_v46, 0.0  ;;  %vm69_vm7 = vcmp.gt.f32.partialorder %v61_v47, 0.0 }
  0x10   :  { %v88_v52 = vpack.c.bf16 %v83_v51, %v82_v49  ;;  %v76_v53 = vmul.f32 0.2, %v60_v46  ;;  %v77_v54 = vmul.f32 0.2, %v61_v47 }
  0x11   :  { %91 = vst [vmem:[%s151_s3 + $0x8] sm:$0xff] %v87_v50 }
  0x12   :  { %92 = vst [vmem:[%s151_s3 + $0x10] sm:$0xff] %v88_v52  ;;  %v84_v55 = vsel %vm68_vm6, %v60_v46, %v76_v53  ;;  %v85_v56 = vsel %vm69_vm7, %v61_v47, %v77_v54 }
  0x13   :  { %v89_v57 = vpack.c.bf16 %v85_v56, %v84_v55 }
  0x15   :  { %93 = vst [vmem:[%s151_s3 + $0x18] sm:$0xff] %v89_v57 }

// kernel: conv_unet_forward.53
= control target key start
LH: loop header
LB: loop body
LE: loop exit
PB: predicated region body
PF: predicated region fallthrough
CT: control target
= control target key end

     0   :  { %s1099_s12 = smov 0   ;;  %s1101_s13 = smov 0   ;;  %s1250_s0 = inlined_call_operand.vmem [shape: bf16[16,6912], index: 0, kind: input, shape index: {}]   ;;  %s1251_s1 = inlined_call_operand.vmem [shape: bf16[6912,256], index: 1, kind: input, shape index: {}]   ;;  %s1252_s2 = inlined_call_operand.vmem [shape: bf16[16,256], index: 2, kind: output, shape index: {0}]   ;;  %s1253_s3 = inlined_call_operand.vmem [shape: f32[1,8,256], index: 3, kind: output, shape index: {1}]  }
   0x1   :  { %s1103_s14 = smov 0   ;;  %s1105_s15 = smov 0  }
   0x2   :  { %s1107_s16 = smov 0  }
   0x3 LB: > { %s26_s17 = sadd.s32 1, %s1072_s15  ;;  %p49_p1 = scmp.ne.s32.totalorder %s1064_s13, %s1060_s12  ;;  %s1076_s16 = sphi %s1107_s16, %s14_s16   ;;  %s1072_s15 = sphi %s1105_s15, %s1257_s15   ;;  %s1068_s14 = sphi %s1103_s14, %s1256_s14   ;;  %s1064_s13 = sphi %s1101_s13, %s1255_s13   ;;  %s1060_s12 = sphi %s1099_s12, %s1254_s12  }
   0x4   : > { %p27_p0 = scmp.ge.s32.totalorder %s26_s17, 27  ;;  %p50_p2 = scmp.eq.s32.totalorder %s1076_s16, 0 }
   0x5   : > { %s42_s19 = sadd.s32 1, %s1064_s13  ;;  %p808_p5 = scmp.ge.s32.totalorder %s1076_s16, 27 }
   0x6   : > { %s1259_s17 = smov (%p27_p0, %s26_s17), 0  ;;  %p51_p3 = por %p50_p2, %p49_p1 }
   0x7   : > { %s38_s18 = ssub.s32 %s1072_s15, %s1259_s17  ;;  %159 = sbr.rel (%p808_p5) target bundleno = 18 (0x12), region = 16 }
   0x8   : > { %p40_p4 = scmp.eq.s32.totalorder %s38_s18, 0 }
   0xa   : > { %s1134_s20 = scalar_select %p40_p4, %s1064_s13, %s42_s19  }
   0xc   : > { %162 = sbr.rel (!%p51_p3) target bundleno = 18 (0x12), region = 20  ;;  %s164_s21 = sand.u32 (%p51_p3), 1, %s1064_s13  }
   0xd   : > { %s961_s22 = sshll.u32 (%p51_p3), %s1072_s15, 3  ;;  %s809_s23 = sshll.u32 (%p51_p3), %s164_s21, 4 }
   0xe   : > { %s172_s26 = scalar_lea.vmem (%p51_p3), %s1250_s0, %s961_s22  ;;  %s166_s27 = scalar_lea.vmem (%p51_p3), [#allocation3], %s809_s23 }
   0xf   : > { %v203_v0 = vld [vmem:[%s172_s26] sm:$0xff] (%p51_p3)  ;;  %v205_v1 = vld [vmem:[%s172_s26 + $0xd8] sm:$0xff] (%p51_p3) }
  0x10   : > { %204 = vst [vmem:[%s166_s27] sm:$0xff] (%p51_p3), %v203_v0 }
  0x11   : > { %206 = vst [vmem:[%s166_s27 + $0x8] sm:$0xff] %v205_v1 }
  0x12 PF: > { %p812_p6 = scmp.ge.s32.totalorder %s1076_s16, 1  ;;  %p226_p7 = scmp.lt.s32.totalorder %s1076_s16, 28 }
  0x14   : > { %p227_p8 = pnand %p812_p6, %p226_p7 }
  0x15   : > { %s233_s28 = sand.u32 (!%p227_p8), 1, %s1060_s12   ;;  %s814_s29 = sshll.u32 (!%p227_p8), %s1068_s14, 5 }
  0x16   : > { %230 = sbr.rel (%p227_p8) target bundleno = 244 (0xf4), region = 62  ;;  %s813_s30 = sshll.u32 (!%p227_p8), %s233_s28, 4 }
  0x17   : > { %p284_p9 = scmp.lt.s32.totalorder (!%p227_p8), %s814_s29, 863  ;;  %s1151_s8 = scalar_lea.vmem (!%p227_p8), [#allocation3], %s813_s30 }
  0x18   : > { %p817_p10 = scmp.ne.s32.totalorder (!%p227_p8), %s1068_s14, 0 }
  0x1b   : > { %s1261_s29 = smov (!%p284_p9, %s814_s29), 863  ;;  %319 = sbr.rel (%p817_p10) target bundleno = 37 (0x25), region = 70 }
  0x1c   : > { %s962_s4 = sshll.u32 %s1261_s29, 3 }
  0x1d   : > { %s1149_s7 = scalar_lea.vmem %s1251_s1, %s962_s4 }
  0x20   : > { %v1078_v2 = vmov 0.0  }
  0x21   : > { %320 = vst [vmem:[#allocation2 + $0x10] sm:$0xff] %v1078_v2 }
  0x22   : > { %321 = vst [vmem:[#allocation2] sm:$0xff] %v1078_v2 }
  0x23   : > { %322 = vst [vmem:[#allocation2 + $0x18] sm:$0xff] %v1078_v2 }
  0x24   : > { %323 = vst [vmem:[#allocation2 + $0x8] sm:$0xff] %v1078_v2 }
  0x25 PF: > { %v884_v3 = vld [vmem:[%s1149_s7 + $0x70] sm:$0xf]  ;;  %v980_v4 = vld [vmem:[%s1149_s7 + $0x74] sm:$0xf0]  ;;  %v979_v8 = vld [vmem:[%s1149_s7 + $0x74] sm:$0xf] }
  0x26   : > { %v948_v5 = vld [vmem:[%s1149_s7 + $0xf0] sm:$0xf]  ;;  %v885_v6 = vor.u32 %v980_v4, %v884_v3  ;;  %v996_v7 = vld [vmem:[%s1149_s7 + $0xf4] sm:$0xf0]  ;;  %v886_v9 = vld [vmem:[%s1149_s7 + $0x78] sm:$0xf0] }
  0x27   : > { %v949_v10 = vor.u32 %v996_v7, %v948_v5  ;;  %v889_v11 = vor.u32 %v979_v8, %v886_v9  ;;  %v995_v12 = vld [vmem:[%s1149_s7 + $0xf4] sm:$0xf]  ;;  %v950_v13 = vld [vmem:[%s1149_s7 + $0xf8] sm:$0xf0]  ;;  %v876_v14 = vld [vmem:[%s1149_s7 + $0x60] sm:$0xf] }
  0x28   : > { %532 = vmatpush.bf16.msra.mxu0 %v885_v6  ;;  %v953_v15 = vor.u32 %v995_v12, %v950_v13  ;;  %v978_v16 = vld [vmem:[%s1149_s7 + $0x64] sm:$0xf0]  ;;  %v940_v17 = vld [vmem:[%s1149_s7 + $0xe0] sm:$0xf]  ;;  %v977_v21 = vld [vmem:[%s1149_s7 + $0x64] sm:$0xf] }
  0x29   : > { %v994_v18 = vld [vmem:[%s1149_s7 + $0xe4] sm:$0xf0]  ;;  %546 = vmatpush.bf16.msra.mxu1 %v949_v10  ;;  %560 = vmatpush.bf16.msra.mxu2 %v889_v11  ;;  %v877_v19 = vor.u32 %v978_v16, %v876_v14  ;;  %v878_v22 = vld [vmem:[%s1149_s7 + $0x68] sm:$0xf0]  ;;  %v993_v23 = vld [vmem:[%s1149_s7 + $0xe4] sm:$0xf] }
  0x2a   : > { %v941_v20 = vor.u32 %v994_v18, %v940_v17  ;;  %574 = vmatpush.bf16.msra.mxu3 %v953_v15  ;;  %v881_v24 = vor.u32 %v977_v21, %v878_v22  ;;  %v942_v25 = vld [vmem:[%s1149_s7 + $0xe8] sm:$0xf0]  ;;  %v868_v26 = vld [vmem:[%s1149_s7 + $0x50] sm:$0xf]  ;;  %v976_v27 = vld [vmem:[%s1149_s7 + $0x54] sm:$0xf0] }
  0x2b   : > { %v945_v28 = vor.u32 %v993_v23, %v942_v25  ;;  %v932_v29 = vld [vmem:[%s1149_s7 + $0xd0] sm:$0xf]  ;;  %v992_v30 = vld [vmem:[%s1149_s7 + $0xd4] sm:$0xf0]  ;;  %v975_v31 = vld [vmem:[%s1149_s7 + $0x54] sm:$0xf]  ;;  %v869_v32 = vor.u32 %v976_v27, %v868_v26 }
  0x2c   : > { %533 = vmatpush.bf16.msra.mxu0 %v877_v19  ;;  %v870_v33 = vld [vmem:[%s1149_s7 + $0x58] sm:$0xf0]  ;;  %v991_v34 = vld [vmem:[%s1149_s7 + $0xd4] sm:$0xf]  ;;  %v933_v36 = vor.u32 %v992_v30, %v932_v29  ;;  %v860_v38 = vld [vmem:[%s1149_s7 + $0x40] sm:$0xf] }
  0x2d   : > { %v934_v35 = vld [vmem:[%s1149_s7 + $0xd8] sm:$0xf0]  ;;  %547 = vmatpush.bf16.msra.mxu1 %v941_v20  ;;  %561 = vmatpush.bf16.msra.mxu2 %v881_v24  ;;  %v873_v37 = vor.u32 %v975_v31, %v870_v33  ;;  %v974_v39 = vld [vmem:[%s1149_s7 + $0x44] sm:$0xf0]  ;;  %v924_v40 = vld [vmem:[%s1149_s7 + $0xc0] sm:$0xf] }
  0x2e   : > { %575 = vmatpush.bf16.msra.mxu3 %v945_v28  ;;  %v937_v41 = vor.u32 %v991_v34, %v934_v35  ;;  %v990_v42 = vld [vmem:[%s1149_s7 + $0xc4] sm:$0xf0]  ;;  %v973_v43 = vld [vmem:[%s1149_s7 + $0x44] sm:$0xf]  ;;  %v862_v44 = vld [vmem:[%s1149_s7 + $0x48] sm:$0xf0]  ;;  %v861_v47 = vor.u32 %v974_v39, %v860_v38 }
  0x2f   : > { %v989_v45 = vld [vmem:[%s1149_s7 + $0xc4] sm:$0xf]  ;;  %v926_v46 = vld [vmem:[%s1149_s7 + $0xc8] sm:$0xf0]  ;;  %v925_v48 = vor.u32 %v990_v42, %v924_v40  ;;  %v865_v49 = vor.u32 %v973_v43, %v862_v44  ;;  %v852_v50 = vld [vmem:[%s1149_s7 + $0x30] sm:$0xf] }
  0x30   : > { %534 = vmatpush.bf16.msra.mxu0 %v869_v32  ;;  %v972_v51 = vld [vmem:[%s1149_s7 + $0x34] sm:$0xf0]  ;;  %v916_v52 = vld [vmem:[%s1149_s7 + $0xb0] sm:$0xf]  ;;  %v929_v53 = vor.u32 %v989_v45, %v926_v46  ;;  %v971_v55 = vld [vmem:[%s1149_s7 + $0x34] sm:$0xf] }
  0x31   : > { %548 = vmatpush.bf16.msra.mxu1 %v933_v36  ;;  %562 = vmatpush.bf16.msra.mxu2 %v873_v37  ;;  %v988_v54 = vld [vmem:[%s1149_s7 + $0xb4] sm:$0xf0]  ;;  %v854_v56 = vld [vmem:[%s1149_s7 + $0x38] sm:$0xf0]  ;;  %v987_v57 = vld [vmem:[%s1149_s7 + $0xb4] sm:$0xf]  ;;  %v853_v59 = vor.u32 %v972_v51, %v852_v50 }
  0x32   : > { %576 = vmatpush.bf16.msra.mxu3 %v937_v41  ;;  %v918_v58 = vld [vmem:[%s1149_s7 + $0xb8] sm:$0xf0]  ;;  %v917_v60 = vor.u32 %v988_v54, %v916_v52  ;;  %v857_v61 = vor.u32 %v971_v55, %v854_v56  ;;  %v844_v62 = vld [vmem:[%s1149_s7 + $0x20] sm:$0xf]  ;;  %v970_v63 = vld [vmem:[%s1149_s7 + $0x24] sm:$0xf0] }
  0x33   : > { %v908_v0 = vld [vmem:[%s1149_s7 + $0xa0] sm:$0xf]  ;;  %v921_v1 = vor.u32 %v987_v57, %v918_v58  ;;  %v986_v2 = vld [vmem:[%s1149_s7 + $0xa4] sm:$0xf0]  ;;  %v969_v3 = vld [vmem:[%s1149_s7 + $0x24] sm:$0xf]  ;;  %v845_v7 = vor.u32 %v970_v63, %v844_v62 }
  0x34   : > { %535 = vmatpush.bf16.msra.mxu0 %v861_v47  ;;  %v846_v4 = vld [vmem:[%s1149_s7 + $0x28] sm:$0xf0]  ;;  %v985_v5 = vld [vmem:[%s1149_s7 + $0xa4] sm:$0xf]  ;;  %v909_v8 = vor.u32 %v986_v2, %v908_v0  ;;  %v836_v10 = vld [vmem:[%s1149_s7 + $0x10] sm:$0xf] }
  0x35   : > { %549 = vmatpush.bf16.msra.mxu1 %v925_v48  ;;  %563 = vmatpush.bf16.msra.mxu2 %v865_v49  ;;  %v910_v6 = vld [vmem:[%s1149_s7 + $0xa8] sm:$0xf0]  ;;  %v849_v9 = vor.u32 %v969_v3, %v846_v4  ;;  %v968_v11 = vld [vmem:[%s1149_s7 + $0x14] sm:$0xf0]  ;;  %v900_v12 = vld [vmem:[%s1149_s7 + $0x90] sm:$0xf] }
  0x36   : > { %577 = vmatpush.bf16.msra.mxu3 %v929_v53  ;;  %v913_v13 = vor.u32 %v985_v5, %v910_v6  ;;  %v984_v14 = vld [vmem:[%s1149_s7 + $0x94] sm:$0xf0]  ;;  %v967_v15 = vld [vmem:[%s1149_s7 + $0x14] sm:$0xf]  ;;  %v838_v16 = vld [vmem:[%s1149_s7 + $0x18] sm:$0xf0]  ;;  %v837_v19 = vor.u32 %v968_v11, %v836_v10 }
  0x37   : > { %v983_v17 = vld [vmem:[%s1149_s7 + $0x94] sm:$0xf]  ;;  %v902_v18 = vld [vmem:[%s1149_s7 + $0x98] sm:$0xf0]  ;;  %v901_v20 = vor.u32 %v984_v14, %v900_v12  ;;  %v841_v21 = vor.u32 %v967_v15, %v838_v16  ;;  %v828_v22 = vld [vmem:[%s1149_s7] sm:$0xf] }
  0x38   : > { %536 = vmatpush.bf16.msra.mxu0 %v853_v59  ;;  %v966_v23 = vld [vmem:[%s1149_s7 + $0x4] sm:$0xf0]  ;;  %v892_v24 = vld [vmem:[%s1149_s7 + $0x80] sm:$0xf]  ;;  %v905_v25 = vor.u32 %v983_v17, %v902_v18  ;;  %v965_v27 = vld [vmem:[%s1149_s7 + $0x4] sm:$0xf] }
  0x39   : > { %550 = vmatpush.bf16.msra.mxu1 %v917_v60  ;;  %564 = vmatpush.bf16.msra.mxu2 %v857_v61  ;;  %v982_v26 = vld [vmem:[%s1149_s7 + $0x84] sm:$0xf0]  ;;  %v830_v28 = vld [vmem:[%s1149_s7 + $0x8] sm:$0xf0]  ;;  %v981_v29 = vld [vmem:[%s1149_s7 + $0x84] sm:$0xf]  ;;  %v829_v31 = vor.u32 %v966_v23, %v828_v22 }
  0x3a   : > { %578 = vmatpush.bf16.msra.mxu3 %v921_v1  ;;  %v894_v30 = vld [vmem:[%s1149_s7 + $0x88] sm:$0xf0]  ;;  %v820_v32 = vld [vmem:[%s1151_s8] sm:$0xf]  ;;  %v964_v33 = vld [vmem:[%s1151_s8 + $0x4] sm:$0xf0]  ;;  %v893_v34 = vor.u32 %v982_v26, %v892_v24  ;;  %v833_v35 = vor.u32 %v965_v27, %v830_v28 }
  0x3b   : > { %v963_v36 = vld [vmem:[%s1151_s8 + $0x4] sm:$0xf]  ;;  %v822_v37 = vld [vmem:[%s1151_s8 + $0x8] sm:$0xf0]  ;;  %v897_v38 = vor.u32 %v981_v29, %v894_v30  ;;  %v821_v39 = vor.u32 %v964_v33, %v820_v32  ;;  %p954_p11 = scmp.ne.s32.totalorder %s1068_s14, 26 }
  0x3c   : > { %537 = vmatpush.bf16.msra.mxu0 %v845_v7  ;;  %v825_v40 = vor.u32 %v963_v36, %v822_v37  ;;  %v324_v42 = vld [vmem:[#allocation2 + $0x10] sm:$0xff]  ;;  %v325_v47 = vld [vmem:[#allocation2] sm:$0xff]  ;;  %v326_v51 = vld [vmem:[#allocation2 + $0x18] sm:$0xff] }
  0x3d   : > { %551 = vmatpush.bf16.msra.mxu1 %v909_v8  ;;  %565 = vmatpush.bf16.msra.mxu2 %v849_v9  ;;  %v327_v57 = vld [vmem:[#allocation2 + $0x8] sm:$0xff] }
  0x3e   : > { %579 = vmatpush.bf16.msra.mxu3 %v913_v13 }
  0x40   : > { %538 = vmatpush.bf16.msra.mxu0 %v837_v19 }
  0x41   : > { %552 = vmatpush.bf16.msra.mxu1 %v901_v20  ;;  %566 = vmatpush.bf16.msra.mxu2 %v841_v21 }
  0x42   : > { %580 = vmatpush.bf16.msra.mxu3 %v905_v25 }
  0x44   : > { %539 = vmatpush.bf16.msra.mxu0 %v829_v31 }
  0x45   : > { %553 = vmatpush.bf16.msra.mxu1 %v893_v34  ;;  %567 = vmatpush.bf16.msra.mxu2 %v833_v35 }
  0x46   : > { %581 = vmatpush.bf16.msra.mxu3 %v897_v38 }
  0x47   : > { %540 = vmatmul.bf16.vlgmr.msra.gmra.mxu0 %v821_v39 }
  0x48   : > { %554 = vmatmul.bf16.vlgmr.msra.gmra.mxu1 %v825_v40  ;;  %568 = vmatmul.bf16.vlgmr.msra.gmra.mxu2 %v821_v39 }
  0x49   : > { %582 = vmatmul.bf16.vlgmr.msra.gmra.mxu3 %v825_v40 }
  0xc4   : > { %v541_v41 = vpop.f32.mrf.mxu0 }
  0xc5   : > { %v555_v43 = vpop.f32.mrf.mxu1 }
  0xc6   : > { %v556_v44 = vadd.f32 %v555_v43, %v541_v41 }
  0xc8   : > { %v588_v45 = vadd.f32 %v556_v44, %v324_v42 }
  0xca   : > { %592 = vst [vmem:[#allocation2 + $0x10] sm:$0xff] %v588_v45 }
  0xcb   : > { %v569_v46 = vpop.f32.mrf.mxu2 }
  0xcc   : > { %v583_v48 = vpop.f32.mrf.mxu3  ;;  %v543_v49 = vpop.f32.mrf.mxu0 }
  0xcd   : > { %v584_v50 = vadd.f32 %v583_v48, %v569_v46  ;;  %v557_v52 = vpop.f32.mrf.mxu1 }
  0xce   : > { %v558_v53 = vadd.f32 %v557_v52, %v543_v49 }
  0xcf   : > { %v589_v54 = vadd.f32 %v584_v50, %v325_v47 }
  0xd0   : > { %v590_v55 = vadd.f32 %v558_v53, %v326_v51 }
  0xd1   : > { %593 = vst [vmem:[#allocation2] sm:$0xff] %v589_v54 }
  0xd2   : > { %594 = vst [vmem:[#allocation2 + $0x18] sm:$0xff] %v590_v55 }
  0xd3   : > { %v571_v56 = vpop.f32.mrf.mxu2 }
  0xd4   : > { %v585_v58 = vpop.f32.mrf.mxu3 }
  0xd5   : > { %v586_v59 = vadd.f32 %v585_v58, %v571_v56  ;;  %599 = sbr.rel (%p954_p11) target bundleno = 244 (0xf4), region = 74 }
  0xd7   : > { %v591_v60 = vadd.f32 %v586_v59, %v327_v57 }
  0xd9   : > { %595 = vst [vmem:[#allocation2 + $0x8] sm:$0xff] %v591_v60 }
  0xda   : > { %v600_v61 = vld [vmem:[#allocation2 + $0x10] sm:$0xff]  ;;  %v601_v62 = vld [vmem:[#allocation2] sm:$0xff]  ;;  %v602_v63 = vld [vmem:[#allocation2 + $0x18] sm:$0xff]  ;;  %vm640_vm0 = vcmask 1040384   ;;  %vm643_vm1 = vcmask 1041408  }
  0xdb   : > { %v604_v0 = vpack.c.bf16 %v601_v62, %v600_v61  ;;  %v622_v1 = vmul.f32 %v600_v61, %v600_v61  ;;  %v623_v2 = vmul.f32 %v601_v62, %v601_v62  ;;  %v608_v4 = vadd.f32 %v602_v63, %v600_v61 }
  0xdc   : > { %v624_v7 = vmul.f32 %v602_v63, %v602_v63 }
  0xdd   : > { %606 = vst [vmem:[%s1252_s2] sm:$0xff] %v604_v0  ;;  %v609_v9 = vrot.slane %v608_v4, 4 }
  0xde   : > { %v626_v11 = vadd.f32 %v624_v7, %v622_v1 }
  0xdf   : > { %v610_v13 = vadd.f32 %v609_v9, %v608_v4 }
  0xe0   : > { %v603_v3 = vld [vmem:[#allocation2 + $0x8] sm:$0xff]  ;;  %v627_v15 = vrot.slane %v626_v11, 4 }
  0xe1   : > { %v605_v5 = vpack.c.bf16 %v603_v3, %v602_v63  ;;  %v615_v6 = vadd.f32 %v603_v3, %v601_v62  ;;  %v625_v8 = vmul.f32 %v603_v3, %v603_v3  ;;  %v611_v17 = vrot.slane %v610_v13, 2 }
  0xe2   : > { %v628_v19 = vadd.f32 %v627_v15, %v626_v11 }
  0xe3   : > { %607 = vst [vmem:[%s1252_s2 + $0x8] sm:$0xff] %v605_v5  ;;  %v616_v10 = vrot.slane %v615_v6, 4  ;;  %v633_v12 = vadd.f32 %v625_v8, %v623_v2  ;;  %v612_v21 = vadd.f32 %v611_v17, %v610_v13 }
  0xe4   : > { %v629_v22 = vrot.slane %v628_v19, 2 }
  0xe5   : > { %v617_v14 = vadd.f32 %v616_v10, %v615_v6  ;;  %v634_v16 = vrot.slane %v633_v12, 4  ;;  %v613_v25 = vrot.slane %v612_v21, 1 }
  0xe6   : > { %v630_v26 = vadd.f32 %v629_v22, %v628_v19 }
  0xe7   : > { %v618_v18 = vrot.slane %v617_v14, 2  ;;  %v635_v20 = vadd.f32 %v634_v16, %v633_v12  ;;  %v614_v29 = vadd.f32 %v613_v25, %v612_v21 }
  0xe8   : > { %v631_v30 = vrot.slane %v630_v26, 1 }
  0xe9   : > { %v619_v23 = vadd.f32 %v618_v18, %v617_v14  ;;  %v636_v24 = vrot.slane %v635_v20, 2 }
  0xea   : > { %v632_v33 = vadd.f32 %v631_v30, %v630_v26 }
  0xeb   : > { %v620_v27 = vrot.slane %v619_v23, 1  ;;  %v637_v28 = vadd.f32 %v636_v24, %v635_v20 }
  0xec   : > { %v641_v35 = vsel %vm640_vm0, %v614_v29, %v632_v33 }
  0xed   : > { %v621_v31 = vadd.f32 %v620_v27, %v619_v23  ;;  %v638_v32 = vrot.slane %v637_v28, 1  ;;  %v644_v37 = vsel %vm643_vm1, %v641_v35, 0.0 }
  0xee   : > { %646 = vst [vmem:[%s1253_s3] sm:$0xff] %v644_v37 }
  0xef   : > { %v639_v34 = vadd.f32 %v638_v32, %v637_v28 }
  0xf1   : > { %v642_v36 = vsel %vm640_vm0, %v621_v31, %v639_v34 }
  0xf2   : > { %v645_v38 = vsel %vm643_vm1, %v642_v36, 0.0 }
  0xf3   : > { %647 = vst [vmem:[%s1253_s3 + $0x8] sm:$0xff] %v645_v38 }
  0xf4 PF: > { %s14_s16 = sadd.s32 1, %s1076_s16   ;;  %s1254_s12 = smov %s1064_s13 }
  0xf5   : > { %p11_p12 = scmp.ge.s32.totalorder %s14_s16, 29   ;;  %s1255_s13 = smov %s1134_s20 }
  0xf6   : > { %s1256_s14 = smov %s1072_s15  ;;  %s1257_s15 = smov %s1259_s17 }
  0xf7   :  { %13 = sbr.rel (!%p11_p12) target bundleno = 3 (0x3), region = 124 }

// kernel: conv_unet_forward.54
= control target key start
LH: loop header
LB: loop body
LE: loop exit
PB: predicated region body
PF: predicated region fallthrough
CT: control target
= control target key end

     0   :  { %s98_s0 = inlined_call_operand.vmem [shape: bf16[16,256], index: 0, kind: input, shape index: {}]   ;;  %s99_s1 = inlined_call_operand.vmem [shape: f32[1,256], index: 1, kind: input, shape index: {}]   ;;  %s100_s2 = inlined_call_operand.vmem [shape: f32[1,256], index: 2, kind: input, shape index: {}]   ;;  %s101_s3 = inlined_call_operand.vmem [shape: bf16[16,256], index: 3, kind: output, shape index: {}]  }
   0x1   :  { %v14_v0 = vld [vmem:[%s98_s0] sm:$0xff]  ;;  %v15_v7 = vld [vmem:[%s98_s0 + $0x8] sm:$0xff] }
   0x2   :  { %v20_v1 = vld [vmem:[%s99_s1] sm:$0x3]  ;;  %v16_v3 = vunpack.c.l.bf16 %v14_v0  ;;  %v17_v4 = vunpack.c.h.bf16 %v14_v0  ;;  %v18_v10 = vunpack.c.l.bf16 %v15_v7  ;;  %v19_v11 = vunpack.c.h.bf16 %v15_v7 }
   0x3   :  { %v30_v2 = vld [vmem:[%s100_s2] sm:$0x3]  ;;  %v22_v5 = vperm.slane %v20_v1, 0  ;;  %v23_v6 = vperm.slane %v20_v1, 1 }
   0x4   :  { %v32_v8 = vperm.slane %v30_v2, 0  ;;  %v33_v9 = vperm.slane %v30_v2, 1 }
   0x5   :  { %v26_v12 = vmul.f32 %v22_v5, %v16_v3  ;;  %v27_v13 = vmul.f32 %v23_v6, %v17_v4  ;;  %v28_v14 = vmul.f32 %v22_v5, %v18_v10  ;;  %v29_v15 = vmul.f32 %v23_v6, %v19_v11 }
   0x7   :  { %v36_v16 = vadd.f32 %v32_v8, %v26_v12  ;;  %v37_v17 = vadd.f32 %v33_v9, %v27_v13  ;;  %v38_v18 = vadd.f32 %v32_v8, %v28_v14  ;;  %v39_v19 = vadd.f32 %v33_v9, %v29_v15 }
   0x9   :  { %vm40_vm0 = vcmp.gt.f32.partialorder %v36_v16, 0.0  ;;  %vm41_vm1 = vcmp.gt.f32.partialorder %v37_v17, 0.0  ;;  %v44_v20 = vmul.f32 0.2, %v36_v16  ;;  %v45_v21 = vmul.f32 0.2, %v37_v17 }
   0xa   :  { %vm42_vm2 = vcmp.gt.f32.partialorder %v38_v18, 0.0  ;;  %vm43_vm3 = vcmp.gt.f32.partialorder %v39_v19, 0.0  ;;  %v46_v22 = vmul.f32 0.2, %v38_v18  ;;  %v47_v23 = vmul.f32 0.2, %v39_v19 }
   0xb   :  { %v48_v24 = vsel %vm40_vm0, %v36_v16, %v44_v20  ;;  %v49_v25 = vsel %vm41_vm1, %v37_v17, %v45_v21 }
   0xc   :  { %v52_v26 = vpack.c.bf16 %v49_v25, %v48_v24  ;;  %v50_v27 = vsel %vm42_vm2, %v38_v18, %v46_v22  ;;  %v51_v28 = vsel %vm43_vm3, %v39_v19, %v47_v23 }
   0xd   :  { %v53_v29 = vpack.c.bf16 %v51_v28, %v50_v27 }
   0xe   :  { %54 = vst [vmem:[%s101_s3] sm:$0xff] %v52_v26 }
   0xf   :  { %55 = vst [vmem:[%s101_s3 + $0x8] sm:$0xff] %v53_v29 }

// kernel: conv_unet_forward.55
= control target key start
LH: loop header
LB: loop body
LE: loop exit
PB: predicated region body
PF: predicated region fallthrough
CT: control target
= control target key end

     0   :  { %s797_s12 = smov 0   ;;  %s799_s13 = smov 0   ;;  %s890_s0 = inlined_call_operand.vmem [shape: bf16[32,3456], index: 0, kind: input, shape index: {}]   ;;  %s891_s1 = inlined_call_operand.vmem [shape: bf16[3456,128], index: 1, kind: input, shape index: {}]   ;;  %s892_s2 = inlined_call_operand.vmem [shape: bf16[32,128], index: 2, kind: output, shape index: {0}]   ;;  %s893_s3 = inlined_call_operand.vmem [shape: f32[1,8,128], index: 3, kind: output, shape index: {1}]  }
   0x1   :  { %s801_s14 = smov 0   ;;  %s803_s15 = smov 0  }
   0x2   :  { %s805_s16 = smov 0  }
   0x3 LB: > { %s26_s17 = sadd.s32 1, %s770_s15  ;;  %p49_p1 = scmp.ne.s32.totalorder %s762_s13, %s758_s12  ;;  %s774_s16 = sphi %s805_s16, %s14_s16   ;;  %s770_s15 = sphi %s803_s15, %s897_s15   ;;  %s766_s14 = sphi %s801_s14, %s896_s14   ;;  %s762_s13 = sphi %s799_s13, %s895_s13   ;;  %s758_s12 = sphi %s797_s12, %s894_s12  }
   0x4   : > { %p27_p0 = scmp.ge.s32.totalorder %s26_s17, 27  ;;  %p50_p2 = scmp.eq.s32.totalorder %s774_s16, 0 }
   0x5   : > { %s42_s19 = sadd.s32 1, %s762_s13  ;;  %p612_p5 = scmp.ge.s32.totalorder %s774_s16, 27 }
   0x6   : > { %s899_s17 = smov (%p27_p0, %s26_s17), 0  ;;  %p51_p3 = por %p50_p2, %p49_p1 }
   0x7   : > { %s38_s18 = ssub.s32 %s770_s15, %s899_s17  ;;  %159 = sbr.rel (%p612_p5) target bundleno = 20 (0x14), region = 16 }
   0x8   : > { %p40_p4 = scmp.eq.s32.totalorder %s38_s18, 0 }
   0xa   : > { %s832_s20 = scalar_select %p40_p4, %s762_s13, %s42_s19  }
   0xc   : > { %162 = sbr.rel (!%p51_p3) target bundleno = 20 (0x14), region = 20  ;;  %s164_s21 = sand.u32 (%p51_p3), 1, %s762_s13  }
   0xd   : > { %s614_s22 = sshll.u32 (%p51_p3), %s770_s15, 2  ;;  %s613_s23 = sshll.u32 (%p51_p3), %s164_s21, 4 }
   0xe   : > { %s171_s26 = scalar_lea.vmem (%p51_p3), %s890_s0, %s614_s22  ;;  %s166_s27 = scalar_lea.vmem (%p51_p3), [#allocation3], %s613_s23 }
   0xf   : > { %v188_v0 = vld [vmem:[%s171_s26] sm:$0xf] (%p51_p3)  ;;  %v190_v1 = vld [vmem:[%s171_s26 + $0x6c] sm:$0xf] (%p51_p3)  ;;  %v192_v2 = vld [vmem:[%s171_s26 + $0xd8] sm:$0xf] (%p51_p3) }
  0x10   : > { %189 = vst [vmem:[%s166_s27] sm:$0xf] (%p51_p3), %v188_v0  ;;  %v194_v3 = vld [vmem:[%s171_s26 + $0x144] sm:$0xf] (%p51_p3) }
  0x11   : > { %191 = vst [vmem:[%s166_s27 + $0x4] sm:$0xf] %v190_v1 }
  0x12   : > { %193 = vst [vmem:[%s166_s27 + $0x8] sm:$0xf] %v192_v2 }
  0x13   : > { %195 = vst [vmem:[%s166_s27 + $0xc] sm:$0xf] %v194_v3 }
  0x14 PF: > { %p615_p6 = scmp.ge.s32.totalorder %s774_s16, 1  ;;  %p238_p7 = scmp.lt.s32.totalorder %s774_s16, 28 }
  0x16   : > { %p239_p8 = pnand %p615_p6, %p238_p7 }
  0x17   : > { %s245_s28 = sand.u32 (!%p239_p8), 1, %s758_s12   ;;  %s617_s29 = sshll.u32 (!%p239_p8), %s766_s14, 4 }
  0x18   : > { %242 = sbr.rel (%p239_p8) target bundleno = 238 (0xee), region = 65  ;;  %s844_s30 = sshll.u32 (!%p239_p8), %s245_s28, 4 }
  0x19   : > { %p288_p9 = scmp.lt.s32.totalorder (!%p239_p8), %s617_s29, 431  ;;  %s247_s8 = scalar_lea.vmem (!%p239_p8), [#allocation3], %s844_s30 }
  0x1a   : > { %p619_p10 = scmp.ne.s32.totalorder (!%p239_p8), %s766_s14, 0 }
  0x1d   : > { %s901_s29 = smov (!%p288_p9, %s617_s29), 431  ;;  %315 = sbr.rel (%p619_p10) target bundleno = 39 (0x27), region = 73 }
  0x1e   : > { %s618_s4 = sshll.u32 %s901_s29, 2 }
  0x1f   : > { %s849_s7 = scalar_lea.vmem %s891_s1, %s618_s4 }
  0x22   : > { %v776_v4 = vmov 0.0  }
  0x23   : > { %316 = vst [vmem:[#allocation2 + $0x10] sm:$0xff] %v776_v4 }
  0x24   : > { %317 = vst [vmem:[#allocation2] sm:$0xff] %v776_v4 }
  0x25   : > { %318 = vst [vmem:[#allocation2 + $0x18] sm:$0xff] %v776_v4 }
  0x26   : > { %319 = vst [vmem:[#allocation2 + $0x8] sm:$0xff] %v776_v4 }
  0x27 PF: > { %v675_v5 = vld [vmem:[%s849_s7 + $0x38] sm:$0xff]  ;;  %v674_v6 = vld [vmem:[%s849_s7 + $0x30] sm:$0xff]  ;;  %v673_v7 = vld [vmem:[%s849_s7 + $0x28] sm:$0xff]  ;;  %p660_p11 = scmp.ne.s32.totalorder %s766_s14, 26 }
  0x28   : > { %404 = vmatpush.bf16.msra.mxu0 %v675_v5  ;;  %687 = vmatpush.bf16.msra.mxu1 %v675_v5  ;;  %v672_v8 = vld [vmem:[%s849_s7 + $0x20] sm:$0xff]  ;;  %v671_v9 = vld [vmem:[%s849_s7 + $0x18] sm:$0xff]  ;;  %v670_v10 = vld [vmem:[%s849_s7 + $0x10] sm:$0xff] }
  0x29   : > { %v669_v11 = vld [vmem:[%s849_s7 + $0x8] sm:$0xff]  ;;  %v668_v12 = vld [vmem:[%s849_s7] sm:$0xff] }
  0x2a   : > { %v666_v13 = vld [vmem:[%s247_s8] sm:$0xff]  ;;  %v667_v14 = vld [vmem:[%s247_s8 + $0x8] sm:$0xff] }
  0x2b   : > { %v320_v15 = vld [vmem:[#allocation2 + $0x10] sm:$0xff]  ;;  %v321_v21 = vld [vmem:[#allocation2] sm:$0xff] }
  0x2c   : > { %405 = vmatpush.bf16.msra.mxu0 %v674_v6  ;;  %688 = vmatpush.bf16.msra.mxu1 %v674_v6  ;;  %v322_v16 = vld [vmem:[#allocation2 + $0x18] sm:$0xff] }
  0x2d   : > { %v323_v22 = vld [vmem:[#allocation2 + $0x8] sm:$0xff] }
  0x30   : > { %406 = vmatpush.bf16.msra.mxu0 %v673_v7  ;;  %689 = vmatpush.bf16.msra.mxu1 %v673_v7 }
  0x34   : > { %407 = vmatpush.bf16.msra.mxu0 %v672_v8  ;;  %690 = vmatpush.bf16.msra.mxu1 %v672_v8 }
  0x38   : > { %408 = vmatpush.bf16.msra.mxu0 %v671_v9  ;;  %691 = vmatpush.bf16.msra.mxu1 %v671_v9 }
  0x3c   : > { %409 = vmatpush.bf16.msra.mxu0 %v670_v10  ;;  %692 = vmatpush.bf16.msra.mxu1 %v670_v10 }
  0x40   : > { %410 = vmatpush.bf16.msra.mxu0 %v669_v11  ;;  %693 = vmatpush.bf16.msra.mxu1 %v669_v11 }
  0x44   : > { %411 = vmatpush.bf16.msra.mxu0 %v668_v12  ;;  %694 = vmatpush.bf16.msra.mxu1 %v668_v12 }
  0x47   : > { %412 = vmatmul.bf16.vlgmr.msra.gmra.mxu0 %v666_v13  ;;  %417 = vmatmul.bf16.vlgmr.msra.gmra.mxu1 %v667_v14 }
  0xc4   : > { %v413_v17 = vpop.f32.mrf.mxu0  ;;  %v418_v18 = vpop.f32.mrf.mxu1 }
  0xc5   : > { %v423_v19 = vadd.f32 %v413_v17, %v320_v15  ;;  %v425_v20 = vadd.f32 %v418_v18, %v322_v16 }
  0xc7   : > { %427 = vst [vmem:[#allocation2 + $0x10] sm:$0xff] %v423_v19 }
  0xc8   : > { %429 = vst [vmem:[#allocation2 + $0x18] sm:$0xff] %v425_v20 }
  0xcc   : > { %v415_v23 = vpop.f32.mrf.mxu0  ;;  %v420_v24 = vpop.f32.mrf.mxu1  ;;  %434 = sbr.rel (%p660_p11) target bundleno = 238 (0xee), region = 77 }
  0xcd   : > { %v424_v25 = vadd.f32 %v415_v23, %v321_v21  ;;  %v426_v26 = vadd.f32 %v420_v24, %v323_v22 }
  0xcf   : > { %428 = vst [vmem:[#allocation2] sm:$0xff] %v424_v25 }
  0xd0   : > { %430 = vst [vmem:[#allocation2 + $0x8] sm:$0xff] %v426_v26 }
  0xd1   : > { %v435_v27 = vld [vmem:[#allocation2 + $0x10] sm:$0xff]  ;;  %v437_v29 = vld [vmem:[#allocation2 + $0x18] sm:$0xff]  ;;  %vm469_vm0 = vcmask 1040384   ;;  %vm471_vm1 = vcmask 1041408  }
  0xd2   : > { %v456_v32 = vmul.f32 %v435_v27, %v435_v27  ;;  %v458_v36 = vmul.f32 %v437_v29, %v437_v29 }
  0xd6   : > { %v436_v28 = vld [vmem:[#allocation2] sm:$0xff] }
  0xd7   : > { %v679_v30 = vpack.c.bf16 %v436_v28, %v435_v27  ;;  %v447_v31 = vadd.f32 %v436_v28, %v435_v27  ;;  %v457_v33 = vmul.f32 %v436_v28, %v436_v28  ;;  %v438_v34 = vld [vmem:[#allocation2 + $0x8] sm:$0xff] }
  0xd8   : > { %v684_v35 = vpack.c.bf16 %v438_v34, %v437_v29  ;;  %v459_v39 = vmul.f32 %v438_v34, %v438_v34 }
  0xd9   : > { %680 = vst [vmem:[%s892_s2] sm:$0xff] %v679_v30   ;;  %v460_v37 = vadd.f32 %v457_v33, %v456_v32  ;;  %v448_v38 = vadd.f32 %v447_v31, %v437_v29 }
  0xda   : > { %686 = vst [vmem:[%s892_s2 + $0x8] sm:$0xff] %v684_v35  }
  0xdb   : > { %v449_v40 = vadd.f32 %v448_v38, %v438_v34  ;;  %v461_v41 = vadd.f32 %v460_v37, %v458_v36 }
  0xdd   : > { %v450_v42 = vrot.slane %v449_v40, 4  ;;  %v462_v43 = vadd.f32 %v461_v41, %v459_v39 }
  0xdf   : > { %v451_v44 = vadd.f32 %v450_v42, %v449_v40  ;;  %v463_v45 = vrot.slane %v462_v43, 4 }
  0xe1   : > { %v452_v46 = vrot.slane %v451_v44, 2  ;;  %v464_v47 = vadd.f32 %v463_v45, %v462_v43 }
  0xe3   : > { %v453_v48 = vadd.f32 %v452_v46, %v451_v44  ;;  %v465_v49 = vrot.slane %v464_v47, 2 }
  0xe5   : > { %v454_v50 = vrot.slane %v453_v48, 1  ;;  %v466_v51 = vadd.f32 %v465_v49, %v464_v47 }
  0xe7   : > { %v455_v52 = vadd.f32 %v454_v50, %v453_v48  ;;  %v467_v53 = vrot.slane %v466_v51, 1 }
  0xe9   : > { %v468_v54 = vadd.f32 %v467_v53, %v466_v51 }
  0xeb   : > { %v470_v55 = vsel %vm469_vm0, %v455_v52, %v468_v54 }
  0xec   : > { %v472_v56 = vsel %vm471_vm1, %v470_v55, 0.0 }
  0xed   : > { %473 = vst [vmem:[%s893_s3] sm:$0xff] %v472_v56 }
  0xee PF: > { %s14_s16 = sadd.s32 1, %s774_s16   ;;  %s894_s12 = smov %s762_s13 }
  0xef   : > { %p11_p12 = scmp.ge.s32.totalorder %s14_s16, 29   ;;  %s895_s13 = smov %s832_s20 }
  0xf0   : > { %s896_s14 = smov %s770_s15  ;;  %s897_s15 = smov %s899_s17 }
  0xf1   :  { %13 = sbr.rel (!%p11_p12) target bundleno = 3 (0x3), region = 127 }

// kernel: conv_unet_forward.56
= control target key start
LH: loop header
LB: loop body
LE: loop exit
PB: predicated region body
PF: predicated region fallthrough
CT: control target
= control target key end

     0   :  { %s122_s0 = inlined_call_operand.vmem [shape: bf16[32,128], index: 0, kind: input, shape index: {}]   ;;  %s123_s1 = inlined_call_operand.vmem [shape: f32[1,128], index: 1, kind: input, shape index: {}]   ;;  %s124_s2 = inlined_call_operand.vmem [shape: f32[1,128], index: 2, kind: input, shape index: {}]   ;;  %s125_s3 = inlined_call_operand.vmem [shape: bf16[32,128], index: 3, kind: output, shape index: {}]  }
   0x1   :  { %v63_v0 = vld [vmem:[%s122_s0] sm:$0xff]   ;;  %v80_v5 = vld [vmem:[%s122_s0 + $0x8] sm:$0xff]  }
   0x2   :  { %v82_v1 = vld [vmem:[%s123_s1] ss:$0 sm:$0xff]  ;;  %v64_v2 = vunpack.c.l.bf16 %v63_v0  ;;  %v65_v3 = vunpack.c.h.bf16 %v63_v0  ;;  %v68_v6 = vunpack.c.l.bf16 %v80_v5  ;;  %v69_v7 = vunpack.c.h.bf16 %v80_v5 }
   0x3   :  { %v83_v4 = vld [vmem:[%s124_s2] ss:$0 sm:$0xff] }
   0x4   :  { %v26_v8 = vmul.f32 %v82_v1, %v64_v2  ;;  %v27_v9 = vmul.f32 %v82_v1, %v65_v3  ;;  %v28_v10 = vmul.f32 %v82_v1, %v68_v6  ;;  %v29_v11 = vmul.f32 %v82_v1, %v69_v7 }
   0x6   :  { %v34_v12 = vadd.f32 %v83_v4, %v26_v8  ;;  %v35_v13 = vadd.f32 %v83_v4, %v27_v9  ;;  %v36_v14 = vadd.f32 %v83_v4, %v28_v10  ;;  %v37_v15 = vadd.f32 %v83_v4, %v29_v11 }
   0x8   :  { %vm38_vm0 = vcmp.gt.f32.partialorder %v34_v12, 0.0  ;;  %vm39_vm1 = vcmp.gt.f32.partialorder %v35_v13, 0.0  ;;  %v42_v16 = vmul.f32 0.2, %v34_v12  ;;  %v43_v17 = vmul.f32 0.2, %v35_v13 }
   0x9   :  { %vm40_vm2 = vcmp.gt.f32.partialorder %v36_v14, 0.0  ;;  %vm41_vm3 = vcmp.gt.f32.partialorder %v37_v15, 0.0  ;;  %v44_v18 = vmul.f32 0.2, %v36_v14  ;;  %v45_v19 = vmul.f32 0.2, %v37_v15 }
   0xa   :  { %v46_v20 = vsel %vm38_vm0, %v34_v12, %v42_v16  ;;  %v47_v21 = vsel %vm39_vm1, %v35_v13, %v43_v17 }
   0xb   :  { %v73_v22 = vpack.c.bf16 %v47_v21, %v46_v20  ;;  %v48_v23 = vsel %vm40_vm2, %v36_v14, %v44_v18  ;;  %v49_v24 = vsel %vm41_vm3, %v37_v15, %v45_v19 }
   0xc   :  { %v78_v25 = vpack.c.bf16 %v49_v24, %v48_v23 }
   0xd   :  { %74 = vst [vmem:[%s125_s3] sm:$0xff] %v73_v22  }
   0xe   :  { %81 = vst [vmem:[%s125_s3 + $0x8] sm:$0xff] %v78_v25  }

// kernel: conv_unet_forward.58
= control target key start
LH: loop header
LB: loop body
LE: loop exit
PB: predicated region body
PF: predicated region fallthrough
CT: control target
= control target key end

     0   :  { %s368_s0 = inlined_call_operand.vmem [shape: bf16[128,128], index: 0, kind: input, shape index: {}]   ;;  %s369_s1 = inlined_call_operand.vmem [shape: f32[1,128], index: 1, kind: input, shape index: {}]   ;;  %s370_s2 = inlined_call_operand.vmem [shape: f32[1,128], index: 2, kind: input, shape index: {}]   ;;  %s371_s3 = inlined_call_operand.vmem [shape: bf16[128,128], index: 3, kind: output, shape index: {}]  }
   0x1   :  { %v171_v0 = vld [vmem:[%s368_s0] sm:$0xff]   ;;  %v242_v5 = vld [vmem:[%s368_s0 + $0x8] sm:$0xff]   ;;  %v243_v8 = vld [vmem:[%s368_s0 + $0x10] sm:$0xff]  }
   0x2   :  { %v284_v1 = vld [vmem:[%s369_s1] ss:$0 sm:$0xff]  ;;  %v172_v2 = vunpack.c.l.bf16 %v171_v0  ;;  %v173_v3 = vunpack.c.h.bf16 %v171_v0  ;;  %v176_v6 = vunpack.c.l.bf16 %v242_v5  ;;  %v177_v7 = vunpack.c.h.bf16 %v242_v5  ;;  %v244_v9 = vld [vmem:[%s368_s0 + $0x18] sm:$0xff]   ;;  %v246_v39 = vld [vmem:[%s368_s0 + $0x28] sm:$0xff]  }
   0x3   :  { %v289_v4 = vld [vmem:[%s370_s2] ss:$0 sm:$0xff]  ;;  %v180_v12 = vunpack.c.l.bf16 %v243_v8  ;;  %v181_v13 = vunpack.c.h.bf16 %v243_v8  ;;  %v184_v16 = vunpack.c.l.bf16 %v244_v9  ;;  %v185_v17 = vunpack.c.h.bf16 %v244_v9  ;;  %v247_v49 = vld [vmem:[%s368_s0 + $0x30] sm:$0xff]   ;;  %v248_v57 = vld [vmem:[%s368_s0 + $0x38] sm:$0xff]  }
   0x4   :  { %v50_v10 = vmul.f32 %v284_v1, %v172_v2  ;;  %v51_v11 = vmul.f32 %v284_v1, %v173_v3  ;;  %v52_v14 = vmul.f32 %v284_v1, %v176_v6  ;;  %v53_v15 = vmul.f32 %v284_v1, %v177_v7  ;;  %v245_v38 = vld [vmem:[%s368_s0 + $0x20] sm:$0xff]  }
   0x5   :  { %v54_v20 = vmul.f32 %v284_v1, %v180_v12  ;;  %v55_v21 = vmul.f32 %v284_v1, %v181_v13  ;;  %v56_v24 = vmul.f32 %v284_v1, %v184_v16  ;;  %v57_v25 = vmul.f32 %v284_v1, %v185_v17 }
   0x6   :  { %v70_v18 = vadd.f32 %v289_v4, %v50_v10  ;;  %v71_v19 = vadd.f32 %v289_v4, %v51_v11  ;;  %v72_v22 = vadd.f32 %v289_v4, %v52_v14  ;;  %v73_v23 = vadd.f32 %v289_v4, %v53_v15 }
   0x7   :  { %v74_v32 = vadd.f32 %v289_v4, %v54_v20  ;;  %v75_v33 = vadd.f32 %v289_v4, %v55_v21  ;;  %v76_v37 = vadd.f32 %v289_v4, %v56_v24  ;;  %v77_v43 = vadd.f32 %v289_v4, %v57_v25 }
   0x8   :  { %vm86_vm0 = vcmp.gt.f32.partialorder %v70_v18, 0.0  ;;  %vm87_vm1 = vcmp.gt.f32.partialorder %v71_v19, 0.0  ;;  %v102_v26 = vmul.f32 0.2, %v70_v18  ;;  %v103_v27 = vmul.f32 0.2, %v71_v19 }
   0x9   :  { %vm88_vm2 = vcmp.gt.f32.partialorder %v72_v22, 0.0  ;;  %vm89_vm3 = vcmp.gt.f32.partialorder %v73_v23, 0.0  ;;  %v104_v28 = vmul.f32 0.2, %v72_v22  ;;  %v105_v29 = vmul.f32 0.2, %v73_v23 }
   0xa   :  { %v118_v30 = vsel %vm86_vm0, %v70_v18, %v102_v26  ;;  %v119_v31 = vsel %vm87_vm1, %v71_v19, %v103_v27  ;;  %vm90_vm4 = vcmp.gt.f32.partialorder %v74_v32, 0.0  ;;  %vm91_vm5 = vcmp.gt.f32.partialorder %v75_v33, 0.0 }
   0xb   :  { %v205_v34 = vpack.c.bf16 %v119_v31, %v118_v30  ;;  %v120_v35 = vsel %vm88_vm2, %v72_v22, %v104_v28  ;;  %v121_v36 = vsel %vm89_vm3, %v73_v23, %v105_v29  ;;  %v106_v41 = vmul.f32 0.2, %v74_v32 }
   0xc   :  { %v210_v40 = vpack.c.bf16 %v121_v36, %v120_v35  ;;  %v107_v42 = vmul.f32 0.2, %v75_v33  ;;  %vm92_vm6 = vcmp.gt.f32.partialorder %v76_v37, 0.0  ;;  %v108_v44 = vmul.f32 0.2, %v76_v37 }
   0xd   :  { %206 = vst [vmem:[%s371_s3] sm:$0xff] %v205_v34   ;;  %v122_v45 = vsel %vm90_vm4, %v74_v32, %v106_v41  ;;  %v188_v46 = vunpack.c.l.bf16 %v245_v38  ;;  %v189_v47 = vunpack.c.h.bf16 %v245_v38  ;;  %v192_v48 = vunpack.c.l.bf16 %v246_v39 }
   0xe   :  { %249 = vst [vmem:[%s371_s3 + $0x8] sm:$0xff] %v210_v40   ;;  %v123_v50 = vsel %vm91_vm5, %v75_v33, %v107_v42  ;;  %vm93_vm7 = vcmp.gt.f32.partialorder %v77_v43, 0.0  ;;  %v109_v51 = vmul.f32 0.2, %v77_v43  ;;  %v124_v52 = vsel %vm92_vm6, %v76_v37, %v108_v44 }
   0xf   :  { %v215_v53 = vpack.c.bf16 %v123_v50, %v122_v45  ;;  %v58_v54 = vmul.f32 %v284_v1, %v188_v46  ;;  %v59_v55 = vmul.f32 %v284_v1, %v189_v47  ;;  %v193_v56 = vunpack.c.h.bf16 %v246_v39 }
  0x10   :  { %v125_v58 = vsel %vm93_vm7, %v77_v43, %v109_v51  ;;  %v60_v59 = vmul.f32 %v284_v1, %v192_v48  ;;  %v196_v60 = vunpack.c.l.bf16 %v247_v49  ;;  %v197_v61 = vunpack.c.h.bf16 %v247_v49 }
  0x11   :  { %250 = vst [vmem:[%s371_s3 + $0x10] sm:$0xff] %v215_v53   ;;  %v220_v62 = vpack.c.bf16 %v125_v58, %v124_v52  ;;  %v78_v63 = vadd.f32 %v289_v4, %v58_v54  ;;  %v79_v0 = vadd.f32 %v289_v4, %v59_v55  ;;  %v61_v2 = vmul.f32 %v284_v1, %v193_v56 }
  0x12   :  { %v80_v3 = vadd.f32 %v289_v4, %v60_v59  ;;  %v62_v5 = vmul.f32 %v284_v1, %v196_v60  ;;  %v63_v6 = vmul.f32 %v284_v1, %v197_v61  ;;  %v200_v7 = vunpack.c.l.bf16 %v248_v57 }
  0x13   :  { %251 = vst [vmem:[%s371_s3 + $0x18] sm:$0xff] %v220_v62   ;;  %vm94_vm8 = vcmp.gt.f32.partialorder %v78_v63, 0.0  ;;  %vm95_vm9 = vcmp.gt.f32.partialorder %v79_v0, 0.0  ;;  %v110_v8 = vmul.f32 0.2, %v78_v63  ;;  %v81_v9 = vadd.f32 %v289_v4, %v61_v2 }
  0x14   :  { %v111_v10 = vmul.f32 0.2, %v79_v0  ;;  %vm96_vm10 = vcmp.gt.f32.partialorder %v80_v3, 0.0  ;;  %v112_v11 = vmul.f32 0.2, %v80_v3  ;;  %v82_v12 = vadd.f32 %v289_v4, %v62_v5 }
  0x15   :  { %v126_v13 = vsel %vm94_vm8, %v78_v63, %v110_v8  ;;  %vm97_vm11 = vcmp.gt.f32.partialorder %v81_v9, 0.0  ;;  %v113_v14 = vmul.f32 0.2, %v81_v9  ;;  %v83_v15 = vadd.f32 %v289_v4, %v63_v6 }
  0x16   :  { %v127_v16 = vsel %vm95_vm9, %v79_v0, %v111_v10  ;;  %v128_v17 = vsel %vm96_vm10, %v80_v3, %v112_v11  ;;  %vm98_vm12 = vcmp.gt.f32.partialorder %v82_v12, 0.0  ;;  %v114_v18 = vmul.f32 0.2, %v82_v12 }
  0x17   :  { %v225_v19 = vpack.c.bf16 %v127_v16, %v126_v13  ;;  %v129_v20 = vsel %vm97_vm11, %v81_v9, %v113_v14  ;;  %vm99_vm13 = vcmp.gt.f32.partialorder %v83_v15, 0.0  ;;  %v115_v21 = vmul.f32 0.2, %v83_v15 }
  0x18   :  { %v230_v22 = vpack.c.bf16 %v129_v20, %v128_v17  ;;  %v130_v23 = vsel %vm98_vm12, %v82_v12, %v114_v18  ;;  %v201_v24 = vunpack.c.h.bf16 %v248_v57  ;;  %v64_v25 = vmul.f32 %v284_v1, %v200_v7 }
  0x19   :  { %252 = vst [vmem:[%s371_s3 + $0x20] sm:$0xff] %v225_v19   ;;  %v131_v26 = vsel %vm99_vm13, %v83_v15, %v115_v21 }
  0x1a   :  { %253 = vst [vmem:[%s371_s3 + $0x28] sm:$0xff] %v230_v22   ;;  %v235_v27 = vpack.c.bf16 %v131_v26, %v130_v23  ;;  %v65_v28 = vmul.f32 %v284_v1, %v201_v24  ;;  %v84_v29 = vadd.f32 %v289_v4, %v64_v25 }
  0x1c   :  { %254 = vst [vmem:[%s371_s3 + $0x30] sm:$0xff] %v235_v27   ;;  %v85_v30 = vadd.f32 %v289_v4, %v65_v28  ;;  %vm100_vm14 = vcmp.gt.f32.partialorder %v84_v29, 0.0  ;;  %v116_v31 = vmul.f32 0.2, %v84_v29 }
  0x1e   :  { %vm101_vm15 = vcmp.gt.f32.partialorder %v85_v30, 0.0  ;;  %v117_v32 = vmul.f32 0.2, %v85_v30  ;;  %v132_v33 = vsel %vm100_vm14, %v84_v29, %v116_v31 }
  0x20   :  { %v133_v34 = vsel %vm101_vm15, %v85_v30, %v117_v32 }
  0x21   :  { %v240_v35 = vpack.c.bf16 %v133_v34, %v132_v33 }
  0x23   :  { %255 = vst [vmem:[%s371_s3 + $0x38] sm:$0xff] %v240_v35  }

// kernel: conv_unet_forward.57
= control target key start
LH: loop header
LB: loop body
LE: loop exit
PB: predicated region body
PF: predicated region fallthrough
CT: control target
= control target key end

     0   :  { %s1339_s12 = smov 0   ;;  %s1341_s13 = smov 0   ;;  %s1503_s0 = inlined_call_operand.vmem [shape: bf16[128,1792], index: 0, kind: input, shape index: {}]   ;;  %s1504_s1 = inlined_call_operand.vmem [shape: bf16[1792,128], index: 1, kind: input, shape index: {}]   ;;  %s1505_s2 = inlined_call_operand.vmem [shape: bf16[128,128], index: 2, kind: output, shape index: {0}]   ;;  %s1506_s3 = inlined_call_operand.vmem [shape: f32[1,8,128], index: 3, kind: output, shape index: {1}]  }
   0x1   :  { %s1343_s14 = smov 0   ;;  %s1345_s15 = smov 0  }
   0x2   :  { %s1347_s16 = smov 0  }
   0x3 LB: > { %s26_s17 = sadd.s32 1, %s1312_s15  ;;  %p49_p1 = scmp.ne.s32.totalorder %s1304_s13, %s1300_s12  ;;  %s1316_s16 = sphi %s1347_s16, %s14_s16   ;;  %s1312_s15 = sphi %s1345_s15, %s1510_s15   ;;  %s1308_s14 = sphi %s1343_s14, %s1509_s14   ;;  %s1304_s13 = sphi %s1341_s13, %s1508_s13   ;;  %s1300_s12 = sphi %s1339_s12, %s1507_s12  }
   0x4   : > { %p27_p0 = scmp.ge.s32.totalorder %s26_s17, 7  ;;  %p50_p2 = scmp.eq.s32.totalorder %s1316_s16, 0 }
   0x5   : > { %s42_s19 = sadd.s32 1, %s1304_s13  ;;  %p998_p5 = scmp.ge.s32.totalorder %s1316_s16, 7 }
   0x6   : > { %s1512_s17 = smov (%p27_p0, %s26_s17), 0  ;;  %p51_p3 = por %p50_p2, %p49_p1 }
   0x7   : > { %s38_s18 = ssub.s32 %s1312_s15, %s1512_s17  ;;  %159 = sbr.rel (%p998_p5) target bundleno = 32 (0x20), region = 16 }
   0x8   : > { %p40_p4 = scmp.eq.s32.totalorder %s38_s18, 0 }
   0xa   : > { %s1374_s20 = scalar_select %p40_p4, %s1304_s13, %s42_s19  }
   0xc   : > { %162 = sbr.rel (!%p51_p3) target bundleno = 32 (0x20), region = 20  ;;  %s164_s21 = sand.u32 (%p51_p3), 1, %s1304_s13  }
   0xd   : > { %s1141_s22 = sshll.u32 (%p51_p3), %s1312_s15, 3  ;;  %s999_s23 = sshll.u32 (%p51_p3), %s164_s21, 7 }
   0xe   : > { %s1382_s26 = scalar_lea.vmem (%p51_p3), %s1503_s0, %s1141_s22  ;;  %s166_s27 = scalar_lea.vmem (%p51_p3), [#allocation3], %s999_s23 }
   0xf   : > { %v231_v0 = vld [vmem:[%s1382_s26] sm:$0xff] (%p51_p3)  ;;  %v233_v1 = vld [vmem:[%s1382_s26 + $0x38] sm:$0xff] (%p51_p3)  ;;  %v235_v2 = vld [vmem:[%s1382_s26 + $0x70] sm:$0xff] (%p51_p3) }
  0x10   : > { %232 = vst [vmem:[%s166_s27] sm:$0xff] (%p51_p3), %v231_v0  ;;  %v237_v3 = vld [vmem:[%s1382_s26 + $0xa8] sm:$0xff] (%p51_p3)  ;;  %v239_v4 = vld [vmem:[%s1382_s26 + $0xe0] sm:$0xff] (%p51_p3)  ;;  %v241_v5 = vld [vmem:[%s1382_s26 + $0x118] sm:$0xff] (%p51_p3) }
  0x11   : > { %234 = vst [vmem:[%s166_s27 + $0x8] sm:$0xff] %v233_v1  ;;  %v243_v6 = vld [vmem:[%s1382_s26 + $0x150] sm:$0xff]  ;;  %v245_v7 = vld [vmem:[%s1382_s26 + $0x188] sm:$0xff]  ;;  %v247_v8 = vld [vmem:[%s1382_s26 + $0x1c0] sm:$0xff] }
  0x12   : > { %236 = vst [vmem:[%s166_s27 + $0x10] sm:$0xff] %v235_v2  ;;  %v249_v9 = vld [vmem:[%s1382_s26 + $0x1f8] sm:$0xff]  ;;  %v251_v10 = vld [vmem:[%s1382_s26 + $0x230] sm:$0xff]  ;;  %v253_v11 = vld [vmem:[%s1382_s26 + $0x268] sm:$0xff] }
  0x13   : > { %238 = vst [vmem:[%s166_s27 + $0x18] sm:$0xff] %v237_v3  ;;  %v255_v12 = vld [vmem:[%s1382_s26 + $0x2a0] sm:$0xff]  ;;  %v257_v13 = vld [vmem:[%s1382_s26 + $0x2d8] sm:$0xff]  ;;  %v259_v14 = vld [vmem:[%s1382_s26 + $0x310] sm:$0xff] }
  0x14   : > { %240 = vst [vmem:[%s166_s27 + $0x20] sm:$0xff] %v239_v4  ;;  %v261_v15 = vld [vmem:[%s1382_s26 + $0x348] sm:$0xff] }
  0x15   : > { %242 = vst [vmem:[%s166_s27 + $0x28] sm:$0xff] %v241_v5 }
  0x16   : > { %244 = vst [vmem:[%s166_s27 + $0x30] sm:$0xff] %v243_v6 }
  0x17   : > { %246 = vst [vmem:[%s166_s27 + $0x38] sm:$0xff] %v245_v7 }
  0x18   : > { %248 = vst [vmem:[%s166_s27 + $0x40] sm:$0xff] %v247_v8 }
  0x19   : > { %250 = vst [vmem:[%s166_s27 + $0x48] sm:$0xff] %v249_v9 }
  0x1a   : > { %252 = vst [vmem:[%s166_s27 + $0x50] sm:$0xff] %v251_v10 }
  0x1b   : > { %254 = vst [vmem:[%s166_s27 + $0x58] sm:$0xff] %v253_v11 }
  0x1c   : > { %256 = vst [vmem:[%s166_s27 + $0x60] sm:$0xff] %v255_v12 }
  0x1d   : > { %258 = vst [vmem:[%s166_s27 + $0x68] sm:$0xff] %v257_v13 }
  0x1e   : > { %260 = vst [vmem:[%s166_s27 + $0x70] sm:$0xff] %v259_v14 }
  0x1f   : > { %262 = vst [vmem:[%s166_s27 + $0x78] sm:$0xff] %v261_v15 }
  0x20 PF: > { %p1002_p6 = scmp.ge.s32.totalorder %s1316_s16, 1  ;;  %p279_p7 = scmp.lt.s32.totalorder %s1316_s16, 8 }
  0x22   : > { %p280_p8 = pnand %p1002_p6, %p279_p7 }
  0x23   : > { %s286_s28 = sand.u32 (!%p280_p8), 1, %s1300_s12   ;;  %s1004_s29 = sshll.u32 (!%p280_p8), %s1308_s14, 5 }
  0x24   : > { %283 = sbr.rel (%p280_p8) target bundleno = 337 (0x151), region = 62  ;;  %s1003_s30 = sshll.u32 (!%p280_p8), %s286_s28, 7 }
  0x25   : > { %p330_p9 = scmp.lt.s32.totalorder (!%p280_p8), %s1004_s29, 223  ;;  %s1409_s8 = scalar_lea.vmem (!%p280_p8), [#allocation3], %s1003_s30 }
  0x26   : > { %p1006_p10 = scmp.ne.s32.totalorder (!%p280_p8), %s1308_s14, 0 }
  0x29   : > { %s1514_s29 = smov (!%p330_p9, %s1004_s29), 223  ;;  %357 = sbr.rel (%p1006_p10) target bundleno = 63 (0x3f), region = 70 }
  0x2a   : > { %s1005_s4 = sshll.u32 %s1514_s29, 2 }
  0x2b   : > { %s1407_s7 = scalar_lea.vmem %s1504_s1, %s1005_s4 }
  0x2e   : > { %v1318_v16 = vmov 0.0  }
  0x2f   : > { %358 = vst [vmem:[#allocation2 + $0x30] sm:$0xff] %v1318_v16 }
  0x30   : > { %359 = vst [vmem:[#allocation2] sm:$0xff] %v1318_v16 }
  0x31   : > { %360 = vst [vmem:[#allocation2 + $0x58] sm:$0xff] %v1318_v16 }
  0x32   : > { %361 = vst [vmem:[#allocation2 + $0x18] sm:$0xff] %v1318_v16 }
  0x33   : > { %362 = vst [vmem:[#allocation2 + $0x50] sm:$0xff] %v1318_v16 }
  0x34   : > { %363 = vst [vmem:[#allocation2 + $0x68] sm:$0xff] %v1318_v16 }
  0x35   : > { %364 = vst [vmem:[#allocation2 + $0x8] sm:$0xff] %v1318_v16 }
  0x36   : > { %365 = vst [vmem:[#allocation2 + $0x48] sm:$0xff] %v1318_v16 }
  0x37   : > { %366 = vst [vmem:[#allocation2 + $0x40] sm:$0xff] %v1318_v16 }
  0x38   : > { %367 = vst [vmem:[#allocation2 + $0x20] sm:$0xff] %v1318_v16 }
  0x39   : > { %368 = vst [vmem:[#allocation2 + $0x10] sm:$0xff] %v1318_v16 }
  0x3a   : > { %369 = vst [vmem:[#allocation2 + $0x38] sm:$0xff] %v1318_v16 }
  0x3b   : > { %370 = vst [vmem:[#allocation2 + $0x60] sm:$0xff] %v1318_v16 }
  0x3c   : > { %371 = vst [vmem:[#allocation2 + $0x70] sm:$0xff] %v1318_v16 }
  0x3d   : > { %372 = vst [vmem:[#allocation2 + $0x78] sm:$0xff] %v1318_v16 }
  0x3e   : > { %373 = vst [vmem:[#allocation2 + $0x28] sm:$0xff] %v1318_v16 }
  0x3f PF: > { %v1165_v17 = vld [vmem:[%s1407_s7 + $0x38] sm:$0xff]  ;;  %v1164_v19 = vld [vmem:[%s1407_s7 + $0x30] sm:$0xff]  ;;  %v1163_v21 = vld [vmem:[%s1407_s7 + $0x28] sm:$0xff]  ;;  %p1135_p11 = scmp.ne.s32.totalorder %s1308_s14, 6 }
  0x40   : > { %v1173_v18 = vld [vmem:[%s1407_s7 + $0x78] sm:$0xff]  ;;  %614 = vmatpush.bf16.msra.mxu0 %v1165_v17  ;;  %1221 = vmatpush.bf16.msra.mxu2 %v1165_v17  ;;  %v1172_v20 = vld [vmem:[%s1407_s7 + $0x70] sm:$0xff]  ;;  %v1171_v22 = vld [vmem:[%s1407_s7 + $0x68] sm:$0xff] }
  0x41   : > { %663 = vmatpush.bf16.msra.mxu1 %v1173_v18  ;;  %1229 = vmatpush.bf16.msra.mxu3 %v1173_v18  ;;  %v1162_v23 = vld [vmem:[%s1407_s7 + $0x20] sm:$0xff]  ;;  %v1161_v25 = vld [vmem:[%s1407_s7 + $0x18] sm:$0xff]  ;;  %v1160_v27 = vld [vmem:[%s1407_s7 + $0x10] sm:$0xff] }
  0x42   : > { %v1170_v24 = vld [vmem:[%s1407_s7 + $0x60] sm:$0xff]  ;;  %v1169_v26 = vld [vmem:[%s1407_s7 + $0x58] sm:$0xff]  ;;  %v1168_v28 = vld [vmem:[%s1407_s7 + $0x50] sm:$0xff] }
  0x43   : > { %v1159_v29 = vld [vmem:[%s1407_s7 + $0x8] sm:$0xff]  ;;  %v1158_v31 = vld [vmem:[%s1407_s7] sm:$0xff]  ;;  %v1017_v45 = vld [vmem:[%s1409_s8 + $0x10] sm:$0xf] }
  0x44   : > { %615 = vmatpush.bf16.msra.mxu0 %v1164_v19  ;;  %1222 = vmatpush.bf16.msra.mxu2 %v1164_v19  ;;  %v1167_v30 = vld [vmem:[%s1407_s7 + $0x48] sm:$0xff]  ;;  %v1166_v32 = vld [vmem:[%s1407_s7 + $0x40] sm:$0xff]  ;;  %v1145_v46 = vld [vmem:[%s1409_s8 + $0x14] sm:$0xf0] }
  0x45   : > { %664 = vmatpush.bf16.msra.mxu1 %v1172_v20  ;;  %1230 = vmatpush.bf16.msra.mxu3 %v1172_v20  ;;  %v1009_v33 = vld [vmem:[%s1409_s8] sm:$0xf]  ;;  %v1143_v34 = vld [vmem:[%s1409_s8 + $0x4] sm:$0xf0]  ;;  %v1142_v37 = vld [vmem:[%s1409_s8 + $0x4] sm:$0xf]  ;;  %v1018_v53 = vor.u32 %v1145_v46, %v1017_v45 }
  0x46   : > { %v1041_v35 = vld [vmem:[%s1409_s8 + $0x40] sm:$0xf]  ;;  %v1151_v36 = vld [vmem:[%s1409_s8 + $0x44] sm:$0xf0]  ;;  %v1011_v38 = vld [vmem:[%s1409_s8 + $0x8] sm:$0xf0]  ;;  %v1010_v41 = vor.u32 %v1143_v34, %v1009_v33 }
  0x47   : > { %v1150_v39 = vld [vmem:[%s1409_s8 + $0x44] sm:$0xf]  ;;  %v1043_v40 = vld [vmem:[%s1409_s8 + $0x48] sm:$0xf0]  ;;  %v1042_v42 = vor.u32 %v1151_v36, %v1041_v35  ;;  %v1014_v43 = vor.u32 %v1142_v37, %v1011_v38  ;;  %v1049_v47 = vld [vmem:[%s1409_s8 + $0x50] sm:$0xf] }
  0x48   : > { %616 = vmatpush.bf16.msra.mxu0 %v1163_v21  ;;  %1223 = vmatpush.bf16.msra.mxu2 %v1163_v21  ;;  %v1046_v44 = vor.u32 %v1150_v39, %v1043_v40  ;;  %v1153_v48 = vld [vmem:[%s1409_s8 + $0x54] sm:$0xf0]  ;;  %v1144_v49 = vld [vmem:[%s1409_s8 + $0x14] sm:$0xf]  ;;  %v1019_v50 = vld [vmem:[%s1409_s8 + $0x18] sm:$0xf0] }
  0x49   : > { %665 = vmatpush.bf16.msra.mxu1 %v1171_v22  ;;  %1231 = vmatpush.bf16.msra.mxu3 %v1171_v22  ;;  %v1152_v51 = vld [vmem:[%s1409_s8 + $0x54] sm:$0xf]  ;;  %v1051_v52 = vld [vmem:[%s1409_s8 + $0x58] sm:$0xf0]  ;;  %v1050_v54 = vor.u32 %v1153_v48, %v1049_v47  ;;  %v1022_v55 = vor.u32 %v1144_v49, %v1019_v50  ;;  %v1025_v57 = vld [vmem:[%s1409_s8 + $0x20] sm:$0xf] }
  0x4a   : > { %v1054_v56 = vor.u32 %v1152_v51, %v1051_v52  ;;  %v1147_v58 = vld [vmem:[%s1409_s8 + $0x24] sm:$0xf0]  ;;  %v1057_v59 = vld [vmem:[%s1409_s8 + $0x60] sm:$0xf]  ;;  %v1146_v61 = vld [vmem:[%s1409_s8 + $0x24] sm:$0xf] }
  0x4b   : > { %v1155_v60 = vld [vmem:[%s1409_s8 + $0x64] sm:$0xf0]  ;;  %v1027_v62 = vld [vmem:[%s1409_s8 + $0x28] sm:$0xf0]  ;;  %v1154_v63 = vld [vmem:[%s1409_s8 + $0x64] sm:$0xf]  ;;  %v1026_v1 = vor.u32 %v1147_v58, %v1025_v57 }
  0x4c   : > { %617 = vmatpush.bf16.msra.mxu0 %v1162_v23  ;;  %1224 = vmatpush.bf16.msra.mxu2 %v1162_v23  ;;  %v1059_v0 = vld [vmem:[%s1409_s8 + $0x68] sm:$0xf0]  ;;  %v1058_v2 = vor.u32 %v1155_v60, %v1057_v59  ;;  %v1030_v3 = vor.u32 %v1146_v61, %v1027_v62  ;;  %v1033_v5 = vld [vmem:[%s1409_s8 + $0x30] sm:$0xf]  ;;  %v1149_v6 = vld [vmem:[%s1409_s8 + $0x34] sm:$0xf0] }
  0x4d   : > { %666 = vmatpush.bf16.msra.mxu1 %v1170_v24  ;;  %1232 = vmatpush.bf16.msra.mxu3 %v1170_v24  ;;  %v1062_v4 = vor.u32 %v1154_v63, %v1059_v0  ;;  %v1065_v7 = vld [vmem:[%s1409_s8 + $0x70] sm:$0xf]  ;;  %v1157_v8 = vld [vmem:[%s1409_s8 + $0x74] sm:$0xf0]  ;;  %v1148_v9 = vld [vmem:[%s1409_s8 + $0x34] sm:$0xf]  ;;  %v1034_v13 = vor.u32 %v1149_v6, %v1033_v5 }
  0x4e   : > { %v1035_v10 = vld [vmem:[%s1409_s8 + $0x38] sm:$0xf0]  ;;  %v1156_v11 = vld [vmem:[%s1409_s8 + $0x74] sm:$0xf]  ;;  %v1066_v14 = vor.u32 %v1157_v8, %v1065_v7  ;;  %v382_v23 = vld [vmem:[#allocation2 + $0x40] sm:$0xff] }
  0x4f   : > { %v1067_v12 = vld [vmem:[%s1409_s8 + $0x78] sm:$0xf0]  ;;  %v1038_v15 = vor.u32 %v1148_v9, %v1035_v10  ;;  %v374_v18 = vld [vmem:[#allocation2 + $0x30] sm:$0xff]  ;;  %v383_v33 = vld [vmem:[#allocation2 + $0x20] sm:$0xff] }
  0x50   : > { %618 = vmatpush.bf16.msra.mxu0 %v1161_v25  ;;  %1225 = vmatpush.bf16.msra.mxu2 %v1161_v25  ;;  %v1070_v16 = vor.u32 %v1156_v11, %v1067_v12  ;;  %v376_v37 = vld [vmem:[#allocation2 + $0x58] sm:$0xff]  ;;  %v378_v57 = vld [vmem:[#allocation2 + $0x50] sm:$0xff]  ;;  %v386_v63 = vld [vmem:[#allocation2 + $0x60] sm:$0xff] }
  0x51   : > { %667 = vmatpush.bf16.msra.mxu1 %v1169_v26  ;;  %1233 = vmatpush.bf16.msra.mxu3 %v1169_v26  ;;  %v377_v47 = vld [vmem:[#allocation2 + $0x18] sm:$0xff]  ;;  %v387_v9 = vld [vmem:[#allocation2 + $0x70] sm:$0xff] }
  0x54   : > { %619 = vmatpush.bf16.msra.mxu0 %v1160_v27  ;;  %1226 = vmatpush.bf16.msra.mxu2 %v1160_v27  ;;  %v375_v27 = vld [vmem:[#allocation2] sm:$0xff] }
  0x55   : > { %668 = vmatpush.bf16.msra.mxu1 %v1168_v28  ;;  %1234 = vmatpush.bf16.msra.mxu3 %v1168_v28 }
  0x58   : > { %620 = vmatpush.bf16.msra.mxu0 %v1159_v29  ;;  %1227 = vmatpush.bf16.msra.mxu2 %v1159_v29 }
  0x59   : > { %669 = vmatpush.bf16.msra.mxu1 %v1167_v30  ;;  %1235 = vmatpush.bf16.msra.mxu3 %v1167_v30 }
  0x5c   : > { %621 = vmatpush.bf16.msra.mxu0 %v1158_v31  ;;  %1228 = vmatpush.bf16.msra.mxu2 %v1158_v31 }
  0x5d   : > { %670 = vmatpush.bf16.msra.mxu1 %v1166_v32  ;;  %1236 = vmatpush.bf16.msra.mxu3 %v1166_v32 }
  0x5f   : > { %622 = vmatmul.bf16.vlgmr.msra.gmra.mxu0 %v1010_v41  ;;  %642 = vmatmul.bf16.vlgmr.msra.gmra.mxu2 %v1042_v42 }
  0x60   : > { %671 = vmatmul.bf16.vlgmr.msra.gmra.mxu1 %v1014_v43  ;;  %691 = vmatmul.bf16.vlgmr.msra.gmra.mxu3 %v1046_v44  ;;  %v384_v43 = vld [vmem:[#allocation2 + $0x10] sm:$0xff] }
  0x6f   : > { %627 = vmatmul.bf16.gmra.mxu0 %v1018_v53  ;;  %647 = vmatmul.bf16.gmra.mxu2 %v1050_v54  ;;  %v385_v53 = vld [vmem:[#allocation2 + $0x38] sm:$0xff] }
  0x70   : > { %676 = vmatmul.bf16.gmra.mxu1 %v1022_v55  ;;  %696 = vmatmul.bf16.gmra.mxu3 %v1054_v56 }
  0x7f   : > { %632 = vmatmul.bf16.gmra.mxu0 %v1026_v1  ;;  %652 = vmatmul.bf16.gmra.mxu2 %v1058_v2 }
  0x80   : > { %681 = vmatmul.bf16.gmra.mxu1 %v1030_v3  ;;  %701 = vmatmul.bf16.gmra.mxu3 %v1062_v4  ;;  %v379_v3 = vld [vmem:[#allocation2 + $0x68] sm:$0xff] }
  0x8f   : > { %637 = vmatmul.bf16.gmra.mxu0 %v1034_v13  ;;  %657 = vmatmul.bf16.gmra.mxu2 %v1066_v14  ;;  %v380_v13 = vld [vmem:[#allocation2 + $0x8] sm:$0xff] }
  0x90   : > { %686 = vmatmul.bf16.gmra.mxu1 %v1038_v15  ;;  %706 = vmatmul.bf16.gmra.mxu3 %v1070_v16 }
  0xdc   : > { %v623_v17 = vpop.f32.mrf.mxu0 }
  0xdd   : > { %v672_v19 = vpop.f32.mrf.mxu1 }
  0xde   : > { %v673_v20 = vadd.f32 %v672_v19, %v623_v17  ;;  %v388_v19 = vld [vmem:[#allocation2 + $0x78] sm:$0xff] }
  0xe0   : > { %v712_v21 = vadd.f32 %v673_v20, %v374_v18 }
  0xe2   : > { %728 = vst [vmem:[#allocation2 + $0x30] sm:$0xff] %v712_v21  ;;  %v643_v22 = vpop.f32.mrf.mxu2 }
  0xe3   : > { %v692_v24 = vpop.f32.mrf.mxu3 }
  0xe4   : > { %v693_v25 = vadd.f32 %v692_v24, %v643_v22  ;;  %v625_v26 = vpop.f32.mrf.mxu0 }
  0xe5   : > { %v674_v28 = vpop.f32.mrf.mxu1 }
  0xe6   : > { %v720_v29 = vadd.f32 %v693_v25, %v382_v23  ;;  %v675_v30 = vadd.f32 %v674_v28, %v625_v26  ;;  %v381_v23 = vld [vmem:[#allocation2 + $0x48] sm:$0xff] }
  0xe8   : > { %736 = vst [vmem:[#allocation2 + $0x40] sm:$0xff] %v720_v29  ;;  %v713_v31 = vadd.f32 %v675_v30, %v375_v27  ;;  %v389_v29 = vld [vmem:[#allocation2 + $0x28] sm:$0xff] }
  0xea   : > { %729 = vst [vmem:[#allocation2] sm:$0xff] %v713_v31  ;;  %v645_v32 = vpop.f32.mrf.mxu2 }
  0xeb   : > { %v694_v34 = vpop.f32.mrf.mxu3 }
  0xec   : > { %v695_v35 = vadd.f32 %v694_v34, %v645_v32  ;;  %v628_v36 = vpop.f32.mrf.mxu0 }
  0xed   : > { %v677_v38 = vpop.f32.mrf.mxu1 }
  0xee   : > { %v721_v39 = vadd.f32 %v695_v35, %v383_v33  ;;  %v678_v40 = vadd.f32 %v677_v38, %v628_v36 }
  0xf0   : > { %737 = vst [vmem:[#allocation2 + $0x20] sm:$0xff] %v721_v39  ;;  %v714_v41 = vadd.f32 %v678_v40, %v376_v37 }
  0xf2   : > { %730 = vst [vmem:[#allocation2 + $0x58] sm:$0xff] %v714_v41  ;;  %v648_v42 = vpop.f32.mrf.mxu2 }
  0xf3   : > { %v697_v44 = vpop.f32.mrf.mxu3 }
  0xf4   : > { %v698_v45 = vadd.f32 %v697_v44, %v648_v42  ;;  %v630_v46 = vpop.f32.mrf.mxu0 }
  0xf5   : > { %v679_v48 = vpop.f32.mrf.mxu1 }
  0xf6   : > { %v722_v49 = vadd.f32 %v698_v45, %v384_v43  ;;  %v680_v50 = vadd.f32 %v679_v48, %v630_v46 }
  0xf8   : > { %738 = vst [vmem:[#allocation2 + $0x10] sm:$0xff] %v722_v49  ;;  %v715_v51 = vadd.f32 %v680_v50, %v377_v47 }
  0xfa   : > { %731 = vst [vmem:[#allocation2 + $0x18] sm:$0xff] %v715_v51  ;;  %v650_v52 = vpop.f32.mrf.mxu2 }
  0xfb   : > { %v699_v54 = vpop.f32.mrf.mxu3 }
  0xfc   : > { %v700_v55 = vadd.f32 %v699_v54, %v650_v52  ;;  %v633_v56 = vpop.f32.mrf.mxu0 }
  0xfd   : > { %v682_v58 = vpop.f32.mrf.mxu1 }
  0xfe   : > { %v723_v59 = vadd.f32 %v700_v55, %v385_v53  ;;  %v683_v60 = vadd.f32 %v682_v58, %v633_v56 }
 0x100   : > { %739 = vst [vmem:[#allocation2 + $0x38] sm:$0xff] %v723_v59  ;;  %v716_v61 = vadd.f32 %v683_v60, %v378_v57 }
 0x102   : > { %732 = vst [vmem:[#allocation2 + $0x50] sm:$0xff] %v716_v61  ;;  %v653_v62 = vpop.f32.mrf.mxu2 }
 0x103   : > { %v702_v0 = vpop.f32.mrf.mxu3 }
 0x104   : > { %v703_v1 = vadd.f32 %v702_v0, %v653_v62  ;;  %v635_v2 = vpop.f32.mrf.mxu0 }
 0x105   : > { %v684_v4 = vpop.f32.mrf.mxu1 }
 0x106   : > { %v724_v5 = vadd.f32 %v703_v1, %v386_v63  ;;  %v685_v6 = vadd.f32 %v684_v4, %v635_v2 }
 0x108   : > { %740 = vst [vmem:[#allocation2 + $0x60] sm:$0xff] %v724_v5  ;;  %v717_v7 = vadd.f32 %v685_v6, %v379_v3 }
 0x10a   : > { %733 = vst [vmem:[#allocation2 + $0x68] sm:$0xff] %v717_v7  ;;  %v655_v8 = vpop.f32.mrf.mxu2 }
 0x10b   : > { %v704_v10 = vpop.f32.mrf.mxu3 }
 0x10c   : > { %v705_v11 = vadd.f32 %v704_v10, %v655_v8  ;;  %v638_v12 = vpop.f32.mrf.mxu0 }
 0x10d   : > { %v687_v14 = vpop.f32.mrf.mxu1 }
 0x10e   : > { %v725_v15 = vadd.f32 %v705_v11, %v387_v9  ;;  %v688_v16 = vadd.f32 %v687_v14, %v638_v12 }
 0x110   : > { %741 = vst [vmem:[#allocation2 + $0x70] sm:$0xff] %v725_v15  ;;  %v718_v17 = vadd.f32 %v688_v16, %v380_v13 }
 0x112   : > { %734 = vst [vmem:[#allocation2 + $0x8] sm:$0xff] %v718_v17  ;;  %v658_v18 = vpop.f32.mrf.mxu2 }
 0x113   : > { %v707_v20 = vpop.f32.mrf.mxu3 }
 0x114   : > { %v708_v21 = vadd.f32 %v707_v20, %v658_v18  ;;  %v640_v22 = vpop.f32.mrf.mxu0 }
 0x115   : > { %v689_v24 = vpop.f32.mrf.mxu1 }
 0x116   : > { %v726_v25 = vadd.f32 %v708_v21, %v388_v19  ;;  %v690_v26 = vadd.f32 %v689_v24, %v640_v22 }
 0x118   : > { %742 = vst [vmem:[#allocation2 + $0x78] sm:$0xff] %v726_v25  ;;  %v719_v27 = vadd.f32 %v690_v26, %v381_v23 }
 0x11a   : > { %735 = vst [vmem:[#allocation2 + $0x48] sm:$0xff] %v719_v27  ;;  %v660_v28 = vpop.f32.mrf.mxu2 }
 0x11b   : > { %v709_v30 = vpop.f32.mrf.mxu3 }
 0x11c   : > { %v710_v31 = vadd.f32 %v709_v30, %v660_v28  ;;  %747 = sbr.rel (%p1135_p11) target bundleno = 337 (0x151), region = 74 }
 0x11e   : > { %v727_v32 = vadd.f32 %v710_v31, %v389_v29 }
 0x120   : > { %743 = vst [vmem:[#allocation2 + $0x28] sm:$0xff] %v727_v32 }
 0x121   : > { %v748_v33 = vld [vmem:[#allocation2 + $0x30] sm:$0xff]  ;;  %v749_v34 = vld [vmem:[#allocation2] sm:$0xff]  ;;  %v750_v35 = vld [vmem:[#allocation2 + $0x58] sm:$0xff]  ;;  %vm854_vm0 = vcmask 1040384   ;;  %vm856_vm1 = vcmask 1041408  }
 0x122   : > { %v1177_v36 = vpack.c.bf16 %v749_v34, %v748_v33  ;;  %v796_v37 = vadd.f32 %v749_v34, %v748_v33  ;;  %v817_v38 = vmul.f32 %v748_v33, %v748_v33  ;;  %v818_v39 = vmul.f32 %v749_v34, %v749_v34  ;;  %v751_v40 = vld [vmem:[#allocation2 + $0x18] sm:$0xff]  ;;  %v752_v41 = vld [vmem:[#allocation2 + $0x50] sm:$0xff]  ;;  %v753_v42 = vld [vmem:[#allocation2 + $0x68] sm:$0xff] }
 0x123   : > { %v1182_v43 = vpack.c.bf16 %v751_v40, %v750_v35  ;;  %v819_v44 = vmul.f32 %v750_v35, %v750_v35  ;;  %v1187_v45 = vpack.c.bf16 %v753_v42, %v752_v41  ;;  %v754_v46 = vld [vmem:[#allocation2 + $0x8] sm:$0xff]  ;;  %v820_v49 = vmul.f32 %v751_v40, %v751_v40  ;;  %v756_v51 = vld [vmem:[#allocation2 + $0x40] sm:$0xff]  ;;  %v758_v55 = vld [vmem:[#allocation2 + $0x10] sm:$0xff] }
 0x124   : > { %1178 = vst [vmem:[%s1505_s2] sm:$0xff] %v1177_v36   ;;  %v833_v47 = vadd.f32 %v818_v39, %v817_v38  ;;  %v797_v48 = vadd.f32 %v796_v37, %v750_v35  ;;  %v755_v50 = vld [vmem:[#allocation2 + $0x48] sm:$0xff]  ;;  %v757_v52 = vld [vmem:[#allocation2 + $0x20] sm:$0xff]  ;;  %v821_v58 = vmul.f32 %v752_v41, %v752_v41  ;;  %v759_v59 = vld [vmem:[#allocation2 + $0x38] sm:$0xff]  ;;  %v822_v2 = vmul.f32 %v753_v42, %v753_v42 }
 0x125   : > { %1214 = vst [vmem:[%s1505_s2 + $0x8] sm:$0xff] %v1182_v43   ;;  %v1192_v53 = vpack.c.bf16 %v755_v50, %v754_v46  ;;  %v1197_v54 = vpack.c.bf16 %v757_v52, %v756_v51  ;;  %v760_v60 = vld [vmem:[#allocation2 + $0x60] sm:$0xff]  ;;  %v761_v61 = vld [vmem:[#allocation2 + $0x70] sm:$0xff]  ;;  %v1202_v62 = vpack.c.bf16 %v759_v59, %v758_v55  ;;  %v762_v3 = vld [vmem:[#allocation2 + $0x78] sm:$0xff]  ;;  %v823_v8 = vmul.f32 %v754_v46, %v754_v46 }
 0x126   : > { %v798_v56 = vadd.f32 %v797_v48, %v751_v40  ;;  %v834_v57 = vadd.f32 %v833_v47, %v819_v44  ;;  %1215 = vst [vmem:[%s1505_s2 + $0x10] sm:$0xff] %v1187_v45   ;;  %v1207_v63 = vpack.c.bf16 %v761_v61, %v760_v60  ;;  %v824_v11 = vmul.f32 %v755_v50, %v755_v50 }
 0x127   : > { %1216 = vst [vmem:[%s1505_s2 + $0x18] sm:$0xff] %v1192_v53   ;;  %v763_v4 = vld [vmem:[#allocation2 + $0x28] sm:$0xff]  ;;  %v825_v14 = vmul.f32 %v756_v51, %v756_v51  ;;  %v826_v17 = vmul.f32 %v757_v52, %v757_v52  ;;  %v827_v20 = vmul.f32 %v758_v55, %v758_v55  ;;  %v828_v23 = vmul.f32 %v759_v59, %v759_v59 }
 0x128   : > { %v835_v0 = vadd.f32 %v834_v57, %v820_v49  ;;  %v799_v1 = vadd.f32 %v798_v56, %v752_v41  ;;  %1217 = vst [vmem:[%s1505_s2 + $0x20] sm:$0xff] %v1197_v54   ;;  %v1212_v5 = vpack.c.bf16 %v763_v4, %v762_v3  ;;  %v829_v26 = vmul.f32 %v760_v60, %v760_v60 }
 0x129   : > { %1218 = vst [vmem:[%s1505_s2 + $0x28] sm:$0xff] %v1202_v62   ;;  %v830_v29 = vmul.f32 %v761_v61, %v761_v61  ;;  %v831_v32 = vmul.f32 %v762_v3, %v762_v3  ;;  %v832_v35 = vmul.f32 %v763_v4, %v763_v4 }
 0x12a   : > { %v800_v6 = vadd.f32 %v799_v1, %v753_v42  ;;  %v836_v7 = vadd.f32 %v835_v0, %v821_v58  ;;  %1219 = vst [vmem:[%s1505_s2 + $0x30] sm:$0xff] %v1207_v63  }
 0x12b   : > { %1220 = vst [vmem:[%s1505_s2 + $0x38] sm:$0xff] %v1212_v5  }
 0x12c   : > { %v837_v9 = vadd.f32 %v836_v7, %v822_v2  ;;  %v801_v10 = vadd.f32 %v800_v6, %v754_v46 }
 0x12e   : > { %v802_v12 = vadd.f32 %v801_v10, %v755_v50  ;;  %v838_v13 = vadd.f32 %v837_v9, %v823_v8 }
 0x130   : > { %v839_v15 = vadd.f32 %v838_v13, %v824_v11  ;;  %v803_v16 = vadd.f32 %v802_v12, %v756_v51 }
 0x132   : > { %v804_v18 = vadd.f32 %v803_v16, %v757_v52  ;;  %v840_v19 = vadd.f32 %v839_v15, %v825_v14 }
 0x134   : > { %v841_v21 = vadd.f32 %v840_v19, %v826_v17  ;;  %v805_v22 = vadd.f32 %v804_v18, %v758_v55 }
 0x136   : > { %v806_v24 = vadd.f32 %v805_v22, %v759_v59  ;;  %v842_v25 = vadd.f32 %v841_v21, %v827_v20 }
 0x138   : > { %v843_v27 = vadd.f32 %v842_v25, %v828_v23  ;;  %v807_v28 = vadd.f32 %v806_v24, %v760_v60 }
 0x13a   : > { %v808_v30 = vadd.f32 %v807_v28, %v761_v61  ;;  %v844_v31 = vadd.f32 %v843_v27, %v829_v26 }
 0x13c   : > { %v845_v33 = vadd.f32 %v844_v31, %v830_v29  ;;  %v809_v34 = vadd.f32 %v808_v30, %v762_v3 }
 0x13e   : > { %v810_v36 = vadd.f32 %v809_v34, %v763_v4  ;;  %v846_v37 = vadd.f32 %v845_v33, %v831_v32 }
 0x140   : > { %v811_v38 = vrot.slane %v810_v36, 4  ;;  %v847_v39 = vadd.f32 %v846_v37, %v832_v35 }
 0x142   : > { %v812_v40 = vadd.f32 %v811_v38, %v810_v36  ;;  %v848_v41 = vrot.slane %v847_v39, 4 }
 0x144   : > { %v813_v42 = vrot.slane %v812_v40, 2  ;;  %v849_v43 = vadd.f32 %v848_v41, %v847_v39 }
 0x146   : > { %v814_v44 = vadd.f32 %v813_v42, %v812_v40  ;;  %v850_v45 = vrot.slane %v849_v43, 2 }
 0x148   : > { %v815_v46 = vrot.slane %v814_v44, 1  ;;  %v851_v47 = vadd.f32 %v850_v45, %v849_v43 }
 0x14a   : > { %v816_v48 = vadd.f32 %v815_v46, %v814_v44  ;;  %v852_v49 = vrot.slane %v851_v47, 1 }
 0x14c   : > { %v853_v50 = vadd.f32 %v852_v49, %v851_v47 }
 0x14e   : > { %v855_v51 = vsel %vm854_vm0, %v816_v48, %v853_v50 }
 0x14f   : > { %v857_v52 = vsel %vm856_vm1, %v855_v51, 0.0 }
 0x150   : > { %858 = vst [vmem:[%s1506_s3] sm:$0xff] %v857_v52 }
 0x151 PF: > { %s14_s16 = sadd.s32 1, %s1316_s16   ;;  %s1507_s12 = smov %s1304_s13 }
 0x152   : > { %p11_p12 = scmp.ge.s32.totalorder %s14_s16, 9   ;;  %s1508_s13 = smov %s1374_s20 }
 0x153   : > { %s1509_s14 = smov %s1312_s15  ;;  %s1510_s15 = smov %s1512_s17 }
 0x154   :  { %13 = sbr.rel (!%p11_p12) target bundleno = 3 (0x3), region = 124 }

// kernel: conv_unet_forward.59
= control target key start
LH: loop header
LB: loop body
LE: loop exit
PB: predicated region body
PF: predicated region fallthrough
CT: control target
= control target key end

     0   :  { %s1351_s12 = smov 0   ;;  %s1353_s13 = smov 0   ;;  %s1612_s0 = inlined_call_operand.vmem [shape: bf16[512,640], index: 0, kind: input, shape index: {}]   ;;  %s1613_s1 = inlined_call_operand.vmem [shape: bf16[640,128], index: 1, kind: input, shape index: {}]   ;;  %s1614_s2 = inlined_call_operand.vmem [shape: f32[1,128], index: 2, kind: input, shape index: {}]   ;;  %s1615_s3 = inlined_call_operand.vmem [shape: f32[512,128], index: 3, kind: output, shape index: {}]  }
   0x1   :  { %s1355_s14 = smov 0   ;;  %s1357_s15 = smov 0  }
   0x2   :  { %s1359_s16 = smov 0   ;;  %s1361_s17 = smov 0  }
   0x3   :  { %s1363_s18 = smov 0  }
   0x4 LB: > { %s25_s19 = sadd.s32 1, %s1320_s16  ;;  %s32_s20 = sadd.s32 1, %s1324_s17  ;;  %s1328_s18 = sphi %s1363_s18, %s13_s18   ;;  %s1324_s17 = sphi %s1361_s17, %s1621_s17   ;;  %s1320_s16 = sphi %s1359_s16, %s1620_s16   ;;  %s1316_s15 = sphi %s1357_s15, %s1619_s15   ;;  %s1312_s14 = sphi %s1355_s14, %s1618_s14   ;;  %s1308_s13 = sphi %s1353_s13, %s1617_s13   ;;  %s1304_s12 = sphi %s1351_s12, %s1616_s12  }
   0x5   : > { %p26_p0 = scmp.ge.s32.totalorder %s25_s19, 5  ;;  %p48_p1 = scmp.ne.s32.totalorder %s1308_s13, %s1304_s12 }
   0x6   : > { %p49_p2 = scmp.eq.s32.totalorder %s1328_s18, 0  ;;  %s41_s24 = sadd.s32 1, %s1308_s13 }
   0x7   : > { %s1623_s19 = smov (%p26_p0, %s25_s19), 0  ;;  %s1625_s20 = smov (!%p26_p0, %s32_s20), %s1324_s17 }
   0x8   : > { %p50_p3 = por %p49_p2, %p48_p1  ;;  %p34_p4 = scmp.ge.s32.totalorder %s1625_s20, 2 }
   0x9   : > { %s37_s21 = ssub.s32 %s1320_s16, %s1623_s19  ;;  %p1056_p6 = scmp.ge.s32.totalorder %s1328_s18, 10 }
   0xa   : > { %s1627_s20 = smov (%p34_p4, %s1625_s20), 0 }
   0xb   : > { %s36_s22 = ssub.s32 %s1324_s17, %s1627_s20  ;;  %162 = sbr.rel (%p1056_p6) target bundleno = 55 (0x37), region = 20 }
   0xc   : > { %s38_s23 = sor.u32 %s37_s21, %s36_s22 }
   0xd   : > { %p39_p5 = scmp.eq.s32.totalorder %s38_s23, 0 }
   0xf   : > { %s1402_s25 = scalar_select %p39_p5, %s1308_s13, %s41_s24  }
  0x10   : > { %165 = sbr.rel (!%p50_p3) target bundleno = 55 (0x37), region = 24  ;;  %s167_s26 = sand.u32 (%p50_p3), 1, %s1308_s13  }
  0x11   : > { %s1215_s27 = smul.u32 (%p50_p3), 160, %s1324_s17  ;;  %s1057_s28 = sshll.u32 (%p50_p3), %s167_s26, 7 }
  0x12   : > { %s1416_s7 = scalar_lea.vmem (%p50_p3), [#allocation3], %s1057_s28 }
  0x13   : > { %s172_s29 = sadd.s32 (%p50_p3), %s1320_s16, %s1215_s27 }
  0x14   : > { %s1060_s30 = sshll.u32 (%p50_p3), %s172_s29, 2 }
  0x15   : > { %s1411_s6 = scalar_lea.vmem %s1612_s0, %s1060_s30 }
  0x16   : > { %v191_v0 = vld [vmem:[%s1411_s6] sm:$0xf]  ;;  %v193_v1 = vld [vmem:[%s1411_s6 + $0x14] sm:$0xf]  ;;  %v195_v2 = vld [vmem:[%s1411_s6 + $0x28] sm:$0xf] }
  0x17   : > { %192 = vst [vmem:[%s1416_s7] sm:$0xf] %v191_v0  ;;  %v197_v3 = vld [vmem:[%s1411_s6 + $0x3c] sm:$0xf]  ;;  %v199_v4 = vld [vmem:[%s1411_s6 + $0x50] sm:$0xf] }
  0x18   : > { %194 = vst [vmem:[%s1416_s7 + $0x4] sm:$0xf] %v193_v1  ;;  %v201_v5 = vld [vmem:[%s1411_s6 + $0x64] sm:$0xf]  ;;  %v203_v6 = vld [vmem:[%s1411_s6 + $0x78] sm:$0xf] }
  0x19   : > { %196 = vst [vmem:[%s1416_s7 + $0x8] sm:$0xf] %v195_v2  ;;  %v205_v7 = vld [vmem:[%s1411_s6 + $0x8c] sm:$0xf]  ;;  %v207_v8 = vld [vmem:[%s1411_s6 + $0xa0] sm:$0xf] }
  0x1a   : > { %198 = vst [vmem:[%s1416_s7 + $0xc] sm:$0xf] %v197_v3  ;;  %v209_v9 = vld [vmem:[%s1411_s6 + $0xb4] sm:$0xf]  ;;  %v211_v10 = vld [vmem:[%s1411_s6 + $0xc8] sm:$0xf] }
  0x1b   : > { %200 = vst [vmem:[%s1416_s7 + $0x10] sm:$0xf] %v199_v4  ;;  %v213_v11 = vld [vmem:[%s1411_s6 + $0xdc] sm:$0xf]  ;;  %v215_v12 = vld [vmem:[%s1411_s6 + $0xf0] sm:$0xf] }
  0x1c   : > { %202 = vst [vmem:[%s1416_s7 + $0x14] sm:$0xf] %v201_v5  ;;  %v217_v13 = vld [vmem:[%s1411_s6 + $0x104] sm:$0xf]  ;;  %v219_v14 = vld [vmem:[%s1411_s6 + $0x118] sm:$0xf] }
  0x1d   : > { %204 = vst [vmem:[%s1416_s7 + $0x18] sm:$0xf] %v203_v6  ;;  %v221_v15 = vld [vmem:[%s1411_s6 + $0x12c] sm:$0xf]  ;;  %v223_v16 = vld [vmem:[%s1411_s6 + $0x140] sm:$0xf] }
  0x1e   : > { %206 = vst [vmem:[%s1416_s7 + $0x1c] sm:$0xf] %v205_v7  ;;  %v225_v17 = vld [vmem:[%s1411_s6 + $0x154] sm:$0xf]  ;;  %v227_v18 = vld [vmem:[%s1411_s6 + $0x168] sm:$0xf] }
  0x1f   : > { %208 = vst [vmem:[%s1416_s7 + $0x20] sm:$0xf] %v207_v8  ;;  %v229_v19 = vld [vmem:[%s1411_s6 + $0x17c] sm:$0xf]  ;;  %v231_v20 = vld [vmem:[%s1411_s6 + $0x190] sm:$0xf] }
  0x20   : > { %210 = vst [vmem:[%s1416_s7 + $0x24] sm:$0xf] %v209_v9  ;;  %v233_v21 = vld [vmem:[%s1411_s6 + $0x1a4] sm:$0xf]  ;;  %v235_v22 = vld [vmem:[%s1411_s6 + $0x1b8] sm:$0xf] }
  0x21   : > { %212 = vst [vmem:[%s1416_s7 + $0x28] sm:$0xf] %v211_v10  ;;  %v237_v23 = vld [vmem:[%s1411_s6 + $0x1cc] sm:$0xf]  ;;  %v239_v24 = vld [vmem:[%s1411_s6 + $0x1e0] sm:$0xf] }
  0x22   : > { %214 = vst [vmem:[%s1416_s7 + $0x2c] sm:$0xf] %v213_v11  ;;  %v241_v25 = vld [vmem:[%s1411_s6 + $0x1f4] sm:$0xf]  ;;  %v243_v26 = vld [vmem:[%s1411_s6 + $0x208] sm:$0xf] }
  0x23   : > { %216 = vst [vmem:[%s1416_s7 + $0x30] sm:$0xf] %v215_v12  ;;  %v245_v27 = vld [vmem:[%s1411_s6 + $0x21c] sm:$0xf]  ;;  %v247_v28 = vld [vmem:[%s1411_s6 + $0x230] sm:$0xf] }
  0x24   : > { %218 = vst [vmem:[%s1416_s7 + $0x34] sm:$0xf] %v217_v13  ;;  %v249_v29 = vld [vmem:[%s1411_s6 + $0x244] sm:$0xf]  ;;  %v251_v30 = vld [vmem:[%s1411_s6 + $0x258] sm:$0xf] }
  0x25   : > { %220 = vst [vmem:[%s1416_s7 + $0x38] sm:$0xf] %v219_v14  ;;  %v253_v31 = vld [vmem:[%s1411_s6 + $0x26c] sm:$0xf] }
  0x26   : > { %222 = vst [vmem:[%s1416_s7 + $0x3c] sm:$0xf] %v221_v15 }
  0x27   : > { %224 = vst [vmem:[%s1416_s7 + $0x40] sm:$0xf] %v223_v16 }
  0x28   : > { %226 = vst [vmem:[%s1416_s7 + $0x44] sm:$0xf] %v225_v17 }
  0x29   : > { %228 = vst [vmem:[%s1416_s7 + $0x48] sm:$0xf] %v227_v18 }
  0x2a   : > { %230 = vst [vmem:[%s1416_s7 + $0x4c] sm:$0xf] %v229_v19 }
  0x2b   : > { %232 = vst [vmem:[%s1416_s7 + $0x50] sm:$0xf] %v231_v20 }
  0x2c   : > { %234 = vst [vmem:[%s1416_s7 + $0x54] sm:$0xf] %v233_v21 }
  0x2d   : > { %236 = vst [vmem:[%s1416_s7 + $0x58] sm:$0xf] %v235_v22 }
  0x2e   : > { %238 = vst [vmem:[%s1416_s7 + $0x5c] sm:$0xf] %v237_v23 }
  0x2f   : > { %240 = vst [vmem:[%s1416_s7 + $0x60] sm:$0xf] %v239_v24 }
  0x30   : > { %242 = vst [vmem:[%s1416_s7 + $0x64] sm:$0xf] %v241_v25 }
  0x31   : > { %244 = vst [vmem:[%s1416_s7 + $0x68] sm:$0xf] %v243_v26 }
  0x32   : > { %246 = vst [vmem:[%s1416_s7 + $0x6c] sm:$0xf] %v245_v27 }
  0x33   : > { %248 = vst [vmem:[%s1416_s7 + $0x70] sm:$0xf] %v247_v28 }
  0x34   : > { %250 = vst [vmem:[%s1416_s7 + $0x74] sm:$0xf] %v249_v29 }
  0x35   : > { %252 = vst [vmem:[%s1416_s7 + $0x78] sm:$0xf] %v251_v30 }
  0x36   : > { %254 = vst [vmem:[%s1416_s7 + $0x7c] sm:$0xf] %v253_v31 }
  0x37 PF: > { %p1061_p7 = scmp.ge.s32.totalorder %s1328_s18, 1  ;;  %p353_p8 = scmp.lt.s32.totalorder %s1328_s18, 11 }
  0x39   : > { %p354_p9 = pnand %p1061_p7, %p353_p8 }
  0x3a   : > { %s360_s8 = sand.u32 (!%p354_p9), 1, %s1304_s12   ;;  %s1063_s9 = sshll.u32 (!%p354_p9), %s1312_s14, 4 }
  0x3b   : > { %357 = sbr.rel (%p354_p9) target bundleno = 365 (0x16d), region = 69  ;;  %s1062_s10 = sshll.u32 (!%p354_p9), %s360_s8, 7 }
  0x3c   : > { %p399_p10 = scmp.lt.s32.totalorder (!%p354_p9), %s1063_s9, 79  ;;  %s1065_s11 = sshll.u32 (!%p354_p9), %s1316_s15, 5 }
  0x3d   : > { %p411_p11 = scmp.lt.s32.totalorder (!%p354_p9), %s1065_s11, 63  ;;  %s1494_s12 = scalar_lea.vmem (!%p354_p9), [#allocation3], %s1062_s10 }
  0x3e   : > { %p1067_p12 = scmp.ne.s32.totalorder (!%p354_p9), %s1312_s14, 0 }
  0x40   : > { %s1629_s9 = smov (!%p399_p10, %s1063_s9), 79  ;;  %s1631_s11 = smov (!%p411_p11, %s1065_s11), 63 }
  0x41   : > { %s1064_s21 = sshll.u32 %s1629_s9, 2  ;;  %s1066_s26 = sshll.u32 %s1631_s11, 3 }
  0x42   : > { %s1487_s24 = scalar_lea.vmem %s1613_s1, %s1064_s21  ;;  %s1492_s29 = scalar_lea.vmem %s1615_s3, %s1066_s26 }
  0x43   : > { %422 = sbr.rel (%p1067_p12) target bundleno = 105 (0x69), region = 77 }
  0x48   : > { %v1330_v32 = vmov 0.0  }
  0x49   : > { %423 = vst [vmem:[#allocation2 + $0xb0] sm:$0xff] %v1330_v32 }
  0x4a   : > { %424 = vst [vmem:[#allocation2] sm:$0xff] %v1330_v32 }
  0x4b   : > { %425 = vst [vmem:[#allocation2 + $0xd8] sm:$0xff] %v1330_v32 }
  0x4c   : > { %426 = vst [vmem:[#allocation2 + $0x18] sm:$0xff] %v1330_v32 }
  0x4d   : > { %427 = vst [vmem:[#allocation2 + $0x50] sm:$0xff] %v1330_v32 }
  0x4e   : > { %428 = vst [vmem:[#allocation2 + $0x68] sm:$0xff] %v1330_v32 }
  0x4f   : > { %429 = vst [vmem:[#allocation2 + $0x30] sm:$0xff] %v1330_v32 }
  0x50   : > { %430 = vst [vmem:[#allocation2 + $0x48] sm:$0xff] %v1330_v32 }
  0x51   : > { %431 = vst [vmem:[#allocation2 + $0x80] sm:$0xff] %v1330_v32 }
  0x52   : > { %432 = vst [vmem:[#allocation2 + $0x88] sm:$0xff] %v1330_v32 }
  0x53   : > { %433 = vst [vmem:[#allocation2 + $0xe8] sm:$0xff] %v1330_v32 }
  0x54   : > { %434 = vst [vmem:[#allocation2 + $0xb8] sm:$0xff] %v1330_v32 }
  0x55   : > { %435 = vst [vmem:[#allocation2 + $0x60] sm:$0xff] %v1330_v32 }
  0x56   : > { %436 = vst [vmem:[#allocation2 + $0xf0] sm:$0xff] %v1330_v32 }
  0x57   : > { %437 = vst [vmem:[#allocation2 + $0x8] sm:$0xff] %v1330_v32 }
  0x58   : > { %438 = vst [vmem:[#allocation2 + $0x78] sm:$0xff] %v1330_v32 }
  0x59   : > { %439 = vst [vmem:[#allocation2 + $0x38] sm:$0xff] %v1330_v32 }
  0x5a   : > { %440 = vst [vmem:[#allocation2 + $0x58] sm:$0xff] %v1330_v32 }
  0x5b   : > { %441 = vst [vmem:[#allocation2 + $0x40] sm:$0xff] %v1330_v32 }
  0x5c   : > { %442 = vst [vmem:[#allocation2 + $0xc8] sm:$0xff] %v1330_v32 }
  0x5d   : > { %443 = vst [vmem:[#allocation2 + $0xe0] sm:$0xff] %v1330_v32 }
  0x5e   : > { %444 = vst [vmem:[#allocation2 + $0x90] sm:$0xff] %v1330_v32 }
  0x5f   : > { %445 = vst [vmem:[#allocation2 + $0x70] sm:$0xff] %v1330_v32 }
  0x60   : > { %446 = vst [vmem:[#allocation2 + $0xc0] sm:$0xff] %v1330_v32 }
  0x61   : > { %447 = vst [vmem:[#allocation2 + $0xa8] sm:$0xff] %v1330_v32 }
  0x62   : > { %448 = vst [vmem:[#allocation2 + $0xd0] sm:$0xff] %v1330_v32 }
  0x63   : > { %449 = vst [vmem:[#allocation2 + $0x10] sm:$0xff] %v1330_v32 }
  0x64   : > { %450 = vst [vmem:[#allocation2 + $0x28] sm:$0xff] %v1330_v32 }
  0x65   : > { %451 = vst [vmem:[#allocation2 + $0xa0] sm:$0xff] %v1330_v32 }
  0x66   : > { %452 = vst [vmem:[#allocation2 + $0xf8] sm:$0xff] %v1330_v32 }
  0x67   : > { %453 = vst [vmem:[#allocation2 + $0x20] sm:$0xff] %v1330_v32 }
  0x68   : > { %454 = vst [vmem:[#allocation2 + $0x98] sm:$0xff] %v1330_v32 }
  0x69 PF: > { %v1190_v33 = vld [vmem:[%s1487_s24 + $0x38] sm:$0xff]  ;;  %v1189_v34 = vld [vmem:[%s1487_s24 + $0x30] sm:$0xff]  ;;  %v1188_v35 = vld [vmem:[%s1487_s24 + $0x28] sm:$0xff]  ;;  %p1164_p13 = scmp.ne.s32.totalorder %s1312_s14, 4 }
  0x6a   : > { %679 = vmatpush.bf16.msra.mxu0 %v1190_v33  ;;  %1191 = vmatpush.bf16.msra.mxu1 %v1190_v33  ;;  %v1187_v36 = vld [vmem:[%s1487_s24 + $0x20] sm:$0xff]  ;;  %v1186_v37 = vld [vmem:[%s1487_s24 + $0x18] sm:$0xff]  ;;  %v1185_v38 = vld [vmem:[%s1487_s24 + $0x10] sm:$0xff] }
  0x6b   : > { %1192 = vmatpush.bf16.msra.mxu2 %v1190_v33  ;;  %1193 = vmatpush.bf16.msra.mxu3 %v1190_v33  ;;  %v1184_v39 = vld [vmem:[%s1487_s24 + $0x8] sm:$0xff]  ;;  %v1183_v40 = vld [vmem:[%s1487_s24] sm:$0xff]  ;;  %v1169_v49 = vld [vmem:[%s1494_s12 + $0x10] sm:$0xff] }
  0x6c   : > { %v1167_v41 = vld [vmem:[%s1494_s12] sm:$0xff]  ;;  %v1168_v45 = vld [vmem:[%s1494_s12 + $0x8] sm:$0xff]  ;;  %v1173_v50 = vld [vmem:[%s1494_s12 + $0x30] sm:$0xff] }
  0x6d   : > { %v1171_v42 = vld [vmem:[%s1494_s12 + $0x20] sm:$0xff]  ;;  %v1172_v46 = vld [vmem:[%s1494_s12 + $0x28] sm:$0xff]  ;;  %v1177_v51 = vld [vmem:[%s1494_s12 + $0x50] sm:$0xff] }
  0x6e   : > { %680 = vmatpush.bf16.msra.mxu0 %v1189_v34  ;;  %1194 = vmatpush.bf16.msra.mxu1 %v1189_v34  ;;  %v1175_v43 = vld [vmem:[%s1494_s12 + $0x40] sm:$0xff]  ;;  %v1176_v47 = vld [vmem:[%s1494_s12 + $0x48] sm:$0xff]  ;;  %v1181_v52 = vld [vmem:[%s1494_s12 + $0x70] sm:$0xff] }
  0x6f   : > { %1195 = vmatpush.bf16.msra.mxu2 %v1189_v34  ;;  %1196 = vmatpush.bf16.msra.mxu3 %v1189_v34  ;;  %v1179_v44 = vld [vmem:[%s1494_s12 + $0x60] sm:$0xff]  ;;  %v1180_v48 = vld [vmem:[%s1494_s12 + $0x68] sm:$0xff]  ;;  %v1170_v53 = vld [vmem:[%s1494_s12 + $0x18] sm:$0xff] }
  0x70   : > { %v1174_v54 = vld [vmem:[%s1494_s12 + $0x38] sm:$0xff]  ;;  %v455_v57 = vld [vmem:[#allocation2 + $0xb0] sm:$0xff]  ;;  %v463_v58 = vld [vmem:[#allocation2 + $0x80] sm:$0xff] }
  0x71   : > { %v1178_v55 = vld [vmem:[%s1494_s12 + $0x58] sm:$0xff]  ;;  %v479_v0 = vld [vmem:[#allocation2 + $0xa8] sm:$0xff]  ;;  %v456_v1 = vld [vmem:[#allocation2] sm:$0xff] }
  0x72   : > { %681 = vmatpush.bf16.msra.mxu0 %v1188_v35  ;;  %1197 = vmatpush.bf16.msra.mxu1 %v1188_v35  ;;  %v1182_v56 = vld [vmem:[%s1494_s12 + $0x78] sm:$0xff]  ;;  %v464_v2 = vld [vmem:[#allocation2 + $0x88] sm:$0xff]  ;;  %v480_v12 = vld [vmem:[#allocation2 + $0xd0] sm:$0xff] }
  0x73   : > { %1198 = vmatpush.bf16.msra.mxu2 %v1188_v35  ;;  %1199 = vmatpush.bf16.msra.mxu3 %v1188_v35  ;;  %v471_v63 = vld [vmem:[#allocation2 + $0x38] sm:$0xff]  ;;  %v465_v14 = vld [vmem:[#allocation2 + $0xe8] sm:$0xff]  ;;  %v473_v23 = vld [vmem:[#allocation2 + $0x40] sm:$0xff] }
  0x74   : > { %v472_v11 = vld [vmem:[#allocation2 + $0x58] sm:$0xff]  ;;  %v481_v24 = vld [vmem:[#allocation2 + $0x10] sm:$0xff]  ;;  %v474_v35 = vld [vmem:[#allocation2 + $0xc8] sm:$0xff] }
  0x75   : > { %v457_v13 = vld [vmem:[#allocation2 + $0xd8] sm:$0xff] }
  0x76   : > { %682 = vmatpush.bf16.msra.mxu0 %v1187_v36  ;;  %1200 = vmatpush.bf16.msra.mxu1 %v1187_v36  ;;  %v458_v25 = vld [vmem:[#allocation2 + $0x18] sm:$0xff] }
  0x77   : > { %1201 = vmatpush.bf16.msra.mxu2 %v1187_v36  ;;  %1202 = vmatpush.bf16.msra.mxu3 %v1187_v36  ;;  %v466_v26 = vld [vmem:[#allocation2 + $0xb8] sm:$0xff]  ;;  %v482_v36 = vld [vmem:[#allocation2 + $0x28] sm:$0xff] }
  0x7a   : > { %683 = vmatpush.bf16.msra.mxu0 %v1186_v37  ;;  %1203 = vmatpush.bf16.msra.mxu1 %v1186_v37 }
  0x7b   : > { %1204 = vmatpush.bf16.msra.mxu2 %v1186_v37  ;;  %1205 = vmatpush.bf16.msra.mxu3 %v1186_v37  ;;  %v459_v37 = vld [vmem:[#allocation2 + $0x50] sm:$0xff] }
  0x7e   : > { %684 = vmatpush.bf16.msra.mxu0 %v1185_v38  ;;  %1206 = vmatpush.bf16.msra.mxu1 %v1185_v38 }
  0x7f   : > { %1207 = vmatpush.bf16.msra.mxu2 %v1185_v38  ;;  %1208 = vmatpush.bf16.msra.mxu3 %v1185_v38  ;;  %v467_v38 = vld [vmem:[#allocation2 + $0x60] sm:$0xff] }
  0x82   : > { %685 = vmatpush.bf16.msra.mxu0 %v1184_v39  ;;  %1209 = vmatpush.bf16.msra.mxu1 %v1184_v39 }
  0x83   : > { %1210 = vmatpush.bf16.msra.mxu2 %v1184_v39  ;;  %1211 = vmatpush.bf16.msra.mxu3 %v1184_v39 }
  0x86   : > { %686 = vmatpush.bf16.msra.mxu0 %v1183_v40  ;;  %1212 = vmatpush.bf16.msra.mxu1 %v1183_v40 }
  0x87   : > { %1213 = vmatpush.bf16.msra.mxu2 %v1183_v40  ;;  %1214 = vmatpush.bf16.msra.mxu3 %v1183_v40 }
  0x89   : > { %687 = vmatmul.bf16.vlgmr.msra.gmra.mxu0 %v1167_v41  ;;  %707 = vmatmul.bf16.vlgmr.msra.gmra.mxu1 %v1171_v42 }
  0x8a   : > { %727 = vmatmul.bf16.vlgmr.msra.gmra.mxu2 %v1175_v43  ;;  %747 = vmatmul.bf16.vlgmr.msra.gmra.mxu3 %v1179_v44 }
  0x99   : > { %692 = vmatmul.bf16.gmra.mxu0 %v1168_v45  ;;  %712 = vmatmul.bf16.gmra.mxu1 %v1172_v46 }
  0x9a   : > { %732 = vmatmul.bf16.gmra.mxu2 %v1176_v47  ;;  %752 = vmatmul.bf16.gmra.mxu3 %v1180_v48  ;;  %v475_v47 = vld [vmem:[#allocation2 + $0xe0] sm:$0xff] }
  0x9b   : > { %v483_v48 = vld [vmem:[#allocation2 + $0xa0] sm:$0xff] }
  0xa9   : > { %697 = vmatmul.bf16.gmra.mxu0 %v1169_v49  ;;  %717 = vmatmul.bf16.gmra.mxu1 %v1173_v50  ;;  %v460_v49 = vld [vmem:[#allocation2 + $0x68] sm:$0xff]  ;;  %v468_v50 = vld [vmem:[#allocation2 + $0xf0] sm:$0xff] }
  0xaa   : > { %737 = vmatmul.bf16.gmra.mxu2 %v1177_v51  ;;  %757 = vmatmul.bf16.gmra.mxu3 %v1181_v52 }
  0xb9   : > { %702 = vmatmul.bf16.gmra.mxu0 %v1170_v53  ;;  %722 = vmatmul.bf16.gmra.mxu1 %v1174_v54 }
  0xba   : > { %742 = vmatmul.bf16.gmra.mxu2 %v1178_v55  ;;  %762 = vmatmul.bf16.gmra.mxu3 %v1182_v56 }
 0x106   : > { %v688_v59 = vpop.f32.mrf.mxu0  ;;  %v708_v60 = vpop.f32.mrf.mxu1 }
 0x107   : > { %v768_v61 = vadd.f32 %v688_v59, %v455_v57  ;;  %v776_v62 = vadd.f32 %v708_v60, %v463_v58  ;;  %v476_v59 = vld [vmem:[#allocation2 + $0x90] sm:$0xff]  ;;  %v484_v60 = vld [vmem:[#allocation2 + $0xf8] sm:$0xff] }
 0x109   : > { %800 = vst [vmem:[#allocation2 + $0xb0] sm:$0xff] %v768_v61  ;;  %v461_v61 = vld [vmem:[#allocation2 + $0x30] sm:$0xff] }
 0x10a   : > { %808 = vst [vmem:[#allocation2 + $0x80] sm:$0xff] %v776_v62  ;;  %v469_v62 = vld [vmem:[#allocation2 + $0x8] sm:$0xff] }
 0x10d   : > { %v728_v3 = vpop.f32.mrf.mxu2  ;;  %v748_v4 = vpop.f32.mrf.mxu3 }
 0x10e   : > { %v784_v5 = vadd.f32 %v728_v3, %v471_v63  ;;  %v792_v6 = vadd.f32 %v748_v4, %v479_v0  ;;  %v690_v7 = vpop.f32.mrf.mxu0  ;;  %v710_v8 = vpop.f32.mrf.mxu1 }
 0x10f   : > { %v769_v9 = vadd.f32 %v690_v7, %v456_v1  ;;  %v777_v10 = vadd.f32 %v710_v8, %v464_v2  ;;  %v477_v7 = vld [vmem:[#allocation2 + $0x70] sm:$0xff]  ;;  %v485_v8 = vld [vmem:[#allocation2 + $0x20] sm:$0xff] }
 0x110   : > { %816 = vst [vmem:[#allocation2 + $0x38] sm:$0xff] %v784_v5 }
 0x111   : > { %824 = vst [vmem:[#allocation2 + $0xa8] sm:$0xff] %v792_v6 }
 0x112   : > { %801 = vst [vmem:[#allocation2] sm:$0xff] %v769_v9  ;;  %v462_v9 = vld [vmem:[#allocation2 + $0x48] sm:$0xff] }
 0x113   : > { %809 = vst [vmem:[#allocation2 + $0x88] sm:$0xff] %v777_v10  ;;  %v470_v10 = vld [vmem:[#allocation2 + $0x78] sm:$0xff] }
 0x115   : > { %v730_v15 = vpop.f32.mrf.mxu2  ;;  %v750_v16 = vpop.f32.mrf.mxu3 }
 0x116   : > { %v785_v17 = vadd.f32 %v730_v15, %v472_v11  ;;  %v793_v18 = vadd.f32 %v750_v16, %v480_v12  ;;  %v693_v19 = vpop.f32.mrf.mxu0  ;;  %v713_v20 = vpop.f32.mrf.mxu1 }
 0x117   : > { %v770_v21 = vadd.f32 %v693_v19, %v457_v13  ;;  %v778_v22 = vadd.f32 %v713_v20, %v465_v14  ;;  %v478_v19 = vld [vmem:[#allocation2 + $0xc0] sm:$0xff]  ;;  %v486_v20 = vld [vmem:[#allocation2 + $0x98] sm:$0xff] }
 0x118   : > { %817 = vst [vmem:[#allocation2 + $0x58] sm:$0xff] %v785_v17 }
 0x119   : > { %825 = vst [vmem:[#allocation2 + $0xd0] sm:$0xff] %v793_v18 }
 0x11a   : > { %802 = vst [vmem:[#allocation2 + $0xd8] sm:$0xff] %v770_v21 }
 0x11b   : > { %810 = vst [vmem:[#allocation2 + $0xe8] sm:$0xff] %v778_v22 }
 0x11d   : > { %v733_v27 = vpop.f32.mrf.mxu2  ;;  %v753_v28 = vpop.f32.mrf.mxu3 }
 0x11e   : > { %v786_v29 = vadd.f32 %v733_v27, %v473_v23  ;;  %v794_v30 = vadd.f32 %v753_v28, %v481_v24  ;;  %v695_v31 = vpop.f32.mrf.mxu0  ;;  %v715_v32 = vpop.f32.mrf.mxu1 }
 0x11f   : > { %v771_v33 = vadd.f32 %v695_v31, %v458_v25  ;;  %v779_v34 = vadd.f32 %v715_v32, %v466_v26 }
 0x120   : > { %818 = vst [vmem:[#allocation2 + $0x40] sm:$0xff] %v786_v29 }
 0x121   : > { %826 = vst [vmem:[#allocation2 + $0x10] sm:$0xff] %v794_v30 }
 0x122   : > { %803 = vst [vmem:[#allocation2 + $0x18] sm:$0xff] %v771_v33 }
 0x123   : > { %811 = vst [vmem:[#allocation2 + $0xb8] sm:$0xff] %v779_v34 }
 0x125   : > { %v735_v39 = vpop.f32.mrf.mxu2  ;;  %v755_v40 = vpop.f32.mrf.mxu3 }
 0x126   : > { %v787_v41 = vadd.f32 %v735_v39, %v474_v35  ;;  %v795_v42 = vadd.f32 %v755_v40, %v482_v36  ;;  %v698_v43 = vpop.f32.mrf.mxu0  ;;  %v718_v44 = vpop.f32.mrf.mxu1 }
 0x127   : > { %v772_v45 = vadd.f32 %v698_v43, %v459_v37  ;;  %v780_v46 = vadd.f32 %v718_v44, %v467_v38 }
 0x128   : > { %819 = vst [vmem:[#allocation2 + $0xc8] sm:$0xff] %v787_v41 }
 0x129   : > { %827 = vst [vmem:[#allocation2 + $0x28] sm:$0xff] %v795_v42 }
 0x12a   : > { %804 = vst [vmem:[#allocation2 + $0x50] sm:$0xff] %v772_v45 }
 0x12b   : > { %812 = vst [vmem:[#allocation2 + $0x60] sm:$0xff] %v780_v46 }
 0x12d   : > { %v738_v51 = vpop.f32.mrf.mxu2  ;;  %v758_v52 = vpop.f32.mrf.mxu3 }
 0x12e   : > { %v788_v53 = vadd.f32 %v738_v51, %v475_v47  ;;  %v796_v54 = vadd.f32 %v758_v52, %v483_v48  ;;  %v700_v55 = vpop.f32.mrf.mxu0  ;;  %v720_v56 = vpop.f32.mrf.mxu1 }
 0x12f   : > { %v773_v57 = vadd.f32 %v700_v55, %v460_v49  ;;  %v781_v58 = vadd.f32 %v720_v56, %v468_v50 }
 0x130   : > { %820 = vst [vmem:[#allocation2 + $0xe0] sm:$0xff] %v788_v53 }
 0x131   : > { %828 = vst [vmem:[#allocation2 + $0xa0] sm:$0xff] %v796_v54 }
 0x132   : > { %805 = vst [vmem:[#allocation2 + $0x68] sm:$0xff] %v773_v57 }
 0x133   : > { %813 = vst [vmem:[#allocation2 + $0xf0] sm:$0xff] %v781_v58 }
 0x135   : > { %v740_v63 = vpop.f32.mrf.mxu2  ;;  %v760_v0 = vpop.f32.mrf.mxu3 }
 0x136   : > { %v789_v1 = vadd.f32 %v740_v63, %v476_v59  ;;  %v797_v2 = vadd.f32 %v760_v0, %v484_v60  ;;  %v703_v3 = vpop.f32.mrf.mxu0  ;;  %v723_v4 = vpop.f32.mrf.mxu1 }
 0x137   : > { %v774_v5 = vadd.f32 %v703_v3, %v461_v61  ;;  %v782_v6 = vadd.f32 %v723_v4, %v469_v62 }
 0x138   : > { %821 = vst [vmem:[#allocation2 + $0x90] sm:$0xff] %v789_v1 }
 0x139   : > { %829 = vst [vmem:[#allocation2 + $0xf8] sm:$0xff] %v797_v2 }
 0x13a   : > { %806 = vst [vmem:[#allocation2 + $0x30] sm:$0xff] %v774_v5 }
 0x13b   : > { %814 = vst [vmem:[#allocation2 + $0x8] sm:$0xff] %v782_v6 }
 0x13d   : > { %v743_v11 = vpop.f32.mrf.mxu2  ;;  %v763_v12 = vpop.f32.mrf.mxu3 }
 0x13e   : > { %v790_v13 = vadd.f32 %v743_v11, %v477_v7  ;;  %v798_v14 = vadd.f32 %v763_v12, %v485_v8  ;;  %v705_v15 = vpop.f32.mrf.mxu0  ;;  %v725_v16 = vpop.f32.mrf.mxu1 }
 0x13f   : > { %v775_v17 = vadd.f32 %v705_v15, %v462_v9  ;;  %v783_v18 = vadd.f32 %v725_v16, %v470_v10 }
 0x140   : > { %822 = vst [vmem:[#allocation2 + $0x70] sm:$0xff] %v790_v13 }
 0x141   : > { %830 = vst [vmem:[#allocation2 + $0x20] sm:$0xff] %v798_v14 }
 0x142   : > { %807 = vst [vmem:[#allocation2 + $0x48] sm:$0xff] %v775_v17 }
 0x143   : > { %815 = vst [vmem:[#allocation2 + $0x78] sm:$0xff] %v783_v18 }
 0x145   : > { %v745_v21 = vpop.f32.mrf.mxu2  ;;  %v765_v22 = vpop.f32.mrf.mxu3  ;;  %835 = sbr.rel (%p1164_p13) target bundleno = 365 (0x16d), region = 81 }
 0x146   : > { %v791_v23 = vadd.f32 %v745_v21, %v478_v19  ;;  %v799_v24 = vadd.f32 %v765_v22, %v486_v20 }
 0x148   : > { %823 = vst [vmem:[#allocation2 + $0xc0] sm:$0xff] %v791_v23 }
 0x149   : > { %831 = vst [vmem:[#allocation2 + $0x98] sm:$0xff] %v799_v24 }
 0x14a   : > { %v836_v25 = vld [vmem:[#allocation2 + $0xb0] sm:$0xff]  ;;  %v1525_v26 = vld [vmem:[%s1614_s2] ss:$0 sm:$0xff]  ;;  %v838_v28 = vld [vmem:[#allocation2 + $0xd8] sm:$0xff] }
 0x14b   : > { %v837_v27 = vld [vmem:[#allocation2] sm:$0xff]  ;;  %v839_v29 = vld [vmem:[#allocation2 + $0x18] sm:$0xff]  ;;  %v872_v30 = vadd.f32 %v1525_v26, %v836_v25  ;;  %v874_v32 = vadd.f32 %v1525_v26, %v838_v28  ;;  %v840_v33 = vld [vmem:[#allocation2 + $0x50] sm:$0xff] }
 0x14c   : > { %v873_v31 = vadd.f32 %v1525_v26, %v837_v27  ;;  %v841_v34 = vld [vmem:[#allocation2 + $0x68] sm:$0xff]  ;;  %v875_v35 = vadd.f32 %v1525_v26, %v839_v29  ;;  %v842_v36 = vld [vmem:[#allocation2 + $0x30] sm:$0xff]  ;;  %v876_v37 = vadd.f32 %v1525_v26, %v840_v33  ;;  %v844_v40 = vld [vmem:[#allocation2 + $0x80] sm:$0xff] }
 0x14d   : > { %904 = vst [vmem:[%s1492_s29] sm:$0xff] %v872_v30  ;;  %v843_v38 = vld [vmem:[#allocation2 + $0x48] sm:$0xff]  ;;  %v877_v39 = vadd.f32 %v1525_v26, %v841_v34  ;;  %v878_v41 = vadd.f32 %v1525_v26, %v842_v36  ;;  %v880_v45 = vadd.f32 %v1525_v26, %v844_v40  ;;  %v847_v46 = vld [vmem:[#allocation2 + $0xb8] sm:$0xff]  ;;  %v848_v48 = vld [vmem:[#allocation2 + $0x60] sm:$0xff] }
 0x14e   : > { %905 = vst [vmem:[%s1492_s29 + $0x8] sm:$0xff] %v873_v31  ;;  %v845_v42 = vld [vmem:[#allocation2 + $0x88] sm:$0xff]  ;;  %v879_v43 = vadd.f32 %v1525_v26, %v843_v38  ;;  %v849_v50 = vld [vmem:[#allocation2 + $0xf0] sm:$0xff]  ;;  %v883_v51 = vadd.f32 %v1525_v26, %v847_v46  ;;  %v884_v53 = vadd.f32 %v1525_v26, %v848_v48  ;;  %v851_v54 = vld [vmem:[#allocation2 + $0x78] sm:$0xff] }
 0x14f   : > { %906 = vst [vmem:[%s1492_s29 + $0x10] sm:$0xff] %v874_v32  ;;  %v846_v44 = vld [vmem:[#allocation2 + $0xe8] sm:$0xff]  ;;  %v881_v47 = vadd.f32 %v1525_v26, %v845_v42  ;;  %v885_v55 = vadd.f32 %v1525_v26, %v849_v50  ;;  %v852_v56 = vld [vmem:[#allocation2 + $0x38] sm:$0xff]  ;;  %v887_v59 = vadd.f32 %v1525_v26, %v851_v54  ;;  %v854_v60 = vld [vmem:[#allocation2 + $0x40] sm:$0xff] }
 0x150   : > { %907 = vst [vmem:[%s1492_s29 + $0x18] sm:$0xff] %v875_v35  ;;  %v882_v49 = vadd.f32 %v1525_v26, %v846_v44  ;;  %v850_v52 = vld [vmem:[#allocation2 + $0x8] sm:$0xff]  ;;  %v853_v58 = vld [vmem:[#allocation2 + $0x58] sm:$0xff]  ;;  %v888_v61 = vadd.f32 %v1525_v26, %v852_v56  ;;  %v856_v0 = vld [vmem:[#allocation2 + $0xe0] sm:$0xff]  ;;  %v890_v1 = vadd.f32 %v1525_v26, %v854_v60 }
 0x151   : > { %908 = vst [vmem:[%s1492_s29 + $0x20] sm:$0xff] %v876_v37  ;;  %v886_v57 = vadd.f32 %v1525_v26, %v850_v52  ;;  %v855_v62 = vld [vmem:[#allocation2 + $0xc8] sm:$0xff]  ;;  %v889_v63 = vadd.f32 %v1525_v26, %v853_v58  ;;  %v857_v2 = vld [vmem:[#allocation2 + $0x90] sm:$0xff]  ;;  %v892_v5 = vadd.f32 %v1525_v26, %v856_v0  ;;  %v859_v6 = vld [vmem:[#allocation2 + $0xc0] sm:$0xff] }
 0x152   : > { %909 = vst [vmem:[%s1492_s29 + $0x28] sm:$0xff] %v877_v39  ;;  %v891_v3 = vadd.f32 %v1525_v26, %v855_v62  ;;  %v858_v4 = vld [vmem:[#allocation2 + $0x70] sm:$0xff]  ;;  %v893_v7 = vadd.f32 %v1525_v26, %v857_v2  ;;  %v860_v8 = vld [vmem:[#allocation2 + $0xa8] sm:$0xff]  ;;  %v895_v11 = vadd.f32 %v1525_v26, %v859_v6  ;;  %v864_v16 = vld [vmem:[#allocation2 + $0xa0] sm:$0xff] }
 0x153   : > { %910 = vst [vmem:[%s1492_s29 + $0x30] sm:$0xff] %v878_v41  ;;  %v894_v9 = vadd.f32 %v1525_v26, %v858_v4  ;;  %v861_v10 = vld [vmem:[#allocation2 + $0xd0] sm:$0xff]  ;;  %v896_v13 = vadd.f32 %v1525_v26, %v860_v8  ;;  %v863_v14 = vld [vmem:[#allocation2 + $0x28] sm:$0xff]  ;;  %v865_v18 = vld [vmem:[#allocation2 + $0xf8] sm:$0xff]  ;;  %v900_v21 = vadd.f32 %v1525_v26, %v864_v16 }
 0x154   : > { %911 = vst [vmem:[%s1492_s29 + $0x38] sm:$0xff] %v879_v43  ;;  %v862_v12 = vld [vmem:[#allocation2 + $0x10] sm:$0xff]  ;;  %v897_v15 = vadd.f32 %v1525_v26, %v861_v10  ;;  %v899_v19 = vadd.f32 %v1525_v26, %v863_v14  ;;  %v866_v20 = vld [vmem:[#allocation2 + $0x20] sm:$0xff]  ;;  %v867_v22 = vld [vmem:[#allocation2 + $0x98] sm:$0xff]  ;;  %v901_v23 = vadd.f32 %v1525_v26, %v865_v18 }
 0x155   : > { %912 = vst [vmem:[%s1492_s29 + $0x40] sm:$0xff] %v880_v45  ;;  %v898_v17 = vadd.f32 %v1525_v26, %v862_v12  ;;  %v902_v24 = vadd.f32 %v1525_v26, %v866_v20  ;;  %v903_v25 = vadd.f32 %v1525_v26, %v867_v22 }
 0x156   : > { %913 = vst [vmem:[%s1492_s29 + $0x48] sm:$0xff] %v881_v47 }
 0x157   : > { %914 = vst [vmem:[%s1492_s29 + $0x50] sm:$0xff] %v882_v49 }
 0x158   : > { %915 = vst [vmem:[%s1492_s29 + $0x58] sm:$0xff] %v883_v51 }
 0x159   : > { %916 = vst [vmem:[%s1492_s29 + $0x60] sm:$0xff] %v884_v53 }
 0x15a   : > { %917 = vst [vmem:[%s1492_s29 + $0x68] sm:$0xff] %v885_v55 }
 0x15b   : > { %918 = vst [vmem:[%s1492_s29 + $0x70] sm:$0xff] %v886_v57 }
 0x15c   : > { %919 = vst [vmem:[%s1492_s29 + $0x78] sm:$0xff] %v887_v59 }
 0x15d   : > { %920 = vst [vmem:[%s1492_s29 + $0x80] sm:$0xff] %v888_v61 }
 0x15e   : > { %921 = vst [vmem:[%s1492_s29 + $0x88] sm:$0xff] %v889_v63 }
 0x15f   : > { %922 = vst [vmem:[%s1492_s29 + $0x90] sm:$0xff] %v890_v1 }
 0x160   : > { %923 = vst [vmem:[%s1492_s29 + $0x98] sm:$0xff] %v891_v3 }
 0x161   : > { %924 = vst [vmem:[%s1492_s29 + $0xa0] sm:$0xff] %v892_v5 }
 0x162   : > { %925 = vst [vmem:[%s1492_s29 + $0xa8] sm:$0xff] %v893_v7 }
 0x163   : > { %926 = vst [vmem:[%s1492_s29 + $0xb0] sm:$0xff] %v894_v9 }
 0x164   : > { %927 = vst [vmem:[%s1492_s29 + $0xb8] sm:$0xff] %v895_v11 }
 0x165   : > { %928 = vst [vmem:[%s1492_s29 + $0xc0] sm:$0xff] %v896_v13 }
 0x166   : > { %929 = vst [vmem:[%s1492_s29 + $0xc8] sm:$0xff] %v897_v15 }
 0x167   : > { %930 = vst [vmem:[%s1492_s29 + $0xd0] sm:$0xff] %v898_v17 }
 0x168   : > { %931 = vst [vmem:[%s1492_s29 + $0xd8] sm:$0xff] %v899_v19 }
 0x169   : > { %932 = vst [vmem:[%s1492_s29 + $0xe0] sm:$0xff] %v900_v21 }
 0x16a   : > { %933 = vst [vmem:[%s1492_s29 + $0xe8] sm:$0xff] %v901_v23 }
 0x16b   : > { %934 = vst [vmem:[%s1492_s29 + $0xf0] sm:$0xff] %v902_v24 }
 0x16c   : > { %935 = vst [vmem:[%s1492_s29 + $0xf8] sm:$0xff] %v903_v25 }
 0x16d PF: > { %s13_s18 = sadd.s32 1, %s1328_s18   ;;  %s1616_s12 = smov %s1308_s13 }
 0x16e   : > { %p10_p0 = scmp.ge.s32.totalorder %s13_s18, 12   ;;  %s1617_s13 = smov %s1402_s25 }
 0x16f   : > { %s1618_s14 = smov %s1320_s16  ;;  %s1619_s15 = smov %s1324_s17 }
 0x170   : > { %s1620_s16 = smov %s1623_s19  ;;  %s1621_s17 = smov %s1627_s20 }
 0x171   :  { %12 = sbr.rel (!%p10_p0) target bundleno = 4 (0x4), region = 122 }

</bundles_post_ra>
